<compile_context>
chip_gen: v7x
topology: tpu7x:2x2x1
jax: 0.10.0
libtpu: 0.0.40
codegen_flags: <defaults>
</compile_context>

<pallas_src>
import functools

import numpy as np
import jax
import jax.numpy as jnp
from jax import lax
from jax.experimental import pallas as pl
from jax.experimental.pallas import tpu as pltpu


def _round_up(x, m):
    return (x + m - 1) // m * m


# ------------------------ tiled matmul (+bias/act/residual) ------------------------

def _mm_kernel(*refs, act, has_res):
    if has_res:
        a_ref, b_ref, bias_ref, r_ref, o_ref, acc_ref = refs
    else:
        a_ref, b_ref, bias_ref, o_ref, acc_ref = refs
        r_ref = None
    k = pl.program_id(2)

    @pl.when(k == 0)
    def _():
        acc_ref[...] = jnp.zeros_like(acc_ref)

    acc_ref[...] += jnp.dot(a_ref[...], b_ref[...],
                            preferred_element_type=jnp.float32)

    @pl.when(k == pl.num_programs(2) - 1)
    def _():
        y = acc_ref[...] + bias_ref[...]          # bias added exactly once (finalize)
        if act == "tanh":
            y = jnp.tanh(y)
        if has_res:
            y = y + r_ref[...]
        o_ref[...] = y.astype(o_ref.dtype)


def _matmul_bias(a, b, bias, residual=None, act="none"):
    """(M,K)@(K,N) + bias, optional tanh / residual epilogue.

    bf16 operands, f32 accumulation in a VMEM scratch tile, tiled & pipelined.
    """
    M, K = a.shape
    _, N = b.shape
    # Tile sizes: MXU/lane aligned, small enough to fit comfortably in the
    # scoped VMEM budget of all of v5e / v6e / v7x (~1.5 MiB/step double-buffered).
    tm = min(256, _round_up(M, 8))
    tn = min(256, _round_up(N, 128))
    tk = min(512, _round_up(K, 128))
    Mp, Np, Kp = _round_up(M, tm), _round_up(N, tn), _round_up(K, tk)

    a_p = jnp.pad(a.astype(jnp.bfloat16), ((0, Mp - M), (0, Kp - K)))
    b_p = jnp.pad(b.astype(jnp.bfloat16), ((0, Kp - K), (0, Np - N)))
    bias_p = jnp.pad(bias.reshape(1, N).astype(jnp.float32), ((0, 0), (0, Np - N)))

    in_specs = [
        pl.BlockSpec((tm, tk), lambda i, j, k: (i, k)),
        pl.BlockSpec((tk, tn), lambda i, j, k: (k, j)),
        pl.BlockSpec((1, tn), lambda i, j, k: (0, j)),
    ]
    args = [a_p, b_p, bias_p]
    has_res = residual is not None
    if has_res:
        r_p = jnp.pad(residual.astype(jnp.float32), ((0, Mp - M), (0, Np - N)))
        in_specs.append(pl.BlockSpec((tm, tn), lambda i, j, k: (i, j)))
        args.append(r_p)

    out = pl.pallas_call(
        functools.partial(_mm_kernel, act=act, has_res=has_res),
        out_shape=jax.ShapeDtypeStruct((Mp, Np), jnp.float32),
        grid=(Mp // tm, Np // tn, Kp // tk),
        in_specs=in_specs,
        out_specs=pl.BlockSpec((tm, tn), lambda i, j, k: (i, j)),
        scratch_shapes=[pltpu.VMEM((tm, tn), jnp.float32)],
        compiler_params=pltpu.CompilerParams(
            dimension_semantics=("parallel", "parallel", "arbitrary")),
    )(*args)
    return out[:M, :N]


# ------------------------ GroupNorm (+act, optional residual) ----------------------

def _gn_kernel(*refs, eps, act, has_res):
    if has_res:
        x_ref, g_ref, b_ref, r_ref, o_ref = refs
    else:
        x_ref, g_ref, b_ref, o_ref = refs
        r_ref = None
    x = x_ref[...]                                          # (rb, Cg, HW) f32
    # per-row mean/var over (Cg, HW): lane reduce then sublane reduce.
    mean = jnp.mean(jnp.mean(x, axis=2, keepdims=True), axis=1, keepdims=True)
    d = x - mean
    var = jnp.mean(jnp.mean(d * d, axis=2, keepdims=True), axis=1, keepdims=True)
    y = d * lax.rsqrt(var + eps)
    y = y * g_ref[...] + b_ref[...]                         # (rb, Cg, 1) broadcast over HW
    if act == "relu":
        y = jnp.maximum(y, 0.0)
    elif act == "tanh":
        y = jnp.tanh(y)
    if has_res:
        y = y + r_ref[...]
    o_ref[...] = y


def group_norm_act(x, gamma, beta, num_groups, act="none", residual=None, eps=1e-5):
    """PyTorch GroupNorm fused with activation and optional residual add."""
    N, C, H, W = x.shape
    G = num_groups
    Cg = C // G
    HW = H * W
    R = N * G
    x3 = x.reshape(R, Cg, HW).astype(jnp.float32)
    # gamma/beta stay tiny: (R, Cg, 1), broadcast over HW inside the kernel.
    g3 = jnp.tile(gamma.reshape(G, Cg, 1), (N, 1, 1)).astype(jnp.float32)
    b3 = jnp.tile(beta.reshape(G, Cg, 1), (N, 1, 1)).astype(jnp.float32)

    # rows per block: largest divisor of R keeping the x block under ~4 MiB.
    rb = 1
    for cand in (8, 4, 2, 1):
        if R % cand == 0 and cand * Cg * HW * 4 <= 4 * 1024 * 1024:
            rb = cand
            break
    # TODO(synk): for very large H*W, additionally tile the Cg*HW axis (two-pass stats).

    in_specs = [
        pl.BlockSpec((rb, Cg, HW), lambda r: (r, 0, 0)),
        pl.BlockSpec((rb, Cg, 1), lambda r: (r, 0, 0)),
        pl.BlockSpec((rb, Cg, 1), lambda r: (r, 0, 0)),
    ]
    args = [x3, g3, b3]
    has_res = residual is not None
    if has_res:
        in_specs.append(pl.BlockSpec((rb, Cg, HW), lambda r: (r, 0, 0)))
        args.append(residual.reshape(R, Cg, HW).astype(jnp.float32))

    out = pl.pallas_call(
        functools.partial(_gn_kernel, eps=eps, act=act, has_res=has_res),
        out_shape=jax.ShapeDtypeStruct((R, Cg, HW), jnp.float32),
        grid=(R // rb,),
        in_specs=in_specs,
        out_specs=pl.BlockSpec((rb, Cg, HW), lambda r: (r, 0, 0)),
        compiler_params=pltpu.CompilerParams(dimension_semantics=("parallel",)),
    )(*args)
    return out.reshape(N, C, H, W)


# ------------------------------ conv lowering --------------------------------------

def conv2d(x, w, b, stride=1, pad=0, pad_mode="zero", act="none", residual=None):
    """PyTorch-semantics Conv2d (NCHW) via (bf16) im2col + tiled Pallas matmul.

    `act`/`residual` are fused into the matmul epilogue (e.g. tanh + `x +` for
    the out block)."""
    N, C, H, W = x.shape
    Cout, Cin, KH, KW = w.shape
    if pad > 0:
        mode = "reflect" if pad_mode == "reflect" else "constant"
        x = jnp.pad(x, ((0, 0), (0, 0), (pad, pad), (pad, pad)), mode=mode)
    Hp, Wp = x.shape[2], x.shape[3]
    Ho = (Hp - KH) // stride + 1
    Wo = (Wp - KW) // stride + 1
    xb = x.astype(jnp.bfloat16)

    if KH == 1 and KW == 1 and stride == 1:
        # 1x1 conv: no im2col at all, just a layout change.
        a = xb.transpose(0, 2, 3, 1).reshape(N * Ho * Wo, C)
    else:
        # TODO(synk): fuse im2col into the matmul kernel (halo-tile DMA) to avoid the
        # KH*KW HBM blowup; mitigated here by building the patches in bf16 (half traffic).
        cols = []
        for kh in range(KH):
            for kw in range(KW):
                cols.append(xb[:, :, kh:kh + stride * Ho:stride, kw:kw + stride * Wo:stride])
        patches = jnp.stack(cols, axis=0)              # (KH*KW, N, C, Ho, Wo)
        patches = patches.transpose(1, 3, 4, 2, 0)     # (N, Ho, Wo, C, KH*KW)
        a = patches.reshape(N * Ho * Wo, C * KH * KW)  # K order = (Cin, KH, KW)

    bmat = w.reshape(Cout, Cin * KH * KW).T.astype(jnp.bfloat16)
    res2 = None
    if residual is not None:
        res2 = residual.transpose(0, 2, 3, 1).reshape(N * Ho * Wo, Cout)
    out = _matmul_bias(a, bmat, b, residual=res2, act=act)      # (N*Ho*Wo, Cout)
    return out.reshape(N, Ho, Wo, Cout).transpose(0, 3, 1, 2)


def conv_transpose2d(x, w, b):
    """PyTorch ConvTranspose2d(kernel=3, stride=2, padding=1, output_padding=1)
    via the 4-phase decomposition: 4 small convs whose outputs interleave into
    the 2x-upsampled result (no zero-dilated input, 4x fewer MXU FLOPs)."""
    N, C, H, W = x.shape
    Cin, Cout, KH, KW = w.shape
    assert KH == 3 and KW == 3
    wt = jnp.transpose(w, (1, 0, 2, 3))                  # (Cout, Cin, 3, 3)

    # Phase kernels (derived from y[2i+r, 2j+s] = sum of specific w taps).
    k_ee = wt[:, :, 1:2, 1:2]                                                    # 1x1
    k_eo = jnp.stack([wt[:, :, 1, 2], wt[:, :, 1, 0]], axis=-1)[:, :, None, :]   # 1x2
    k_oe = jnp.stack([wt[:, :, 2, 1], wt[:, :, 0, 1]], axis=-1)[:, :, :, None]   # 2x1
    k_oo = jnp.stack([wt[:, :, 2, 2], wt[:, :, 2, 0],
                      wt[:, :, 0, 2], wt[:, :, 0, 0]], axis=-1).reshape(Cout, Cin, 2, 2)

    x_r = jnp.pad(x, ((0, 0), (0, 0), (0, 0), (0, 1)))    # pad right
    x_b = jnp.pad(x, ((0, 0), (0, 0), (0, 1), (0, 0)))    # pad bottom
    x_rb = jnp.pad(x, ((0, 0), (0, 0), (0, 1), (0, 1)))   # pad both

    p_ee = conv2d(x, k_ee, b)      # y[2i,   2j]
    p_eo = conv2d(x_r, k_eo, b)    # y[2i,   2j+1]
    p_oe = conv2d(x_b, k_oe, b)    # y[2i+1, 2j]
    p_oo = conv2d(x_rb, k_oo, b)   # y[2i+1, 2j+1]

    row0 = jnp.stack([p_ee, p_eo], axis=-1)               # (N, Cout, H, W, 2)
    row1 = jnp.stack([p_oe, p_oo], axis=-1)
    y = jnp.stack([row0, row1], axis=3)                   # (N, Cout, H, 2, W, 2)
    return y.reshape(N, Cout, 2 * H, 2 * W)


# ------------------------------- parameters ----------------------------------------

def _conv_init(key, cout, cin, kh, kw):
    kw_, kb = jax.random.split(key)
    fan_in = cin * kh * kw
    w = jax.random.normal(kw_, (cout, cin, kh, kw), jnp.float32) / np.sqrt(fan_in)
    b = 0.01 * jax.random.normal(kb, (cout,), jnp.float32)
    return w, b


def _convT_init(key, cin, cout, kh, kw):
    kw_, kb = jax.random.split(key)
    fan_in = cin * kh * kw
    w = jax.random.normal(kw_, (cin, cout, kh, kw), jnp.float32) / np.sqrt(fan_in)
    b = 0.01 * jax.random.normal(kb, (cout,), jnp.float32)
    return w, b


def _gn_init(key, c):
    kg, kb = jax.random.split(key)
    gamma = 1.0 + 0.1 * jax.random.normal(kg, (c,), jnp.float32)
    beta = 0.1 * jax.random.normal(kb, (c,), jnp.float32)
    return gamma, beta


def init_net1_params(key, n_residual_block=4):
    in_f = 64
    ks = iter(jax.random.split(key, 32 + 6 * n_residual_block))
    p = {}
    p["init_conv"] = _conv_init(next(ks), in_f, 3, 7, 7)
    p["init_gn"] = _gn_init(next(ks), in_f)
    p["ds1_conv"] = _conv_init(next(ks), in_f * 2, in_f, 3, 3)
    p["ds1_gn"] = _gn_init(next(ks), in_f * 2)
    p["ds2_conv"] = _conv_init(next(ks), in_f * 4, in_f * 2, 3, 3)
    p["ds2_gn"] = _gn_init(next(ks), in_f * 4)
    cf = in_f * 4
    blocks = []
    for _ in range(n_residual_block):
        blocks.append({
            "c1":  _conv_init(next(ks), cf // 4, cf, 1, 1),
            "gn1": _gn_init(next(ks), cf // 4),
            "c3":  _conv_init(next(ks), cf // 4, cf // 4, 3, 3),
            "gn2": _gn_init(next(ks), cf // 4),
            "c2":  _conv_init(next(ks), cf, cf // 4, 1, 1),
            "gn3": _gn_init(next(ks), cf),
        })
    p["res_blocks"] = blocks
    p["up1_deconv"] = _convT_init(next(ks), in_f * 8, in_f * 2, 3, 3)
    p["up1_gn"] = _gn_init(next(ks), in_f * 2)
    p["up2_deconv"] = _convT_init(next(ks), in_f * 4, in_f, 3, 3)
    p["up2_gn"] = _gn_init(next(ks), in_f)
    p["out_conv"] = _conv_init(next(ks), 3, in_f, 7, 7)
    return p


# --------------------------------- forward -----------------------------------------

def residual_block_bottleneck(bp, x):
    cf = x.shape[1]
    out = conv2d(x, *bp["c1"])                                              # conv1x1_1
    out = group_norm_act(out, *bp["gn1"], num_groups=cf // 16, act="relu")   # gn1 + relu
    out = conv2d(out, *bp["c3"], pad=1, pad_mode="reflect")                  # refl-pad + conv3x3
    out = group_norm_act(out, *bp["gn2"], num_groups=cf // 16, act="relu")   # gn2 + relu
    out = conv2d(out, *bp["c2"])                                             # conv1x1_2
    # gn3 + relu + residual add fused in one Pallas kernel
    out = group_norm_act(out, *bp["gn3"], num_groups=cf // 4, act="relu", residual=x)
    return out


def net1_forward(params, x):
    in_f = 64
    # init block: ReflectionPad2d(3) -> Conv2d(3,64,7) -> GroupNorm(16,64) -> tanh
    y = conv2d(x, *params["init_conv"], stride=1, pad=3, pad_mode="reflect")
    y = group_norm_act(y, *params["init_gn"], num_groups=in_f // 4, act="tanh")
    # downsampling 1: Conv2d(64,128,3,s2,p1) -> GroupNorm(32,128) -> relu
    d1 = conv2d(y, *params["ds1_conv"], stride=2, pad=1)
    d1 = group_norm_act(d1, *params["ds1_gn"], num_groups=in_f // 2, act="relu")
    # downsampling 2: Conv2d(128,256,3,s2,p1) -> GroupNorm(64,256) -> relu
    d2 = conv2d(d1, *params["ds2_conv"], stride=2, pad=1)
    d2 = group_norm_act(d2, *params["ds2_gn"], num_groups=in_f, act="relu")
    # residual bottleneck stack
    r = d2
    for bp in params["res_blocks"]:
        r = residual_block_bottleneck(bp, r)
    # skip concat + upsampling 1 (4-phase transposed conv)
    c1 = jnp.concatenate([d2, r], axis=1)
    u1 = conv_transpose2d(c1, *params["up1_deconv"])
    u1 = group_norm_act(u1, *params["up1_gn"], num_groups=in_f // 2, act="relu")
    # skip concat + upsampling 2
    c2 = jnp.concatenate([u1, d1], axis=1)
    u2 = conv_transpose2d(c2, *params["up2_deconv"])
    u2 = group_norm_act(u2, *params["up2_gn"], num_groups=in_f // 4, act="relu")
    # out block: ReflectionPad2d(3) -> Conv2d(64,3,7) -> tanh ; residual with input
    # (tanh + `x +` fused into the matmul epilogue)
    return conv2d(u2, *params["out_conv"], stride=1, pad=3, pad_mode="reflect",
                  act="tanh", residual=x)


if __name__ == "__main__":
    key = jax.random.PRNGKey(0)
    pkey, xkey = jax.random.split(key)
    # small config: batch=1, 3x16x16 image, 4 residual bottleneck blocks
    params = init_net1_params(pkey, n_residual_block=4)
    x = jax.random.normal(xkey, (1, 3, 16, 16), jnp.float32)
    fwd = jax.jit(net1_forward)
    out = jax.block_until_ready(fwd(params, x))
    assert out.shape == x.shape, out.shape
    assert bool(jnp.all(jnp.isfinite(out)))
    print("KERNEL_OK")
</pallas_src>

<mosaic_0001>
module attributes {stable_mosaic.version = 11 : i64} {
  func.func @_mm_kernel(%arg0: i32, %arg1: i32, %arg2: i32, %arg3: memref<256x256xbf16, #tpu.memory_space<vmem>>, %arg4: memref<256x128xbf16, #tpu.memory_space<vmem>>, %arg5: memref<1x128xf32, #tpu.memory_space<vmem>>, %arg6: memref<256x128xf32, #tpu.memory_space<vmem>>, %arg7: memref<256x128xf32, #tpu.memory_space<vmem>>) attributes {dimension_semantics = [#tpu.dimension_semantics<parallel>, #tpu.dimension_semantics<parallel>, #tpu.dimension_semantics<arbitrary>], iteration_bounds = array<i64: 1, 1, 1>, scalar_prefetch = 0 : i64, scratch_operands = 1 : i64, tpu.core_type = #tpu.core_type<tc>, window_params = [{transform_indices = @transform_0, window_bounds = array<i64: 256, 256>}, {transform_indices = @transform_1, window_bounds = array<i64: 256, 128>}, {transform_indices = @transform_2, window_bounds = array<i64: 1, 128>}, {transform_indices = @transform_3, window_bounds = array<i64: 256, 128>}]} {
    %c0_i32 = arith.constant 0 : i32
    %0 = arith.cmpi eq, %arg2, %c0_i32 : i32
    %1 = arith.extui %0 : i1 to i32
    %c0_i32_0 = arith.constant 0 : i32
    %2 = arith.cmpi ne, %1, %c0_i32_0 : i32
    scf.if %2 {
      %cst_10 = arith.constant 0.000000e+00 : f32
      %12 = vector.broadcast %cst_10 : f32 to vector<256x128xf32>
      %c0_11 = arith.constant 0 : index
      %c0_12 = arith.constant 0 : index
      %13 = vector.load %arg7[%c0_11, %c0_12] : memref<256x128xf32, #tpu.memory_space<vmem>>, vector<256x128xf32>
      tpu.vector_store %arg7[%c0_11, %c0_12], %12 {strides = array<i32>} : memref<256x128xf32, #tpu.memory_space<vmem>>, vector<256x128xf32>,
    } else {
    }
    %c0 = arith.constant 0 : index
    %c0_1 = arith.constant 0 : index
    %3 = vector.load %arg7[%c0, %c0_1] : memref<256x128xf32, #tpu.memory_space<vmem>>, vector<256x128xf32>
    %c0_2 = arith.constant 0 : index
    %c0_3 = arith.constant 0 : index
    %4 = vector.load %arg3[%c0_2, %c0_3] : memref<256x256xbf16, #tpu.memory_space<vmem>>, vector<256x256xbf16>
    %c0_4 = arith.constant 0 : index
    %c0_5 = arith.constant 0 : index
    %5 = vector.load %arg4[%c0_4, %c0_5] : memref<256x128xbf16, #tpu.memory_space<vmem>>, vector<256x128xbf16>
    %cst = arith.constant dense<0.000000e+00> : vector<256x128xf32>
    %6 = tpu.matmul %4, %5, %cst {dimension_numbers = #tpu.dot_dimension_numbers<[1], [0], [0], [1], [0, 0, 1, 1], [], []>} : vector<256x256xbf16>, vector<256x128xbf16>, vector<256x128xf32> -> vector<256x128xf32>
    %7 = arith.addf %3, %6 : vector<256x128xf32>
    %c0_6 = arith.constant 0 : index
    %c0_7 = arith.constant 0 : index
    %8 = vector.load %arg7[%c0_6, %c0_7] : memref<256x128xf32, #tpu.memory_space<vmem>>, vector<256x128xf32>
    tpu.vector_store %arg7[%c0_6, %c0_7], %7 {strides = array<i32>} : memref<256x128xf32, #tpu.memory_space<vmem>>, vector<256x128xf32>,
    %c0_i32_8 = arith.constant 0 : i32
    %9 = arith.cmpi eq, %arg2, %c0_i32_8 : i32
    %10 = arith.extui %9 : i1 to i32
    %c0_i32_9 = arith.constant 0 : i32
    %11 = arith.cmpi ne, %10, %c0_i32_9 : i32
    scf.if %11 {
      %c0_10 = arith.constant 0 : index
      %c0_11 = arith.constant 0 : index
      %12 = vector.load %arg7[%c0_10, %c0_11] : memref<256x128xf32, #tpu.memory_space<vmem>>, vector<256x128xf32>
      %c0_12 = arith.constant 0 : index
      %c0_13 = arith.constant 0 : index
      %13 = vector.load %arg5[%c0_12, %c0_13] : memref<1x128xf32, #tpu.memory_space<vmem>>, vector<1x128xf32>
      %14 = vector.broadcast %13 : vector<1x128xf32> to vector<256x128xf32>
      %15 = arith.addf %12, %14 : vector<256x128xf32>
      %c0_14 = arith.constant 0 : index
      %c0_15 = arith.constant 0 : index
      %16 = vector.load %arg6[%c0_14, %c0_15] : memref<256x128xf32, #tpu.memory_space<vmem>>, vector<256x128xf32>
      tpu.vector_store %arg6[%c0_14, %c0_15], %15 {strides = array<i32>} : memref<256x128xf32, #tpu.memory_space<vmem>>, vector<256x128xf32>,
    } else {
    }
    return
  }
  func.func @transform_0(%arg0: i32, %arg1: i32, %arg2: i32) -> (i32, i32) {
    %c0_i32 = arith.constant 0 : i32
    return %arg0, %arg2 : i32, i32
  }
  func.func @transform_1(%arg0: i32, %arg1: i32, %arg2: i32) -> (i32, i32) {
    %c0_i32 = arith.constant 0 : i32
    return %arg2, %arg1 : i32, i32
  }
  func.func @transform_2(%arg0: i32, %arg1: i32, %arg2: i32) -> (i32, i32) {
    %c0_i32 = arith.constant 0 : i32
    %c0_i32_0 = arith.constant 0 : i32
    return %c0_i32, %arg1 : i32, i32
  }
  func.func @transform_3(%arg0: i32, %arg1: i32, %arg2: i32) -> (i32, i32) {
    %c0_i32 = arith.constant 0 : i32
    return %arg0, %arg1 : i32, i32
  }
}

module attributes {stable_mosaic.version = 11 : i64} {
  func.func @_gn_kernel(%arg0: i32, %arg1: memref<8x4x256xf32, #tpu.memory_space<vmem>>, %arg2: memref<8x4x1xf32, #tpu.memory_space<vmem>>, %arg3: memref<8x4x1xf32, #tpu.memory_space<vmem>>, %arg4: memref<8x4x256xf32, #tpu.memory_space<vmem>>) attributes {dimension_semantics = [#tpu.dimension_semantics<parallel>], iteration_bounds = array<i64: 2>, scalar_prefetch = 0 : i64, scratch_operands = 0 : i64, tpu.core_type = #tpu.core_type<tc>, window_params = [{transform_indices = @transform_0, window_bounds = array<i64: 8, 4, 256>}, {transform_indices = @transform_1, window_bounds = array<i64: 8, 4, 1>}, {transform_indices = @transform_2, window_bounds = array<i64: 8, 4, 1>}, {transform_indices = @transform_3, window_bounds = array<i64: 8, 4, 256>}]} {
    %c0 = arith.constant 0 : index
    %c0_0 = arith.constant 0 : index
    %c0_1 = arith.constant 0 : index
    %0 = vector.load %arg1[%c0, %c0_0, %c0_1] : memref<8x4x256xf32, #tpu.memory_space<vmem>>, vector<8x4x256xf32>
    %cst = arith.constant dense<0.000000e+00> : vector<8x4xf32>
    %1 = vector.multi_reduction <add>, %0, %cst [2] : vector<8x4x256xf32> to vector<8x4xf32>
    %2 = vector.shape_cast %1 : vector<8x4xf32> to vector<8x4x1xf32>
    %cst_2 = arith.constant 2.560000e+02 : f32
    %3 = vector.broadcast %cst_2 : f32 to vector<8x4x1xf32>
    %4 = arith.divf %2, %3 : vector<8x4x1xf32>
    %cst_3 = arith.constant dense<0.000000e+00> : vector<8x1xf32>
    %5 = vector.multi_reduction <add>, %4, %cst_3 [1] : vector<8x4x1xf32> to vector<8x1xf32>
    %6 = vector.shape_cast %5 : vector<8x1xf32> to vector<8x1x1xf32>
    %cst_4 = arith.constant 4.000000e+00 : f32
    %7 = vector.broadcast %cst_4 : f32 to vector<8x1x1xf32>
    %8 = arith.divf %6, %7 : vector<8x1x1xf32>
    %9 = vector.broadcast %8 : vector<8x1x1xf32> to vector<8x4x256xf32>
    %10 = arith.subf %0, %9 : vector<8x4x256xf32>
    %11 = arith.mulf %10, %10 : vector<8x4x256xf32>
    %cst_5 = arith.constant dense<0.000000e+00> : vector<8x4xf32>
    %12 = vector.multi_reduction <add>, %11, %cst_5 [2] : vector<8x4x256xf32> to vector<8x4xf32>
    %13 = vector.shape_cast %12 : vector<8x4xf32> to vector<8x4x1xf32>
    %cst_6 = arith.constant 2.560000e+02 : f32
    %14 = vector.broadcast %cst_6 : f32 to vector<8x4x1xf32>
    %15 = arith.divf %13, %14 : vector<8x4x1xf32>
    %cst_7 = arith.constant dense<0.000000e+00> : vector<8x1xf32>
    %16 = vector.multi_reduction <add>, %15, %cst_7 [1] : vector<8x4x1xf32> to vector<8x1xf32>
    %17 = vector.shape_cast %16 : vector<8x1xf32> to vector<8x1x1xf32>
    %cst_8 = arith.constant 4.000000e+00 : f32
    %18 = vector.broadcast %cst_8 : f32 to vector<8x1x1xf32>
    %19 = arith.divf %17, %18 : vector<8x1x1xf32>
    %cst_9 = arith.constant 9.99999974E-6 : f32
    %20 = vector.broadcast %cst_9 : f32 to vector<8x1x1xf32>
    %21 = arith.addf %19, %20 : vector<8x1x1xf32>
    %22 = math.rsqrt %21 : vector<8x1x1xf32>
    %23 = vector.broadcast %22 : vector<8x1x1xf32> to vector<8x4x256xf32>
    %24 = arith.mulf %10, %23 : vector<8x4x256xf32>
    %c0_10 = arith.constant 0 : index
    %c0_11 = arith.constant 0 : index
    %c0_12 = arith.constant 0 : index
    %25 = vector.load %arg2[%c0_10, %c0_11, %c0_12] : memref<8x4x1xf32, #tpu.memory_space<vmem>>, vector<8x4x1xf32>
    %26 = vector.broadcast %25 : vector<8x4x1xf32> to vector<8x4x256xf32>
    %27 = arith.mulf %24, %26 : vector<8x4x256xf32>
    %c0_13 = arith.constant 0 : index
    %c0_14 = arith.constant 0 : index
    %c0_15 = arith.constant 0 : index
    %28 = vector.load %arg3[%c0_13, %c0_14, %c0_15] : memref<8x4x1xf32, #tpu.memory_space<vmem>>, vector<8x4x1xf32>
    %29 = vector.broadcast %28 : vector<8x4x1xf32> to vector<8x4x256xf32>
    %30 = arith.addf %27, %29 : vector<8x4x256xf32>
    %31 = math.tanh %30 : vector<8x4x256xf32>
    %c0_16 = arith.constant 0 : index
    %c0_17 = arith.constant 0 : index
    %c0_18 = arith.constant 0 : index
    %32 = vector.load %arg4[%c0_16, %c0_17, %c0_18] : memref<8x4x256xf32, #tpu.memory_space<vmem>>, vector<8x4x256xf32>
    tpu.vector_store %arg4[%c0_16, %c0_17, %c0_18], %31 {strides = array<i32>} : memref<8x4x256xf32, #tpu.memory_space<vmem>>, vector<8x4x256xf32>,
    return
  }
  func.func @transform_0(%arg0: i32) -> (i32, i32, i32) {
    %c0_i32 = arith.constant 0 : i32
    %c0_i32_0 = arith.constant 0 : i32
    %c0_i32_1 = arith.constant 0 : i32
    return %arg0, %c0_i32, %c0_i32_0 : i32, i32, i32
  }
  func.func @transform_1(%arg0: i32) -> (i32, i32, i32) {
    %c0_i32 = arith.constant 0 : i32
    %c0_i32_0 = arith.constant 0 : i32
    %c0_i32_1 = arith.constant 0 : i32
    return %arg0, %c0_i32, %c0_i32_0 : i32, i32, i32
  }
  func.func @transform_2(%arg0: i32) -> (i32, i32, i32) {
    %c0_i32 = arith.constant 0 : i32
    %c0_i32_0 = arith.constant 0 : i32
    %c0_i32_1 = arith.constant 0 : i32
    return %arg0, %c0_i32, %c0_i32_0 : i32, i32, i32
  }
  func.func @transform_3(%arg0: i32) -> (i32, i32, i32) {
    %c0_i32 = arith.constant 0 : i32
    %c0_i32_0 = arith.constant 0 : i32
    %c0_i32_1 = arith.constant 0 : i32
    return %arg0, %c0_i32, %c0_i32_0 : i32, i32, i32
  }
}

module attributes {stable_mosaic.version = 11 : i64} {
  func.func @_mm_kernel(%arg0: i32, %arg1: i32, %arg2: i32, %arg3: memref<64x512xbf16, #tpu.memory_space<vmem>>, %arg4: memref<512x128xbf16, #tpu.memory_space<vmem>>, %arg5: memref<1x128xf32, #tpu.memory_space<vmem>>, %arg6: memref<64x128xf32, #tpu.memory_space<vmem>>, %arg7: memref<64x128xf32, #tpu.memory_space<vmem>>) attributes {dimension_semantics = [#tpu.dimension_semantics<parallel>, #tpu.dimension_semantics<parallel>, #tpu.dimension_semantics<arbitrary>], iteration_bounds = array<i64: 1, 1, 2>, scalar_prefetch = 0 : i64, scratch_operands = 1 : i64, tpu.core_type = #tpu.core_type<tc>, window_params = [{transform_indices = @transform_0, window_bounds = array<i64: 64, 512>}, {transform_indices = @transform_1, window_bounds = array<i64: 512, 128>}, {transform_indices = @transform_2, window_bounds = array<i64: 1, 128>}, {transform_indices = @transform_3, window_bounds = array<i64: 64, 128>}]} {
    %c0_i32 = arith.constant 0 : i32
    %0 = arith.cmpi eq, %arg2, %c0_i32 : i32
    %1 = arith.extui %0 : i1 to i32
    %c0_i32_0 = arith.constant 0 : i32
    %2 = arith.cmpi ne, %1, %c0_i32_0 : i32
    scf.if %2 {
      %cst_9 = arith.constant 0.000000e+00 : f32
      %12 = vector.broadcast %cst_9 : f32 to vector<64x128xf32>
      %c0_10 = arith.constant 0 : index
      %c0_11 = arith.constant 0 : index
      %13 = vector.load %arg7[%c0_10, %c0_11] : memref<64x128xf32, #tpu.memory_space<vmem>>, vector<64x128xf32>
      tpu.vector_store %arg7[%c0_10, %c0_11], %12 {strides = array<i32>} : memref<64x128xf32, #tpu.memory_space<vmem>>, vector<64x128xf32>,
    } else {
    }
    %c0 = arith.constant 0 : index
    %c0_1 = arith.constant 0 : index
    %3 = vector.load %arg7[%c0, %c0_1] : memref<64x128xf32, #tpu.memory_space<vmem>>, vector<64x128xf32>
    %c0_2 = arith.constant 0 : index
    %c0_3 = arith.constant 0 : index
    %4 = vector.load %arg3[%c0_2, %c0_3] : memref<64x512xbf16, #tpu.memory_space<vmem>>, vector<64x512xbf16>
    %c0_4 = arith.constant 0 : index
    %c0_5 = arith.constant 0 : index
    %5 = vector.load %arg4[%c0_4, %c0_5] : memref<512x128xbf16, #tpu.memory_space<vmem>>, vector<512x128xbf16>
    %cst = arith.constant dense<0.000000e+00> : vector<64x128xf32>
    %6 = tpu.matmul %4, %5, %cst {dimension_numbers = #tpu.dot_dimension_numbers<[1], [0], [0], [1], [0, 0, 1, 1], [], []>} : vector<64x512xbf16>, vector<512x128xbf16>, vector<64x128xf32> -> vector<64x128xf32>
    %7 = arith.addf %3, %6 : vector<64x128xf32>
    %c0_6 = arith.constant 0 : index
    %c0_7 = arith.constant 0 : index
    %8 = vector.load %arg7[%c0_6, %c0_7] : memref<64x128xf32, #tpu.memory_space<vmem>>, vector<64x128xf32>
    tpu.vector_store %arg7[%c0_6, %c0_7], %7 {strides = array<i32>} : memref<64x128xf32, #tpu.memory_space<vmem>>, vector<64x128xf32>,
    %c1_i32 = arith.constant 1 : i32
    %9 = arith.cmpi eq, %arg2, %c1_i32 : i32
    %10 = arith.extui %9 : i1 to i32
    %c0_i32_8 = arith.constant 0 : i32
    %11 = arith.cmpi ne, %10, %c0_i32_8 : i32
    scf.if %11 {
      %c0_9 = arith.constant 0 : index
      %c0_10 = arith.constant 0 : index
      %12 = vector.load %arg7[%c0_9, %c0_10] : memref<64x128xf32, #tpu.memory_space<vmem>>, vector<64x128xf32>
      %c0_11 = arith.constant 0 : index
      %c0_12 = arith.constant 0 : index
      %13 = vector.load %arg5[%c0_11, %c0_12] : memref<1x128xf32, #tpu.memory_space<vmem>>, vector<1x128xf32>
      %14 = vector.broadcast %13 : vector<1x128xf32> to vector<64x128xf32>
      %15 = arith.addf %12, %14 : vector<64x128xf32>
      %c0_13 = arith.constant 0 : index
      %c0_14 = arith.constant 0 : index
      %16 = vector.load %arg6[%c0_13, %c0_14] : memref<64x128xf32, #tpu.memory_space<vmem>>, vector<64x128xf32>
      tpu.vector_store %arg6[%c0_13, %c0_14], %15 {strides = array<i32>} : memref<64x128xf32, #tpu.memory_space<vmem>>, vector<64x128xf32>,
    } else {
    }
    return
  }
  func.func @transform_0(%arg0: i32, %arg1: i32, %arg2: i32) -> (i32, i32) {
    %c0_i32 = arith.constant 0 : i32
    return %arg0, %arg2 : i32, i32
  }
  func.func @transform_1(%arg0: i32, %arg1: i32, %arg2: i32) -> (i32, i32) {
    %c0_i32 = arith.constant 0 : i32
    return %arg2, %arg1 : i32, i32
  }
  func.func @transform_2(%arg0: i32, %arg1: i32, %arg2: i32) -> (i32, i32) {
    %c0_i32 = arith.constant 0 : i32
    %c0_i32_0 = arith.constant 0 : i32
    return %c0_i32, %arg1 : i32, i32
  }
  func.func @transform_3(%arg0: i32, %arg1: i32, %arg2: i32) -> (i32, i32) {
    %c0_i32 = arith.constant 0 : i32
    return %arg0, %arg1 : i32, i32
  }
}

module attributes {stable_mosaic.version = 11 : i64} {
  func.func @_gn_kernel(%arg0: i32, %arg1: memref<8x4x64xf32, #tpu.memory_space<vmem>>, %arg2: memref<8x4x1xf32, #tpu.memory_space<vmem>>, %arg3: memref<8x4x1xf32, #tpu.memory_space<vmem>>, %arg4: memref<8x4x64xf32, #tpu.memory_space<vmem>>) attributes {dimension_semantics = [#tpu.dimension_semantics<parallel>], iteration_bounds = array<i64: 4>, scalar_prefetch = 0 : i64, scratch_operands = 0 : i64, tpu.core_type = #tpu.core_type<tc>, window_params = [{transform_indices = @transform_0, window_bounds = array<i64: 8, 4, 64>}, {transform_indices = @transform_1, window_bounds = array<i64: 8, 4, 1>}, {transform_indices = @transform_2, window_bounds = array<i64: 8, 4, 1>}, {transform_indices = @transform_3, window_bounds = array<i64: 8, 4, 64>}]} {
    %c0 = arith.constant 0 : index
    %c0_0 = arith.constant 0 : index
    %c0_1 = arith.constant 0 : index
    %0 = vector.load %arg1[%c0, %c0_0, %c0_1] : memref<8x4x64xf32, #tpu.memory_space<vmem>>, vector<8x4x64xf32>
    %cst = arith.constant dense<0.000000e+00> : vector<8x4xf32>
    %1 = vector.multi_reduction <add>, %0, %cst [2] : vector<8x4x64xf32> to vector<8x4xf32>
    %2 = vector.shape_cast %1 : vector<8x4xf32> to vector<8x4x1xf32>
    %cst_2 = arith.constant 6.400000e+01 : f32
    %3 = vector.broadcast %cst_2 : f32 to vector<8x4x1xf32>
    %4 = arith.divf %2, %3 : vector<8x4x1xf32>
    %cst_3 = arith.constant dense<0.000000e+00> : vector<8x1xf32>
    %5 = vector.multi_reduction <add>, %4, %cst_3 [1] : vector<8x4x1xf32> to vector<8x1xf32>
    %6 = vector.shape_cast %5 : vector<8x1xf32> to vector<8x1x1xf32>
    %cst_4 = arith.constant 4.000000e+00 : f32
    %7 = vector.broadcast %cst_4 : f32 to vector<8x1x1xf32>
    %8 = arith.divf %6, %7 : vector<8x1x1xf32>
    %9 = vector.broadcast %8 : vector<8x1x1xf32> to vector<8x4x64xf32>
    %10 = arith.subf %0, %9 : vector<8x4x64xf32>
    %11 = arith.mulf %10, %10 : vector<8x4x64xf32>
    %cst_5 = arith.constant dense<0.000000e+00> : vector<8x4xf32>
    %12 = vector.multi_reduction <add>, %11, %cst_5 [2] : vector<8x4x64xf32> to vector<8x4xf32>
    %13 = vector.shape_cast %12 : vector<8x4xf32> to vector<8x4x1xf32>
    %cst_6 = arith.constant 6.400000e+01 : f32
    %14 = vector.broadcast %cst_6 : f32 to vector<8x4x1xf32>
    %15 = arith.divf %13, %14 : vector<8x4x1xf32>
    %cst_7 = arith.constant dense<0.000000e+00> : vector<8x1xf32>
    %16 = vector.multi_reduction <add>, %15, %cst_7 [1] : vector<8x4x1xf32> to vector<8x1xf32>
    %17 = vector.shape_cast %16 : vector<8x1xf32> to vector<8x1x1xf32>
    %cst_8 = arith.constant 4.000000e+00 : f32
    %18 = vector.broadcast %cst_8 : f32 to vector<8x1x1xf32>
    %19 = arith.divf %17, %18 : vector<8x1x1xf32>
    %cst_9 = arith.constant 9.99999974E-6 : f32
    %20 = vector.broadcast %cst_9 : f32 to vector<8x1x1xf32>
    %21 = arith.addf %19, %20 : vector<8x1x1xf32>
    %22 = math.rsqrt %21 : vector<8x1x1xf32>
    %23 = vector.broadcast %22 : vector<8x1x1xf32> to vector<8x4x64xf32>
    %24 = arith.mulf %10, %23 : vector<8x4x64xf32>
    %c0_10 = arith.constant 0 : index
    %c0_11 = arith.constant 0 : index
    %c0_12 = arith.constant 0 : index
    %25 = vector.load %arg2[%c0_10, %c0_11, %c0_12] : memref<8x4x1xf32, #tpu.memory_space<vmem>>, vector<8x4x1xf32>
    %26 = vector.broadcast %25 : vector<8x4x1xf32> to vector<8x4x64xf32>
    %27 = arith.mulf %24, %26 : vector<8x4x64xf32>
    %c0_13 = arith.constant 0 : index
    %c0_14 = arith.constant 0 : index
    %c0_15 = arith.constant 0 : index
    %28 = vector.load %arg3[%c0_13, %c0_14, %c0_15] : memref<8x4x1xf32, #tpu.memory_space<vmem>>, vector<8x4x1xf32>
    %29 = vector.broadcast %28 : vector<8x4x1xf32> to vector<8x4x64xf32>
    %30 = arith.addf %27, %29 : vector<8x4x64xf32>
    %cst_16 = arith.constant 0.000000e+00 : f32
    %31 = vector.broadcast %cst_16 : f32 to vector<8x4x64xf32>
    %32 = arith.maximumf %30, %31 : vector<8x4x64xf32>
    %c0_17 = arith.constant 0 : index
    %c0_18 = arith.constant 0 : index
    %c0_19 = arith.constant 0 : index
    %33 = vector.load %arg4[%c0_17, %c0_18, %c0_19] : memref<8x4x64xf32, #tpu.memory_space<vmem>>, vector<8x4x64xf32>
    tpu.vector_store %arg4[%c0_17, %c0_18, %c0_19], %32 {strides = array<i32>} : memref<8x4x64xf32, #tpu.memory_space<vmem>>, vector<8x4x64xf32>,
    return
  }
  func.func @transform_0(%arg0: i32) -> (i32, i32, i32) {
    %c0_i32 = arith.constant 0 : i32
    %c0_i32_0 = arith.constant 0 : i32
    %c0_i32_1 = arith.constant 0 : i32
    return %arg0, %c0_i32, %c0_i32_0 : i32, i32, i32
  }
  func.func @transform_1(%arg0: i32) -> (i32, i32, i32) {
    %c0_i32 = arith.constant 0 : i32
    %c0_i32_0 = arith.constant 0 : i32
    %c0_i32_1 = arith.constant 0 : i32
    return %arg0, %c0_i32, %c0_i32_0 : i32, i32, i32
  }
  func.func @transform_2(%arg0: i32) -> (i32, i32, i32) {
    %c0_i32 = arith.constant 0 : i32
    %c0_i32_0 = arith.constant 0 : i32
    %c0_i32_1 = arith.constant 0 : i32
    return %arg0, %c0_i32, %c0_i32_0 : i32, i32, i32
  }
  func.func @transform_3(%arg0: i32) -> (i32, i32, i32) {
    %c0_i32 = arith.constant 0 : i32
    %c0_i32_0 = arith.constant 0 : i32
    %c0_i32_1 = arith.constant 0 : i32
    return %arg0, %c0_i32, %c0_i32_0 : i32, i32, i32
  }
}

module attributes {stable_mosaic.version = 11 : i64} {
  func.func @_mm_kernel(%arg0: i32, %arg1: i32, %arg2: i32, %arg3: memref<16x512xbf16, #tpu.memory_space<vmem>>, %arg4: memref<512x256xbf16, #tpu.memory_space<vmem>>, %arg5: memref<1x256xf32, #tpu.memory_space<vmem>>, %arg6: memref<16x256xf32, #tpu.memory_space<vmem>>, %arg7: memref<16x256xf32, #tpu.memory_space<vmem>>) attributes {dimension_semantics = [#tpu.dimension_semantics<parallel>, #tpu.dimension_semantics<parallel>, #tpu.dimension_semantics<arbitrary>], iteration_bounds = array<i64: 1, 1, 3>, scalar_prefetch = 0 : i64, scratch_operands = 1 : i64, tpu.core_type = #tpu.core_type<tc>, window_params = [{transform_indices = @transform_0, window_bounds = array<i64: 16, 512>}, {transform_indices = @transform_1, window_bounds = array<i64: 512, 256>}, {transform_indices = @transform_2, window_bounds = array<i64: 1, 256>}, {transform_indices = @transform_3, window_bounds = array<i64: 16, 256>}]} {
    %c0_i32 = arith.constant 0 : i32
    %0 = arith.cmpi eq, %arg2, %c0_i32 : i32
    %1 = arith.extui %0 : i1 to i32
    %c0_i32_0 = arith.constant 0 : i32
    %2 = arith.cmpi ne, %1, %c0_i32_0 : i32
    scf.if %2 {
      %cst_9 = arith.constant 0.000000e+00 : f32
      %12 = vector.broadcast %cst_9 : f32 to vector<16x256xf32>
      %c0_10 = arith.constant 0 : index
      %c0_11 = arith.constant 0 : index
      %13 = vector.load %arg7[%c0_10, %c0_11] : memref<16x256xf32, #tpu.memory_space<vmem>>, vector<16x256xf32>
      tpu.vector_store %arg7[%c0_10, %c0_11], %12 {strides = array<i32>} : memref<16x256xf32, #tpu.memory_space<vmem>>, vector<16x256xf32>,
    } else {
    }
    %c0 = arith.constant 0 : index
    %c0_1 = arith.constant 0 : index
    %3 = vector.load %arg7[%c0, %c0_1] : memref<16x256xf32, #tpu.memory_space<vmem>>, vector<16x256xf32>
    %c0_2 = arith.constant 0 : index
    %c0_3 = arith.constant 0 : index
    %4 = vector.load %arg3[%c0_2, %c0_3] : memref<16x512xbf16, #tpu.memory_space<vmem>>, vector<16x512xbf16>
    %c0_4 = arith.constant 0 : index
    %c0_5 = arith.constant 0 : index
    %5 = vector.load %arg4[%c0_4, %c0_5] : memref<512x256xbf16, #tpu.memory_space<vmem>>, vector<512x256xbf16>
    %cst = arith.constant dense<0.000000e+00> : vector<16x256xf32>
    %6 = tpu.matmul %4, %5, %cst {dimension_numbers = #tpu.dot_dimension_numbers<[1], [0], [0], [1], [0, 0, 1, 1], [], []>} : vector<16x512xbf16>, vector<512x256xbf16>, vector<16x256xf32> -> vector<16x256xf32>
    %7 = arith.addf %3, %6 : vector<16x256xf32>
    %c0_6 = arith.constant 0 : index
    %c0_7 = arith.constant 0 : index
    %8 = vector.load %arg7[%c0_6, %c0_7] : memref<16x256xf32, #tpu.memory_space<vmem>>, vector<16x256xf32>
    tpu.vector_store %arg7[%c0_6, %c0_7], %7 {strides = array<i32>} : memref<16x256xf32, #tpu.memory_space<vmem>>, vector<16x256xf32>,
    %c2_i32 = arith.constant 2 : i32
    %9 = arith.cmpi eq, %arg2, %c2_i32 : i32
    %10 = arith.extui %9 : i1 to i32
    %c0_i32_8 = arith.constant 0 : i32
    %11 = arith.cmpi ne, %10, %c0_i32_8 : i32
    scf.if %11 {
      %c0_9 = arith.constant 0 : index
      %c0_10 = arith.constant 0 : index
      %12 = vector.load %arg7[%c0_9, %c0_10] : memref<16x256xf32, #tpu.memory_space<vmem>>, vector<16x256xf32>
      %c0_11 = arith.constant 0 : index
      %c0_12 = arith.constant 0 : index
      %13 = vector.load %arg5[%c0_11, %c0_12] : memref<1x256xf32, #tpu.memory_space<vmem>>, vector<1x256xf32>
      %14 = vector.broadcast %13 : vector<1x256xf32> to vector<16x256xf32>
      %15 = arith.addf %12, %14 : vector<16x256xf32>
      %c0_13 = arith.constant 0 : index
      %c0_14 = arith.constant 0 : index
      %16 = vector.load %arg6[%c0_13, %c0_14] : memref<16x256xf32, #tpu.memory_space<vmem>>, vector<16x256xf32>
      tpu.vector_store %arg6[%c0_13, %c0_14], %15 {strides = array<i32>} : memref<16x256xf32, #tpu.memory_space<vmem>>, vector<16x256xf32>,
    } else {
    }
    return
  }
  func.func @transform_0(%arg0: i32, %arg1: i32, %arg2: i32) -> (i32, i32) {
    %c0_i32 = arith.constant 0 : i32
    return %arg0, %arg2 : i32, i32
  }
  func.func @transform_1(%arg0: i32, %arg1: i32, %arg2: i32) -> (i32, i32) {
    %c0_i32 = arith.constant 0 : i32
    return %arg2, %arg1 : i32, i32
  }
  func.func @transform_2(%arg0: i32, %arg1: i32, %arg2: i32) -> (i32, i32) {
    %c0_i32 = arith.constant 0 : i32
    %c0_i32_0 = arith.constant 0 : i32
    return %c0_i32, %arg1 : i32, i32
  }
  func.func @transform_3(%arg0: i32, %arg1: i32, %arg2: i32) -> (i32, i32) {
    %c0_i32 = arith.constant 0 : i32
    return %arg0, %arg1 : i32, i32
  }
}

module attributes {stable_mosaic.version = 11 : i64} {
  func.func @_gn_kernel(%arg0: i32, %arg1: memref<8x4x16xf32, #tpu.memory_space<vmem>>, %arg2: memref<8x4x1xf32, #tpu.memory_space<vmem>>, %arg3: memref<8x4x1xf32, #tpu.memory_space<vmem>>, %arg4: memref<8x4x16xf32, #tpu.memory_space<vmem>>) attributes {dimension_semantics = [#tpu.dimension_semantics<parallel>], iteration_bounds = array<i64: 8>, scalar_prefetch = 0 : i64, scratch_operands = 0 : i64, tpu.core_type = #tpu.core_type<tc>, window_params = [{transform_indices = @transform_0, window_bounds = array<i64: 8, 4, 16>}, {transform_indices = @transform_1, window_bounds = array<i64: 8, 4, 1>}, {transform_indices = @transform_2, window_bounds = array<i64: 8, 4, 1>}, {transform_indices = @transform_3, window_bounds = array<i64: 8, 4, 16>}]} {
    %c0 = arith.constant 0 : index
    %c0_0 = arith.constant 0 : index
    %c0_1 = arith.constant 0 : index
    %0 = vector.load %arg1[%c0, %c0_0, %c0_1] : memref<8x4x16xf32, #tpu.memory_space<vmem>>, vector<8x4x16xf32>
    %cst = arith.constant dense<0.000000e+00> : vector<8x4xf32>
    %1 = vector.multi_reduction <add>, %0, %cst [2] : vector<8x4x16xf32> to vector<8x4xf32>
    %2 = vector.shape_cast %1 : vector<8x4xf32> to vector<8x4x1xf32>
    %cst_2 = arith.constant 1.600000e+01 : f32
    %3 = vector.broadcast %cst_2 : f32 to vector<8x4x1xf32>
    %4 = arith.divf %2, %3 : vector<8x4x1xf32>
    %cst_3 = arith.constant dense<0.000000e+00> : vector<8x1xf32>
    %5 = vector.multi_reduction <add>, %4, %cst_3 [1] : vector<8x4x1xf32> to vector<8x1xf32>
    %6 = vector.shape_cast %5 : vector<8x1xf32> to vector<8x1x1xf32>
    %cst_4 = arith.constant 4.000000e+00 : f32
    %7 = vector.broadcast %cst_4 : f32 to vector<8x1x1xf32>
    %8 = arith.divf %6, %7 : vector<8x1x1xf32>
    %9 = vector.broadcast %8 : vector<8x1x1xf32> to vector<8x4x16xf32>
    %10 = arith.subf %0, %9 : vector<8x4x16xf32>
    %11 = arith.mulf %10, %10 : vector<8x4x16xf32>
    %cst_5 = arith.constant dense<0.000000e+00> : vector<8x4xf32>
    %12 = vector.multi_reduction <add>, %11, %cst_5 [2] : vector<8x4x16xf32> to vector<8x4xf32>
    %13 = vector.shape_cast %12 : vector<8x4xf32> to vector<8x4x1xf32>
    %cst_6 = arith.constant 1.600000e+01 : f32
    %14 = vector.broadcast %cst_6 : f32 to vector<8x4x1xf32>
    %15 = arith.divf %13, %14 : vector<8x4x1xf32>
    %cst_7 = arith.constant dense<0.000000e+00> : vector<8x1xf32>
    %16 = vector.multi_reduction <add>, %15, %cst_7 [1] : vector<8x4x1xf32> to vector<8x1xf32>
    %17 = vector.shape_cast %16 : vector<8x1xf32> to vector<8x1x1xf32>
    %cst_8 = arith.constant 4.000000e+00 : f32
    %18 = vector.broadcast %cst_8 : f32 to vector<8x1x1xf32>
    %19 = arith.divf %17, %18 : vector<8x1x1xf32>
    %cst_9 = arith.constant 9.99999974E-6 : f32
    %20 = vector.broadcast %cst_9 : f32 to vector<8x1x1xf32>
    %21 = arith.addf %19, %20 : vector<8x1x1xf32>
    %22 = math.rsqrt %21 : vector<8x1x1xf32>
    %23 = vector.broadcast %22 : vector<8x1x1xf32> to vector<8x4x16xf32>
    %24 = arith.mulf %10, %23 : vector<8x4x16xf32>
    %c0_10 = arith.constant 0 : index
    %c0_11 = arith.constant 0 : index
    %c0_12 = arith.constant 0 : index
    %25 = vector.load %arg2[%c0_10, %c0_11, %c0_12] : memref<8x4x1xf32, #tpu.memory_space<vmem>>, vector<8x4x1xf32>
    %26 = vector.broadcast %25 : vector<8x4x1xf32> to vector<8x4x16xf32>
    %27 = arith.mulf %24, %26 : vector<8x4x16xf32>
    %c0_13 = arith.constant 0 : index
    %c0_14 = arith.constant 0 : index
    %c0_15 = arith.constant 0 : index
    %28 = vector.load %arg3[%c0_13, %c0_14, %c0_15] : memref<8x4x1xf32, #tpu.memory_space<vmem>>, vector<8x4x1xf32>
    %29 = vector.broadcast %28 : vector<8x4x1xf32> to vector<8x4x16xf32>
    %30 = arith.addf %27, %29 : vector<8x4x16xf32>
    %cst_16 = arith.constant 0.000000e+00 : f32
    %31 = vector.broadcast %cst_16 : f32 to vector<8x4x16xf32>
    %32 = arith.maximumf %30, %31 : vector<8x4x16xf32>
    %c0_17 = arith.constant 0 : index
    %c0_18 = arith.constant 0 : index
    %c0_19 = arith.constant 0 : index
    %33 = vector.load %arg4[%c0_17, %c0_18, %c0_19] : memref<8x4x16xf32, #tpu.memory_space<vmem>>, vector<8x4x16xf32>
    tpu.vector_store %arg4[%c0_17, %c0_18, %c0_19], %32 {strides = array<i32>} : memref<8x4x16xf32, #tpu.memory_space<vmem>>, vector<8x4x16xf32>,
    return
  }
  func.func @transform_0(%arg0: i32) -> (i32, i32, i32) {
    %c0_i32 = arith.constant 0 : i32
    %c0_i32_0 = arith.constant 0 : i32
    %c0_i32_1 = arith.constant 0 : i32
    return %arg0, %c0_i32, %c0_i32_0 : i32, i32, i32
  }
  func.func @transform_1(%arg0: i32) -> (i32, i32, i32) {
    %c0_i32 = arith.constant 0 : i32
    %c0_i32_0 = arith.constant 0 : i32
    %c0_i32_1 = arith.constant 0 : i32
    return %arg0, %c0_i32, %c0_i32_0 : i32, i32, i32
  }
  func.func @transform_2(%arg0: i32) -> (i32, i32, i32) {
    %c0_i32 = arith.constant 0 : i32
    %c0_i32_0 = arith.constant 0 : i32
    %c0_i32_1 = arith.constant 0 : i32
    return %arg0, %c0_i32, %c0_i32_0 : i32, i32, i32
  }
  func.func @transform_3(%arg0: i32) -> (i32, i32, i32) {
    %c0_i32 = arith.constant 0 : i32
    %c0_i32_0 = arith.constant 0 : i32
    %c0_i32_1 = arith.constant 0 : i32
    return %arg0, %c0_i32, %c0_i32_0 : i32, i32, i32
  }
}

module attributes {stable_mosaic.version = 11 : i64} {
  func.func @_mm_kernel(%arg0: i32, %arg1: i32, %arg2: i32, %arg3: memref<16x256xbf16, #tpu.memory_space<vmem>>, %arg4: memref<256x128xbf16, #tpu.memory_space<vmem>>, %arg5: memref<1x128xf32, #tpu.memory_space<vmem>>, %arg6: memref<16x128xf32, #tpu.memory_space<vmem>>, %arg7: memref<16x128xf32, #tpu.memory_space<vmem>>) attributes {dimension_semantics = [#tpu.dimension_semantics<parallel>, #tpu.dimension_semantics<parallel>, #tpu.dimension_semantics<arbitrary>], iteration_bounds = array<i64: 1, 1, 1>, scalar_prefetch = 0 : i64, scratch_operands = 1 : i64, tpu.core_type = #tpu.core_type<tc>, window_params = [{transform_indices = @transform_0, window_bounds = array<i64: 16, 256>}, {transform_indices = @transform_1, window_bounds = array<i64: 256, 128>}, {transform_indices = @transform_2, window_bounds = array<i64: 1, 128>}, {transform_indices = @transform_3, window_bounds = array<i64: 16, 128>}]} {
    %c0_i32 = arith.constant 0 : i32
    %0 = arith.cmpi eq, %arg2, %c0_i32 : i32
    %1 = arith.extui %0 : i1 to i32
    %c0_i32_0 = arith.constant 0 : i32
    %2 = arith.cmpi ne, %1, %c0_i32_0 : i32
    scf.if %2 {
      %cst_10 = arith.constant 0.000000e+00 : f32
      %12 = vector.broadcast %cst_10 : f32 to vector<16x128xf32>
      %c0_11 = arith.constant 0 : index
      %c0_12 = arith.constant 0 : index
      %13 = vector.load %arg7[%c0_11, %c0_12] : memref<16x128xf32, #tpu.memory_space<vmem>>, vector<16x128xf32>
      tpu.vector_store %arg7[%c0_11, %c0_12], %12 {strides = array<i32>} : memref<16x128xf32, #tpu.memory_space<vmem>>, vector<16x128xf32>,
    } else {
    }
    %c0 = arith.constant 0 : index
    %c0_1 = arith.constant 0 : index
    %3 = vector.load %arg7[%c0, %c0_1] : memref<16x128xf32, #tpu.memory_space<vmem>>, vector<16x128xf32>
    %c0_2 = arith.constant 0 : index
    %c0_3 = arith.constant 0 : index
    %4 = vector.load %arg3[%c0_2, %c0_3] : memref<16x256xbf16, #tpu.memory_space<vmem>>, vector<16x256xbf16>
    %c0_4 = arith.constant 0 : index
    %c0_5 = arith.constant 0 : index
    %5 = vector.load %arg4[%c0_4, %c0_5] : memref<256x128xbf16, #tpu.memory_space<vmem>>, vector<256x128xbf16>
    %cst = arith.constant dense<0.000000e+00> : vector<16x128xf32>
    %6 = tpu.matmul %4, %5, %cst {dimension_numbers = #tpu.dot_dimension_numbers<[1], [0], [0], [1], [0, 0, 1, 1], [], []>} : vector<16x256xbf16>, vector<256x128xbf16>, vector<16x128xf32> -> vector<16x128xf32>
    %7 = arith.addf %3, %6 : vector<16x128xf32>
    %c0_6 = arith.constant 0 : index
    %c0_7 = arith.constant 0 : index
    %8 = vector.load %arg7[%c0_6, %c0_7] : memref<16x128xf32, #tpu.memory_space<vmem>>, vector<16x128xf32>
    tpu.vector_store %arg7[%c0_6, %c0_7], %7 {strides = array<i32>} : memref<16x128xf32, #tpu.memory_space<vmem>>, vector<16x128xf32>,
    %c0_i32_8 = arith.constant 0 : i32
    %9 = arith.cmpi eq, %arg2, %c0_i32_8 : i32
    %10 = arith.extui %9 : i1 to i32
    %c0_i32_9 = arith.constant 0 : i32
    %11 = arith.cmpi ne, %10, %c0_i32_9 : i32
    scf.if %11 {
      %c0_10 = arith.constant 0 : index
      %c0_11 = arith.constant 0 : index
      %12 = vector.load %arg7[%c0_10, %c0_11] : memref<16x128xf32, #tpu.memory_space<vmem>>, vector<16x128xf32>
      %c0_12 = arith.constant 0 : index
      %c0_13 = arith.constant 0 : index
      %13 = vector.load %arg5[%c0_12, %c0_13] : memref<1x128xf32, #tpu.memory_space<vmem>>, vector<1x128xf32>
      %14 = vector.broadcast %13 : vector<1x128xf32> to vector<16x128xf32>
      %15 = arith.addf %12, %14 : vector<16x128xf32>
      %c0_14 = arith.constant 0 : index
      %c0_15 = arith.constant 0 : index
      %16 = vector.load %arg6[%c0_14, %c0_15] : memref<16x128xf32, #tpu.memory_space<vmem>>, vector<16x128xf32>
      tpu.vector_store %arg6[%c0_14, %c0_15], %15 {strides = array<i32>} : memref<16x128xf32, #tpu.memory_space<vmem>>, vector<16x128xf32>,
    } else {
    }
    return
  }
  func.func @transform_0(%arg0: i32, %arg1: i32, %arg2: i32) -> (i32, i32) {
    %c0_i32 = arith.constant 0 : i32
    return %arg0, %arg2 : i32, i32
  }
  func.func @transform_1(%arg0: i32, %arg1: i32, %arg2: i32) -> (i32, i32) {
    %c0_i32 = arith.constant 0 : i32
    return %arg2, %arg1 : i32, i32
  }
  func.func @transform_2(%arg0: i32, %arg1: i32, %arg2: i32) -> (i32, i32) {
    %c0_i32 = arith.constant 0 : i32
    %c0_i32_0 = arith.constant 0 : i32
    return %c0_i32, %arg1 : i32, i32
  }
  func.func @transform_3(%arg0: i32, %arg1: i32, %arg2: i32) -> (i32, i32) {
    %c0_i32 = arith.constant 0 : i32
    return %arg0, %arg1 : i32, i32
  }
}

module attributes {stable_mosaic.version = 11 : i64} {
  func.func @_gn_kernel(%arg0: i32, %arg1: memref<8x4x16xf32, #tpu.memory_space<vmem>>, %arg2: memref<8x4x1xf32, #tpu.memory_space<vmem>>, %arg3: memref<8x4x1xf32, #tpu.memory_space<vmem>>, %arg4: memref<8x4x16xf32, #tpu.memory_space<vmem>>) attributes {dimension_semantics = [#tpu.dimension_semantics<parallel>], iteration_bounds = array<i64: 2>, scalar_prefetch = 0 : i64, scratch_operands = 0 : i64, tpu.core_type = #tpu.core_type<tc>, window_params = [{transform_indices = @transform_0, window_bounds = array<i64: 8, 4, 16>}, {transform_indices = @transform_1, window_bounds = array<i64: 8, 4, 1>}, {transform_indices = @transform_2, window_bounds = array<i64: 8, 4, 1>}, {transform_indices = @transform_3, window_bounds = array<i64: 8, 4, 16>}]} {
    %c0 = arith.constant 0 : index
    %c0_0 = arith.constant 0 : index
    %c0_1 = arith.constant 0 : index
    %0 = vector.load %arg1[%c0, %c0_0, %c0_1] : memref<8x4x16xf32, #tpu.memory_space<vmem>>, vector<8x4x16xf32>
    %cst = arith.constant dense<0.000000e+00> : vector<8x4xf32>
    %1 = vector.multi_reduction <add>, %0, %cst [2] : vector<8x4x16xf32> to vector<8x4xf32>
    %2 = vector.shape_cast %1 : vector<8x4xf32> to vector<8x4x1xf32>
    %cst_2 = arith.constant 1.600000e+01 : f32
    %3 = vector.broadcast %cst_2 : f32 to vector<8x4x1xf32>
    %4 = arith.divf %2, %3 : vector<8x4x1xf32>
    %cst_3 = arith.constant dense<0.000000e+00> : vector<8x1xf32>
    %5 = vector.multi_reduction <add>, %4, %cst_3 [1] : vector<8x4x1xf32> to vector<8x1xf32>
    %6 = vector.shape_cast %5 : vector<8x1xf32> to vector<8x1x1xf32>
    %cst_4 = arith.constant 4.000000e+00 : f32
    %7 = vector.broadcast %cst_4 : f32 to vector<8x1x1xf32>
    %8 = arith.divf %6, %7 : vector<8x1x1xf32>
    %9 = vector.broadcast %8 : vector<8x1x1xf32> to vector<8x4x16xf32>
    %10 = arith.subf %0, %9 : vector<8x4x16xf32>
    %11 = arith.mulf %10, %10 : vector<8x4x16xf32>
    %cst_5 = arith.constant dense<0.000000e+00> : vector<8x4xf32>
    %12 = vector.multi_reduction <add>, %11, %cst_5 [2] : vector<8x4x16xf32> to vector<8x4xf32>
    %13 = vector.shape_cast %12 : vector<8x4xf32> to vector<8x4x1xf32>
    %cst_6 = arith.constant 1.600000e+01 : f32
    %14 = vector.broadcast %cst_6 : f32 to vector<8x4x1xf32>
    %15 = arith.divf %13, %14 : vector<8x4x1xf32>
    %cst_7 = arith.constant dense<0.000000e+00> : vector<8x1xf32>
    %16 = vector.multi_reduction <add>, %15, %cst_7 [1] : vector<8x4x1xf32> to vector<8x1xf32>
    %17 = vector.shape_cast %16 : vector<8x1xf32> to vector<8x1x1xf32>
    %cst_8 = arith.constant 4.000000e+00 : f32
    %18 = vector.broadcast %cst_8 : f32 to vector<8x1x1xf32>
    %19 = arith.divf %17, %18 : vector<8x1x1xf32>
    %cst_9 = arith.constant 9.99999974E-6 : f32
    %20 = vector.broadcast %cst_9 : f32 to vector<8x1x1xf32>
    %21 = arith.addf %19, %20 : vector<8x1x1xf32>
    %22 = math.rsqrt %21 : vector<8x1x1xf32>
    %23 = vector.broadcast %22 : vector<8x1x1xf32> to vector<8x4x16xf32>
    %24 = arith.mulf %10, %23 : vector<8x4x16xf32>
    %c0_10 = arith.constant 0 : index
    %c0_11 = arith.constant 0 : index
    %c0_12 = arith.constant 0 : index
    %25 = vector.load %arg2[%c0_10, %c0_11, %c0_12] : memref<8x4x1xf32, #tpu.memory_space<vmem>>, vector<8x4x1xf32>
    %26 = vector.broadcast %25 : vector<8x4x1xf32> to vector<8x4x16xf32>
    %27 = arith.mulf %24, %26 : vector<8x4x16xf32>
    %c0_13 = arith.constant 0 : index
    %c0_14 = arith.constant 0 : index
    %c0_15 = arith.constant 0 : index
    %28 = vector.load %arg3[%c0_13, %c0_14, %c0_15] : memref<8x4x1xf32, #tpu.memory_space<vmem>>, vector<8x4x1xf32>
    %29 = vector.broadcast %28 : vector<8x4x1xf32> to vector<8x4x16xf32>
    %30 = arith.addf %27, %29 : vector<8x4x16xf32>
    %cst_16 = arith.constant 0.000000e+00 : f32
    %31 = vector.broadcast %cst_16 : f32 to vector<8x4x16xf32>
    %32 = arith.maximumf %30, %31 : vector<8x4x16xf32>
    %c0_17 = arith.constant 0 : index
    %c0_18 = arith.constant 0 : index
    %c0_19 = arith.constant 0 : index
    %33 = vector.load %arg4[%c0_17, %c0_18, %c0_19] : memref<8x4x16xf32, #tpu.memory_space<vmem>>, vector<8x4x16xf32>
    tpu.vector_store %arg4[%c0_17, %c0_18, %c0_19], %32 {strides = array<i32>} : memref<8x4x16xf32, #tpu.memory_space<vmem>>, vector<8x4x16xf32>,
    return
  }
  func.func @transform_0(%arg0: i32) -> (i32, i32, i32) {
    %c0_i32 = arith.constant 0 : i32
    %c0_i32_0 = arith.constant 0 : i32
    %c0_i32_1 = arith.constant 0 : i32
    return %arg0, %c0_i32, %c0_i32_0 : i32, i32, i32
  }
  func.func @transform_1(%arg0: i32) -> (i32, i32, i32) {
    %c0_i32 = arith.constant 0 : i32
    %c0_i32_0 = arith.constant 0 : i32
    %c0_i32_1 = arith.constant 0 : i32
    return %arg0, %c0_i32, %c0_i32_0 : i32, i32, i32
  }
  func.func @transform_2(%arg0: i32) -> (i32, i32, i32) {
    %c0_i32 = arith.constant 0 : i32
    %c0_i32_0 = arith.constant 0 : i32
    %c0_i32_1 = arith.constant 0 : i32
    return %arg0, %c0_i32, %c0_i32_0 : i32, i32, i32
  }
  func.func @transform_3(%arg0: i32) -> (i32, i32, i32) {
    %c0_i32 = arith.constant 0 : i32
    %c0_i32_0 = arith.constant 0 : i32
    %c0_i32_1 = arith.constant 0 : i32
    return %arg0, %c0_i32, %c0_i32_0 : i32, i32, i32
  }
}

module attributes {stable_mosaic.version = 11 : i64} {
  func.func @_mm_kernel(%arg0: i32, %arg1: i32, %arg2: i32, %arg3: memref<16x512xbf16, #tpu.memory_space<vmem>>, %arg4: memref<512x128xbf16, #tpu.memory_space<vmem>>, %arg5: memref<1x128xf32, #tpu.memory_space<vmem>>, %arg6: memref<16x128xf32, #tpu.memory_space<vmem>>, %arg7: memref<16x128xf32, #tpu.memory_space<vmem>>) attributes {dimension_semantics = [#tpu.dimension_semantics<parallel>, #tpu.dimension_semantics<parallel>, #tpu.dimension_semantics<arbitrary>], iteration_bounds = array<i64: 1, 1, 2>, scalar_prefetch = 0 : i64, scratch_operands = 1 : i64, tpu.core_type = #tpu.core_type<tc>, window_params = [{transform_indices = @transform_0, window_bounds = array<i64: 16, 512>}, {transform_indices = @transform_1, window_bounds = array<i64: 512, 128>}, {transform_indices = @transform_2, window_bounds = array<i64: 1, 128>}, {transform_indices = @transform_3, window_bounds = array<i64: 16, 128>}]} {
    %c0_i32 = arith.constant 0 : i32
    %0 = arith.cmpi eq, %arg2, %c0_i32 : i32
    %1 = arith.extui %0 : i1 to i32
    %c0_i32_0 = arith.constant 0 : i32
    %2 = arith.cmpi ne, %1, %c0_i32_0 : i32
    scf.if %2 {
      %cst_9 = arith.constant 0.000000e+00 : f32
      %12 = vector.broadcast %cst_9 : f32 to vector<16x128xf32>
      %c0_10 = arith.constant 0 : index
      %c0_11 = arith.constant 0 : index
      %13 = vector.load %arg7[%c0_10, %c0_11] : memref<16x128xf32, #tpu.memory_space<vmem>>, vector<16x128xf32>
      tpu.vector_store %arg7[%c0_10, %c0_11], %12 {strides = array<i32>} : memref<16x128xf32, #tpu.memory_space<vmem>>, vector<16x128xf32>,
    } else {
    }
    %c0 = arith.constant 0 : index
    %c0_1 = arith.constant 0 : index
    %3 = vector.load %arg7[%c0, %c0_1] : memref<16x128xf32, #tpu.memory_space<vmem>>, vector<16x128xf32>
    %c0_2 = arith.constant 0 : index
    %c0_3 = arith.constant 0 : index
    %4 = vector.load %arg3[%c0_2, %c0_3] : memref<16x512xbf16, #tpu.memory_space<vmem>>, vector<16x512xbf16>
    %c0_4 = arith.constant 0 : index
    %c0_5 = arith.constant 0 : index
    %5 = vector.load %arg4[%c0_4, %c0_5] : memref<512x128xbf16, #tpu.memory_space<vmem>>, vector<512x128xbf16>
    %cst = arith.constant dense<0.000000e+00> : vector<16x128xf32>
    %6 = tpu.matmul %4, %5, %cst {dimension_numbers = #tpu.dot_dimension_numbers<[1], [0], [0], [1], [0, 0, 1, 1], [], []>} : vector<16x512xbf16>, vector<512x128xbf16>, vector<16x128xf32> -> vector<16x128xf32>
    %7 = arith.addf %3, %6 : vector<16x128xf32>
    %c0_6 = arith.constant 0 : index
    %c0_7 = arith.constant 0 : index
    %8 = vector.load %arg7[%c0_6, %c0_7] : memref<16x128xf32, #tpu.memory_space<vmem>>, vector<16x128xf32>
    tpu.vector_store %arg7[%c0_6, %c0_7], %7 {strides = array<i32>} : memref<16x128xf32, #tpu.memory_space<vmem>>, vector<16x128xf32>,
    %c1_i32 = arith.constant 1 : i32
    %9 = arith.cmpi eq, %arg2, %c1_i32 : i32
    %10 = arith.extui %9 : i1 to i32
    %c0_i32_8 = arith.constant 0 : i32
    %11 = arith.cmpi ne, %10, %c0_i32_8 : i32
    scf.if %11 {
      %c0_9 = arith.constant 0 : index
      %c0_10 = arith.constant 0 : index
      %12 = vector.load %arg7[%c0_9, %c0_10] : memref<16x128xf32, #tpu.memory_space<vmem>>, vector<16x128xf32>
      %c0_11 = arith.constant 0 : index
      %c0_12 = arith.constant 0 : index
      %13 = vector.load %arg5[%c0_11, %c0_12] : memref<1x128xf32, #tpu.memory_space<vmem>>, vector<1x128xf32>
      %14 = vector.broadcast %13 : vector<1x128xf32> to vector<16x128xf32>
      %15 = arith.addf %12, %14 : vector<16x128xf32>
      %c0_13 = arith.constant 0 : index
      %c0_14 = arith.constant 0 : index
      %16 = vector.load %arg6[%c0_13, %c0_14] : memref<16x128xf32, #tpu.memory_space<vmem>>, vector<16x128xf32>
      tpu.vector_store %arg6[%c0_13, %c0_14], %15 {strides = array<i32>} : memref<16x128xf32, #tpu.memory_space<vmem>>, vector<16x128xf32>,
    } else {
    }
    return
  }
  func.func @transform_0(%arg0: i32, %arg1: i32, %arg2: i32) -> (i32, i32) {
    %c0_i32 = arith.constant 0 : i32
    return %arg0, %arg2 : i32, i32
  }
  func.func @transform_1(%arg0: i32, %arg1: i32, %arg2: i32) -> (i32, i32) {
    %c0_i32 = arith.constant 0 : i32
    return %arg2, %arg1 : i32, i32
  }
  func.func @transform_2(%arg0: i32, %arg1: i32, %arg2: i32) -> (i32, i32) {
    %c0_i32 = arith.constant 0 : i32
    %c0_i32_0 = arith.constant 0 : i32
    return %c0_i32, %arg1 : i32, i32
  }
  func.func @transform_3(%arg0: i32, %arg1: i32, %arg2: i32) -> (i32, i32) {
    %c0_i32 = arith.constant 0 : i32
    return %arg0, %arg1 : i32, i32
  }
}

module attributes {stable_mosaic.version = 11 : i64} {
  func.func @_mm_kernel(%arg0: i32, %arg1: i32, %arg2: i32, %arg3: memref<16x128xbf16, #tpu.memory_space<vmem>>, %arg4: memref<128x256xbf16, #tpu.memory_space<vmem>>, %arg5: memref<1x256xf32, #tpu.memory_space<vmem>>, %arg6: memref<16x256xf32, #tpu.memory_space<vmem>>, %arg7: memref<16x256xf32, #tpu.memory_space<vmem>>) attributes {dimension_semantics = [#tpu.dimension_semantics<parallel>, #tpu.dimension_semantics<parallel>, #tpu.dimension_semantics<arbitrary>], iteration_bounds = array<i64: 1, 1, 1>, scalar_prefetch = 0 : i64, scratch_operands = 1 : i64, tpu.core_type = #tpu.core_type<tc>, window_params = [{transform_indices = @transform_0, window_bounds = array<i64: 16, 128>}, {transform_indices = @transform_1, window_bounds = array<i64: 128, 256>}, {transform_indices = @transform_2, window_bounds = array<i64: 1, 256>}, {transform_indices = @transform_3, window_bounds = array<i64: 16, 256>}]} {
    %c0_i32 = arith.constant 0 : i32
    %0 = arith.cmpi eq, %arg2, %c0_i32 : i32
    %1 = arith.extui %0 : i1 to i32
    %c0_i32_0 = arith.constant 0 : i32
    %2 = arith.cmpi ne, %1, %c0_i32_0 : i32
    scf.if %2 {
      %cst_10 = arith.constant 0.000000e+00 : f32
      %12 = vector.broadcast %cst_10 : f32 to vector<16x256xf32>
      %c0_11 = arith.constant 0 : index
      %c0_12 = arith.constant 0 : index
      %13 = vector.load %arg7[%c0_11, %c0_12] : memref<16x256xf32, #tpu.memory_space<vmem>>, vector<16x256xf32>
      tpu.vector_store %arg7[%c0_11, %c0_12], %12 {strides = array<i32>} : memref<16x256xf32, #tpu.memory_space<vmem>>, vector<16x256xf32>,
    } else {
    }
    %c0 = arith.constant 0 : index
    %c0_1 = arith.constant 0 : index
    %3 = vector.load %arg7[%c0, %c0_1] : memref<16x256xf32, #tpu.memory_space<vmem>>, vector<16x256xf32>
    %c0_2 = arith.constant 0 : index
    %c0_3 = arith.constant 0 : index
    %4 = vector.load %arg3[%c0_2, %c0_3] : memref<16x128xbf16, #tpu.memory_space<vmem>>, vector<16x128xbf16>
    %c0_4 = arith.constant 0 : index
    %c0_5 = arith.constant 0 : index
    %5 = vector.load %arg4[%c0_4, %c0_5] : memref<128x256xbf16, #tpu.memory_space<vmem>>, vector<128x256xbf16>
    %cst = arith.constant dense<0.000000e+00> : vector<16x256xf32>
    %6 = tpu.matmul %4, %5, %cst {dimension_numbers = #tpu.dot_dimension_numbers<[1], [0], [0], [1], [0, 0, 1, 1], [], []>} : vector<16x128xbf16>, vector<128x256xbf16>, vector<16x256xf32> -> vector<16x256xf32>
    %7 = arith.addf %3, %6 : vector<16x256xf32>
    %c0_6 = arith.constant 0 : index
    %c0_7 = arith.constant 0 : index
    %8 = vector.load %arg7[%c0_6, %c0_7] : memref<16x256xf32, #tpu.memory_space<vmem>>, vector<16x256xf32>
    tpu.vector_store %arg7[%c0_6, %c0_7], %7 {strides = array<i32>} : memref<16x256xf32, #tpu.memory_space<vmem>>, vector<16x256xf32>,
    %c0_i32_8 = arith.constant 0 : i32
    %9 = arith.cmpi eq, %arg2, %c0_i32_8 : i32
    %10 = arith.extui %9 : i1 to i32
    %c0_i32_9 = arith.constant 0 : i32
    %11 = arith.cmpi ne, %10, %c0_i32_9 : i32
    scf.if %11 {
      %c0_10 = arith.constant 0 : index
      %c0_11 = arith.constant 0 : index
      %12 = vector.load %arg7[%c0_10, %c0_11] : memref<16x256xf32, #tpu.memory_space<vmem>>, vector<16x256xf32>
      %c0_12 = arith.constant 0 : index
      %c0_13 = arith.constant 0 : index
      %13 = vector.load %arg5[%c0_12, %c0_13] : memref<1x256xf32, #tpu.memory_space<vmem>>, vector<1x256xf32>
      %14 = vector.broadcast %13 : vector<1x256xf32> to vector<16x256xf32>
      %15 = arith.addf %12, %14 : vector<16x256xf32>
      %c0_14 = arith.constant 0 : index
      %c0_15 = arith.constant 0 : index
      %16 = vector.load %arg6[%c0_14, %c0_15] : memref<16x256xf32, #tpu.memory_space<vmem>>, vector<16x256xf32>
      tpu.vector_store %arg6[%c0_14, %c0_15], %15 {strides = array<i32>} : memref<16x256xf32, #tpu.memory_space<vmem>>, vector<16x256xf32>,
    } else {
    }
    return
  }
  func.func @transform_0(%arg0: i32, %arg1: i32, %arg2: i32) -> (i32, i32) {
    %c0_i32 = arith.constant 0 : i32
    return %arg0, %arg2 : i32, i32
  }
  func.func @transform_1(%arg0: i32, %arg1: i32, %arg2: i32) -> (i32, i32) {
    %c0_i32 = arith.constant 0 : i32
    return %arg2, %arg1 : i32, i32
  }
  func.func @transform_2(%arg0: i32, %arg1: i32, %arg2: i32) -> (i32, i32) {
    %c0_i32 = arith.constant 0 : i32
    %c0_i32_0 = arith.constant 0 : i32
    return %c0_i32, %arg1 : i32, i32
  }
  func.func @transform_3(%arg0: i32, %arg1: i32, %arg2: i32) -> (i32, i32) {
    %c0_i32 = arith.constant 0 : i32
    return %arg0, %arg1 : i32, i32
  }
}

module attributes {stable_mosaic.version = 11 : i64} {
  func.func @_gn_kernel(%arg0: i32, %arg1: memref<8x4x16xf32, #tpu.memory_space<vmem>>, %arg2: memref<8x4x1xf32, #tpu.memory_space<vmem>>, %arg3: memref<8x4x1xf32, #tpu.memory_space<vmem>>, %arg4: memref<8x4x16xf32, #tpu.memory_space<vmem>>, %arg5: memref<8x4x16xf32, #tpu.memory_space<vmem>>) attributes {dimension_semantics = [#tpu.dimension_semantics<parallel>], iteration_bounds = array<i64: 8>, scalar_prefetch = 0 : i64, scratch_operands = 0 : i64, tpu.core_type = #tpu.core_type<tc>, window_params = [{transform_indices = @transform_0, window_bounds = array<i64: 8, 4, 16>}, {transform_indices = @transform_1, window_bounds = array<i64: 8, 4, 1>}, {transform_indices = @transform_2, window_bounds = array<i64: 8, 4, 1>}, {transform_indices = @transform_3, window_bounds = array<i64: 8, 4, 16>}, {transform_indices = @transform_4, window_bounds = array<i64: 8, 4, 16>}]} {
    %c0 = arith.constant 0 : index
    %c0_0 = arith.constant 0 : index
    %c0_1 = arith.constant 0 : index
    %0 = vector.load %arg1[%c0, %c0_0, %c0_1] : memref<8x4x16xf32, #tpu.memory_space<vmem>>, vector<8x4x16xf32>
    %cst = arith.constant dense<0.000000e+00> : vector<8x4xf32>
    %1 = vector.multi_reduction <add>, %0, %cst [2] : vector<8x4x16xf32> to vector<8x4xf32>
    %2 = vector.shape_cast %1 : vector<8x4xf32> to vector<8x4x1xf32>
    %cst_2 = arith.constant 1.600000e+01 : f32
    %3 = vector.broadcast %cst_2 : f32 to vector<8x4x1xf32>
    %4 = arith.divf %2, %3 : vector<8x4x1xf32>
    %cst_3 = arith.constant dense<0.000000e+00> : vector<8x1xf32>
    %5 = vector.multi_reduction <add>, %4, %cst_3 [1] : vector<8x4x1xf32> to vector<8x1xf32>
    %6 = vector.shape_cast %5 : vector<8x1xf32> to vector<8x1x1xf32>
    %cst_4 = arith.constant 4.000000e+00 : f32
    %7 = vector.broadcast %cst_4 : f32 to vector<8x1x1xf32>
    %8 = arith.divf %6, %7 : vector<8x1x1xf32>
    %9 = vector.broadcast %8 : vector<8x1x1xf32> to vector<8x4x16xf32>
    %10 = arith.subf %0, %9 : vector<8x4x16xf32>
    %11 = arith.mulf %10, %10 : vector<8x4x16xf32>
    %cst_5 = arith.constant dense<0.000000e+00> : vector<8x4xf32>
    %12 = vector.multi_reduction <add>, %11, %cst_5 [2] : vector<8x4x16xf32> to vector<8x4xf32>
    %13 = vector.shape_cast %12 : vector<8x4xf32> to vector<8x4x1xf32>
    %cst_6 = arith.constant 1.600000e+01 : f32
    %14 = vector.broadcast %cst_6 : f32 to vector<8x4x1xf32>
    %15 = arith.divf %13, %14 : vector<8x4x1xf32>
    %cst_7 = arith.constant dense<0.000000e+00> : vector<8x1xf32>
    %16 = vector.multi_reduction <add>, %15, %cst_7 [1] : vector<8x4x1xf32> to vector<8x1xf32>
    %17 = vector.shape_cast %16 : vector<8x1xf32> to vector<8x1x1xf32>
    %cst_8 = arith.constant 4.000000e+00 : f32
    %18 = vector.broadcast %cst_8 : f32 to vector<8x1x1xf32>
    %19 = arith.divf %17, %18 : vector<8x1x1xf32>
    %cst_9 = arith.constant 9.99999974E-6 : f32
    %20 = vector.broadcast %cst_9 : f32 to vector<8x1x1xf32>
    %21 = arith.addf %19, %20 : vector<8x1x1xf32>
    %22 = math.rsqrt %21 : vector<8x1x1xf32>
    %23 = vector.broadcast %22 : vector<8x1x1xf32> to vector<8x4x16xf32>
    %24 = arith.mulf %10, %23 : vector<8x4x16xf32>
    %c0_10 = arith.constant 0 : index
    %c0_11 = arith.constant 0 : index
    %c0_12 = arith.constant 0 : index
    %25 = vector.load %arg2[%c0_10, %c0_11, %c0_12] : memref<8x4x1xf32, #tpu.memory_space<vmem>>, vector<8x4x1xf32>
    %26 = vector.broadcast %25 : vector<8x4x1xf32> to vector<8x4x16xf32>
    %27 = arith.mulf %24, %26 : vector<8x4x16xf32>
    %c0_13 = arith.constant 0 : index
    %c0_14 = arith.constant 0 : index
    %c0_15 = arith.constant 0 : index
    %28 = vector.load %arg3[%c0_13, %c0_14, %c0_15] : memref<8x4x1xf32, #tpu.memory_space<vmem>>, vector<8x4x1xf32>
    %29 = vector.broadcast %28 : vector<8x4x1xf32> to vector<8x4x16xf32>
    %30 = arith.addf %27, %29 : vector<8x4x16xf32>
    %cst_16 = arith.constant 0.000000e+00 : f32
    %31 = vector.broadcast %cst_16 : f32 to vector<8x4x16xf32>
    %32 = arith.maximumf %30, %31 : vector<8x4x16xf32>
    %c0_17 = arith.constant 0 : index
    %c0_18 = arith.constant 0 : index
    %c0_19 = arith.constant 0 : index
    %33 = vector.load %arg4[%c0_17, %c0_18, %c0_19] : memref<8x4x16xf32, #tpu.memory_space<vmem>>, vector<8x4x16xf32>
    %34 = arith.addf %32, %33 : vector<8x4x16xf32>
    %c0_20 = arith.constant 0 : index
    %c0_21 = arith.constant 0 : index
    %c0_22 = arith.constant 0 : index
    %35 = vector.load %arg5[%c0_20, %c0_21, %c0_22] : memref<8x4x16xf32, #tpu.memory_space<vmem>>, vector<8x4x16xf32>
    tpu.vector_store %arg5[%c0_20, %c0_21, %c0_22], %34 {strides = array<i32>} : memref<8x4x16xf32, #tpu.memory_space<vmem>>, vector<8x4x16xf32>,
    return
  }
  func.func @transform_0(%arg0: i32) -> (i32, i32, i32) {
    %c0_i32 = arith.constant 0 : i32
    %c0_i32_0 = arith.constant 0 : i32
    %c0_i32_1 = arith.constant 0 : i32
    return %arg0, %c0_i32, %c0_i32_0 : i32, i32, i32
  }
  func.func @transform_1(%arg0: i32) -> (i32, i32, i32) {
    %c0_i32 = arith.constant 0 : i32
    %c0_i32_0 = arith.constant 0 : i32
    %c0_i32_1 = arith.constant 0 : i32
    return %arg0, %c0_i32, %c0_i32_0 : i32, i32, i32
  }
  func.func @transform_2(%arg0: i32) -> (i32, i32, i32) {
    %c0_i32 = arith.constant 0 : i32
    %c0_i32_0 = arith.constant 0 : i32
    %c0_i32_1 = arith.constant 0 : i32
    return %arg0, %c0_i32, %c0_i32_0 : i32, i32, i32
  }
  func.func @transform_3(%arg0: i32) -> (i32, i32, i32) {
    %c0_i32 = arith.constant 0 : i32
    %c0_i32_0 = arith.constant 0 : i32
    %c0_i32_1 = arith.constant 0 : i32
    return %arg0, %c0_i32, %c0_i32_0 : i32, i32, i32
  }
  func.func @transform_4(%arg0: i32) -> (i32, i32, i32) {
    %c0_i32 = arith.constant 0 : i32
    %c0_i32_0 = arith.constant 0 : i32
    %c0_i32_1 = arith.constant 0 : i32
    return %arg0, %c0_i32, %c0_i32_0 : i32, i32, i32
  }
}

module attributes {stable_mosaic.version = 11 : i64} {
  func.func @_mm_kernel(%arg0: i32, %arg1: i32, %arg2: i32, %arg3: memref<16x512xbf16, #tpu.memory_space<vmem>>, %arg4: memref<512x128xbf16, #tpu.memory_space<vmem>>, %arg5: memref<1x128xf32, #tpu.memory_space<vmem>>, %arg6: memref<16x128xf32, #tpu.memory_space<vmem>>, %arg7: memref<16x128xf32, #tpu.memory_space<vmem>>) attributes {dimension_semantics = [#tpu.dimension_semantics<parallel>, #tpu.dimension_semantics<parallel>, #tpu.dimension_semantics<arbitrary>], iteration_bounds = array<i64: 1, 1, 1>, scalar_prefetch = 0 : i64, scratch_operands = 1 : i64, tpu.core_type = #tpu.core_type<tc>, window_params = [{transform_indices = @transform_0, window_bounds = array<i64: 16, 512>}, {transform_indices = @transform_1, window_bounds = array<i64: 512, 128>}, {transform_indices = @transform_2, window_bounds = array<i64: 1, 128>}, {transform_indices = @transform_3, window_bounds = array<i64: 16, 128>}]} {
    %c0_i32 = arith.constant 0 : i32
    %0 = arith.cmpi eq, %arg2, %c0_i32 : i32
    %1 = arith.extui %0 : i1 to i32
    %c0_i32_0 = arith.constant 0 : i32
    %2 = arith.cmpi ne, %1, %c0_i32_0 : i32
    scf.if %2 {
      %cst_10 = arith.constant 0.000000e+00 : f32
      %12 = vector.broadcast %cst_10 : f32 to vector<16x128xf32>
      %c0_11 = arith.constant 0 : index
      %c0_12 = arith.constant 0 : index
      %13 = vector.load %arg7[%c0_11, %c0_12] : memref<16x128xf32, #tpu.memory_space<vmem>>, vector<16x128xf32>
      tpu.vector_store %arg7[%c0_11, %c0_12], %12 {strides = array<i32>} : memref<16x128xf32, #tpu.memory_space<vmem>>, vector<16x128xf32>,
    } else {
    }
    %c0 = arith.constant 0 : index
    %c0_1 = arith.constant 0 : index
    %3 = vector.load %arg7[%c0, %c0_1] : memref<16x128xf32, #tpu.memory_space<vmem>>, vector<16x128xf32>
    %c0_2 = arith.constant 0 : index
    %c0_3 = arith.constant 0 : index
    %4 = vector.load %arg3[%c0_2, %c0_3] : memref<16x512xbf16, #tpu.memory_space<vmem>>, vector<16x512xbf16>
    %c0_4 = arith.constant 0 : index
    %c0_5 = arith.constant 0 : index
    %5 = vector.load %arg4[%c0_4, %c0_5] : memref<512x128xbf16, #tpu.memory_space<vmem>>, vector<512x128xbf16>
    %cst = arith.constant dense<0.000000e+00> : vector<16x128xf32>
    %6 = tpu.matmul %4, %5, %cst {dimension_numbers = #tpu.dot_dimension_numbers<[1], [0], [0], [1], [0, 0, 1, 1], [], []>} : vector<16x512xbf16>, vector<512x128xbf16>, vector<16x128xf32> -> vector<16x128xf32>
    %7 = arith.addf %3, %6 : vector<16x128xf32>
    %c0_6 = arith.constant 0 : index
    %c0_7 = arith.constant 0 : index
    %8 = vector.load %arg7[%c0_6, %c0_7] : memref<16x128xf32, #tpu.memory_space<vmem>>, vector<16x128xf32>
    tpu.vector_store %arg7[%c0_6, %c0_7], %7 {strides = array<i32>} : memref<16x128xf32, #tpu.memory_space<vmem>>, vector<16x128xf32>,
    %c0_i32_8 = arith.constant 0 : i32
    %9 = arith.cmpi eq, %arg2, %c0_i32_8 : i32
    %10 = arith.extui %9 : i1 to i32
    %c0_i32_9 = arith.constant 0 : i32
    %11 = arith.cmpi ne, %10, %c0_i32_9 : i32
    scf.if %11 {
      %c0_10 = arith.constant 0 : index
      %c0_11 = arith.constant 0 : index
      %12 = vector.load %arg7[%c0_10, %c0_11] : memref<16x128xf32, #tpu.memory_space<vmem>>, vector<16x128xf32>
      %c0_12 = arith.constant 0 : index
      %c0_13 = arith.constant 0 : index
      %13 = vector.load %arg5[%c0_12, %c0_13] : memref<1x128xf32, #tpu.memory_space<vmem>>, vector<1x128xf32>
      %14 = vector.broadcast %13 : vector<1x128xf32> to vector<16x128xf32>
      %15 = arith.addf %12, %14 : vector<16x128xf32>
      %c0_14 = arith.constant 0 : index
      %c0_15 = arith.constant 0 : index
      %16 = vector.load %arg6[%c0_14, %c0_15] : memref<16x128xf32, #tpu.memory_space<vmem>>, vector<16x128xf32>
      tpu.vector_store %arg6[%c0_14, %c0_15], %15 {strides = array<i32>} : memref<16x128xf32, #tpu.memory_space<vmem>>, vector<16x128xf32>,
    } else {
    }
    return
  }
  func.func @transform_0(%arg0: i32, %arg1: i32, %arg2: i32) -> (i32, i32) {
    %c0_i32 = arith.constant 0 : i32
    return %arg0, %arg2 : i32, i32
  }
  func.func @transform_1(%arg0: i32, %arg1: i32, %arg2: i32) -> (i32, i32) {
    %c0_i32 = arith.constant 0 : i32
    return %arg2, %arg1 : i32, i32
  }
  func.func @transform_2(%arg0: i32, %arg1: i32, %arg2: i32) -> (i32, i32) {
    %c0_i32 = arith.constant 0 : i32
    %c0_i32_0 = arith.constant 0 : i32
    return %c0_i32, %arg1 : i32, i32
  }
  func.func @transform_3(%arg0: i32, %arg1: i32, %arg2: i32) -> (i32, i32) {
    %c0_i32 = arith.constant 0 : i32
    return %arg0, %arg1 : i32, i32
  }
}

module attributes {stable_mosaic.version = 11 : i64} {
  func.func @_mm_kernel(%arg0: i32, %arg1: i32, %arg2: i32, %arg3: memref<16x512xbf16, #tpu.memory_space<vmem>>, %arg4: memref<512x128xbf16, #tpu.memory_space<vmem>>, %arg5: memref<1x128xf32, #tpu.memory_space<vmem>>, %arg6: memref<16x128xf32, #tpu.memory_space<vmem>>, %arg7: memref<16x128xf32, #tpu.memory_space<vmem>>) attributes {dimension_semantics = [#tpu.dimension_semantics<parallel>, #tpu.dimension_semantics<parallel>, #tpu.dimension_semantics<arbitrary>], iteration_bounds = array<i64: 1, 1, 4>, scalar_prefetch = 0 : i64, scratch_operands = 1 : i64, tpu.core_type = #tpu.core_type<tc>, window_params = [{transform_indices = @transform_0, window_bounds = array<i64: 16, 512>}, {transform_indices = @transform_1, window_bounds = array<i64: 512, 128>}, {transform_indices = @transform_2, window_bounds = array<i64: 1, 128>}, {transform_indices = @transform_3, window_bounds = array<i64: 16, 128>}]} {
    %c0_i32 = arith.constant 0 : i32
    %0 = arith.cmpi eq, %arg2, %c0_i32 : i32
    %1 = arith.extui %0 : i1 to i32
    %c0_i32_0 = arith.constant 0 : i32
    %2 = arith.cmpi ne, %1, %c0_i32_0 : i32
    scf.if %2 {
      %cst_9 = arith.constant 0.000000e+00 : f32
      %12 = vector.broadcast %cst_9 : f32 to vector<16x128xf32>
      %c0_10 = arith.constant 0 : index
      %c0_11 = arith.constant 0 : index
      %13 = vector.load %arg7[%c0_10, %c0_11] : memref<16x128xf32, #tpu.memory_space<vmem>>, vector<16x128xf32>
      tpu.vector_store %arg7[%c0_10, %c0_11], %12 {strides = array<i32>} : memref<16x128xf32, #tpu.memory_space<vmem>>, vector<16x128xf32>,
    } else {
    }
    %c0 = arith.constant 0 : index
    %c0_1 = arith.constant 0 : index
    %3 = vector.load %arg7[%c0, %c0_1] : memref<16x128xf32, #tpu.memory_space<vmem>>, vector<16x128xf32>
    %c0_2 = arith.constant 0 : index
    %c0_3 = arith.constant 0 : index
    %4 = vector.load %arg3[%c0_2, %c0_3] : memref<16x512xbf16, #tpu.memory_space<vmem>>, vector<16x512xbf16>
    %c0_4 = arith.constant 0 : index
    %c0_5 = arith.constant 0 : index
    %5 = vector.load %arg4[%c0_4, %c0_5] : memref<512x128xbf16, #tpu.memory_space<vmem>>, vector<512x128xbf16>
    %cst = arith.constant dense<0.000000e+00> : vector<16x128xf32>
    %6 = tpu.matmul %4, %5, %cst {dimension_numbers = #tpu.dot_dimension_numbers<[1], [0], [0], [1], [0, 0, 1, 1], [], []>} : vector<16x512xbf16>, vector<512x128xbf16>, vector<16x128xf32> -> vector<16x128xf32>
    %7 = arith.addf %3, %6 : vector<16x128xf32>
    %c0_6 = arith.constant 0 : index
    %c0_7 = arith.constant 0 : index
    %8 = vector.load %arg7[%c0_6, %c0_7] : memref<16x128xf32, #tpu.memory_space<vmem>>, vector<16x128xf32>
    tpu.vector_store %arg7[%c0_6, %c0_7], %7 {strides = array<i32>} : memref<16x128xf32, #tpu.memory_space<vmem>>, vector<16x128xf32>,
    %c3_i32 = arith.constant 3 : i32
    %9 = arith.cmpi eq, %arg2, %c3_i32 : i32
    %10 = arith.extui %9 : i1 to i32
    %c0_i32_8 = arith.constant 0 : i32
    %11 = arith.cmpi ne, %10, %c0_i32_8 : i32
    scf.if %11 {
      %c0_9 = arith.constant 0 : index
      %c0_10 = arith.constant 0 : index
      %12 = vector.load %arg7[%c0_9, %c0_10] : memref<16x128xf32, #tpu.memory_space<vmem>>, vector<16x128xf32>
      %c0_11 = arith.constant 0 : index
      %c0_12 = arith.constant 0 : index
      %13 = vector.load %arg5[%c0_11, %c0_12] : memref<1x128xf32, #tpu.memory_space<vmem>>, vector<1x128xf32>
      %14 = vector.broadcast %13 : vector<1x128xf32> to vector<16x128xf32>
      %15 = arith.addf %12, %14 : vector<16x128xf32>
      %c0_13 = arith.constant 0 : index
      %c0_14 = arith.constant 0 : index
      %16 = vector.load %arg6[%c0_13, %c0_14] : memref<16x128xf32, #tpu.memory_space<vmem>>, vector<16x128xf32>
      tpu.vector_store %arg6[%c0_13, %c0_14], %15 {strides = array<i32>} : memref<16x128xf32, #tpu.memory_space<vmem>>, vector<16x128xf32>,
    } else {
    }
    return
  }
  func.func @transform_0(%arg0: i32, %arg1: i32, %arg2: i32) -> (i32, i32) {
    %c0_i32 = arith.constant 0 : i32
    return %arg0, %arg2 : i32, i32
  }
  func.func @transform_1(%arg0: i32, %arg1: i32, %arg2: i32) -> (i32, i32) {
    %c0_i32 = arith.constant 0 : i32
    return %arg2, %arg1 : i32, i32
  }
  func.func @transform_2(%arg0: i32, %arg1: i32, %arg2: i32) -> (i32, i32) {
    %c0_i32 = arith.constant 0 : i32
    %c0_i32_0 = arith.constant 0 : i32
    return %c0_i32, %arg1 : i32, i32
  }
  func.func @transform_3(%arg0: i32, %arg1: i32, %arg2: i32) -> (i32, i32) {
    %c0_i32 = arith.constant 0 : i32
    return %arg0, %arg1 : i32, i32
  }
}

module attributes {stable_mosaic.version = 11 : i64} {
  func.func @_mm_kernel(%arg0: i32, %arg1: i32, %arg2: i32, %arg3: memref<64x256xbf16, #tpu.memory_space<vmem>>, %arg4: memref<256x128xbf16, #tpu.memory_space<vmem>>, %arg5: memref<1x128xf32, #tpu.memory_space<vmem>>, %arg6: memref<64x128xf32, #tpu.memory_space<vmem>>, %arg7: memref<64x128xf32, #tpu.memory_space<vmem>>) attributes {dimension_semantics = [#tpu.dimension_semantics<parallel>, #tpu.dimension_semantics<parallel>, #tpu.dimension_semantics<arbitrary>], iteration_bounds = array<i64: 1, 1, 1>, scalar_prefetch = 0 : i64, scratch_operands = 1 : i64, tpu.core_type = #tpu.core_type<tc>, window_params = [{transform_indices = @transform_0, window_bounds = array<i64: 64, 256>}, {transform_indices = @transform_1, window_bounds = array<i64: 256, 128>}, {transform_indices = @transform_2, window_bounds = array<i64: 1, 128>}, {transform_indices = @transform_3, window_bounds = array<i64: 64, 128>}]} {
    %c0_i32 = arith.constant 0 : i32
    %0 = arith.cmpi eq, %arg2, %c0_i32 : i32
    %1 = arith.extui %0 : i1 to i32
    %c0_i32_0 = arith.constant 0 : i32
    %2 = arith.cmpi ne, %1, %c0_i32_0 : i32
    scf.if %2 {
      %cst_10 = arith.constant 0.000000e+00 : f32
      %12 = vector.broadcast %cst_10 : f32 to vector<64x128xf32>
      %c0_11 = arith.constant 0 : index
      %c0_12 = arith.constant 0 : index
      %13 = vector.load %arg7[%c0_11, %c0_12] : memref<64x128xf32, #tpu.memory_space<vmem>>, vector<64x128xf32>
      tpu.vector_store %arg7[%c0_11, %c0_12], %12 {strides = array<i32>} : memref<64x128xf32, #tpu.memory_space<vmem>>, vector<64x128xf32>,
    } else {
    }
    %c0 = arith.constant 0 : index
    %c0_1 = arith.constant 0 : index
    %3 = vector.load %arg7[%c0, %c0_1] : memref<64x128xf32, #tpu.memory_space<vmem>>, vector<64x128xf32>
    %c0_2 = arith.constant 0 : index
    %c0_3 = arith.constant 0 : index
    %4 = vector.load %arg3[%c0_2, %c0_3] : memref<64x256xbf16, #tpu.memory_space<vmem>>, vector<64x256xbf16>
    %c0_4 = arith.constant 0 : index
    %c0_5 = arith.constant 0 : index
    %5 = vector.load %arg4[%c0_4, %c0_5] : memref<256x128xbf16, #tpu.memory_space<vmem>>, vector<256x128xbf16>
    %cst = arith.constant dense<0.000000e+00> : vector<64x128xf32>
    %6 = tpu.matmul %4, %5, %cst {dimension_numbers = #tpu.dot_dimension_numbers<[1], [0], [0], [1], [0, 0, 1, 1], [], []>} : vector<64x256xbf16>, vector<256x128xbf16>, vector<64x128xf32> -> vector<64x128xf32>
    %7 = arith.addf %3, %6 : vector<64x128xf32>
    %c0_6 = arith.constant 0 : index
    %c0_7 = arith.constant 0 : index
    %8 = vector.load %arg7[%c0_6, %c0_7] : memref<64x128xf32, #tpu.memory_space<vmem>>, vector<64x128xf32>
    tpu.vector_store %arg7[%c0_6, %c0_7], %7 {strides = array<i32>} : memref<64x128xf32, #tpu.memory_space<vmem>>, vector<64x128xf32>,
    %c0_i32_8 = arith.constant 0 : i32
    %9 = arith.cmpi eq, %arg2, %c0_i32_8 : i32
    %10 = arith.extui %9 : i1 to i32
    %c0_i32_9 = arith.constant 0 : i32
    %11 = arith.cmpi ne, %10, %c0_i32_9 : i32
    scf.if %11 {
      %c0_10 = arith.constant 0 : index
      %c0_11 = arith.constant 0 : index
      %12 = vector.load %arg7[%c0_10, %c0_11] : memref<64x128xf32, #tpu.memory_space<vmem>>, vector<64x128xf32>
      %c0_12 = arith.constant 0 : index
      %c0_13 = arith.constant 0 : index
      %13 = vector.load %arg5[%c0_12, %c0_13] : memref<1x128xf32, #tpu.memory_space<vmem>>, vector<1x128xf32>
      %14 = vector.broadcast %13 : vector<1x128xf32> to vector<64x128xf32>
      %15 = arith.addf %12, %14 : vector<64x128xf32>
      %c0_14 = arith.constant 0 : index
      %c0_15 = arith.constant 0 : index
      %16 = vector.load %arg6[%c0_14, %c0_15] : memref<64x128xf32, #tpu.memory_space<vmem>>, vector<64x128xf32>
      tpu.vector_store %arg6[%c0_14, %c0_15], %15 {strides = array<i32>} : memref<64x128xf32, #tpu.memory_space<vmem>>, vector<64x128xf32>,
    } else {
    }
    return
  }
  func.func @transform_0(%arg0: i32, %arg1: i32, %arg2: i32) -> (i32, i32) {
    %c0_i32 = arith.constant 0 : i32
    return %arg0, %arg2 : i32, i32
  }
  func.func @transform_1(%arg0: i32, %arg1: i32, %arg2: i32) -> (i32, i32) {
    %c0_i32 = arith.constant 0 : i32
    return %arg2, %arg1 : i32, i32
  }
  func.func @transform_2(%arg0: i32, %arg1: i32, %arg2: i32) -> (i32, i32) {
    %c0_i32 = arith.constant 0 : i32
    %c0_i32_0 = arith.constant 0 : i32
    return %c0_i32, %arg1 : i32, i32
  }
  func.func @transform_3(%arg0: i32, %arg1: i32, %arg2: i32) -> (i32, i32) {
    %c0_i32 = arith.constant 0 : i32
    return %arg0, %arg1 : i32, i32
  }
}

module attributes {stable_mosaic.version = 11 : i64} {
  func.func @_mm_kernel(%arg0: i32, %arg1: i32, %arg2: i32, %arg3: memref<64x512xbf16, #tpu.memory_space<vmem>>, %arg4: memref<512x128xbf16, #tpu.memory_space<vmem>>, %arg5: memref<1x128xf32, #tpu.memory_space<vmem>>, %arg6: memref<64x128xf32, #tpu.memory_space<vmem>>, %arg7: memref<64x128xf32, #tpu.memory_space<vmem>>) attributes {dimension_semantics = [#tpu.dimension_semantics<parallel>, #tpu.dimension_semantics<parallel>, #tpu.dimension_semantics<arbitrary>], iteration_bounds = array<i64: 1, 1, 1>, scalar_prefetch = 0 : i64, scratch_operands = 1 : i64, tpu.core_type = #tpu.core_type<tc>, window_params = [{transform_indices = @transform_0, window_bounds = array<i64: 64, 512>}, {transform_indices = @transform_1, window_bounds = array<i64: 512, 128>}, {transform_indices = @transform_2, window_bounds = array<i64: 1, 128>}, {transform_indices = @transform_3, window_bounds = array<i64: 64, 128>}]} {
    %c0_i32 = arith.constant 0 : i32
    %0 = arith.cmpi eq, %arg2, %c0_i32 : i32
    %1 = arith.extui %0 : i1 to i32
    %c0_i32_0 = arith.constant 0 : i32
    %2 = arith.cmpi ne, %1, %c0_i32_0 : i32
    scf.if %2 {
      %cst_10 = arith.constant 0.000000e+00 : f32
      %12 = vector.broadcast %cst_10 : f32 to vector<64x128xf32>
      %c0_11 = arith.constant 0 : index
      %c0_12 = arith.constant 0 : index
      %13 = vector.load %arg7[%c0_11, %c0_12] : memref<64x128xf32, #tpu.memory_space<vmem>>, vector<64x128xf32>
      tpu.vector_store %arg7[%c0_11, %c0_12], %12 {strides = array<i32>} : memref<64x128xf32, #tpu.memory_space<vmem>>, vector<64x128xf32>,
    } else {
    }
    %c0 = arith.constant 0 : index
    %c0_1 = arith.constant 0 : index
    %3 = vector.load %arg7[%c0, %c0_1] : memref<64x128xf32, #tpu.memory_space<vmem>>, vector<64x128xf32>
    %c0_2 = arith.constant 0 : index
    %c0_3 = arith.constant 0 : index
    %4 = vector.load %arg3[%c0_2, %c0_3] : memref<64x512xbf16, #tpu.memory_space<vmem>>, vector<64x512xbf16>
    %c0_4 = arith.constant 0 : index
    %c0_5 = arith.constant 0 : index
    %5 = vector.load %arg4[%c0_4, %c0_5] : memref<512x128xbf16, #tpu.memory_space<vmem>>, vector<512x128xbf16>
    %cst = arith.constant dense<0.000000e+00> : vector<64x128xf32>
    %6 = tpu.matmul %4, %5, %cst {dimension_numbers = #tpu.dot_dimension_numbers<[1], [0], [0], [1], [0, 0, 1, 1], [], []>} : vector<64x512xbf16>, vector<512x128xbf16>, vector<64x128xf32> -> vector<64x128xf32>
    %7 = arith.addf %3, %6 : vector<64x128xf32>
    %c0_6 = arith.constant 0 : index
    %c0_7 = arith.constant 0 : index
    %8 = vector.load %arg7[%c0_6, %c0_7] : memref<64x128xf32, #tpu.memory_space<vmem>>, vector<64x128xf32>
    tpu.vector_store %arg7[%c0_6, %c0_7], %7 {strides = array<i32>} : memref<64x128xf32, #tpu.memory_space<vmem>>, vector<64x128xf32>,
    %c0_i32_8 = arith.constant 0 : i32
    %9 = arith.cmpi eq, %arg2, %c0_i32_8 : i32
    %10 = arith.extui %9 : i1 to i32
    %c0_i32_9 = arith.constant 0 : i32
    %11 = arith.cmpi ne, %10, %c0_i32_9 : i32
    scf.if %11 {
      %c0_10 = arith.constant 0 : index
      %c0_11 = arith.constant 0 : index
      %12 = vector.load %arg7[%c0_10, %c0_11] : memref<64x128xf32, #tpu.memory_space<vmem>>, vector<64x128xf32>
      %c0_12 = arith.constant 0 : index
      %c0_13 = arith.constant 0 : index
      %13 = vector.load %arg5[%c0_12, %c0_13] : memref<1x128xf32, #tpu.memory_space<vmem>>, vector<1x128xf32>
      %14 = vector.broadcast %13 : vector<1x128xf32> to vector<64x128xf32>
      %15 = arith.addf %12, %14 : vector<64x128xf32>
      %c0_14 = arith.constant 0 : index
      %c0_15 = arith.constant 0 : index
      %16 = vector.load %arg6[%c0_14, %c0_15] : memref<64x128xf32, #tpu.memory_space<vmem>>, vector<64x128xf32>
      tpu.vector_store %arg6[%c0_14, %c0_15], %15 {strides = array<i32>} : memref<64x128xf32, #tpu.memory_space<vmem>>, vector<64x128xf32>,
    } else {
    }
    return
  }
  func.func @transform_0(%arg0: i32, %arg1: i32, %arg2: i32) -> (i32, i32) {
    %c0_i32 = arith.constant 0 : i32
    return %arg0, %arg2 : i32, i32
  }
  func.func @transform_1(%arg0: i32, %arg1: i32, %arg2: i32) -> (i32, i32) {
    %c0_i32 = arith.constant 0 : i32
    return %arg2, %arg1 : i32, i32
  }
  func.func @transform_2(%arg0: i32, %arg1: i32, %arg2: i32) -> (i32, i32) {
    %c0_i32 = arith.constant 0 : i32
    %c0_i32_0 = arith.constant 0 : i32
    return %c0_i32, %arg1 : i32, i32
  }
  func.func @transform_3(%arg0: i32, %arg1: i32, %arg2: i32) -> (i32, i32) {
    %c0_i32 = arith.constant 0 : i32
    return %arg0, %arg1 : i32, i32
  }
}

module attributes {stable_mosaic.version = 11 : i64} {
  func.func @_gn_kernel(%arg0: i32, %arg1: memref<8x4x256xf32, #tpu.memory_space<vmem>>, %arg2: memref<8x4x1xf32, #tpu.memory_space<vmem>>, %arg3: memref<8x4x1xf32, #tpu.memory_space<vmem>>, %arg4: memref<8x4x256xf32, #tpu.memory_space<vmem>>) attributes {dimension_semantics = [#tpu.dimension_semantics<parallel>], iteration_bounds = array<i64: 2>, scalar_prefetch = 0 : i64, scratch_operands = 0 : i64, tpu.core_type = #tpu.core_type<tc>, window_params = [{transform_indices = @transform_0, window_bounds = array<i64: 8, 4, 256>}, {transform_indices = @transform_1, window_bounds = array<i64: 8, 4, 1>}, {transform_indices = @transform_2, window_bounds = array<i64: 8, 4, 1>}, {transform_indices = @transform_3, window_bounds = array<i64: 8, 4, 256>}]} {
    %c0 = arith.constant 0 : index
    %c0_0 = arith.constant 0 : index
    %c0_1 = arith.constant 0 : index
    %0 = vector.load %arg1[%c0, %c0_0, %c0_1] : memref<8x4x256xf32, #tpu.memory_space<vmem>>, vector<8x4x256xf32>
    %cst = arith.constant dense<0.000000e+00> : vector<8x4xf32>
    %1 = vector.multi_reduction <add>, %0, %cst [2] : vector<8x4x256xf32> to vector<8x4xf32>
    %2 = vector.shape_cast %1 : vector<8x4xf32> to vector<8x4x1xf32>
    %cst_2 = arith.constant 2.560000e+02 : f32
    %3 = vector.broadcast %cst_2 : f32 to vector<8x4x1xf32>
    %4 = arith.divf %2, %3 : vector<8x4x1xf32>
    %cst_3 = arith.constant dense<0.000000e+00> : vector<8x1xf32>
    %5 = vector.multi_reduction <add>, %4, %cst_3 [1] : vector<8x4x1xf32> to vector<8x1xf32>
    %6 = vector.shape_cast %5 : vector<8x1xf32> to vector<8x1x1xf32>
    %cst_4 = arith.constant 4.000000e+00 : f32
    %7 = vector.broadcast %cst_4 : f32 to vector<8x1x1xf32>
    %8 = arith.divf %6, %7 : vector<8x1x1xf32>
    %9 = vector.broadcast %8 : vector<8x1x1xf32> to vector<8x4x256xf32>
    %10 = arith.subf %0, %9 : vector<8x4x256xf32>
    %11 = arith.mulf %10, %10 : vector<8x4x256xf32>
    %cst_5 = arith.constant dense<0.000000e+00> : vector<8x4xf32>
    %12 = vector.multi_reduction <add>, %11, %cst_5 [2] : vector<8x4x256xf32> to vector<8x4xf32>
    %13 = vector.shape_cast %12 : vector<8x4xf32> to vector<8x4x1xf32>
    %cst_6 = arith.constant 2.560000e+02 : f32
    %14 = vector.broadcast %cst_6 : f32 to vector<8x4x1xf32>
    %15 = arith.divf %13, %14 : vector<8x4x1xf32>
    %cst_7 = arith.constant dense<0.000000e+00> : vector<8x1xf32>
    %16 = vector.multi_reduction <add>, %15, %cst_7 [1] : vector<8x4x1xf32> to vector<8x1xf32>
    %17 = vector.shape_cast %16 : vector<8x1xf32> to vector<8x1x1xf32>
    %cst_8 = arith.constant 4.000000e+00 : f32
    %18 = vector.broadcast %cst_8 : f32 to vector<8x1x1xf32>
    %19 = arith.divf %17, %18 : vector<8x1x1xf32>
    %cst_9 = arith.constant 9.99999974E-6 : f32
    %20 = vector.broadcast %cst_9 : f32 to vector<8x1x1xf32>
    %21 = arith.addf %19, %20 : vector<8x1x1xf32>
    %22 = math.rsqrt %21 : vector<8x1x1xf32>
    %23 = vector.broadcast %22 : vector<8x1x1xf32> to vector<8x4x256xf32>
    %24 = arith.mulf %10, %23 : vector<8x4x256xf32>
    %c0_10 = arith.constant 0 : index
    %c0_11 = arith.constant 0 : index
    %c0_12 = arith.constant 0 : index
    %25 = vector.load %arg2[%c0_10, %c0_11, %c0_12] : memref<8x4x1xf32, #tpu.memory_space<vmem>>, vector<8x4x1xf32>
    %26 = vector.broadcast %25 : vector<8x4x1xf32> to vector<8x4x256xf32>
    %27 = arith.mulf %24, %26 : vector<8x4x256xf32>
    %c0_13 = arith.constant 0 : index
    %c0_14 = arith.constant 0 : index
    %c0_15 = arith.constant 0 : index
    %28 = vector.load %arg3[%c0_13, %c0_14, %c0_15] : memref<8x4x1xf32, #tpu.memory_space<vmem>>, vector<8x4x1xf32>
    %29 = vector.broadcast %28 : vector<8x4x1xf32> to vector<8x4x256xf32>
    %30 = arith.addf %27, %29 : vector<8x4x256xf32>
    %cst_16 = arith.constant 0.000000e+00 : f32
    %31 = vector.broadcast %cst_16 : f32 to vector<8x4x256xf32>
    %32 = arith.maximumf %30, %31 : vector<8x4x256xf32>
    %c0_17 = arith.constant 0 : index
    %c0_18 = arith.constant 0 : index
    %c0_19 = arith.constant 0 : index
    %33 = vector.load %arg4[%c0_17, %c0_18, %c0_19] : memref<8x4x256xf32, #tpu.memory_space<vmem>>, vector<8x4x256xf32>
    tpu.vector_store %arg4[%c0_17, %c0_18, %c0_19], %32 {strides = array<i32>} : memref<8x4x256xf32, #tpu.memory_space<vmem>>, vector<8x4x256xf32>,
    return
  }
  func.func @transform_0(%arg0: i32) -> (i32, i32, i32) {
    %c0_i32 = arith.constant 0 : i32
    %c0_i32_0 = arith.constant 0 : i32
    %c0_i32_1 = arith.constant 0 : i32
    return %arg0, %c0_i32, %c0_i32_0 : i32, i32, i32
  }
  func.func @transform_1(%arg0: i32) -> (i32, i32, i32) {
    %c0_i32 = arith.constant 0 : i32
    %c0_i32_0 = arith.constant 0 : i32
    %c0_i32_1 = arith.constant 0 : i32
    return %arg0, %c0_i32, %c0_i32_0 : i32, i32, i32
  }
  func.func @transform_2(%arg0: i32) -> (i32, i32, i32) {
    %c0_i32 = arith.constant 0 : i32
    %c0_i32_0 = arith.constant 0 : i32
    %c0_i32_1 = arith.constant 0 : i32
    return %arg0, %c0_i32, %c0_i32_0 : i32, i32, i32
  }
  func.func @transform_3(%arg0: i32) -> (i32, i32, i32) {
    %c0_i32 = arith.constant 0 : i32
    %c0_i32_0 = arith.constant 0 : i32
    %c0_i32_1 = arith.constant 0 : i32
    return %arg0, %c0_i32, %c0_i32_0 : i32, i32, i32
  }
}

module attributes {stable_mosaic.version = 11 : i64} {
  func.func @_mm_kernel(%arg0: i32, %arg1: i32, %arg2: i32, %arg3: memref<256x512xbf16, #tpu.memory_space<vmem>>, %arg4: memref<512x128xbf16, #tpu.memory_space<vmem>>, %arg5: memref<1x128xf32, #tpu.memory_space<vmem>>, %arg6: memref<256x128xf32, #tpu.memory_space<vmem>>, %arg7: memref<256x128xf32, #tpu.memory_space<vmem>>, %arg8: memref<256x128xf32, #tpu.memory_space<vmem>>) attributes {dimension_semantics = [#tpu.dimension_semantics<parallel>, #tpu.dimension_semantics<parallel>, #tpu.dimension_semantics<arbitrary>], iteration_bounds = array<i64: 1, 1, 7>, scalar_prefetch = 0 : i64, scratch_operands = 1 : i64, tpu.core_type = #tpu.core_type<tc>, window_params = [{transform_indices = @transform_0, window_bounds = array<i64: 256, 512>}, {transform_indices = @transform_1, window_bounds = array<i64: 512, 128>}, {transform_indices = @transform_2, window_bounds = array<i64: 1, 128>}, {transform_indices = @transform_3, window_bounds = array<i64: 256, 128>}, {transform_indices = @transform_4, window_bounds = array<i64: 256, 128>}]} {
    %c0_i32 = arith.constant 0 : i32
    %0 = arith.cmpi eq, %arg2, %c0_i32 : i32
    %1 = arith.extui %0 : i1 to i32
    %c0_i32_0 = arith.constant 0 : i32
    %2 = arith.cmpi ne, %1, %c0_i32_0 : i32
    scf.if %2 {
      %cst_9 = arith.constant 0.000000e+00 : f32
      %12 = vector.broadcast %cst_9 : f32 to vector<256x128xf32>
      %c0_10 = arith.constant 0 : index
      %c0_11 = arith.constant 0 : index
      %13 = vector.load %arg8[%c0_10, %c0_11] : memref<256x128xf32, #tpu.memory_space<vmem>>, vector<256x128xf32>
      tpu.vector_store %arg8[%c0_10, %c0_11], %12 {strides = array<i32>} : memref<256x128xf32, #tpu.memory_space<vmem>>, vector<256x128xf32>,
    } else {
    }
    %c0 = arith.constant 0 : index
    %c0_1 = arith.constant 0 : index
    %3 = vector.load %arg8[%c0, %c0_1] : memref<256x128xf32, #tpu.memory_space<vmem>>, vector<256x128xf32>
    %c0_2 = arith.constant 0 : index
    %c0_3 = arith.constant 0 : index
    %4 = vector.load %arg3[%c0_2, %c0_3] : memref<256x512xbf16, #tpu.memory_space<vmem>>, vector<256x512xbf16>
    %c0_4 = arith.constant 0 : index
    %c0_5 = arith.constant 0 : index
    %5 = vector.load %arg4[%c0_4, %c0_5] : memref<512x128xbf16, #tpu.memory_space<vmem>>, vector<512x128xbf16>
    %cst = arith.constant dense<0.000000e+00> : vector<256x128xf32>
    %6 = tpu.matmul %4, %5, %cst {dimension_numbers = #tpu.dot_dimension_numbers<[1], [0], [0], [1], [0, 0, 1, 1], [], []>} : vector<256x512xbf16>, vector<512x128xbf16>, vector<256x128xf32> -> vector<256x128xf32>
    %7 = arith.addf %3, %6 : vector<256x128xf32>
    %c0_6 = arith.constant 0 : index
    %c0_7 = arith.constant 0 : index
    %8 = vector.load %arg8[%c0_6, %c0_7] : memref<256x128xf32, #tpu.memory_space<vmem>>, vector<256x128xf32>
    tpu.vector_store %arg8[%c0_6, %c0_7], %7 {strides = array<i32>} : memref<256x128xf32, #tpu.memory_space<vmem>>, vector<256x128xf32>,
    %c6_i32 = arith.constant 6 : i32
    %9 = arith.cmpi eq, %arg2, %c6_i32 : i32
    %10 = arith.extui %9 : i1 to i32
    %c0_i32_8 = arith.constant 0 : i32
    %11 = arith.cmpi ne, %10, %c0_i32_8 : i32
    scf.if %11 {
      %c0_9 = arith.constant 0 : index
      %c0_10 = arith.constant 0 : index
      %12 = vector.load %arg8[%c0_9, %c0_10] : memref<256x128xf32, #tpu.memory_space<vmem>>, vector<256x128xf32>
      %c0_11 = arith.constant 0 : index
      %c0_12 = arith.constant 0 : index
      %13 = vector.load %arg5[%c0_11, %c0_12] : memref<1x128xf32, #tpu.memory_space<vmem>>, vector<1x128xf32>
      %14 = vector.broadcast %13 : vector<1x128xf32> to vector<256x128xf32>
      %15 = arith.addf %12, %14 : vector<256x128xf32>
      %16 = math.tanh %15 : vector<256x128xf32>
      %c0_13 = arith.constant 0 : index
      %c0_14 = arith.constant 0 : index
      %17 = vector.load %arg6[%c0_13, %c0_14] : memref<256x128xf32, #tpu.memory_space<vmem>>, vector<256x128xf32>
      %18 = arith.addf %16, %17 : vector<256x128xf32>
      %c0_15 = arith.constant 0 : index
      %c0_16 = arith.constant 0 : index
      %19 = vector.load %arg7[%c0_15, %c0_16] : memref<256x128xf32, #tpu.memory_space<vmem>>, vector<256x128xf32>
      tpu.vector_store %arg7[%c0_15, %c0_16], %18 {strides = array<i32>} : memref<256x128xf32, #tpu.memory_space<vmem>>, vector<256x128xf32>,
    } else {
    }
    return
  }
  func.func @transform_0(%arg0: i32, %arg1: i32, %arg2: i32) -> (i32, i32) {
    %c0_i32 = arith.constant 0 : i32
    return %arg0, %arg2 : i32, i32
  }
  func.func @transform_1(%arg0: i32, %arg1: i32, %arg2: i32) -> (i32, i32) {
    %c0_i32 = arith.constant 0 : i32
    return %arg2, %arg1 : i32, i32
  }
  func.func @transform_2(%arg0: i32, %arg1: i32, %arg2: i32) -> (i32, i32) {
    %c0_i32 = arith.constant 0 : i32
    %c0_i32_0 = arith.constant 0 : i32
    return %c0_i32, %arg1 : i32, i32
  }
  func.func @transform_3(%arg0: i32, %arg1: i32, %arg2: i32) -> (i32, i32) {
    %c0_i32 = arith.constant 0 : i32
    return %arg0, %arg1 : i32, i32
  }
  func.func @transform_4(%arg0: i32, %arg1: i32, %arg2: i32) -> (i32, i32) {
    %c0_i32 = arith.constant 0 : i32
    return %arg0, %arg1 : i32, i32
  }
}

</mosaic_0001>

<bundles_post_ra>
// kernel: net1_forward.41
= control target key start
LH: loop header
LB: loop body
LE: loop exit
PB: predicated region body
PF: predicated region fallthrough
CT: control target
= control target key end

     0   :  { %s1276_s1 = inlined_call_operand.vmem [shape: bf16[256,128], index: 1, kind: input, shape index: {}]   ;;  %s1277_s0 = inlined_call_operand.vmem [shape: bf16[256,256], index: 0, kind: input, shape index: {}]   ;;  %s1278_s2 = inlined_call_operand.vmem [shape: f32[1,128], index: 2, kind: input, shape index: {}]   ;;  %s1279_s3 = inlined_call_operand.vmem [shape: f32[256,128], index: 3, kind: output, shape index: {}]  }
   0x1   :  { %v915_v0 = vld [vmem:[%s1276_s1 + $0x40] sm:$0xff]   ;;  %v917_v2 = vld [vmem:[%s1276_s1 + $0x48] sm:$0xff]   ;;  %v919_v4 = vld [vmem:[%s1276_s1 + $0x50] sm:$0xff]  }
   0x2   :  { %v916_v1 = vld [vmem:[%s1276_s1] sm:$0xff]   ;;  %787 = vmatprep.subr.bf16.mxu0 %v915_v0  ;;  %899 = vmatprep.subr.bf16.mxu1 %v915_v0  ;;  %v918_v3 = vld [vmem:[%s1276_s1 + $0x8] sm:$0xff]   ;;  %v920_v5 = vld [vmem:[%s1276_s1 + $0x10] sm:$0xff]  }
   0x3   :  { %788 = vmatpush3.bf16.msra.mxu0 %v916_v1  ;;  %907 = vmatpush3.bf16.msra.mxu1 %v916_v1  ;;  %v921_v6 = vld [vmem:[%s1276_s1 + $0x58] sm:$0xff]   ;;  %v923_v8 = vld [vmem:[%s1276_s1 + $0x60] sm:$0xff]   ;;  %v925_v10 = vld [vmem:[%s1276_s1 + $0x68] sm:$0xff]  }
   0x4   :  { %789 = vmatprep.subr.bf16.mxu0 %v917_v2  ;;  %900 = vmatprep.subr.bf16.mxu1 %v917_v2  ;;  %v922_v7 = vld [vmem:[%s1276_s1 + $0x18] sm:$0xff]   ;;  %v924_v9 = vld [vmem:[%s1276_s1 + $0x20] sm:$0xff]   ;;  %v926_v13 = vld [vmem:[%s1276_s1 + $0x28] sm:$0xff]  }
   0x5   :  { %v933_v11 = vld [vmem:[%s1277_s0 + $0x4] ss:$8 sps:$4 sm:$0xff]   ;;  %v927_v14 = vld [vmem:[%s1276_s1 + $0x70] sm:$0xff]   ;;  %v929_v16 = vld [vmem:[%s1276_s1 + $0x78] sm:$0xff]  }
   0x6   :  { %v936_v12 = vld [vmem:[%s1277_s0 + $0x84] ss:$8 sps:$4 sm:$0xff]   ;;  %435 = vmatprep.mubr.bf16.mxu0 %v933_v11  ;;  %v928_v15 = vld [vmem:[%s1276_s1 + $0x30] sm:$0xff]   ;;  %v930_v17 = vld [vmem:[%s1276_s1 + $0x38] sm:$0xff]  }
   0x7   :  { %790 = vmatpush3.bf16.msra.mxu0 %v918_v3  ;;  %908 = vmatpush3.bf16.msra.mxu1 %v918_v3  ;;  %v931_v18 = vld [vmem:[%s1277_s0] ss:$8 sps:$4 sm:$0xff]   ;;  %v937_v20 = vld [vmem:[%s1277_s0 + $0x14] ss:$8 sps:$4 sm:$0xff]   ;;  %v941_v22 = vld [vmem:[%s1277_s0 + $0x10] ss:$8 sps:$4 sm:$0xff]  }
   0x8   :  { %791 = vmatprep.subr.bf16.mxu0 %v919_v4  ;;  %901 = vmatprep.subr.bf16.mxu1 %v919_v4  ;;  %v934_v19 = vld [vmem:[%s1277_s0 + $0x80] ss:$8 sps:$4 sm:$0xff]   ;;  %v939_v21 = vld [vmem:[%s1277_s0 + $0x94] ss:$8 sps:$4 sm:$0xff]   ;;  %v942_v23 = vld [vmem:[%s1277_s0 + $0x90] ss:$8 sps:$4 sm:$0xff]  }
   0x9   :  { %499 = vmatprep.mubr.bf16.mxu1 %v936_v12  ;;  %v943_v24 = vld [vmem:[%s1277_s0 + $0x24] ss:$8 sps:$4 sm:$0xff]   ;;  %v947_v26 = vld [vmem:[%s1277_s0 + $0x20] ss:$8 sps:$4 sm:$0xff]   ;;  %v949_v28 = vld [vmem:[%s1277_s0 + $0x34] ss:$8 sps:$4 sm:$0xff]  }
   0xa   :  { %v945_v25 = vld [vmem:[%s1277_s0 + $0xa4] ss:$8 sps:$4 sm:$0xff]   ;;  %v948_v27 = vld [vmem:[%s1277_s0 + $0xa0] ss:$8 sps:$4 sm:$0xff]   ;;  %v951_v29 = vld [vmem:[%s1277_s0 + $0xb4] ss:$8 sps:$4 sm:$0xff]  }
   0xb   :  { %792 = vmatpush3.bf16.msra.mxu0 %v920_v5  ;;  %909 = vmatpush3.bf16.msra.mxu1 %v920_v5  ;;  %v953_v30 = vld [vmem:[%s1277_s0 + $0x30] ss:$8 sps:$4 sm:$0xff]   ;;  %v955_v32 = vld [vmem:[%s1277_s0 + $0x44] ss:$8 sps:$4 sm:$0xff]   ;;  %v959_v34 = vld [vmem:[%s1277_s0 + $0x40] ss:$8 sps:$4 sm:$0xff]  }
   0xc   :  { %793 = vmatprep.subr.bf16.mxu0 %v921_v6  ;;  %902 = vmatprep.subr.bf16.mxu1 %v921_v6  ;;  %v954_v31 = vld [vmem:[%s1277_s0 + $0xb0] ss:$8 sps:$4 sm:$0xff]   ;;  %v957_v33 = vld [vmem:[%s1277_s0 + $0xc4] ss:$8 sps:$4 sm:$0xff]   ;;  %v960_v35 = vld [vmem:[%s1277_s0 + $0xc0] ss:$8 sps:$4 sm:$0xff]  }
   0xd   :  { %v961_v36 = vld [vmem:[%s1277_s0 + $0x54] ss:$8 sps:$4 sm:$0xff]   ;;  %v965_v38 = vld [vmem:[%s1277_s0 + $0x50] ss:$8 sps:$4 sm:$0xff]   ;;  %v967_v40 = vld [vmem:[%s1277_s0 + $0x64] ss:$8 sps:$4 sm:$0xff]  }
   0xe   :  { %v963_v37 = vld [vmem:[%s1277_s0 + $0xd4] ss:$8 sps:$4 sm:$0xff]   ;;  %v966_v39 = vld [vmem:[%s1277_s0 + $0xd0] ss:$8 sps:$4 sm:$0xff]   ;;  %v969_v41 = vld [vmem:[%s1277_s0 + $0xe4] ss:$8 sps:$4 sm:$0xff]  }
   0xf   :  { %794 = vmatpush3.bf16.msra.mxu0 %v922_v7  ;;  %910 = vmatpush3.bf16.msra.mxu1 %v922_v7  ;;  %v971_v42 = vld [vmem:[%s1277_s0 + $0x60] ss:$8 sps:$4 sm:$0xff]   ;;  %v973_v44 = vld [vmem:[%s1277_s0 + $0x74] ss:$8 sps:$4 sm:$0xff]   ;;  %v977_v46 = vld [vmem:[%s1277_s0 + $0x70] ss:$8 sps:$4 sm:$0xff]  }
  0x10   :  { %795 = vmatprep.subr.bf16.mxu0 %v923_v8  ;;  %903 = vmatprep.subr.bf16.mxu1 %v923_v8  ;;  %v972_v43 = vld [vmem:[%s1277_s0 + $0xe0] ss:$8 sps:$4 sm:$0xff]   ;;  %v975_v45 = vld [vmem:[%s1277_s0 + $0xf4] ss:$8 sps:$4 sm:$0xff]   ;;  %v978_v47 = vld [vmem:[%s1277_s0 + $0xf0] ss:$8 sps:$4 sm:$0xff]  }
  0x11   :  { %v1146_v51 = vld [vmem:[%s1278_s2] ss:$0 sm:$0xff] }
  0x13   :  { %796 = vmatpush3.bf16.msra.mxu0 %v924_v9  ;;  %911 = vmatpush3.bf16.msra.mxu1 %v924_v9 }
  0x14   :  { %797 = vmatprep.subr.bf16.mxu0 %v925_v10  ;;  %904 = vmatprep.subr.bf16.mxu1 %v925_v10 }
  0x17   :  { %798 = vmatpush3.bf16.msra.mxu0 %v926_v13  ;;  %912 = vmatpush3.bf16.msra.mxu1 %v926_v13 }
  0x18   :  { %799 = vmatprep.subr.bf16.mxu0 %v927_v14  ;;  %905 = vmatprep.subr.bf16.mxu1 %v927_v14 }
  0x1b   :  { %800 = vmatpush3.bf16.msra.mxu0 %v928_v15  ;;  %913 = vmatpush3.bf16.msra.mxu1 %v928_v15 }
  0x1c   :  { %801 = vmatprep.subr.bf16.mxu0 %v929_v16  ;;  %906 = vmatprep.subr.bf16.mxu1 %v929_v16 }
  0x1f   :  { %802 = vmatpush3.bf16.msra.mxu0 %v930_v17  ;;  %914 = vmatpush3.bf16.msra.mxu1 %v930_v17 }
  0x22   :  { %436 = vmatmul.mubr.bf16.vlgmr.msra.gmra.mrb[0].mxu0 %v931_v18  ;;  %500 = vmatmul.mubr.bf16.vlgmr.msra.gmra.mrb[0].mxu1 %v934_v19 }
  0x23   :  { %443 = vmatprep.mubr.bf16.mxu0 %v937_v20  ;;  %507 = vmatprep.mubr.bf16.mxu1 %v939_v21 }
  0x2a   :  { %444 = vmatmul.mubr.bf16.gmra.mrb[4].mxu0 %v941_v22  ;;  %508 = vmatmul.mubr.bf16.gmra.mrb[4].mxu1 %v942_v23 }
  0x2b   :  { %451 = vmatprep.mubr.bf16.mxu0 %v943_v24  ;;  %515 = vmatprep.mubr.bf16.mxu1 %v945_v25 }
  0x32   :  { %452 = vmatmul.mubr.bf16.gmra.mrb[8].mxu0 %v947_v26  ;;  %516 = vmatmul.mubr.bf16.gmra.mrb[8].mxu1 %v948_v27 }
  0x33   :  { %459 = vmatprep.mubr.bf16.mxu0 %v949_v28  ;;  %523 = vmatprep.mubr.bf16.mxu1 %v951_v29 }
  0x3a   :  { %460 = vmatmul.mubr.bf16.gmra.mrb[12].mxu0 %v953_v30  ;;  %524 = vmatmul.mubr.bf16.gmra.mrb[12].mxu1 %v954_v31 }
  0x3b   :  { %467 = vmatprep.mubr.bf16.mxu0 %v955_v32  ;;  %531 = vmatprep.mubr.bf16.mxu1 %v957_v33 }
  0x42   :  { %468 = vmatmul.mubr.bf16.gmra.mrb[16].mxu0 %v959_v34  ;;  %532 = vmatmul.mubr.bf16.gmra.mrb[16].mxu1 %v960_v35 }
  0x43   :  { %475 = vmatprep.mubr.bf16.mxu0 %v961_v36  ;;  %539 = vmatprep.mubr.bf16.mxu1 %v963_v37 }
  0x4a   :  { %476 = vmatmul.mubr.bf16.gmra.mrb[20].mxu0 %v965_v38  ;;  %540 = vmatmul.mubr.bf16.gmra.mrb[20].mxu1 %v966_v39 }
  0x4b   :  { %483 = vmatprep.mubr.bf16.mxu0 %v967_v40  ;;  %547 = vmatprep.mubr.bf16.mxu1 %v969_v41 }
  0x52   :  { %484 = vmatmul.mubr.bf16.gmra.mrb[24].mxu0 %v971_v42  ;;  %548 = vmatmul.mubr.bf16.gmra.mrb[24].mxu1 %v972_v43 }
  0x53   :  { %491 = vmatprep.mubr.bf16.mxu0 %v973_v44  ;;  %555 = vmatprep.mubr.bf16.mxu1 %v975_v45 }
  0x5a   :  { %492 = vmatmul.mubr.bf16.gmra.mrb[28].mxu0 %v977_v46  ;;  %556 = vmatmul.mubr.bf16.gmra.mrb[28].mxu1 %v978_v47 }
  0xf5   :  { %v803_v48 = vpop.f32.mrb[0].mxu0  ;;  %v851_v49 = vpop.f32.mrb[0].mxu1 }
  0xf6   :  { %v804_v50 = vpop.f32.mrb[1].mxu0  ;;  %v852_v52 = vpop.f32.mrb[1].mxu1 }
  0xf7   :  { %v805_v53 = vadd.f32 %v804_v50, %v803_v48  ;;  %v853_v54 = vadd.f32 %v852_v52, %v851_v49  ;;  %v806_v55 = vpop.f32.mrb[2].mxu0  ;;  %v854_v56 = vpop.f32.mrb[2].mxu1 }
  0xf8   :  { %v807_v57 = vpop.f32.mrb[3].mxu0  ;;  %v855_v58 = vpop.f32.mrb[3].mxu1 }
  0xf9   :  { %v670_v59 = vadd.f32 %v805_v53, %v1146_v51  ;;  %v686_v60 = vadd.f32 %v853_v54, %v1146_v51  ;;  %v808_v61 = vadd.f32 %v807_v57, %v806_v55  ;;  %v856_v62 = vadd.f32 %v855_v58, %v854_v56 }
  0xfb   :  { %702 = vst [vmem:[%s1279_s3] sm:$0xff] %v670_v59  ;;  %718 = vst [vmem:[%s1279_s3 + $0x80] sm:$0xff] %v686_v60  ;;  %v671_v63 = vadd.f32 %v808_v61, %v1146_v51  ;;  %v687_v0 = vadd.f32 %v856_v62, %v1146_v51 }
  0xfd   :  { %703 = vst [vmem:[%s1279_s3 + $0x8] sm:$0xff] %v671_v63  ;;  %719 = vst [vmem:[%s1279_s3 + $0x88] sm:$0xff] %v687_v0  ;;  %v809_v1 = vpop.f32.mrb[4].mxu0  ;;  %v857_v2 = vpop.f32.mrb[4].mxu1 }
  0xfe   :  { %v810_v3 = vpop.f32.mrb[5].mxu0  ;;  %v858_v4 = vpop.f32.mrb[5].mxu1 }
  0xff   :  { %v811_v5 = vadd.f32 %v810_v3, %v809_v1  ;;  %v859_v6 = vadd.f32 %v858_v4, %v857_v2  ;;  %v812_v7 = vpop.f32.mrb[6].mxu0  ;;  %v860_v8 = vpop.f32.mrb[6].mxu1 }
 0x100   :  { %v813_v9 = vpop.f32.mrb[7].mxu0  ;;  %v861_v10 = vpop.f32.mrb[7].mxu1 }
 0x101   :  { %v672_v11 = vadd.f32 %v811_v5, %v1146_v51  ;;  %v688_v12 = vadd.f32 %v859_v6, %v1146_v51  ;;  %v814_v13 = vadd.f32 %v813_v9, %v812_v7  ;;  %v862_v14 = vadd.f32 %v861_v10, %v860_v8 }
 0x103   :  { %704 = vst [vmem:[%s1279_s3 + $0x10] sm:$0xff] %v672_v11  ;;  %720 = vst [vmem:[%s1279_s3 + $0x90] sm:$0xff] %v688_v12  ;;  %v673_v15 = vadd.f32 %v814_v13, %v1146_v51  ;;  %v689_v16 = vadd.f32 %v862_v14, %v1146_v51 }
 0x105   :  { %705 = vst [vmem:[%s1279_s3 + $0x18] sm:$0xff] %v673_v15  ;;  %721 = vst [vmem:[%s1279_s3 + $0x98] sm:$0xff] %v689_v16  ;;  %v815_v17 = vpop.f32.mrb[8].mxu0  ;;  %v863_v18 = vpop.f32.mrb[8].mxu1 }
 0x106   :  { %v816_v19 = vpop.f32.mrb[9].mxu0  ;;  %v864_v20 = vpop.f32.mrb[9].mxu1 }
 0x107   :  { %v817_v21 = vadd.f32 %v816_v19, %v815_v17  ;;  %v865_v22 = vadd.f32 %v864_v20, %v863_v18  ;;  %v818_v23 = vpop.f32.mrb[10].mxu0  ;;  %v866_v24 = vpop.f32.mrb[10].mxu1 }
 0x108   :  { %v819_v25 = vpop.f32.mrb[11].mxu0  ;;  %v867_v26 = vpop.f32.mrb[11].mxu1 }
 0x109   :  { %v674_v27 = vadd.f32 %v817_v21, %v1146_v51  ;;  %v690_v28 = vadd.f32 %v865_v22, %v1146_v51  ;;  %v820_v29 = vadd.f32 %v819_v25, %v818_v23  ;;  %v868_v30 = vadd.f32 %v867_v26, %v866_v24 }
 0x10b   :  { %706 = vst [vmem:[%s1279_s3 + $0x20] sm:$0xff] %v674_v27  ;;  %722 = vst [vmem:[%s1279_s3 + $0xa0] sm:$0xff] %v690_v28  ;;  %v675_v31 = vadd.f32 %v820_v29, %v1146_v51  ;;  %v691_v32 = vadd.f32 %v868_v30, %v1146_v51 }
 0x10d   :  { %707 = vst [vmem:[%s1279_s3 + $0x28] sm:$0xff] %v675_v31  ;;  %723 = vst [vmem:[%s1279_s3 + $0xa8] sm:$0xff] %v691_v32  ;;  %v821_v33 = vpop.f32.mrb[12].mxu0  ;;  %v869_v34 = vpop.f32.mrb[12].mxu1 }
 0x10e   :  { %v822_v35 = vpop.f32.mrb[13].mxu0  ;;  %v870_v36 = vpop.f32.mrb[13].mxu1 }
 0x10f   :  { %v823_v37 = vadd.f32 %v822_v35, %v821_v33  ;;  %v871_v38 = vadd.f32 %v870_v36, %v869_v34  ;;  %v824_v39 = vpop.f32.mrb[14].mxu0  ;;  %v872_v40 = vpop.f32.mrb[14].mxu1 }
 0x110   :  { %v825_v41 = vpop.f32.mrb[15].mxu0  ;;  %v873_v42 = vpop.f32.mrb[15].mxu1 }
 0x111   :  { %v676_v43 = vadd.f32 %v823_v37, %v1146_v51  ;;  %v692_v44 = vadd.f32 %v871_v38, %v1146_v51  ;;  %v826_v45 = vadd.f32 %v825_v41, %v824_v39  ;;  %v874_v46 = vadd.f32 %v873_v42, %v872_v40 }
 0x113   :  { %708 = vst [vmem:[%s1279_s3 + $0x30] sm:$0xff] %v676_v43  ;;  %724 = vst [vmem:[%s1279_s3 + $0xb0] sm:$0xff] %v692_v44  ;;  %v677_v47 = vadd.f32 %v826_v45, %v1146_v51  ;;  %v693_v48 = vadd.f32 %v874_v46, %v1146_v51 }
 0x115   :  { %709 = vst [vmem:[%s1279_s3 + $0x38] sm:$0xff] %v677_v47  ;;  %725 = vst [vmem:[%s1279_s3 + $0xb8] sm:$0xff] %v693_v48  ;;  %v827_v49 = vpop.f32.mrb[16].mxu0  ;;  %v875_v50 = vpop.f32.mrb[16].mxu1 }
 0x116   :  { %v828_v52 = vpop.f32.mrb[17].mxu0  ;;  %v876_v53 = vpop.f32.mrb[17].mxu1 }
 0x117   :  { %v829_v54 = vadd.f32 %v828_v52, %v827_v49  ;;  %v877_v55 = vadd.f32 %v876_v53, %v875_v50  ;;  %v830_v56 = vpop.f32.mrb[18].mxu0  ;;  %v878_v57 = vpop.f32.mrb[18].mxu1 }
 0x118   :  { %v831_v58 = vpop.f32.mrb[19].mxu0  ;;  %v879_v59 = vpop.f32.mrb[19].mxu1 }
 0x119   :  { %v678_v60 = vadd.f32 %v829_v54, %v1146_v51  ;;  %v694_v61 = vadd.f32 %v877_v55, %v1146_v51  ;;  %v832_v62 = vadd.f32 %v831_v58, %v830_v56  ;;  %v880_v63 = vadd.f32 %v879_v59, %v878_v57 }
 0x11b   :  { %710 = vst [vmem:[%s1279_s3 + $0x40] sm:$0xff] %v678_v60  ;;  %726 = vst [vmem:[%s1279_s3 + $0xc0] sm:$0xff] %v694_v61  ;;  %v679_v0 = vadd.f32 %v832_v62, %v1146_v51  ;;  %v695_v1 = vadd.f32 %v880_v63, %v1146_v51 }
 0x11d   :  { %711 = vst [vmem:[%s1279_s3 + $0x48] sm:$0xff] %v679_v0  ;;  %727 = vst [vmem:[%s1279_s3 + $0xc8] sm:$0xff] %v695_v1  ;;  %v833_v2 = vpop.f32.mrb[20].mxu0  ;;  %v881_v3 = vpop.f32.mrb[20].mxu1 }
 0x11e   :  { %v834_v4 = vpop.f32.mrb[21].mxu0  ;;  %v882_v5 = vpop.f32.mrb[21].mxu1 }
 0x11f   :  { %v835_v6 = vadd.f32 %v834_v4, %v833_v2  ;;  %v883_v7 = vadd.f32 %v882_v5, %v881_v3  ;;  %v836_v8 = vpop.f32.mrb[22].mxu0  ;;  %v884_v9 = vpop.f32.mrb[22].mxu1 }
 0x120   :  { %v837_v10 = vpop.f32.mrb[23].mxu0  ;;  %v885_v11 = vpop.f32.mrb[23].mxu1 }
 0x121   :  { %v680_v12 = vadd.f32 %v835_v6, %v1146_v51  ;;  %v696_v13 = vadd.f32 %v883_v7, %v1146_v51  ;;  %v838_v14 = vadd.f32 %v837_v10, %v836_v8  ;;  %v886_v15 = vadd.f32 %v885_v11, %v884_v9 }
 0x123   :  { %712 = vst [vmem:[%s1279_s3 + $0x50] sm:$0xff] %v680_v12  ;;  %728 = vst [vmem:[%s1279_s3 + $0xd0] sm:$0xff] %v696_v13  ;;  %v681_v16 = vadd.f32 %v838_v14, %v1146_v51  ;;  %v697_v17 = vadd.f32 %v886_v15, %v1146_v51 }
 0x125   :  { %713 = vst [vmem:[%s1279_s3 + $0x58] sm:$0xff] %v681_v16  ;;  %729 = vst [vmem:[%s1279_s3 + $0xd8] sm:$0xff] %v697_v17  ;;  %v839_v18 = vpop.f32.mrb[24].mxu0  ;;  %v887_v19 = vpop.f32.mrb[24].mxu1 }
 0x126   :  { %v840_v20 = vpop.f32.mrb[25].mxu0  ;;  %v888_v21 = vpop.f32.mrb[25].mxu1 }
 0x127   :  { %v841_v22 = vadd.f32 %v840_v20, %v839_v18  ;;  %v889_v23 = vadd.f32 %v888_v21, %v887_v19  ;;  %v842_v24 = vpop.f32.mrb[26].mxu0  ;;  %v890_v25 = vpop.f32.mrb[26].mxu1 }
 0x128   :  { %v843_v26 = vpop.f32.mrb[27].mxu0  ;;  %v891_v27 = vpop.f32.mrb[27].mxu1 }
 0x129   :  { %v682_v28 = vadd.f32 %v841_v22, %v1146_v51  ;;  %v698_v29 = vadd.f32 %v889_v23, %v1146_v51  ;;  %v844_v30 = vadd.f32 %v843_v26, %v842_v24  ;;  %v892_v31 = vadd.f32 %v891_v27, %v890_v25 }
 0x12b   :  { %714 = vst [vmem:[%s1279_s3 + $0x60] sm:$0xff] %v682_v28  ;;  %730 = vst [vmem:[%s1279_s3 + $0xe0] sm:$0xff] %v698_v29  ;;  %v683_v32 = vadd.f32 %v844_v30, %v1146_v51  ;;  %v699_v33 = vadd.f32 %v892_v31, %v1146_v51 }
 0x12d   :  { %715 = vst [vmem:[%s1279_s3 + $0x68] sm:$0xff] %v683_v32  ;;  %731 = vst [vmem:[%s1279_s3 + $0xe8] sm:$0xff] %v699_v33  ;;  %v845_v34 = vpop.f32.mrb[28].mxu0  ;;  %v893_v35 = vpop.f32.mrb[28].mxu1 }
 0x12e   :  { %v846_v36 = vpop.f32.mrb[29].mxu0  ;;  %v894_v37 = vpop.f32.mrb[29].mxu1 }
 0x12f   :  { %v847_v38 = vadd.f32 %v846_v36, %v845_v34  ;;  %v895_v39 = vadd.f32 %v894_v37, %v893_v35  ;;  %v848_v40 = vpop.f32.mrb[30].mxu0  ;;  %v896_v41 = vpop.f32.mrb[30].mxu1 }
 0x130   :  { %v849_v42 = vpop.f32.mrb[31].mxu0  ;;  %v897_v43 = vpop.f32.mrb[31].mxu1 }
 0x131   :  { %v684_v44 = vadd.f32 %v847_v38, %v1146_v51  ;;  %v700_v45 = vadd.f32 %v895_v39, %v1146_v51  ;;  %v850_v46 = vadd.f32 %v849_v42, %v848_v40  ;;  %v898_v47 = vadd.f32 %v897_v43, %v896_v41 }
 0x133   :  { %716 = vst [vmem:[%s1279_s3 + $0x70] sm:$0xff] %v684_v44  ;;  %732 = vst [vmem:[%s1279_s3 + $0xf0] sm:$0xff] %v700_v45  ;;  %v685_v48 = vadd.f32 %v850_v46, %v1146_v51  ;;  %v701_v49 = vadd.f32 %v898_v47, %v1146_v51 }
 0x135   :  { %717 = vst [vmem:[%s1279_s3 + $0x78] sm:$0xff] %v685_v48  ;;  %733 = vst [vmem:[%s1279_s3 + $0xf8] sm:$0xff] %v701_v49 }

// kernel: net1_forward.42
= control target key start
LH: loop header
LB: loop body
LE: loop exit
PB: predicated region body
PF: predicated region fallthrough
CT: control target
= control target key end

     0   :  { %s969_s12 = smov 0   ;;  %s1207_s0 = inlined_call_operand.vmem [shape: f32[16,4,256], index: 0, kind: input, shape index: {}]   ;;  %s1208_s1 = inlined_call_operand.vmem [shape: f32[16,4,1], index: 1, kind: input, shape index: {}]   ;;  %s1209_s2 = inlined_call_operand.vmem [shape: f32[16,4,1], index: 2, kind: input, shape index: {}]   ;;  %s1210_s3 = inlined_call_operand.vmem [shape: f32[16,4,256], index: 3, kind: output, shape index: {}]  }
   0x1 LB: > { %s868_s13 = sadd.s32 4294967295, %s945_s12   ;;  %p872_p0 = scmp.ge.s32.totalorder %s945_s12, 1  ;;  %s945_s12 = sphi %s969_s12, %s13_s12  }
   0x2   : > { %p161_p1 = scmp.lt.s32.totalorder %s945_s12, 3 }
   0x4   : > { %p162_p2 = pnand %p872_p0, %p161_p1 }
   0x5   : > { %s873_s14 = sshll.u32 (!%p162_p2), %s868_s13, 3  ;;  %v947_v0 = vmov (!%p162_p2), 0   ;;  %vm255_vm0 = vcmask (!%p162_p2), 1043456  }
   0x6   : > { %165 = sbr.rel (%p162_p2) target bundleno = 399 (0x18f), region = 32  ;;  %p198_p3 = scmp.lt.s32.totalorder (!%p162_p2), %s873_s14, 15  ;;  %898 = vset.pattern.permute.xlu1 (!%p162_p2), %v947_v0  ;;  %897 = vset.pattern.permute.xlu0 (!%p162_p2), %v947_v0 }
   0xd   : > { %s1212_s14 = smov (!%p198_p3, %s873_s14), 15 }
   0xe   : > { %s885_s15 = sshll.u32 %s1212_s14, 3  ;;  %s877_s19 = sshll.u32 %s1212_s14, 2 }
   0xf   : > { %s202_s18 = scalar_lea.vmem %s1207_s0, %s885_s15  ;;  %s208_s22 = scalar_lea.vmem %s1208_s1, %s877_s19 }
  0x10   : > { %v985_v1 = vld [vmem:[%s202_s18 + $0x10] sm:$0xff]  ;;  %v987_v2 = vld [vmem:[%s202_s18] sm:$0xff]  ;;  %v989_v3 = vld [vmem:[%s202_s18 + $0x18] sm:$0xff]  ;;  %s1048_s25 = scalar_lea.vmem %s1209_s2, %s877_s19  ;;  %s1185_s28 = scalar_lea.vmem %s1210_s3, %s885_s15 }
  0x11   : > { %v241_v4 = vcombine.high %v985_v1, %v985_v1  ;;  %v266_v5 = vsel %vm255_vm0, %v985_v1, 0.0  ;;  %v239_v6 = vcombine.high %v987_v2, %v987_v2  ;;  %v256_v7 = vsel %vm255_vm0, %v987_v2, 0.0  ;;  %v999_v8 = vld [vmem:[%s202_s18 + $0x8] sm:$0xff]  ;;  %v1009_v13 = vld [vmem:[%s202_s18 + $0x20] sm:$0xff]  ;;  %v1019_v22 = vld [vmem:[%s202_s18 + $0x38] sm:$0xff] }
  0x12   : > { %v1001_v9 = vld [vmem:[%s202_s18 + $0x28] sm:$0xff]  ;;  %v242_v10 = vcombine.high %v989_v3, %v989_v3  ;;  %v271_v11 = vsel %vm255_vm0, %v989_v3, 0.0  ;;  %v240_v12 = vcombine.high %v999_v8, %v999_v8  ;;  %v261_v16 = vsel %vm255_vm0, %v999_v8, 0.0  ;;  %v1021_v23 = vld [vmem:[%s202_s18 + $0x30] sm:$0xff]  ;;  %v547_v41 = vld [vmem:[%s208_s22 + $0x4] sm:$0xf] }
  0x13   : > { %v267_v14 = vsel %vm255_vm0, %v241_v4, 0.0  ;;  %v257_v15 = vsel %vm255_vm0, %v239_v6, 0.0  ;;  %v244_v17 = vcombine.high %v1001_v9, %v1001_v9  ;;  %v243_v24 = vcombine.high %v1009_v13, %v1009_v13  ;;  %v548_v42 = vld [vmem:[%s208_s22 + $0x8] sm:$0xf]  ;;  %v546_v43 = vld [vmem:[%s208_s22] sm:$0xf] }
  0x14   : > { %v268_v18 = vadd.f32 %v267_v14, %v266_v5  ;;  %v258_v19 = vadd.f32 %v257_v15, %v256_v7  ;;  %v272_v20 = vsel %vm255_vm0, %v242_v10, 0.0  ;;  %v262_v21 = vsel %vm255_vm0, %v240_v12, 0.0  ;;  %v549_v44 = vld [vmem:[%s208_s22 + $0xc] sm:$0xf]  ;;  %v659_v45 = vld [vmem:[%s1048_s25 + $0x4] sm:$0xf] }
  0x15   : > { %v273_v25 = vadd.f32 %v272_v20, %v271_v11  ;;  %v263_v26 = vadd.f32 %v262_v21, %v261_v16  ;;  %v281_v27 = vsel %vm255_vm0, %v1001_v9, 0.0  ;;  %v282_v28 = vsel %vm255_vm0, %v244_v17, 0.0  ;;  %v550_v46 = vld [vmem:[%s208_s22 + $0x10] sm:$0xf]  ;;  %v551_v47 = vld [vmem:[%s208_s22 + $0x14] sm:$0xf] }
  0x16   : > { %269 = vadd.xlane.f32.xlu1 %v268_v18  ;;  %259 = vadd.xlane.f32.xlu0 %v258_v19  ;;  %v276_v29 = vsel %vm255_vm0, %v1009_v13, 0.0  ;;  %v277_v30 = vsel %vm255_vm0, %v243_v24, 0.0  ;;  %v246_v31 = vcombine.high %v1019_v22, %v1019_v22  ;;  %v245_v32 = vcombine.high %v1021_v23, %v1021_v23  ;;  %v552_v48 = vld [vmem:[%s208_s22 + $0x18] sm:$0xf]  ;;  %v553_v49 = vld [vmem:[%s208_s22 + $0x1c] sm:$0xf] }
  0x17   : > { %v283_v33 = vadd.f32 %v282_v28, %v281_v27  ;;  %v278_v34 = vadd.f32 %v277_v30, %v276_v29  ;;  %v291_v35 = vsel %vm255_vm0, %v1019_v22, 0.0  ;;  %v286_v37 = vsel %vm255_vm0, %v1021_v23, 0.0  ;;  %v658_v50 = vld [vmem:[%s1048_s25] sm:$0xf]  ;;  %v660_v51 = vld [vmem:[%s1048_s25 + $0x8] sm:$0xf] }
  0x18   : > { %v292_v36 = vsel %vm255_vm0, %v246_v31, 0.0  ;;  %v287_v38 = vsel %vm255_vm0, %v245_v32, 0.0 }
  0x19   : > { %v293_v39 = vadd.f32 %v292_v36, %v291_v35  ;;  %v288_v40 = vadd.f32 %v287_v38, %v286_v37 }
  0x1a   : > { %274 = vadd.xlane.f32.xlu1 %v273_v25  ;;  %264 = vadd.xlane.f32.xlu0 %v263_v26 }
  0x1e   : > { %284 = vadd.xlane.f32.xlu1 %v283_v33  ;;  %279 = vadd.xlane.f32.xlu0 %v278_v34 }
  0x22   : > { %294 = vadd.xlane.f32.xlu1 %v293_v39  ;;  %289 = vadd.xlane.f32.xlu0 %v288_v40 }
  0x33   : > { %560 = vperm.xlu1 %898, %v547_v41  }
  0x37   : > { %564 = vperm.xlu1 %898, %v548_v42  }
  0x38   : > { %556 = vperm.xlu0 %897, %v546_v43  }
  0x3b   : > { %568 = vperm.xlu1 %898, %v549_v44  }
  0x3c   : > { %672 = vperm.xlu0 %897, %v659_v45  }
  0x3f   : > { %572 = vperm.xlu1 %898, %v550_v46  }
  0x43   : > { %576 = vperm.xlu1 %898, %v551_v47  }
  0x47   : > { %580 = vperm.xlu1 %898, %v552_v48  }
  0x4b   : > { %584 = vperm.xlu1 %898, %v553_v49  }
  0x4f   : > { %668 = vperm.xlu1 %898, %v658_v50  }
  0x53   : > { %676 = vperm.xlu1 %898, %v660_v51  }
  0xa3   : > { %v270_v52 = vpop.xlane.xlu1 %269  ;;  %v260_v53 = vpop.xlane.xlu0 %259 }
  0xa4   : > { %v299_v54 = vmul.f32 0.00390625, %v270_v52  ;;  %v297_v55 = vmul.f32 0.00390625, %v260_v53 }
  0xa6   : > { %v319_v56 = vsel %vm255_vm0, %v299_v54, 0.0  ;;  %v305_v57 = vsel %vm255_vm0, %v297_v55, 0.0 }
  0xa7   : > { %v320_v58 = vrot.slane %v319_v56, 4  ;;  %v306_v59 = vrot.slane %v305_v57, 4  ;;  %v275_v60 = vpop.xlane.xlu1 %274  ;;  %v265_v61 = vpop.xlane.xlu0 %264 }
  0xa8   : > { %v300_v62 = vmul.f32 0.00390625, %v275_v60  ;;  %v298_v63 = vmul.f32 0.00390625, %v265_v61 }
  0xa9   : > { %v321_v0 = vadd.f32 %v320_v58, %v319_v56  ;;  %v307_v4 = vadd.f32 %v306_v59, %v305_v57 }
  0xaa   : > { %v326_v5 = vsel %vm255_vm0, %v300_v62, 0.0  ;;  %v312_v6 = vsel %vm255_vm0, %v298_v63, 0.0 }
  0xab   : > { %v322_v7 = vrot.slane %v321_v0, 2  ;;  %v308_v10 = vrot.slane %v307_v4, 2  ;;  %v327_v11 = vrot.slane %v326_v5, 4  ;;  %v313_v12 = vrot.slane %v312_v6, 4  ;;  %v285_v14 = vpop.xlane.xlu1 %284  ;;  %v280_v15 = vpop.xlane.xlu0 %279 }
  0xac   : > { %v302_v16 = vmul.f32 0.00390625, %v285_v14  ;;  %v301_v17 = vmul.f32 0.00390625, %v280_v15 }
  0xad   : > { %v323_v18 = vadd.f32 %v322_v7, %v321_v0  ;;  %v309_v19 = vadd.f32 %v308_v10, %v307_v4  ;;  %v328_v20 = vadd.f32 %v327_v11, %v326_v5  ;;  %v314_v21 = vadd.f32 %v313_v12, %v312_v6 }
  0xae   : > { %v340_v24 = vsel %vm255_vm0, %v302_v16, 0.0  ;;  %v333_v25 = vsel %vm255_vm0, %v301_v17, 0.0 }
  0xaf   : > { %v324_v26 = vrot.slane %v323_v18, 1  ;;  %v310_v27 = vrot.slane %v309_v19, 1  ;;  %v329_v28 = vrot.slane %v328_v20, 2  ;;  %v315_v29 = vrot.slane %v314_v21, 2  ;;  %v295_v30 = vpop.xlane.xlu1 %294  ;;  %v290_v31 = vpop.xlane.xlu0 %289 }
  0xb0   : > { %v341_v32 = vrot.slane %v340_v24, 4  ;;  %v334_v33 = vrot.slane %v333_v25, 4  ;;  %v304_v34 = vmul.f32 0.00390625, %v295_v30  ;;  %v303_v35 = vmul.f32 0.00390625, %v290_v31 }
  0xb1   : > { %v325_v36 = vadd.f32 %v324_v26, %v323_v18  ;;  %v311_v37 = vadd.f32 %v310_v27, %v309_v19  ;;  %v330_v38 = vadd.f32 %v329_v28, %v328_v20  ;;  %v316_v39 = vadd.f32 %v315_v29, %v314_v21 }
  0xb2   : > { %v342_v40 = vadd.f32 %v341_v32, %v340_v24  ;;  %v335_v41 = vadd.f32 %v334_v33, %v333_v25  ;;  %v354_v42 = vsel %vm255_vm0, %v304_v34, 0.0  ;;  %v347_v43 = vsel %vm255_vm0, %v303_v35, 0.0 }
  0xb3   : > { %v364_v44 = vmul.f32 0.25, %v325_v36  ;;  %v362_v45 = vmul.f32 0.25, %v311_v37  ;;  %v331_v46 = vrot.slane %v330_v38, 1  ;;  %v317_v47 = vrot.slane %v316_v39, 1 }
  0xb4   : > { %v343_v48 = vrot.slane %v342_v40, 2  ;;  %v336_v49 = vrot.slane %v335_v41, 2  ;;  %v355_v50 = vrot.slane %v354_v42, 4  ;;  %v348_v51 = vrot.slane %v347_v43, 4 }
  0xb5   : > { %v332_v52 = vadd.f32 %v331_v46, %v330_v38  ;;  %v318_v53 = vadd.f32 %v317_v47, %v316_v39  ;;  %v1062_v54 = vsub.f32 %v987_v2, %v362_v45  ;;  %v1065_v55 = vsub.f32 %v985_v1, %v364_v44 }
  0xb6   : > { %v344_v56 = vadd.f32 %v343_v48, %v342_v40  ;;  %v337_v57 = vadd.f32 %v336_v49, %v335_v41  ;;  %v356_v58 = vadd.f32 %v355_v50, %v354_v42  ;;  %v349_v59 = vadd.f32 %v348_v51, %v347_v43 }
  0xb7   : > { %v365_v60 = vmul.f32 0.25, %v332_v52  ;;  %v363_v61 = vmul.f32 0.25, %v318_v53  ;;  %v378_v62 = vmul.f32 %v1062_v54, %v1062_v54  ;;  %v380_v63 = vmul.f32 %v1065_v55, %v1065_v55 }
  0xb8   : > { %v345_v0 = vrot.slane %v344_v56, 1  ;;  %v338_v4 = vrot.slane %v337_v57, 1  ;;  %v357_v5 = vrot.slane %v356_v58, 2  ;;  %v350_v2 = vrot.slane %v349_v59, 2 }
  0xb9   : > { %v394_v6 = vcombine.high %v378_v62, %v378_v62  ;;  %v396_v7 = vcombine.high %v380_v63, %v380_v63  ;;  %v410_v14 = vsel %vm255_vm0, %v378_v62, 0.0  ;;  %v1074_v16 = vsub.f32 %v999_v8, %v363_v61  ;;  %v662_v62 = vld [vmem:[%s1048_s25 + $0x10] sm:$0xf] }
  0xba   : > { %v346_v1 = vadd.f32 %v345_v0, %v344_v56  ;;  %v339_v10 = vadd.f32 %v338_v4, %v337_v57  ;;  %v358_v11 = vadd.f32 %v357_v5, %v356_v58  ;;  %v351_v12 = vadd.f32 %v350_v2, %v349_v59  ;;  %v664_v0 = vld [vmem:[%s1048_s25 + $0x18] sm:$0xf]  ;;  %v663_v4 = vld [vmem:[%s1048_s25 + $0x14] sm:$0xf]  ;;  %v665_v5 = vld [vmem:[%s1048_s25 + $0x1c] sm:$0xf]  ;;  %v1122_v2 = vpop.permute.xlu1 %560 }
  0xbb   : > { %v411_v15 = vsel %vm255_vm0, %v394_v6, 0.0  ;;  %v1077_v17 = vsub.f32 %v989_v3, %v365_v60  ;;  %v421_v25 = vsel %vm255_vm0, %v396_v7, 0.0  ;;  %v379_v26 = vmul.f32 %v1074_v16, %v1074_v16 }
  0xbc   : > { %v367_v18 = vmul.f32 0.25, %v346_v1  ;;  %v366_v19 = vmul.f32 0.25, %v339_v10  ;;  %v359_v20 = vrot.slane %v358_v11, 1  ;;  %v352_v21 = vrot.slane %v351_v12, 1 }
  0xbd   : > { %v412_v24 = vadd.f32 %v411_v15, %v410_v14  ;;  %v381_v27 = vmul.f32 %v1077_v17, %v1077_v17  ;;  %v420_v30 = vsel %vm255_vm0, %v380_v63, 0.0  ;;  %v395_v31 = vcombine.high %v379_v26, %v379_v26  ;;  %v661_v63 = vld [vmem:[%s1048_s25 + $0xc] sm:$0xf]  ;;  %v1136_v14 = vpop.permute.xlu0 %556 }
  0xbe   : > { %v360_v28 = vadd.f32 %v359_v20, %v358_v11  ;;  %v353_v29 = vadd.f32 %v352_v21, %v351_v12  ;;  %v1085_v8 = vsub.f32 %v1009_v13, %v366_v19  ;;  %v1088_v3 = vsub.f32 %v1001_v9, %v367_v18  ;;  %v1124_v6 = vpop.permute.xlu1 %564 }
  0xbf   : > { %413 = vadd.xlane.f32.xlu0 %v412_v24  ;;  %v397_v32 = vcombine.high %v381_v27, %v381_v27  ;;  %v422_v37 = vadd.f32 %v421_v25, %v420_v30  ;;  %v415_v13 = vsel %vm255_vm0, %v379_v26, 0.0  ;;  %v416_v38 = vsel %vm255_vm0, %v395_v31, 0.0 }
  0xc0   : > { %v369_v33 = vmul.f32 0.25, %v360_v28  ;;  %v368_v34 = vmul.f32 0.25, %v353_v29  ;;  %v382_v35 = vmul.f32 %v1085_v8, %v1085_v8  ;;  %v383_v36 = vmul.f32 %v1088_v3, %v1088_v3 }
  0xc1   : > { %v417_v9 = vadd.f32 %v416_v38, %v415_v13  ;;  %v426_v40 = vsel %vm255_vm0, %v397_v32, 0.0  ;;  %v425_v46 = vsel %vm255_vm0, %v381_v27, 0.0  ;;  %v1140_v18 = vpop.permute.xlu0 %672 }
  0xc2   : > { %v398_v39 = vcombine.high %v382_v35, %v382_v35  ;;  %v399_v41 = vcombine.high %v383_v36, %v383_v36  ;;  %v1099_v42 = vsub.f32 %v1021_v23, %v368_v34  ;;  %v1102_v43 = vsub.f32 %v1019_v22, %v369_v33  ;;  %v1126_v7 = vpop.permute.xlu1 %568 }
  0xc3   : > { %423 = vadd.xlane.f32.xlu0 %v422_v37  ;;  %418 = vadd.xlane.f32.xlu1 %v417_v9  ;;  %v430_v44 = vsel %vm255_vm0, %v382_v35, 0.0  ;;  %v427_v50 = vadd.f32 %v426_v40, %v425_v46  ;;  %v435_v52 = vsel %vm255_vm0, %v383_v36, 0.0 }
  0xc4   : > { %v431_v45 = vsel %vm255_vm0, %v398_v39, 0.0  ;;  %v384_v48 = vmul.f32 %v1099_v42, %v1099_v42  ;;  %v385_v49 = vmul.f32 %v1102_v43, %v1102_v43  ;;  %v436_v22 = vsel %vm255_vm0, %v399_v41, 0.0 }
  0xc5   : > { %v432_v47 = vadd.f32 %v431_v45, %v430_v44  ;;  %v437_v57 = vadd.f32 %v436_v22, %v435_v52 }
  0xc6   : > { %v400_v23 = vcombine.high %v384_v48, %v384_v48  ;;  %v401_v51 = vcombine.high %v385_v49, %v385_v49  ;;  %v440_v53 = vsel %vm255_vm0, %v384_v48, 0.0  ;;  %v445_v60 = vsel %vm255_vm0, %v385_v49, 0.0  ;;  %v1128_v1 = vpop.permute.xlu1 %572 }
  0xc7   : > { %433 = vadd.xlane.f32.xlu0 %v432_v47  ;;  %428 = vadd.xlane.f32.xlu1 %v427_v50  ;;  %v589_v48 = vlaneseq }
  0xc8   : > { %v441_v56 = vsel %vm255_vm0, %v400_v23, 0.0  ;;  %v446_v59 = vsel %vm255_vm0, %v401_v51, 0.0 }
  0xc9   : > { %v442_v58 = vadd.f32 %v441_v56, %v440_v53  ;;  %v447_v61 = vadd.f32 %v446_v59, %v445_v60 }
  0xca   : > { %v1130_v10 = vpop.permute.xlu1 %576 }
  0xcb   : > { %438 = vadd.xlane.f32.xlu1 %v437_v57  ;;  %443 = vadd.xlane.f32.xlu0 %v442_v58  ;;  %v948_v57 = vmov 839922192  }
  0xcc   : > { %v587_v58 = vunpack.c.l.s4 %v948_v57 }
  0xce   : > { %v1132_v11 = vpop.permute.xlu1 %580 }
  0xcf   : > { %448 = vadd.xlane.f32.xlu1 %v447_v61 }
  0xd2   : > { %v1134_v12 = vpop.permute.xlu1 %584 }
  0xd6   : > { %v1138_v15 = vpop.permute.xlu1 %668 }
  0xda   : > { %v1142_v20 = vpop.permute.xlu1 %676 }
  0xe0   : > { %684 = vperm.xlu1 %898, %v662_v62  }
  0xe1   : > { %680 = vperm.xlu0 %897, %v661_v63  }
  0xe4   : > { %692 = vperm.xlu1 %898, %v664_v0  }
  0xe5   : > { %688 = vperm.xlu0 %897, %v663_v4  }
  0xe9   : > { %696 = vperm.xlu0 %897, %v665_v5  }
 0x14c   : > { %v414_v19 = vpop.xlane.xlu0 %413 }
 0x14d   : > { %v450_v21 = vmul.f32 0.00390625, %v414_v19 }
 0x14f   : > { %v458_v24 = vsel %vm255_vm0, %v450_v21, 0.0 }
 0x150   : > { %v459_v25 = vrot.slane %v458_v24, 4  ;;  %v424_v26 = vpop.xlane.xlu0 %423  ;;  %v419_v27 = vpop.xlane.xlu1 %418 }
 0x151   : > { %v452_v28 = vmul.f32 0.00390625, %v424_v26  ;;  %v451_v30 = vmul.f32 0.00390625, %v419_v27 }
 0x152   : > { %v460_v29 = vadd.f32 %v459_v25, %v458_v24 }
 0x153   : > { %v472_v31 = vsel %vm255_vm0, %v452_v28, 0.0  ;;  %v465_v33 = vsel %vm255_vm0, %v451_v30, 0.0 }
 0x154   : > { %v461_v32 = vrot.slane %v460_v29, 2  ;;  %v473_v34 = vrot.slane %v472_v31, 4  ;;  %v434_v35 = vpop.xlane.xlu0 %433  ;;  %v466_v36 = vrot.slane %v465_v33, 4  ;;  %v429_v37 = vpop.xlane.xlu1 %428 }
 0x155   : > { %v454_v13 = vmul.f32 0.00390625, %v434_v35  ;;  %v453_v39 = vmul.f32 0.00390625, %v429_v37 }
 0x156   : > { %v462_v38 = vadd.f32 %v461_v32, %v460_v29  ;;  %v474_v9 = vadd.f32 %v473_v34, %v472_v31  ;;  %v467_v40 = vadd.f32 %v466_v36, %v465_v33 }
 0x157   : > { %v486_v41 = vsel %vm255_vm0, %v454_v13, 0.0  ;;  %v479_v46 = vsel %vm255_vm0, %v453_v39, 0.0 }
 0x158   : > { %v463_v44 = vrot.slane %v462_v38, 1  ;;  %v475_v45 = vrot.slane %v474_v9, 2  ;;  %v487_v47 = vrot.slane %v486_v41, 4  ;;  %v468_v49 = vrot.slane %v467_v40, 2  ;;  %v439_v22 = vpop.xlane.xlu1 %438  ;;  %v444_v23 = vpop.xlane.xlu0 %443 }
 0x159   : > { %v480_v50 = vrot.slane %v479_v46, 4  ;;  %v455_v56 = vmul.f32 0.00390625, %v439_v22  ;;  %v456_v61 = vmul.f32 0.00390625, %v444_v23 }
 0x15a   : > { %v464_v51 = vadd.f32 %v463_v44, %v462_v38  ;;  %v476_v52 = vadd.f32 %v475_v45, %v474_v9  ;;  %v488_v53 = vadd.f32 %v487_v47, %v486_v41  ;;  %v469_v59 = vadd.f32 %v468_v49, %v467_v40 }
 0x15b   : > { %v481_v60 = vadd.f32 %v480_v50, %v479_v46  ;;  %v493_v4 = vsel %vm255_vm0, %v455_v56, 0.0  ;;  %v500_v24 = vsel %vm255_vm0, %v456_v61, 0.0  ;;  %v590_v45 = vshrl.u32 %v589_v48, 7 }
 0x15c   : > { %v514_v62 = vmul.f32 0.25, %v464_v51  ;;  %v477_v63 = vrot.slane %v476_v52, 1  ;;  %v489_v0 = vrot.slane %v488_v53, 2  ;;  %v470_v5 = vrot.slane %v469_v59, 1  ;;  %v449_v25 = vpop.xlane.xlu1 %448 }
 0x15d   : > { %v482_v19 = vrot.slane %v481_v60, 2  ;;  %v494_v21 = vrot.slane %v493_v4, 4  ;;  %v501_v29 = vrot.slane %v500_v24, 4  ;;  %v457_v33 = vmul.f32 0.00390625, %v449_v25 }
 0x15e   : > { %v522_v26 = vadd.f32 1e-05, %v514_v62  ;;  %v478_v27 = vadd.f32 %v477_v63, %v476_v52  ;;  %v490_v28 = vadd.f32 %v489_v0, %v488_v53  ;;  %v471_v30 = vadd.f32 %v470_v5, %v469_v59 }
 0x15f   : > { %v483_v31 = vadd.f32 %v482_v19, %v481_v60  ;;  %v495_v32 = vadd.f32 %v494_v21, %v493_v4  ;;  %v502_v36 = vadd.f32 %v501_v29, %v500_v24  ;;  %v507_v9 = vsel %vm255_vm0, %v457_v33, 0.0 }
 0x160   : > { %907 = vrsqrt.f32 %v522_v26  ;;  %v516_v34 = vmul.f32 0.25, %v478_v27  ;;  %v491_v35 = vrot.slane %v490_v28, 1  ;;  %v515_v37 = vmul.f32 0.25, %v471_v30 }
 0x161   : > { %v484_v13 = vrot.slane %v483_v31, 1  ;;  %v496_v38 = vrot.slane %v495_v32, 2  ;;  %v503_v41 = vrot.slane %v502_v36, 2  ;;  %v508_v44 = vrot.slane %v507_v9, 4 }
 0x162   : > { %v524_v39 = vadd.f32 1e-05, %v516_v34  ;;  %v492_v40 = vadd.f32 %v491_v35, %v490_v28  ;;  %v523_v46 = vadd.f32 1e-05, %v515_v37  ;;  %v588_v51 = vunpack.c.0.s8 %v587_v58 }
 0x163   : > { %v485_v47 = vadd.f32 %v484_v13, %v483_v31  ;;  %v497_v49 = vadd.f32 %v496_v38, %v495_v32  ;;  %v504_v22 = vadd.f32 %v503_v41, %v502_v36  ;;  %v509_v23 = vadd.f32 %v508_v44, %v507_v9  ;;  %v681_v36 = vpop.permute.xlu0 %680  ;;  %v685_v9 = vpop.permute.xlu1 %684 }
 0x164   : > { %909 = vrsqrt.f32 %v524_v39  ;;  %v518_v50 = vmul.f32 0.25, %v492_v40  ;;  %v1152_v48 = vsub.s32 %v588_v51, %v590_v45 }
 0x165   : > { %911 = vrsqrt.f32 %v523_v46  ;;  %v517_v52 = vmul.f32 0.25, %v485_v47  ;;  %v498_v53 = vrot.slane %v497_v49, 1  ;;  %v505_v57 = vrot.slane %v504_v22, 1 }
 0x166   : > { %v526_v56 = vadd.f32 1e-05, %v518_v50  ;;  %v510_v59 = vrot.slane %v509_v23, 2  ;;  %v592_v58 = vrot.slane %v1136_v14, %v1152_v48  ;;  %v704_v27 = vrot.slane %v1138_v15, %v1152_v48 }
 0x167   : > { %v525_v60 = vadd.f32 1e-05, %v517_v52  ;;  %v499_v61 = vadd.f32 %v498_v53, %v497_v49  ;;  %v506_v62 = vadd.f32 %v505_v57, %v504_v22  ;;  %v606_v32 = vrot.slane %v1124_v6, %v1152_v48  ;;  %v689_v47 = vpop.permute.xlu0 %688  ;;  %v693_v22 = vpop.permute.xlu1 %692 }
 0x168   : > { %913 = vrsqrt.f32 %v526_v56  ;;  %v511_v63 = vadd.f32 %v510_v59, %v509_v23  ;;  %v718_v15 = vrot.slane %v1142_v20, %v1152_v48  ;;  %v711_v38 = vrot.slane %v1140_v18, %v1152_v48 }
 0x169   : > { %915 = vrsqrt.f32 %v525_v60  ;;  %v519_v0 = vmul.f32 0.25, %v499_v61  ;;  %v520_v5 = vmul.f32 0.25, %v506_v62  ;;  %v613_v40 = vrot.slane %v1126_v7, %v1152_v48 }
 0x16a   : > { %v908_v4 = vpop.eup %907  ;;  %v512_v19 = vrot.slane %v511_v63, 1  ;;  %v732_v18 = vrot.slane %v685_v9, %v1152_v48  ;;  %v725_v46 = vrot.slane %v681_v36, %v1152_v48  ;;  %v746_v56 = vrot.slane %v693_v22, %v1152_v48 }
 0x16b   : > { %v538_v21 = vmul.f32 %v908_v4, %v1062_v54  ;;  %v527_v24 = vadd.f32 1e-05, %v519_v0  ;;  %v528_v25 = vadd.f32 1e-05, %v520_v5  ;;  %v599_v54 = vrot.slane %v1122_v2, %v1152_v48  ;;  %v697_v60 = vpop.permute.xlu0 %696 }
 0x16c   : > { %v513_v26 = vadd.f32 %v512_v19, %v511_v63  ;;  %v620_v2 = vrot.slane %v1128_v1, %v1152_v48  ;;  %v753_v0 = vrot.slane %v697_v60, %v1152_v48 }
 0x16d   : > { %v650_v28 = vmul.f32 %v592_v58, %v538_v21  ;;  %917 = vrsqrt.f32 %v527_v24 }
 0x16e   : > { %v910_v29 = vpop.eup %909  ;;  %919 = vrsqrt.f32 %v528_v25  ;;  %v521_v30 = vmul.f32 0.25, %v513_v26 }
 0x16f   : > { %v912_v31 = vpop.eup %911  ;;  %v762_v33 = vadd.f32 %v704_v27, %v650_v28  ;;  %v540_v14 = vmul.f32 %v910_v29, %v1065_v55 }
 0x170   : > { %v539_v34 = vmul.f32 %v912_v31, %v1074_v16  ;;  %v529_v35 = vadd.f32 1e-05, %v521_v30 }
 0x171   : > { %921 = vtanh.f32 %v762_v33  ;;  %v652_v37 = vmul.f32 %v606_v32, %v540_v14 }
 0x172   : > { %v914_v13 = vpop.eup %913  ;;  %v651_v6 = vmul.f32 %v599_v54, %v539_v34  ;;  %923 = vrsqrt.f32 %v529_v35 }
 0x173   : > { %v916_v55 = vpop.eup %915  ;;  %v764_v39 = vadd.f32 %v718_v15, %v652_v37  ;;  %v542_v16 = vmul.f32 %v914_v13, %v1085_v8  ;;  %v627_v8 = vrot.slane %v1130_v10, %v1152_v48  ;;  %v739_v10 = vrot.slane %v689_v47, %v1152_v48 }
 0x174   : > { %v763_v20 = vadd.f32 %v711_v38, %v651_v6  ;;  %v541_v41 = vmul.f32 %v916_v55, %v1077_v17  ;;  %v634_v17 = vrot.slane %v1132_v11, %v1152_v48  ;;  %v641_v11 = vrot.slane %v1134_v12, %v1152_v48 }
 0x175   : > { %925 = vtanh.f32 %v764_v39  ;;  %v654_v44 = vmul.f32 %v620_v2, %v542_v16 }
 0x176   : > { %927 = vtanh.f32 %v763_v20  ;;  %v653_v45 = vmul.f32 %v613_v40, %v541_v41 }
 0x177   : > { %v918_v1 = vpop.eup %917  ;;  %v766_v49 = vadd.f32 %v732_v18, %v654_v44 }
 0x178   : > { %v920_v50 = vpop.eup %919  ;;  %v765_v7 = vadd.f32 %v725_v46, %v653_v45  ;;  %v543_v23 = vmul.f32 %v918_v1, %v1088_v3 }
 0x179   : > { %929 = vtanh.f32 %v766_v49  ;;  %v544_v51 = vmul.f32 %v920_v50, %v1099_v42 }
 0x17a   : > { %931 = vtanh.f32 %v765_v7  ;;  %v655_v52 = vmul.f32 %v627_v8, %v543_v23 }
 0x17b   : > { %v922_v53 = vpop.eup %921  ;;  %v656_v3 = vmul.f32 %v634_v17, %v544_v51 }
 0x17c   : > { %v924_v57 = vpop.eup %923  ;;  %778 = vst [vmem:[%s1185_s28] sm:$0xff] %v922_v53  ;;  %v767_v59 = vadd.f32 %v739_v10, %v655_v52 }
 0x17d   : > { %v768_v42 = vadd.f32 %v746_v56, %v656_v3  ;;  %v545_v61 = vmul.f32 %v924_v57, %v1102_v43 }
 0x17e   : > { %933 = vtanh.f32 %v767_v59 }
 0x17f   : > { %v926_v62 = vpop.eup %925  ;;  %935 = vtanh.f32 %v768_v42  ;;  %v657_v63 = vmul.f32 %v641_v11, %v545_v61 }
 0x180   : > { %v928_v4 = vpop.eup %927  ;;  %780 = vst [vmem:[%s1185_s28 + $0x10] sm:$0xff] %v926_v62 }
 0x181   : > { %779 = vst [vmem:[%s1185_s28 + $0x8] sm:$0xff] %v928_v4  ;;  %v769_v5 = vadd.f32 %v753_v0, %v657_v63 }
 0x183   : > { %v930_v19 = vpop.eup %929  ;;  %937 = vtanh.f32 %v769_v5 }
 0x184   : > { %v932_v12 = vpop.eup %931  ;;  %782 = vst [vmem:[%s1185_s28 + $0x20] sm:$0xff] %v930_v19 }
 0x185   : > { %781 = vst [vmem:[%s1185_s28 + $0x18] sm:$0xff] %v932_v12 }
 0x188   : > { %v934_v58 = vpop.eup %933 }
 0x189   : > { %v936_v43 = vpop.eup %935  ;;  %783 = vst [vmem:[%s1185_s28 + $0x28] sm:$0xff] %v934_v58 }
 0x18a   : > { %784 = vst [vmem:[%s1185_s28 + $0x30] sm:$0xff] %v936_v43 }
 0x18d   : > { %v938_v21 = vpop.eup %937 }
 0x18e   : > { %785 = vst [vmem:[%s1185_s28 + $0x38] sm:$0xff] %v938_v21 }
 0x18f PF: > { %s13_s12 = sadd.s32 1, %s945_s12  }
 0x190   : > { %p10_p4 = scmp.ge.s32.totalorder %s13_s12, 4  }
 0x192   :  { %12 = sbr.rel (!%p10_p4) target bundleno = 1 (0x1), region = 68 }

// kernel: net1_forward.43
= control target key start
LH: loop header
LB: loop body
LE: loop exit
PB: predicated region body
PF: predicated region fallthrough
CT: control target
= control target key end

     0   :  { %s1273_s12 = smov 0   ;;  %s1275_s13 = smov 0   ;;  %s1437_s0 = inlined_call_operand.vmem [shape: bf16[64,1024], index: 0, kind: input, shape index: {}]   ;;  %s1438_s1 = inlined_call_operand.vmem [shape: bf16[1024,128], index: 1, kind: input, shape index: {}]   ;;  %s1439_s2 = inlined_call_operand.vmem [shape: f32[1,128], index: 2, kind: input, shape index: {}]   ;;  %s1440_s3 = inlined_call_operand.vmem [shape: f32[64,128], index: 3, kind: output, shape index: {}]  }
   0x1   :  { %s1277_s14 = smov 0   ;;  %s1279_s15 = smov 0  }
   0x2   :  { %s1281_s16 = smov 0  }
   0x3 LB: > { %s25_s17 = sadd.s32 1, %s1246_s15  ;;  %p48_p1 = scmp.ne.s32.totalorder %s1238_s13, %s1234_s12  ;;  %s1250_s16 = sphi %s1281_s16, %s13_s16   ;;  %s1246_s15 = sphi %s1279_s15, %s1444_s15   ;;  %s1242_s14 = sphi %s1277_s14, %s1443_s14   ;;  %s1238_s13 = sphi %s1275_s13, %s1442_s13   ;;  %s1234_s12 = sphi %s1273_s12, %s1441_s12  }
   0x4   : > { %p26_p0 = scmp.ge.s32.totalorder %s25_s17, 2  ;;  %p49_p2 = scmp.eq.s32.totalorder %s1250_s16, 0 }
   0x5   : > { %s41_s19 = sadd.s32 1, %s1238_s13  ;;  %p971_p5 = scmp.ge.s32.totalorder %s1250_s16, 2 }
   0x6   : > { %s1446_s17 = smov (%p26_p0, %s25_s17), 0  ;;  %p50_p3 = por %p49_p2, %p48_p1 }
   0x7   : > { %s37_s18 = ssub.s32 %s1246_s15, %s1446_s17  ;;  %162 = sbr.rel (%p971_p5) target bundleno = 26 (0x1a), region = 20 }
   0x8   : > { %p39_p4 = scmp.eq.s32.totalorder %s37_s18, 0 }
   0xa   : > { %s1308_s20 = scalar_select %p39_p4, %s1238_s13, %s41_s19  }
   0xe   : > { %165 = sbr.rel (!%p50_p3) target bundleno = 26 (0x1a), region = 24  ;;  %s167_s21 = sand.u32 (%p50_p3), 1, %s1238_s13  }
   0xf   : > { %s1034_s22 = sshll.u32 (%p50_p3), %s1246_s15, 4  ;;  %s972_s23 = sshll.u32 (%p50_p3), %s167_s21, 7 }
  0x10   : > { %s1316_s26 = scalar_lea.vmem (%p50_p3), %s1437_s0, %s1034_s22  ;;  %s169_s27 = scalar_lea.vmem (%p50_p3), [#allocation3], %s972_s23 }
  0x11   : > { %v188_v0 = vld [vmem:[%s1316_s26] sm:$0xff] (%p50_p3)  ;;  %v190_v1 = vld [vmem:[%s1316_s26 + $0x8] sm:$0xff] (%p50_p3) }
  0x12   : > { %v192_v2 = vld [vmem:[%s1316_s26 + $0x20] sm:$0xff] (%p50_p3)  ;;  %189 = vst [vmem:[%s169_s27] sm:$0xff] (%p50_p3), %v188_v0  ;;  %191 = vst [vmem:[%s169_s27 + $0x8] sm:$0xff] (%p50_p3), %v190_v1  ;;  %v194_v3 = vld [vmem:[%s1316_s26 + $0x28] sm:$0xff] (%p50_p3) }
  0x13   : > { %193 = vst [vmem:[%s169_s27 + $0x10] sm:$0xff] (%p50_p3), %v192_v2  ;;  %v196_v4 = vld [vmem:[%s1316_s26 + $0x40] sm:$0xff] (%p50_p3)  ;;  %v198_v5 = vld [vmem:[%s1316_s26 + $0x48] sm:$0xff] (%p50_p3)  ;;  %195 = vst [vmem:[%s169_s27 + $0x18] sm:$0xff] (%p50_p3), %v194_v3 }
  0x14   : > { %197 = vst [vmem:[%s169_s27 + $0x20] sm:$0xff] (%p50_p3), %v196_v4  ;;  %199 = vst [vmem:[%s169_s27 + $0x28] sm:$0xff] (%p50_p3), %v198_v5  ;;  %v200_v6 = vld [vmem:[%s1316_s26 + $0x60] sm:$0xff] (%p50_p3)  ;;  %v202_v7 = vld [vmem:[%s1316_s26 + $0x68] sm:$0xff] (%p50_p3) }
  0x15   : > { %v204_v8 = vld [vmem:[%s1316_s26 + $0x80] sm:$0xff]  ;;  %201 = vst [vmem:[%s169_s27 + $0x30] sm:$0xff] %v200_v6  ;;  %203 = vst [vmem:[%s169_s27 + $0x38] sm:$0xff] %v202_v7  ;;  %v206_v9 = vld [vmem:[%s1316_s26 + $0x88] sm:$0xff] }
  0x16   : > { %205 = vst [vmem:[%s169_s27 + $0x40] sm:$0xff] %v204_v8  ;;  %v208_v10 = vld [vmem:[%s1316_s26 + $0xa0] sm:$0xff]  ;;  %v210_v11 = vld [vmem:[%s1316_s26 + $0xa8] sm:$0xff]  ;;  %207 = vst [vmem:[%s169_s27 + $0x48] sm:$0xff] %v206_v9 }
  0x17   : > { %209 = vst [vmem:[%s169_s27 + $0x50] sm:$0xff] %v208_v10  ;;  %211 = vst [vmem:[%s169_s27 + $0x58] sm:$0xff] %v210_v11  ;;  %v212_v12 = vld [vmem:[%s1316_s26 + $0xc0] sm:$0xff]  ;;  %v214_v13 = vld [vmem:[%s1316_s26 + $0xc8] sm:$0xff] }
  0x18   : > { %v216_v14 = vld [vmem:[%s1316_s26 + $0xe0] sm:$0xff]  ;;  %213 = vst [vmem:[%s169_s27 + $0x60] sm:$0xff] %v212_v12  ;;  %215 = vst [vmem:[%s169_s27 + $0x68] sm:$0xff] %v214_v13  ;;  %v218_v15 = vld [vmem:[%s1316_s26 + $0xe8] sm:$0xff] }
  0x19   : > { %217 = vst [vmem:[%s169_s27 + $0x70] sm:$0xff] %v216_v14  ;;  %219 = vst [vmem:[%s169_s27 + $0x78] sm:$0xff] %v218_v15 }
  0x1a PF: > { %p975_p6 = scmp.ge.s32.totalorder %s1250_s16, 1  ;;  %p236_p7 = scmp.lt.s32.totalorder %s1250_s16, 3 }
  0x1c   : > { %p237_p8 = pnand %p975_p6, %p236_p7 }
  0x1d   : > { %s243_s28 = sand.u32 (!%p237_p8), 1, %s1234_s12   ;;  %s977_s29 = sshll.u32 (!%p237_p8), %s1242_s14, 6 }
  0x1e   : > { %240 = sbr.rel (%p237_p8) target bundleno = 335 (0x14f), region = 51  ;;  %s976_s30 = sshll.u32 (!%p237_p8), %s243_s28, 7 }
  0x1f   : > { %p283_p9 = scmp.lt.s32.totalorder (!%p237_p8), %s977_s29, 127  ;;  %s1343_s8 = scalar_lea.vmem (!%p237_p8), [#allocation3], %s976_s30 }
  0x20   : > { %p979_p10 = scmp.ne.s32.totalorder (!%p237_p8), %s1242_s14, 0 }
  0x25   : > { %s1448_s29 = smov (!%p283_p9, %s977_s29), 127  ;;  %307 = sbr.rel (%p979_p10) target bundleno = 44 (0x2c), region = 59 }
  0x26   : > { %s978_s4 = sshll.u32 %s1448_s29, 2  ;;  %v1252_v16 = vmov (!%p979_p10), 0.0  }
  0x27   : > { %s1341_s7 = scalar_lea.vmem %s1438_s1, %s978_s4  ;;  %308 = vst [vmem:[#allocation2] sm:$0xff] (!%p979_p10), %v1252_v16  ;;  %309 = vst [vmem:[#allocation2 + $0x8] sm:$0xff] (!%p979_p10), %v1252_v16 }
  0x28   : > { %310 = vst [vmem:[#allocation2 + $0x10] sm:$0xff] (!%p979_p10), %v1252_v16  ;;  %311 = vst [vmem:[#allocation2 + $0x18] sm:$0xff] (!%p979_p10), %v1252_v16 }
  0x29   : > { %312 = vst [vmem:[#allocation2 + $0x20] sm:$0xff] (!%p979_p10), %v1252_v16  ;;  %313 = vst [vmem:[#allocation2 + $0x28] sm:$0xff] (!%p979_p10), %v1252_v16 }
  0x2a   : > { %314 = vst [vmem:[#allocation2 + $0x30] sm:$0xff] (!%p979_p10), %v1252_v16  ;;  %315 = vst [vmem:[#allocation2 + $0x38] sm:$0xff] (!%p979_p10), %v1252_v16 }
  0x2c PF: > { %v1156_v17 = vld [vmem:[%s1341_s7 + $0x40] sm:$0xff]   ;;  %v1160_v21 = vld [vmem:[%s1341_s7 + $0x48] sm:$0xff]   ;;  %v1164_v25 = vld [vmem:[%s1341_s7 + $0x50] sm:$0xff]   ;;  %p1028_p11 = scmp.ne.s32.totalorder %s1242_s14, 1 }
  0x2d   : > { %v1157_v18 = vld [vmem:[%s1341_s7 + $0xc0] sm:$0xff]   ;;  %1035 = vmatprep.subr.bf16.mxu0 %v1156_v17  ;;  %v1161_v22 = vld [vmem:[%s1341_s7 + $0xc8] sm:$0xff]   ;;  %v1165_v26 = vld [vmem:[%s1341_s7 + $0xd0] sm:$0xff]  }
  0x2e   : > { %v1158_v19 = vld [vmem:[%s1341_s7] sm:$0xff]   ;;  %1075 = vmatprep.subr.bf16.mxu1 %v1157_v18  ;;  %v1162_v23 = vld [vmem:[%s1341_s7 + $0x8] sm:$0xff]   ;;  %v1166_v27 = vld [vmem:[%s1341_s7 + $0x10] sm:$0xff]  }
  0x2f   : > { %v1159_v20 = vld [vmem:[%s1341_s7 + $0x80] sm:$0xff]   ;;  %1036 = vmatpush3.bf16.msra.mxu0 %v1158_v19  ;;  %v1163_v24 = vld [vmem:[%s1341_s7 + $0x88] sm:$0xff]   ;;  %v1167_v28 = vld [vmem:[%s1341_s7 + $0x90] sm:$0xff]  }
  0x30   : > { %1076 = vmatpush3.bf16.msra.mxu1 %v1159_v20  ;;  %1037 = vmatprep.subr.bf16.mxu0 %v1160_v21  ;;  %v1168_v29 = vld [vmem:[%s1341_s7 + $0x58] sm:$0xff]   ;;  %v1172_v33 = vld [vmem:[%s1341_s7 + $0x60] sm:$0xff]   ;;  %v1176_v37 = vld [vmem:[%s1341_s7 + $0x68] sm:$0xff]  }
  0x31   : > { %1077 = vmatprep.subr.bf16.mxu1 %v1161_v22  ;;  %v1169_v30 = vld [vmem:[%s1341_s7 + $0xd8] sm:$0xff]   ;;  %v1173_v34 = vld [vmem:[%s1341_s7 + $0xe0] sm:$0xff]   ;;  %v1177_v38 = vld [vmem:[%s1341_s7 + $0xe8] sm:$0xff]  }
  0x32   : > { %v1170_v31 = vld [vmem:[%s1341_s7 + $0x18] sm:$0xff]   ;;  %v1174_v35 = vld [vmem:[%s1341_s7 + $0x20] sm:$0xff]   ;;  %v1178_v39 = vld [vmem:[%s1341_s7 + $0x28] sm:$0xff]  }
  0x33   : > { %1038 = vmatpush3.bf16.msra.mxu0 %v1162_v23  ;;  %v1171_v32 = vld [vmem:[%s1341_s7 + $0x98] sm:$0xff]   ;;  %v1175_v36 = vld [vmem:[%s1341_s7 + $0xa0] sm:$0xff]   ;;  %v1179_v40 = vld [vmem:[%s1341_s7 + $0xa8] sm:$0xff]  }
  0x34   : > { %1078 = vmatpush3.bf16.msra.mxu1 %v1163_v24  ;;  %1039 = vmatprep.subr.bf16.mxu0 %v1164_v25  ;;  %v1180_v41 = vld [vmem:[%s1341_s7 + $0x70] sm:$0xff]   ;;  %v1184_v45 = vld [vmem:[%s1341_s7 + $0x78] sm:$0xff]   ;;  %v316_v10 = vld [vmem:[#allocation2] sm:$0xff] }
  0x35   : > { %1079 = vmatprep.subr.bf16.mxu1 %v1165_v26  ;;  %v1181_v42 = vld [vmem:[%s1341_s7 + $0xf0] sm:$0xff]   ;;  %v1185_v46 = vld [vmem:[%s1341_s7 + $0xf8] sm:$0xff]   ;;  %v317_v15 = vld [vmem:[#allocation2 + $0x8] sm:$0xff] }
  0x36   : > { %v1182_v43 = vld [vmem:[%s1341_s7 + $0x30] sm:$0xff]   ;;  %v1186_v47 = vld [vmem:[%s1341_s7 + $0x38] sm:$0xff]  }
  0x37   : > { %1040 = vmatpush3.bf16.msra.mxu0 %v1166_v27  ;;  %v1183_v44 = vld [vmem:[%s1341_s7 + $0xb0] sm:$0xff]   ;;  %v1187_v48 = vld [vmem:[%s1341_s7 + $0xb8] sm:$0xff]  }
  0x38   : > { %1080 = vmatpush3.bf16.msra.mxu1 %v1167_v28  ;;  %1041 = vmatprep.subr.bf16.mxu0 %v1168_v29  ;;  %v1188_v49 = vld [vmem:[%s1343_s8] ss:$16 sps:$4 sm:$0xff]   ;;  %v1190_v50 = vld [vmem:[%s1343_s8 + $0x4] ss:$16 sps:$4 sm:$0xff]   ;;  %v1191_v51 = vld [vmem:[%s1343_s8 + $0x8] ss:$16 sps:$4 sm:$0xff]  }
  0x39   : > { %1081 = vmatprep.subr.bf16.mxu1 %v1169_v30  ;;  %v1193_v52 = vld [vmem:[%s1343_s8 + $0xc] ss:$16 sps:$4 sm:$0xff]   ;;  %708 = vmatprep.mubr.bf16.mxu0 %v1190_v50  ;;  %v1194_v53 = vld [vmem:[%s1343_s8 + $0x24] ss:$16 sps:$4 sm:$0xff]   ;;  %v1198_v55 = vld [vmem:[%s1343_s8 + $0x20] ss:$16 sps:$4 sm:$0xff]  }
  0x3a   : > { %773 = vmatprep.mubr.bf16.mxu1 %v1193_v52  ;;  %v1196_v54 = vld [vmem:[%s1343_s8 + $0x2c] ss:$16 sps:$4 sm:$0xff]   ;;  %v1199_v56 = vld [vmem:[%s1343_s8 + $0x28] ss:$16 sps:$4 sm:$0xff]   ;;  %v1200_v57 = vld [vmem:[%s1343_s8 + $0x44] ss:$16 sps:$4 sm:$0xff]  }
  0x3b   : > { %1042 = vmatpush3.bf16.msra.mxu0 %v1170_v31  ;;  %v1202_v58 = vld [vmem:[%s1343_s8 + $0x4c] ss:$16 sps:$4 sm:$0xff]   ;;  %v1204_v59 = vld [vmem:[%s1343_s8 + $0x40] ss:$16 sps:$4 sm:$0xff]   ;;  %v1205_v60 = vld [vmem:[%s1343_s8 + $0x48] ss:$16 sps:$4 sm:$0xff]  }
  0x3c   : > { %1082 = vmatpush3.bf16.msra.mxu1 %v1171_v32  ;;  %1043 = vmatprep.subr.bf16.mxu0 %v1172_v33  ;;  %v1206_v61 = vld [vmem:[%s1343_s8 + $0x64] ss:$16 sps:$4 sm:$0xff]   ;;  %v1208_v62 = vld [vmem:[%s1343_s8 + $0x6c] ss:$16 sps:$4 sm:$0xff]   ;;  %v1210_v63 = vld [vmem:[%s1343_s8 + $0x60] ss:$16 sps:$4 sm:$0xff]  }
  0x3d   : > { %1083 = vmatprep.subr.bf16.mxu1 %v1173_v34  ;;  %v1211_v0 = vld [vmem:[%s1343_s8 + $0x68] ss:$16 sps:$4 sm:$0xff]   ;;  %v318_v28 = vld [vmem:[#allocation2 + $0x10] sm:$0xff] }
  0x3e   : > { %v319_v33 = vld [vmem:[#allocation2 + $0x18] sm:$0xff] }
  0x3f   : > { %1044 = vmatpush3.bf16.msra.mxu0 %v1174_v35 }
  0x40   : > { %1084 = vmatpush3.bf16.msra.mxu1 %v1175_v36  ;;  %1045 = vmatprep.subr.bf16.mxu0 %v1176_v37 }
  0x41   : > { %1085 = vmatprep.subr.bf16.mxu1 %v1177_v38 }
  0x43   : > { %1046 = vmatpush3.bf16.msra.mxu0 %v1178_v39 }
  0x44   : > { %1086 = vmatpush3.bf16.msra.mxu1 %v1179_v40  ;;  %1047 = vmatprep.subr.bf16.mxu0 %v1180_v41 }
  0x45   : > { %1087 = vmatprep.subr.bf16.mxu1 %v1181_v42 }
  0x47   : > { %1048 = vmatpush3.bf16.msra.mxu0 %v1182_v43 }
  0x48   : > { %1088 = vmatpush3.bf16.msra.mxu1 %v1183_v44  ;;  %1049 = vmatprep.subr.bf16.mxu0 %v1184_v45 }
  0x49   : > { %1089 = vmatprep.subr.bf16.mxu1 %v1185_v46  ;;  %v320_v46 = vld [vmem:[#allocation2 + $0x20] sm:$0xff] }
  0x4b   : > { %1050 = vmatpush3.bf16.msra.mxu0 %v1186_v47 }
  0x4c   : > { %1090 = vmatpush3.bf16.msra.mxu1 %v1187_v48 }
  0x4e   : > { %709 = vmatmul.mubr.bf16.vlgmr.msra.gmra.mrb[0].mxu0 %v1188_v49 }
  0x4f   : > { %774 = vmatmul.mubr.bf16.vlgmr.msra.gmra.mrb[0].mxu1 %v1191_v51  ;;  %716 = vmatprep.mubr.bf16.mxu0 %v1194_v53  ;;  %v321_v51 = vld [vmem:[#allocation2 + $0x28] sm:$0xff] }
  0x50   : > { %781 = vmatprep.mubr.bf16.mxu1 %v1196_v54 }
  0x56   : > { %717 = vmatmul.mubr.bf16.gmra.mrb[4].mxu0 %v1198_v55 }
  0x57   : > { %782 = vmatmul.mubr.bf16.gmra.mrb[4].mxu1 %v1199_v56  ;;  %724 = vmatprep.mubr.bf16.mxu0 %v1200_v57 }
  0x58   : > { %789 = vmatprep.mubr.bf16.mxu1 %v1202_v58 }
  0x5e   : > { %725 = vmatmul.mubr.bf16.gmra.mrb[8].mxu0 %v1204_v59 }
  0x5f   : > { %790 = vmatmul.mubr.bf16.gmra.mrb[8].mxu1 %v1205_v60  ;;  %732 = vmatprep.mubr.bf16.mxu0 %v1206_v61 }
  0x60   : > { %797 = vmatprep.mubr.bf16.mxu1 %v1208_v62 }
  0x66   : > { %733 = vmatmul.mubr.bf16.gmra.mrb[12].mxu0 %v1210_v63 }
  0x67   : > { %798 = vmatmul.mubr.bf16.gmra.mrb[12].mxu1 %v1211_v0  ;;  %v322_v0 = vld [vmem:[#allocation2 + $0x30] sm:$0xff] }
 0x121   : > { %v1051_v1 = vpop.f32.mrb[0].mxu0 }
 0x122   : > { %v1091_v2 = vpop.f32.mrb[0].mxu1  ;;  %v1052_v3 = vpop.f32.mrb[1].mxu0 }
 0x123   : > { %v1053_v4 = vadd.f32 %v1052_v3, %v1051_v1  ;;  %v1092_v5 = vpop.f32.mrb[1].mxu1  ;;  %v1054_v6 = vpop.f32.mrb[2].mxu0 }
 0x124   : > { %v1093_v7 = vadd.f32 %v1092_v5, %v1091_v2  ;;  %v1094_v8 = vpop.f32.mrb[2].mxu1  ;;  %v1055_v9 = vpop.f32.mrb[3].mxu0  ;;  %v323_v5 = vld [vmem:[#allocation2 + $0x38] sm:$0xff] }
 0x125   : > { %v1056_v11 = vadd.f32 %v1055_v9, %v1054_v6  ;;  %v1095_v12 = vpop.f32.mrb[3].mxu1 }
 0x126   : > { %v776_v13 = vadd.f32 %v1093_v7, %v1053_v4  ;;  %v1096_v14 = vadd.f32 %v1095_v12, %v1094_v8 }
 0x128   : > { %v806_v16 = vadd.f32 %v776_v13, %v316_v10  ;;  %v779_v17 = vadd.f32 %v1096_v14, %v1056_v11  ;;  %v1029_v10 = vld [vmem:[%s1439_s2] ss:$0 sm:$0xff] (!%p1028_p11) }
 0x129   : > { %v1057_v18 = vpop.f32.mrb[4].mxu0 }
 0x12a   : > { %814 = vst [vmem:[#allocation2] sm:$0xff] %v806_v16  ;;  %v807_v19 = vadd.f32 %v779_v17, %v317_v15  ;;  %v1097_v20 = vpop.f32.mrb[4].mxu1  ;;  %v1058_v21 = vpop.f32.mrb[5].mxu0 }
 0x12b   : > { %v1059_v22 = vadd.f32 %v1058_v21, %v1057_v18  ;;  %v1098_v23 = vpop.f32.mrb[5].mxu1  ;;  %v1060_v24 = vpop.f32.mrb[6].mxu0 }
 0x12c   : > { %815 = vst [vmem:[#allocation2 + $0x8] sm:$0xff] %v807_v19  ;;  %v1099_v25 = vadd.f32 %v1098_v23, %v1097_v20  ;;  %v1100_v26 = vpop.f32.mrb[6].mxu1  ;;  %v1061_v27 = vpop.f32.mrb[7].mxu0 }
 0x12d   : > { %v1062_v29 = vadd.f32 %v1061_v27, %v1060_v24  ;;  %v1101_v30 = vpop.f32.mrb[7].mxu1 }
 0x12e   : > { %v784_v31 = vadd.f32 %v1099_v25, %v1059_v22  ;;  %v1102_v32 = vadd.f32 %v1101_v30, %v1100_v26 }
 0x130   : > { %v808_v34 = vadd.f32 %v784_v31, %v318_v28  ;;  %v787_v35 = vadd.f32 %v1102_v32, %v1062_v29 }
 0x131   : > { %v1063_v36 = vpop.f32.mrb[8].mxu0  ;;  %v826_v9 = vld [vmem:[#allocation2] sm:$0xff] (!%p1028_p11) }
 0x132   : > { %816 = vst [vmem:[#allocation2 + $0x10] sm:$0xff] %v808_v34  ;;  %v809_v37 = vadd.f32 %v787_v35, %v319_v33  ;;  %v1103_v38 = vpop.f32.mrb[8].mxu1  ;;  %v1064_v39 = vpop.f32.mrb[9].mxu0  ;;  %v841_v12 = vadd.f32 (!%p1028_p11), %v1029_v10, %v826_v9 }
 0x133   : > { %v1065_v40 = vadd.f32 %v1064_v39, %v1063_v36  ;;  %v1104_v41 = vpop.f32.mrb[9].mxu1  ;;  %v1066_v42 = vpop.f32.mrb[10].mxu0  ;;  %v827_v11 = vld [vmem:[#allocation2 + $0x8] sm:$0xff] (!%p1028_p11) }
 0x134   : > { %817 = vst [vmem:[#allocation2 + $0x18] sm:$0xff] %v809_v37  ;;  %v1105_v43 = vadd.f32 %v1104_v41, %v1103_v38  ;;  %v1106_v44 = vpop.f32.mrb[10].mxu1  ;;  %v1067_v45 = vpop.f32.mrb[11].mxu0  ;;  %v842_v13 = vadd.f32 (!%p1028_p11), %v1029_v10, %v827_v11  ;;  %849 = vst [vmem:[%s1440_s3] sm:$0xff] (!%p1028_p11), %v841_v12 }
 0x135   : > { %v1068_v47 = vadd.f32 %v1067_v45, %v1066_v42  ;;  %v1107_v48 = vpop.f32.mrb[11].mxu1 }
 0x136   : > { %v792_v49 = vadd.f32 %v1105_v43, %v1065_v40  ;;  %v1108_v50 = vadd.f32 %v1107_v48, %v1106_v44  ;;  %850 = vst [vmem:[%s1440_s3 + $0x8] sm:$0xff] (!%p1028_p11), %v842_v13 }
 0x138   : > { %v810_v52 = vadd.f32 %v792_v49, %v320_v46  ;;  %v795_v53 = vadd.f32 %v1108_v50, %v1068_v47 }
 0x139   : > { %v1069_v54 = vpop.f32.mrb[12].mxu0  ;;  %v828_v14 = vld [vmem:[#allocation2 + $0x10] sm:$0xff] (!%p1028_p11) }
 0x13a   : > { %818 = vst [vmem:[#allocation2 + $0x20] sm:$0xff] %v810_v52  ;;  %v811_v55 = vadd.f32 %v795_v53, %v321_v51  ;;  %v1109_v56 = vpop.f32.mrb[12].mxu1  ;;  %v1070_v57 = vpop.f32.mrb[13].mxu0  ;;  %v843_v17 = vadd.f32 (!%p1028_p11), %v1029_v10, %v828_v14 }
 0x13b   : > { %v1071_v58 = vadd.f32 %v1070_v57, %v1069_v54  ;;  %v1110_v59 = vpop.f32.mrb[13].mxu1  ;;  %v1072_v60 = vpop.f32.mrb[14].mxu0  ;;  %v829_v15 = vld [vmem:[#allocation2 + $0x18] sm:$0xff] (!%p1028_p11) }
 0x13c   : > { %819 = vst [vmem:[#allocation2 + $0x28] sm:$0xff] %v811_v55  ;;  %v1111_v61 = vadd.f32 %v1110_v59, %v1109_v56  ;;  %v1112_v62 = vpop.f32.mrb[14].mxu1  ;;  %v1073_v63 = vpop.f32.mrb[15].mxu0  ;;  %v844_v18 = vadd.f32 (!%p1028_p11), %v1029_v10, %v829_v15  ;;  %851 = vst [vmem:[%s1440_s3 + $0x10] sm:$0xff] (!%p1028_p11), %v843_v17 }
 0x13d   : > { %v1074_v1 = vadd.f32 %v1073_v63, %v1072_v60  ;;  %v1113_v2 = vpop.f32.mrb[15].mxu1 }
 0x13e   : > { %v800_v3 = vadd.f32 %v1111_v61, %v1071_v58  ;;  %v1114_v4 = vadd.f32 %v1113_v2, %v1112_v62  ;;  %825 = sbr.rel (%p1028_p11) target bundleno = 335 (0x14f), region = 63  ;;  %852 = vst [vmem:[%s1440_s3 + $0x18] sm:$0xff] (!%p1028_p11), %v844_v18 }
 0x140   : > { %v812_v6 = vadd.f32 %v800_v3, %v322_v0  ;;  %v803_v7 = vadd.f32 %v1114_v4, %v1074_v1 }
 0x141   : > { %v830_v16 = vld [vmem:[#allocation2 + $0x20] sm:$0xff] (!%p1028_p11) }
 0x142   : > { %820 = vst [vmem:[#allocation2 + $0x30] sm:$0xff] %v812_v6  ;;  %v813_v8 = vadd.f32 %v803_v7, %v323_v5  ;;  %v845_v19 = vadd.f32 (!%p1028_p11), %v1029_v10, %v830_v16 }
 0x143   : > { %v831_v20 = vld [vmem:[#allocation2 + $0x28] sm:$0xff] (!%p1028_p11) }
 0x144   : > { %821 = vst [vmem:[#allocation2 + $0x38] sm:$0xff] %v813_v8  ;;  %v846_v23 = vadd.f32 (!%p1028_p11), %v1029_v10, %v831_v20  ;;  %853 = vst [vmem:[%s1440_s3 + $0x20] sm:$0xff] (!%p1028_p11), %v845_v19 }
 0x146   : > { %854 = vst [vmem:[%s1440_s3 + $0x28] sm:$0xff] %v846_v23 }
 0x149   : > { %v832_v21 = vld [vmem:[#allocation2 + $0x30] sm:$0xff] }
 0x14a   : > { %v847_v24 = vadd.f32 %v1029_v10, %v832_v21 }
 0x14b   : > { %v833_v22 = vld [vmem:[#allocation2 + $0x38] sm:$0xff] }
 0x14c   : > { %v848_v25 = vadd.f32 %v1029_v10, %v833_v22  ;;  %855 = vst [vmem:[%s1440_s3 + $0x30] sm:$0xff] %v847_v24 }
 0x14e   : > { %856 = vst [vmem:[%s1440_s3 + $0x38] sm:$0xff] %v848_v25 }
 0x14f PF: > { %s13_s16 = sadd.s32 1, %s1250_s16   ;;  %s1441_s12 = smov %s1238_s13 }
 0x150   : > { %p10_p12 = scmp.ge.s32.totalorder %s13_s16, 4   ;;  %s1442_s13 = smov %s1308_s20 }
 0x151   : > { %s1443_s14 = smov %s1246_s15  ;;  %s1444_s15 = smov %s1446_s17 }
 0x152   :  { %12 = sbr.rel (!%p10_p12) target bundleno = 3 (0x3), region = 104 }

// kernel: net1_forward.44
= control target key start
LH: loop header
LB: loop body
LE: loop exit
PB: predicated region body
PF: predicated region fallthrough
CT: control target
= control target key end

     0   :  { %s741_s12 = smov 0   ;;  %s929_s0 = inlined_call_operand.vmem [shape: f32[32,4,64], index: 0, kind: input, shape index: {}]   ;;  %s930_s1 = inlined_call_operand.vmem [shape: f32[32,4,1], index: 1, kind: input, shape index: {}]   ;;  %s931_s2 = inlined_call_operand.vmem [shape: f32[32,4,1], index: 2, kind: input, shape index: {}]   ;;  %s932_s3 = inlined_call_operand.vmem [shape: f32[32,4,64], index: 3, kind: output, shape index: {}]  }
   0x1 LB: > { %s670_s13 = sadd.s32 4294967295, %s718_s12   ;;  %p674_p0 = scmp.ge.s32.totalorder %s718_s12, 1  ;;  %s718_s12 = sphi %s741_s12, %s13_s12  }
   0x2   : > { %p160_p1 = scmp.lt.s32.totalorder %s718_s12, 5 }
   0x4   : > { %p161_p2 = pnand %p674_p0, %p160_p1 }
   0x5   : > { %s675_s14 = sshll.u32 (!%p161_p2), %s670_s13, 3  ;;  %v720_v0 = vmov (!%p161_p2), 0   ;;  %vm226_vm0 = vcmask (!%p161_p2), 519168   ;;  %vm260_vm1 = vcmask (!%p161_p2), 1043456  }
   0x6   : > { %164 = sbr.rel (%p161_p2) target bundleno = 381 (0x17d), region = 32  ;;  %p195_p3 = scmp.lt.s32.totalorder (!%p161_p2), %s675_s14, 31  ;;  %695 = vset.pattern.permute.xlu1 (!%p161_p2), %v720_v0  ;;  %694 = vset.pattern.permute.xlu0 (!%p161_p2), %v720_v0 }
   0xd   : > { %s934_s14 = smov (!%p195_p3, %s675_s14), 31 }
   0xe   : > { %s749_s15 = sshll.u32 %s934_s14, 2 }
   0xf   : > { %s198_s18 = scalar_lea.vmem %s929_s0, %s749_s15  ;;  %s204_s21 = scalar_lea.vmem %s930_s1, %s749_s15 }
  0x10   : > { %v755_v1 = vld [vmem:[%s198_s18 + $0x8] sm:$0xf]  ;;  %v757_v2 = vld [vmem:[%s198_s18] sm:$0xf]  ;;  %v759_v3 = vld [vmem:[%s198_s18 + $0xc] sm:$0xf]  ;;  %s795_s24 = scalar_lea.vmem %s931_s2, %s749_s15  ;;  %s896_s27 = scalar_lea.vmem %s932_s3, %s749_s15 }
  0x11   : > { %v233_v4 = vsel %vm226_vm0, %v755_v1, 0.0  ;;  %v227_v5 = vsel %vm226_vm0, %v757_v2, 0.0  ;;  %v765_v6 = vld [vmem:[%s198_s18 + $0x4] sm:$0xf]  ;;  %v236_v7 = vsel %vm226_vm0, %v759_v3, 0.0 }
  0x12   : > { %234 = vadd.xlane.f32.xlu1 %v233_v4  ;;  %228 = vadd.xlane.f32.xlu0 %v227_v5  ;;  %v230_v8 = vsel %vm226_vm0, %v765_v6, 0.0  ;;  %v771_v9 = vld [vmem:[%s198_s18 + $0x14] sm:$0xf]  ;;  %v773_v10 = vld [vmem:[%s198_s18 + $0x10] sm:$0xf] }
  0x13   : > { %v242_v11 = vsel %vm226_vm0, %v771_v9, 0.0  ;;  %v239_v12 = vsel %vm226_vm0, %v773_v10, 0.0  ;;  %v779_v13 = vld [vmem:[%s198_s18 + $0x1c] sm:$0xf]  ;;  %v781_v14 = vld [vmem:[%s198_s18 + $0x18] sm:$0xf] }
  0x14   : > { %v248_v15 = vsel %vm226_vm0, %v779_v13, 0.0  ;;  %v245_v16 = vsel %vm226_vm0, %v781_v14, 0.0  ;;  %v463_v17 = vld [vmem:[%s204_s21 + $0x4] sm:$0xf]  ;;  %v464_v18 = vld [vmem:[%s204_s21 + $0x8] sm:$0xf] }
  0x15   : > { %v462_v19 = vld [vmem:[%s204_s21] sm:$0xf]  ;;  %v465_v20 = vld [vmem:[%s204_s21 + $0xc] sm:$0xf]  ;;  %v466_v21 = vld [vmem:[%s204_s21 + $0x10] sm:$0xf] }
  0x16   : > { %237 = vadd.xlane.f32.xlu1 %v236_v7  ;;  %231 = vadd.xlane.f32.xlu0 %v230_v8  ;;  %v467_v22 = vld [vmem:[%s204_s21 + $0x14] sm:$0xf]  ;;  %v468_v23 = vld [vmem:[%s204_s21 + $0x18] sm:$0xf]  ;;  %v469_v24 = vld [vmem:[%s204_s21 + $0x1c] sm:$0xf] }
  0x17   : > { %v518_v25 = vld [vmem:[%s795_s24] sm:$0xf] }
  0x1a   : > { %243 = vadd.xlane.f32.xlu1 %v242_v11  ;;  %240 = vadd.xlane.f32.xlu0 %v239_v12 }
  0x1e   : > { %249 = vadd.xlane.f32.xlu1 %v248_v15  ;;  %246 = vadd.xlane.f32.xlu0 %v245_v16 }
  0x2f   : > { %477 = vperm.xlu1 %695, %v463_v17  }
  0x33   : > { %482 = vperm.xlu1 %695, %v464_v18  }
  0x34   : > { %472 = vperm.xlu0 %694, %v462_v19  }
  0x37   : > { %487 = vperm.xlu1 %695, %v465_v20  }
  0x3b   : > { %492 = vperm.xlu1 %695, %v466_v21  }
  0x3f   : > { %497 = vperm.xlu1 %695, %v467_v22  }
  0x43   : > { %502 = vperm.xlu1 %695, %v468_v23  }
  0x47   : > { %507 = vperm.xlu1 %695, %v469_v24  }
  0x4b   : > { %528 = vperm.xlu1 %695, %v518_v25  }
  0x9f   : > { %v235_v26 = vpop.xlane.xlu1 %234  ;;  %v229_v27 = vpop.xlane.xlu0 %228 }
  0xa0   : > { %v254_v28 = vmul.f32 0.015625, %v235_v26  ;;  %v252_v29 = vmul.f32 0.015625, %v229_v27 }
  0xa2   : > { %v275_v30 = vsel %vm260_vm1, %v254_v28, 0.0  ;;  %v261_v31 = vsel %vm260_vm1, %v252_v29, 0.0 }
  0xa3   : > { %v276_v32 = vrot.slane %v275_v30, 4  ;;  %v262_v33 = vrot.slane %v261_v31, 4  ;;  %v238_v34 = vpop.xlane.xlu1 %237  ;;  %v232_v35 = vpop.xlane.xlu0 %231 }
  0xa4   : > { %v255_v36 = vmul.f32 0.015625, %v238_v34  ;;  %v253_v37 = vmul.f32 0.015625, %v232_v35 }
  0xa5   : > { %v277_v38 = vadd.f32 %v276_v32, %v275_v30  ;;  %v263_v39 = vadd.f32 %v262_v33, %v261_v31 }
  0xa6   : > { %v282_v40 = vsel %vm260_vm1, %v255_v36, 0.0  ;;  %v268_v41 = vsel %vm260_vm1, %v253_v37, 0.0 }
  0xa7   : > { %v278_v42 = vrot.slane %v277_v38, 2  ;;  %v264_v43 = vrot.slane %v263_v39, 2  ;;  %v283_v44 = vrot.slane %v282_v40, 4  ;;  %v269_v45 = vrot.slane %v268_v41, 4  ;;  %v244_v46 = vpop.xlane.xlu1 %243  ;;  %v241_v47 = vpop.xlane.xlu0 %240 }
  0xa8   : > { %v257_v48 = vmul.f32 0.015625, %v244_v46  ;;  %v256_v49 = vmul.f32 0.015625, %v241_v47 }
  0xa9   : > { %v279_v50 = vadd.f32 %v278_v42, %v277_v38  ;;  %v265_v51 = vadd.f32 %v264_v43, %v263_v39  ;;  %v284_v52 = vadd.f32 %v283_v44, %v282_v40  ;;  %v270_v53 = vadd.f32 %v269_v45, %v268_v41 }
  0xaa   : > { %v296_v54 = vsel %vm260_vm1, %v257_v48, 0.0  ;;  %v289_v55 = vsel %vm260_vm1, %v256_v49, 0.0 }
  0xab   : > { %v280_v56 = vrot.slane %v279_v50, 1  ;;  %v266_v57 = vrot.slane %v265_v51, 1  ;;  %v285_v58 = vrot.slane %v284_v52, 2  ;;  %v271_v59 = vrot.slane %v270_v53, 2  ;;  %v250_v60 = vpop.xlane.xlu1 %249  ;;  %v247_v61 = vpop.xlane.xlu0 %246 }
  0xac   : > { %v297_v62 = vrot.slane %v296_v54, 4  ;;  %v290_v63 = vrot.slane %v289_v55, 4  ;;  %v259_v0 = vmul.f32 0.015625, %v250_v60  ;;  %v258_v4 = vmul.f32 0.015625, %v247_v61 }
  0xad   : > { %v286_v5 = vadd.f32 %v285_v58, %v284_v52  ;;  %v272_v7 = vadd.f32 %v271_v59, %v270_v53  ;;  %v267_v8 = vadd.f32 %v266_v57, %v265_v51  ;;  %v281_v11 = vadd.f32 %v280_v56, %v279_v50 }
  0xae   : > { %v298_v12 = vadd.f32 %v297_v62, %v296_v54  ;;  %v291_v15 = vadd.f32 %v290_v63, %v289_v55  ;;  %v310_v16 = vsel %vm260_vm1, %v259_v0, 0.0  ;;  %v303_v17 = vsel %vm260_vm1, %v258_v4, 0.0 }
  0xaf   : > { %v287_v18 = vrot.slane %v286_v5, 1  ;;  %v273_v19 = vrot.slane %v272_v7, 1  ;;  %v311_v20 = vrot.slane %v310_v16, 4  ;;  %v304_v21 = vrot.slane %v303_v17, 4 }
  0xb0   : > { %v299_v22 = vrot.slane %v298_v12, 2  ;;  %v292_v23 = vrot.slane %v291_v15, 2  ;;  %v318_v24 = vmul.f32 0.25, %v267_v8  ;;  %v320_v25 = vmul.f32 0.25, %v281_v11  ;;  %v522_v8 = vld [vmem:[%s795_s24 + $0x10] sm:$0xf] }
  0xb1   : > { %v312_v26 = vadd.f32 %v311_v20, %v310_v16  ;;  %v305_v27 = vadd.f32 %v304_v21, %v303_v17  ;;  %v274_v28 = vadd.f32 %v273_v19, %v272_v7  ;;  %v288_v29 = vadd.f32 %v287_v18, %v286_v5  ;;  %v520_v5 = vld [vmem:[%s795_s24 + $0x8] sm:$0xf]  ;;  %v519_v7 = vld [vmem:[%s795_s24 + $0x4] sm:$0xf]  ;;  %v521_v11 = vld [vmem:[%s795_s24 + $0xc] sm:$0xf]  ;;  %v861_v17 = vpop.permute.xlu1 %477 }
  0xb2   : > { %v300_v30 = vadd.f32 %v299_v22, %v298_v12  ;;  %v293_v31 = vadd.f32 %v292_v23, %v291_v15  ;;  %v807_v32 = vsub.f32 %v757_v2, %v318_v24  ;;  %v810_v33 = vsub.f32 %v755_v1, %v320_v25  ;;  %v524_v12 = vld [vmem:[%s795_s24 + $0x18] sm:$0xf]  ;;  %v523_v15 = vld [vmem:[%s795_s24 + $0x14] sm:$0xf]  ;;  %v525_v16 = vld [vmem:[%s795_s24 + $0x1c] sm:$0xf] }
  0xb3   : > { %v313_v34 = vrot.slane %v312_v26, 2  ;;  %v306_v35 = vrot.slane %v305_v27, 2  ;;  %v319_v36 = vmul.f32 0.25, %v274_v28  ;;  %v321_v37 = vmul.f32 0.25, %v288_v29  ;;  %v875_v24 = vpop.permute.xlu0 %472 }
  0xb4   : > { %v301_v38 = vrot.slane %v300_v30, 1  ;;  %v294_v39 = vrot.slane %v293_v31, 1  ;;  %v334_v40 = vmul.f32 %v807_v32, %v807_v32  ;;  %v336_v44 = vmul.f32 %v810_v33, %v810_v33 }
  0xb5   : > { %v314_v41 = vadd.f32 %v313_v34, %v312_v26  ;;  %v307_v42 = vadd.f32 %v306_v35, %v305_v27  ;;  %v815_v43 = vsub.f32 %v765_v6, %v319_v36  ;;  %v818_v2 = vsub.f32 %v759_v3, %v321_v37  ;;  %v863_v18 = vpop.permute.xlu1 %482 }
  0xb6   : > { %v342_v1 = vsel %vm226_vm0, %v334_v40, 0.0  ;;  %v295_v45 = vadd.f32 %v294_v39, %v293_v31  ;;  %v302_v46 = vadd.f32 %v301_v38, %v300_v30  ;;  %v348_v54 = vsel %vm226_vm0, %v336_v44, 0.0 }
  0xb7   : > { %v315_v47 = vrot.slane %v314_v41, 1  ;;  %v308_v48 = vrot.slane %v307_v42, 1  ;;  %343 = vadd.xlane.f32.xlu0 %v342_v1  ;;  %v335_v49 = vmul.f32 %v815_v43, %v815_v43  ;;  %v337_v3 = vmul.f32 %v818_v2, %v818_v2 }
  0xb8   : > { %v322_v50 = vmul.f32 0.25, %v295_v45  ;;  %v323_v51 = vmul.f32 0.25, %v302_v46 }
  0xb9   : > { %v345_v6 = vsel %vm226_vm0, %v335_v49, 0.0  ;;  %v309_v52 = vadd.f32 %v308_v48, %v307_v42  ;;  %v316_v53 = vadd.f32 %v315_v47, %v314_v41  ;;  %v351_v60 = vsel %vm226_vm0, %v337_v3, 0.0  ;;  %v865_v19 = vpop.permute.xlu1 %487 }
  0xba   : > { %346 = vadd.xlane.f32.xlu1 %v345_v6  ;;  %v830_v55 = vsub.f32 %v773_v10, %v322_v50  ;;  %v833_v56 = vsub.f32 %v771_v9, %v323_v51 }
  0xbb   : > { %349 = vadd.xlane.f32.xlu0 %v348_v54  ;;  %v324_v57 = vmul.f32 0.25, %v309_v52  ;;  %v325_v58 = vmul.f32 0.25, %v316_v53 }
  0xbc   : > { %v338_v59 = vmul.f32 %v830_v55, %v830_v55  ;;  %v339_v61 = vmul.f32 %v833_v56, %v833_v56 }
  0xbd   : > { %v841_v62 = vsub.f32 %v781_v14, %v324_v57  ;;  %v844_v9 = vsub.f32 %v779_v13, %v325_v58  ;;  %v867_v20 = vpop.permute.xlu1 %492 }
  0xbe   : > { %352 = vadd.xlane.f32.xlu1 %v351_v60  ;;  %v354_v10 = vsel %vm226_vm0, %v338_v59, 0.0  ;;  %v357_v0 = vsel %vm226_vm0, %v339_v61, 0.0 }
  0xbf   : > { %355 = vadd.xlane.f32.xlu0 %v354_v10  ;;  %v340_v63 = vmul.f32 %v841_v62, %v841_v62  ;;  %v341_v14 = vmul.f32 %v844_v9, %v844_v9 }
  0xc1   : > { %v360_v4 = vsel %vm226_vm0, %v340_v63, 0.0  ;;  %v363_v13 = vsel %vm226_vm0, %v341_v14, 0.0  ;;  %v869_v21 = vpop.permute.xlu1 %497 }
  0xc2   : > { %358 = vadd.xlane.f32.xlu1 %v357_v0 }
  0xc3   : > { %361 = vadd.xlane.f32.xlu0 %v360_v4 }
  0xc5   : > { %v871_v22 = vpop.permute.xlu1 %502 }
  0xc6   : > { %364 = vadd.xlane.f32.xlu1 %v363_v13 }
  0xc9   : > { %v873_v23 = vpop.permute.xlu1 %507 }
  0xcd   : > { %v877_v25 = vpop.permute.xlu1 %528 }
  0xd7   : > { %538 = vperm.xlu1 %695, %v520_v5  }
  0xd9   : > { %533 = vperm.xlu0 %694, %v519_v7  }
  0xdb   : > { %548 = vperm.xlu1 %695, %v522_v8  }
  0xdd   : > { %543 = vperm.xlu0 %694, %v521_v11  }
  0xdf   : > { %558 = vperm.xlu1 %695, %v524_v12  }
  0xe1   : > { %553 = vperm.xlu0 %694, %v523_v15  }
  0xe5   : > { %563 = vperm.xlu0 %694, %v525_v16  }
 0x144   : > { %v344_v26 = vpop.xlane.xlu0 %343 }
 0x145   : > { %v366_v27 = vmul.f32 0.015625, %v344_v26 }
 0x147   : > { %v374_v28 = vsel %vm260_vm1, %v366_v27, 0.0  ;;  %v347_v29 = vpop.xlane.xlu1 %346 }
 0x148   : > { %v375_v30 = vrot.slane %v374_v28, 4  ;;  %v367_v31 = vmul.f32 0.015625, %v347_v29  ;;  %v350_v34 = vpop.xlane.xlu0 %349 }
 0x149   : > { %v368_v35 = vmul.f32 0.015625, %v350_v34 }
 0x14a   : > { %v376_v36 = vadd.f32 %v375_v30, %v374_v28  ;;  %v381_v37 = vsel %vm260_vm1, %v367_v31, 0.0 }
 0x14b   : > { %v382_v38 = vrot.slane %v381_v37, 4  ;;  %v388_v39 = vsel %vm260_vm1, %v368_v35, 0.0  ;;  %v353_v40 = vpop.xlane.xlu1 %352 }
 0x14c   : > { %v377_v41 = vrot.slane %v376_v36, 2  ;;  %v389_v42 = vrot.slane %v388_v39, 4  ;;  %v369_v1 = vmul.f32 0.015625, %v353_v40  ;;  %v356_v44 = vpop.xlane.xlu0 %355 }
 0x14d   : > { %v383_v45 = vadd.f32 %v382_v38, %v381_v37  ;;  %v370_v46 = vmul.f32 0.015625, %v356_v44 }
 0x14e   : > { %v378_v47 = vadd.f32 %v377_v41, %v376_v36  ;;  %v390_v48 = vadd.f32 %v389_v42, %v388_v39  ;;  %v395_v49 = vsel %vm260_vm1, %v369_v1, 0.0 }
 0x14f   : > { %v384_v50 = vrot.slane %v383_v45, 2  ;;  %v396_v51 = vrot.slane %v395_v49, 4  ;;  %v402_v6 = vsel %vm260_vm1, %v370_v46, 0.0  ;;  %v359_v3 = vpop.xlane.xlu1 %358 }
 0x150   : > { %v379_v52 = vrot.slane %v378_v47, 1  ;;  %v391_v53 = vrot.slane %v390_v48, 2  ;;  %v403_v54 = vrot.slane %v402_v6, 4  ;;  %v371_v57 = vmul.f32 0.015625, %v359_v3  ;;  %v362_v58 = vpop.xlane.xlu0 %361 }
 0x151   : > { %v385_v59 = vadd.f32 %v384_v50, %v383_v45  ;;  %v397_v60 = vadd.f32 %v396_v51, %v395_v49  ;;  %v372_v61 = vmul.f32 0.015625, %v362_v58 }
 0x152   : > { %v380_v10 = vadd.f32 %v379_v52, %v378_v47  ;;  %v392_v63 = vadd.f32 %v391_v53, %v390_v48  ;;  %v404_v0 = vadd.f32 %v403_v54, %v402_v6  ;;  %v409_v4 = vsel %vm260_vm1, %v371_v57, 0.0 }
 0x153   : > { %v386_v14 = vrot.slane %v385_v59, 1  ;;  %v398_v13 = vrot.slane %v397_v60, 2  ;;  %v410_v5 = vrot.slane %v409_v4, 4  ;;  %v416_v7 = vsel %vm260_vm1, %v372_v61, 0.0  ;;  %v365_v8 = vpop.xlane.xlu1 %364 }
 0x154   : > { %v430_v11 = vmul.f32 0.25, %v380_v10  ;;  %v393_v12 = vrot.slane %v392_v63, 1  ;;  %v405_v15 = vrot.slane %v404_v0, 2  ;;  %v417_v16 = vrot.slane %v416_v7, 4 }
 0x155   : > { %v387_v26 = vadd.f32 %v386_v14, %v385_v59  ;;  %v399_v27 = vadd.f32 %v398_v13, %v397_v60  ;;  %v411_v28 = vadd.f32 %v410_v5, %v409_v4  ;;  %v373_v29 = vmul.f32 0.015625, %v365_v8 }
 0x156   : > { %v438_v30 = vadd.f32 1e-05, %v430_v11  ;;  %v394_v31 = vadd.f32 %v393_v12, %v392_v63  ;;  %v406_v34 = vadd.f32 %v405_v15, %v404_v0  ;;  %v418_v35 = vadd.f32 %v417_v16, %v416_v7 }
 0x157   : > { %v431_v36 = vmul.f32 0.25, %v387_v26  ;;  %v400_v37 = vrot.slane %v399_v27, 1  ;;  %v412_v38 = vrot.slane %v411_v28, 2  ;;  %v423_v39 = vsel %vm260_vm1, %v373_v29, 0.0  ;;  %v539_v16 = vpop.permute.xlu1 %538 }
 0x158   : > { %696 = vrsqrt.f32 %v438_v30  ;;  %v432_v40 = vmul.f32 0.25, %v394_v31  ;;  %v407_v41 = vrot.slane %v406_v34, 1  ;;  %v419_v42 = vrot.slane %v418_v35, 2  ;;  %v534_v12 = vpop.permute.xlu0 %533 }
 0x159   : > { %v439_v1 = vadd.f32 1e-05, %v431_v36  ;;  %v401_v44 = vadd.f32 %v400_v37, %v399_v27  ;;  %v413_v45 = vadd.f32 %v412_v38, %v411_v28  ;;  %v424_v46 = vrot.slane %v423_v39, 4 }
 0x15a   : > { %v440_v47 = vadd.f32 1e-05, %v432_v40  ;;  %v408_v48 = vadd.f32 %v407_v41, %v406_v34  ;;  %v420_v49 = vadd.f32 %v419_v42, %v418_v35 }
 0x15b   : > { %698 = vrsqrt.f32 %v439_v1  ;;  %v433_v50 = vmul.f32 0.25, %v401_v44  ;;  %v414_v51 = vrot.slane %v413_v45, 1  ;;  %v425_v6 = vadd.f32 %v424_v46, %v423_v39  ;;  %v549_v38 = vpop.permute.xlu1 %548 }
 0x15c   : > { %700 = vrsqrt.f32 %v440_v47  ;;  %v434_v3 = vmul.f32 0.25, %v408_v48  ;;  %v421_v52 = vrot.slane %v420_v49, 1  ;;  %v544_v36 = vpop.permute.xlu0 %543 }
 0x15d   : > { %v441_v53 = vadd.f32 1e-05, %v433_v50  ;;  %v415_v54 = vadd.f32 %v414_v51, %v413_v45  ;;  %v426_v57 = vrot.slane %v425_v6, 2 }
 0x15e   : > { %v442_v58 = vadd.f32 1e-05, %v434_v3  ;;  %v422_v59 = vadd.f32 %v421_v52, %v420_v49 }
 0x15f   : > { %702 = vrsqrt.f32 %v441_v53  ;;  %v435_v60 = vmul.f32 0.25, %v415_v54  ;;  %v427_v61 = vadd.f32 %v426_v57, %v425_v6  ;;  %v559_v47 = vpop.permute.xlu1 %558 }
 0x160   : > { %704 = vrsqrt.f32 %v442_v58  ;;  %v436_v10 = vmul.f32 0.25, %v422_v59  ;;  %v554_v46 = vpop.permute.xlu0 %553 }
 0x161   : > { %v443_v63 = vadd.f32 1e-05, %v435_v60  ;;  %v428_v0 = vrot.slane %v427_v61, 1 }
 0x162   : > { %v697_v4 = vpop.eup %696  ;;  %v444_v14 = vadd.f32 1e-05, %v436_v10 }
 0x163   : > { %v454_v13 = vmul.f32 %v697_v4, %v807_v32  ;;  %706 = vrsqrt.f32 %v443_v63  ;;  %v429_v5 = vadd.f32 %v428_v0, %v427_v61 }
 0x164   : > { %708 = vrsqrt.f32 %v444_v14 }
 0x165   : > { %v699_v7 = vpop.eup %698  ;;  %v510_v8 = vmul.f32 %v875_v24, %v454_v13  ;;  %v437_v11 = vmul.f32 0.25, %v429_v5 }
 0x166   : > { %v701_v15 = vpop.eup %700  ;;  %v455_v26 = vmul.f32 %v699_v7, %v815_v43 }
 0x167   : > { %v566_v27 = vadd.f32 %v877_v25, %v510_v8  ;;  %v445_v28 = vadd.f32 1e-05, %v437_v11  ;;  %v456_v29 = vmul.f32 %v701_v15, %v810_v33 }
 0x168   : > { %v511_v32 = vmul.f32 %v861_v17, %v455_v26 }
 0x169   : > { %v703_v24 = vpop.eup %702  ;;  %v574_v30 = vmax.f32 %v566_v27, 0.0  ;;  %710 = vrsqrt.f32 %v445_v28  ;;  %v512_v31 = vmul.f32 %v863_v18, %v456_v29 }
 0x16a   : > { %v705_v43 = vpop.eup %704  ;;  %v567_v34 = vadd.f32 %v534_v12, %v511_v32  ;;  %v457_v25 = vmul.f32 %v703_v24, %v818_v2 }
 0x16b   : > { %v568_v33 = vadd.f32 %v539_v16, %v512_v31  ;;  %582 = vst.msk [vmem:[%s896_s27] sm:$0xf] %vm226_vm0, %v574_v30  ;;  %v458_v35 = vmul.f32 %v705_v43, %v830_v55 }
 0x16c   : > { %v575_v37 = vmax.f32 %v567_v34, 0.0  ;;  %v513_v17 = vmul.f32 %v865_v19, %v457_v25 }
 0x16d   : > { %v707_v39 = vpop.eup %706  ;;  %v576_v40 = vmax.f32 %v568_v33, 0.0  ;;  %v514_v18 = vmul.f32 %v867_v20, %v458_v35 }
 0x16e   : > { %v709_v41 = vpop.eup %708  ;;  %583 = vst.msk [vmem:[%s896_s27 + $0x4] sm:$0xf] %vm226_vm0, %v575_v37  ;;  %v569_v2 = vadd.f32 %v544_v36, %v513_v17  ;;  %v459_v42 = vmul.f32 %v707_v39, %v833_v56 }
 0x16f   : > { %584 = vst.msk [vmem:[%s896_s27 + $0x8] sm:$0xf] %vm226_vm0, %v576_v40  ;;  %v570_v55 = vadd.f32 %v549_v38, %v514_v18  ;;  %v460_v1 = vmul.f32 %v709_v41, %v841_v62 }
 0x170   : > { %v577_v44 = vmax.f32 %v569_v2, 0.0  ;;  %v515_v19 = vmul.f32 %v869_v21, %v459_v42 }
 0x171   : > { %v578_v45 = vmax.f32 %v570_v55, 0.0  ;;  %v516_v20 = vmul.f32 %v871_v22, %v460_v1  ;;  %v564_v22 = vpop.permute.xlu0 %563 }
 0x172   : > { %585 = vst.msk [vmem:[%s896_s27 + $0xc] sm:$0xf] %vm226_vm0, %v577_v44  ;;  %v571_v48 = vadd.f32 %v554_v46, %v515_v19 }
 0x173   : > { %v711_v56 = vpop.eup %710  ;;  %586 = vst.msk [vmem:[%s896_s27 + $0x10] sm:$0xf] %vm226_vm0, %v578_v45  ;;  %v572_v49 = vadd.f32 %v559_v47, %v516_v20 }
 0x174   : > { %v579_v50 = vmax.f32 %v571_v48, 0.0  ;;  %v461_v62 = vmul.f32 %v711_v56, %v844_v9 }
 0x175   : > { %v580_v51 = vmax.f32 %v572_v49, 0.0 }
 0x176   : > { %587 = vst.msk [vmem:[%s896_s27 + $0x14] sm:$0xf] %vm226_vm0, %v579_v50  ;;  %v517_v21 = vmul.f32 %v873_v23, %v461_v62 }
 0x177   : > { %588 = vst.msk [vmem:[%s896_s27 + $0x18] sm:$0xf] %vm226_vm0, %v580_v51 }
 0x178   : > { %v573_v6 = vadd.f32 %v564_v22, %v517_v21 }
 0x17a   : > { %v581_v3 = vmax.f32 %v573_v6, 0.0 }
 0x17c   : > { %589 = vst.msk [vmem:[%s896_s27 + $0x1c] sm:$0xf] %vm226_vm0, %v581_v3 }
 0x17d PF: > { %s13_s12 = sadd.s32 1, %s718_s12  }
 0x17e   : > { %p10_p4 = scmp.ge.s32.totalorder %s13_s12, 6  }
 0x180   :  { %12 = sbr.rel (!%p10_p4) target bundleno = 1 (0x1), region = 68 }

// kernel: net1_forward.45
= control target key start
LH: loop header
LB: loop body
LE: loop exit
PB: predicated region body
PF: predicated region fallthrough
CT: control target
= control target key end

     0   :  { %s1258_s12 = smov 0   ;;  %s1260_s13 = smov 0   ;;  %s1412_s0 = inlined_call_operand.vmem [shape: bf16[16,1536], index: 0, kind: input, shape index: {}]   ;;  %s1413_s1 = inlined_call_operand.vmem [shape: bf16[1536,256], index: 1, kind: input, shape index: {}]   ;;  %s1414_s2 = inlined_call_operand.vmem [shape: f32[1,256], index: 2, kind: input, shape index: {}]   ;;  %s1415_s3 = inlined_call_operand.vmem [shape: f32[16,256], index: 3, kind: output, shape index: {}]  }
   0x1   :  { %s1262_s14 = smov 0   ;;  %s1264_s15 = smov 0  }
   0x2   :  { %s1266_s16 = smov 0  }
   0x3 LB: > { %s25_s17 = sadd.s32 1, %s1231_s15  ;;  %p48_p1 = scmp.ne.s32.totalorder %s1223_s13, %s1219_s12  ;;  %s1235_s16 = sphi %s1266_s16, %s13_s16   ;;  %s1231_s15 = sphi %s1264_s15, %s1419_s15   ;;  %s1227_s14 = sphi %s1262_s14, %s1418_s14   ;;  %s1223_s13 = sphi %s1260_s13, %s1417_s13   ;;  %s1219_s12 = sphi %s1258_s12, %s1416_s12  }
   0x4   : > { %p26_p0 = scmp.ge.s32.totalorder %s25_s17, 3  ;;  %p49_p2 = scmp.eq.s32.totalorder %s1235_s16, 0 }
   0x5   : > { %s41_s19 = sadd.s32 1, %s1223_s13  ;;  %p965_p5 = scmp.ge.s32.totalorder %s1235_s16, 3 }
   0x6   : > { %s1421_s17 = smov (%p26_p0, %s25_s17), 0  ;;  %p50_p3 = por %p49_p2, %p48_p1 }
   0x7   : > { %s37_s18 = ssub.s32 %s1231_s15, %s1421_s17  ;;  %164 = sbr.rel (%p965_p5) target bundleno = 21 (0x15), region = 20 }
   0x8   : > { %p39_p4 = scmp.eq.s32.totalorder %s37_s18, 0 }
   0xa   : > { %s1293_s20 = scalar_select %p39_p4, %s1223_s13, %s41_s19  }
   0xe   : > { %167 = sbr.rel (!%p50_p3) target bundleno = 21 (0x15), region = 24  ;;  %s169_s21 = sand.u32 (%p50_p3), 1, %s1223_s13  }
   0xf   : > { %s1048_s22 = sshll.u32 (%p50_p3), %s1231_s15, 4  ;;  %s966_s23 = sshll.u32 (%p50_p3), %s169_s21, 5 }
  0x10   : > { %s177_s26 = scalar_lea.vmem (%p50_p3), %s1412_s0, %s1048_s22  ;;  %s171_s27 = scalar_lea.vmem (%p50_p3), [#allocation3], %s966_s23 }
  0x11   : > { %v190_v0 = vld [vmem:[%s177_s26] sm:$0xff] (%p50_p3)  ;;  %v192_v1 = vld [vmem:[%s177_s26 + $0x8] sm:$0xff] (%p50_p3)  ;;  %v194_v2 = vld [vmem:[%s177_s26 + $0x30] sm:$0xff] (%p50_p3) }
  0x12   : > { %191 = vst [vmem:[%s171_s27] sm:$0xff] (%p50_p3), %v190_v0  ;;  %193 = vst [vmem:[%s171_s27 + $0x8] sm:$0xff] (%p50_p3), %v192_v1  ;;  %v196_v3 = vld [vmem:[%s177_s26 + $0x38] sm:$0xff] (%p50_p3) }
  0x13   : > { %195 = vst [vmem:[%s171_s27 + $0x10] sm:$0xff] (%p50_p3), %v194_v2  ;;  %197 = vst [vmem:[%s171_s27 + $0x18] sm:$0xff] (%p50_p3), %v196_v3 }
  0x15 PF: > { %p969_p6 = scmp.ge.s32.totalorder %s1235_s16, 1  ;;  %p217_p7 = scmp.lt.s32.totalorder %s1235_s16, 4 }
  0x17   : > { %p218_p8 = pnand %p969_p6, %p217_p7 }
  0x18   : > { %s224_s28 = sand.u32 (!%p218_p8), 1, %s1219_s12   ;;  %s971_s29 = sshll.u32 (!%p218_p8), %s1227_s14, 6 }
  0x19   : > { %221 = sbr.rel (%p218_p8) target bundleno = 335 (0x14f), region = 51  ;;  %s970_s30 = sshll.u32 (!%p218_p8), %s224_s28, 5 }
  0x1a   : > { %p270_p9 = scmp.lt.s32.totalorder (!%p218_p8), %s971_s29, 191  ;;  %s1310_s8 = scalar_lea.vmem (!%p218_p8), [#allocation3], %s970_s30 }
  0x1b   : > { %p974_p10 = scmp.ne.s32.totalorder (!%p218_p8), %s1227_s14, 0 }
  0x20   : > { %s1423_s29 = smov (!%p270_p9, %s971_s29), 191  ;;  %300 = sbr.rel (%p974_p10) target bundleno = 39 (0x27), region = 59 }
  0x21   : > { %s1049_s4 = sshll.u32 %s1423_s29, 3  ;;  %v1237_v4 = vmov (!%p974_p10), 0.0  }
  0x22   : > { %s1308_s7 = scalar_lea.vmem %s1413_s1, %s1049_s4  ;;  %301 = vst [vmem:[#allocation2] sm:$0xff] (!%p974_p10), %v1237_v4  ;;  %302 = vst [vmem:[#allocation2 + $0x8] sm:$0xff] (!%p974_p10), %v1237_v4 }
  0x23   : > { %303 = vst [vmem:[#allocation2 + $0x10] sm:$0xff] (!%p974_p10), %v1237_v4  ;;  %304 = vst [vmem:[#allocation2 + $0x18] sm:$0xff] (!%p974_p10), %v1237_v4 }
  0x27 PF: > { %v1095_v5 = vld [vmem:[%s1308_s7 + $0x4] ss:$8 sps:$4 sm:$0xff]   ;;  %v1099_v7 = vld [vmem:[%s1308_s7] ss:$8 sps:$4 sm:$0xff]   ;;  %v1101_v9 = vld [vmem:[%s1308_s7 + $0x14] ss:$8 sps:$4 sm:$0xff]  }
  0x28   : > { %v1097_v6 = vld [vmem:[%s1308_s7 + $0x104] ss:$8 sps:$4 sm:$0xff]   ;;  %717 = vmatprep.subr.bf16.mxu1 %v1095_v5  ;;  %v1100_v8 = vld [vmem:[%s1308_s7 + $0x100] ss:$8 sps:$4 sm:$0xff]   ;;  %v1103_v10 = vld [vmem:[%s1308_s7 + $0x114] ss:$8 sps:$4 sm:$0xff]  }
  0x29   : > { %760 = vmatprep.subr.bf16.mxu0 %v1097_v6  ;;  %718 = vmatpush1.bf16.msra.mxu1 %v1099_v7  ;;  %v1105_v11 = vld [vmem:[%s1308_s7 + $0x10] ss:$8 sps:$4 sm:$0xff]   ;;  %v1107_v13 = vld [vmem:[%s1308_s7 + $0x24] ss:$8 sps:$4 sm:$0xff]   ;;  %v1111_v15 = vld [vmem:[%s1308_s7 + $0x20] ss:$8 sps:$4 sm:$0xff]  }
  0x2a   : > { %761 = vmatpush1.bf16.msra.mxu0 %v1100_v8  ;;  %719 = vmatprep.subr.bf16.mxu1 %v1101_v9  ;;  %v1106_v12 = vld [vmem:[%s1308_s7 + $0x110] ss:$8 sps:$4 sm:$0xff]   ;;  %v1109_v14 = vld [vmem:[%s1308_s7 + $0x124] ss:$8 sps:$4 sm:$0xff]   ;;  %v1112_v16 = vld [vmem:[%s1308_s7 + $0x120] ss:$8 sps:$4 sm:$0xff]  }
  0x2b   : > { %762 = vmatprep.subr.bf16.mxu0 %v1103_v10  ;;  %v1113_v17 = vld [vmem:[%s1308_s7 + $0x34] ss:$8 sps:$4 sm:$0xff]   ;;  %v1117_v19 = vld [vmem:[%s1308_s7 + $0x30] ss:$8 sps:$4 sm:$0xff]   ;;  %v1119_v21 = vld [vmem:[%s1308_s7 + $0x44] ss:$8 sps:$4 sm:$0xff]  }
  0x2c   : > { %v1115_v18 = vld [vmem:[%s1308_s7 + $0x134] ss:$8 sps:$4 sm:$0xff]   ;;  %v1118_v20 = vld [vmem:[%s1308_s7 + $0x130] ss:$8 sps:$4 sm:$0xff]   ;;  %v1121_v22 = vld [vmem:[%s1308_s7 + $0x144] ss:$8 sps:$4 sm:$0xff]  }
  0x2d   : > { %720 = vmatpush1.bf16.msra.mxu1 %v1105_v11  ;;  %v1123_v23 = vld [vmem:[%s1308_s7 + $0x40] ss:$8 sps:$4 sm:$0xff]   ;;  %v1125_v25 = vld [vmem:[%s1308_s7 + $0x54] ss:$8 sps:$4 sm:$0xff]   ;;  %v1129_v27 = vld [vmem:[%s1308_s7 + $0x50] ss:$8 sps:$4 sm:$0xff]  }
  0x2e   : > { %763 = vmatpush1.bf16.msra.mxu0 %v1106_v12  ;;  %721 = vmatprep.subr.bf16.mxu1 %v1107_v13  ;;  %v1124_v24 = vld [vmem:[%s1308_s7 + $0x140] ss:$8 sps:$4 sm:$0xff]   ;;  %v1127_v26 = vld [vmem:[%s1308_s7 + $0x154] ss:$8 sps:$4 sm:$0xff]   ;;  %v1130_v28 = vld [vmem:[%s1308_s7 + $0x150] ss:$8 sps:$4 sm:$0xff]  }
  0x2f   : > { %764 = vmatprep.subr.bf16.mxu0 %v1109_v14  ;;  %v1131_v29 = vld [vmem:[%s1308_s7 + $0x64] ss:$8 sps:$4 sm:$0xff]   ;;  %v1135_v31 = vld [vmem:[%s1308_s7 + $0x60] ss:$8 sps:$4 sm:$0xff]   ;;  %v1137_v33 = vld [vmem:[%s1308_s7 + $0x74] ss:$8 sps:$4 sm:$0xff]  }
  0x30   : > { %v1133_v30 = vld [vmem:[%s1308_s7 + $0x164] ss:$8 sps:$4 sm:$0xff]   ;;  %v1136_v32 = vld [vmem:[%s1308_s7 + $0x160] ss:$8 sps:$4 sm:$0xff]   ;;  %v1139_v34 = vld [vmem:[%s1308_s7 + $0x174] ss:$8 sps:$4 sm:$0xff]  }
  0x31   : > { %722 = vmatpush1.bf16.msra.mxu1 %v1111_v15  ;;  %v1141_v35 = vld [vmem:[%s1308_s7 + $0x70] ss:$8 sps:$4 sm:$0xff]   ;;  %v1143_v37 = vld [vmem:[%s1308_s7 + $0x84] ss:$8 sps:$4 sm:$0xff]   ;;  %v1147_v39 = vld [vmem:[%s1308_s7 + $0x80] ss:$8 sps:$4 sm:$0xff]  }
  0x32   : > { %765 = vmatpush1.bf16.msra.mxu0 %v1112_v16  ;;  %723 = vmatprep.subr.bf16.mxu1 %v1113_v17  ;;  %v1142_v36 = vld [vmem:[%s1308_s7 + $0x170] ss:$8 sps:$4 sm:$0xff]   ;;  %v1145_v38 = vld [vmem:[%s1308_s7 + $0x184] ss:$8 sps:$4 sm:$0xff]   ;;  %v1148_v40 = vld [vmem:[%s1308_s7 + $0x180] ss:$8 sps:$4 sm:$0xff]  }
  0x33   : > { %766 = vmatprep.subr.bf16.mxu0 %v1115_v18  ;;  %v1149_v41 = vld [vmem:[%s1308_s7 + $0x94] ss:$8 sps:$4 sm:$0xff]   ;;  %v1153_v43 = vld [vmem:[%s1308_s7 + $0x90] ss:$8 sps:$4 sm:$0xff]   ;;  %v1155_v45 = vld [vmem:[%s1308_s7 + $0xa4] ss:$8 sps:$4 sm:$0xff]  }
  0x34   : > { %v1151_v42 = vld [vmem:[%s1308_s7 + $0x194] ss:$8 sps:$4 sm:$0xff]   ;;  %v1154_v44 = vld [vmem:[%s1308_s7 + $0x190] ss:$8 sps:$4 sm:$0xff]   ;;  %v1157_v46 = vld [vmem:[%s1308_s7 + $0x1a4] ss:$8 sps:$4 sm:$0xff]  }
  0x35   : > { %724 = vmatpush1.bf16.msra.mxu1 %v1117_v19  ;;  %v1159_v47 = vld [vmem:[%s1308_s7 + $0xa0] ss:$8 sps:$4 sm:$0xff]   ;;  %v1161_v49 = vld [vmem:[%s1308_s7 + $0xb4] ss:$8 sps:$4 sm:$0xff]   ;;  %v1165_v51 = vld [vmem:[%s1308_s7 + $0xb0] ss:$8 sps:$4 sm:$0xff]  }
  0x36   : > { %767 = vmatpush1.bf16.msra.mxu0 %v1118_v20  ;;  %725 = vmatprep.subr.bf16.mxu1 %v1119_v21  ;;  %v1160_v48 = vld [vmem:[%s1308_s7 + $0x1a0] ss:$8 sps:$4 sm:$0xff]   ;;  %v1163_v50 = vld [vmem:[%s1308_s7 + $0x1b4] ss:$8 sps:$4 sm:$0xff]   ;;  %v1166_v53 = vld [vmem:[%s1308_s7 + $0x1b0] ss:$8 sps:$4 sm:$0xff]  }
  0x37   : > { %768 = vmatprep.subr.bf16.mxu0 %v1121_v22  ;;  %v1193_v52 = vld [vmem:[%s1310_s8 + $0x4] ss:$16 sps:$4 sm:$0xff]   ;;  %v1196_v56 = vld [vmem:[%s1310_s8 + $0xc] ss:$16 sps:$4 sm:$0xff]   ;;  %v1171_v57 = vld [vmem:[%s1308_s7 + $0xc0] ss:$8 sps:$4 sm:$0xff]  }
  0x38   : > { %v1167_v54 = vld [vmem:[%s1308_s7 + $0xc4] ss:$8 sps:$4 sm:$0xff]   ;;  %749 = vmatprep.mubr.bf16.mxu1 %v1193_v52  ;;  %792 = vmatprep.mubr.bf16.mxu0 %v1196_v56  ;;  %v1172_v58 = vld [vmem:[%s1308_s7 + $0x1c0] ss:$8 sps:$4 sm:$0xff]   ;;  %v1173_v59 = vld [vmem:[%s1308_s7 + $0xd4] ss:$8 sps:$4 sm:$0xff]  }
  0x39   : > { %726 = vmatpush1.bf16.msra.mxu1 %v1123_v23  ;;  %v1169_v55 = vld [vmem:[%s1308_s7 + $0x1c4] ss:$8 sps:$4 sm:$0xff]   ;;  %v1175_v60 = vld [vmem:[%s1308_s7 + $0x1d4] ss:$8 sps:$4 sm:$0xff]   ;;  %v1177_v61 = vld [vmem:[%s1308_s7 + $0xd0] ss:$8 sps:$4 sm:$0xff]  }
  0x3a   : > { %769 = vmatpush1.bf16.msra.mxu0 %v1124_v24  ;;  %727 = vmatprep.subr.bf16.mxu1 %v1125_v25  ;;  %v1178_v62 = vld [vmem:[%s1308_s7 + $0x1d0] ss:$8 sps:$4 sm:$0xff]   ;;  %v1179_v63 = vld [vmem:[%s1308_s7 + $0xe4] ss:$8 sps:$4 sm:$0xff]   ;;  %v1183_v1 = vld [vmem:[%s1308_s7 + $0xe0] ss:$8 sps:$4 sm:$0xff]  }
  0x3b   : > { %770 = vmatprep.subr.bf16.mxu0 %v1127_v26  ;;  %v1181_v0 = vld [vmem:[%s1308_s7 + $0x1e4] ss:$8 sps:$4 sm:$0xff]   ;;  %v1184_v2 = vld [vmem:[%s1308_s7 + $0x1e0] ss:$8 sps:$4 sm:$0xff]   ;;  %v1185_v3 = vld [vmem:[%s1308_s7 + $0xf4] ss:$8 sps:$4 sm:$0xff]  }
  0x3c   : > { %v1187_v4 = vld [vmem:[%s1308_s7 + $0x1f4] ss:$8 sps:$4 sm:$0xff]   ;;  %v1189_v5 = vld [vmem:[%s1308_s7 + $0xf0] ss:$8 sps:$4 sm:$0xff]   ;;  %v305_v10 = vld [vmem:[#allocation2] sm:$0xff]  ;;  %p1043_p11 = scmp.ne.s32.totalorder %s1227_s14, 2 }
  0x3d   : > { %728 = vmatpush1.bf16.msra.mxu1 %v1129_v27  ;;  %v1190_v6 = vld [vmem:[%s1308_s7 + $0x1f0] ss:$8 sps:$4 sm:$0xff]   ;;  %v306_v14 = vld [vmem:[#allocation2 + $0x8] sm:$0xff] }
  0x3e   : > { %771 = vmatpush1.bf16.msra.mxu0 %v1130_v28  ;;  %729 = vmatprep.subr.bf16.mxu1 %v1131_v29  ;;  %v1191_v7 = vld [vmem:[%s1310_s8] ss:$16 sps:$4 sm:$0xff]   ;;  %v1194_v8 = vld [vmem:[%s1310_s8 + $0x8] ss:$16 sps:$4 sm:$0xff]   ;;  %v821_v29 = vlaneseq (!%p1043_p11) }
  0x3f   : > { %772 = vmatprep.subr.bf16.mxu0 %v1133_v30  ;;  %v307_v18 = vld [vmem:[#allocation2 + $0x10] sm:$0xff]  ;;  %v308_v23 = vld [vmem:[#allocation2 + $0x18] sm:$0xff] }
  0x40   : > { %v822_v30 = vshrl.u32 (!%p1043_p11), %v821_v29, 7 }
  0x41   : > { %730 = vmatpush1.bf16.msra.mxu1 %v1135_v31  ;;  %v819_v31 = vld [vmem:[%s1414_s2] sm:$0x3] (!%p1043_p11) }
  0x42   : > { %773 = vmatpush1.bf16.msra.mxu0 %v1136_v32  ;;  %731 = vmatprep.subr.bf16.mxu1 %v1137_v33  ;;  %v823_v33 = vsub.s32 (!%p1043_p11), 0, %v822_v30 }
  0x43   : > { %774 = vmatprep.subr.bf16.mxu0 %v1139_v34  ;;  %v827_v34 = vsub.s32 (!%p1043_p11), 1, %v822_v30 }
  0x45   : > { %732 = vmatpush1.bf16.msra.mxu1 %v1141_v35 }
  0x46   : > { %775 = vmatpush1.bf16.msra.mxu0 %v1142_v36  ;;  %733 = vmatprep.subr.bf16.mxu1 %v1143_v37 }
  0x47   : > { %776 = vmatprep.subr.bf16.mxu0 %v1145_v38  ;;  %v824_v38 = vrot.slane (!%p1043_p11), %v819_v31, %v823_v33 }
  0x49   : > { %734 = vmatpush1.bf16.msra.mxu1 %v1147_v39  ;;  %v828_v39 = vrot.slane (!%p1043_p11), %v819_v31, %v827_v34 }
  0x4a   : > { %777 = vmatpush1.bf16.msra.mxu0 %v1148_v40  ;;  %735 = vmatprep.subr.bf16.mxu1 %v1149_v41 }
  0x4b   : > { %778 = vmatprep.subr.bf16.mxu0 %v1151_v42 }
  0x4d   : > { %736 = vmatpush1.bf16.msra.mxu1 %v1153_v43 }
  0x4e   : > { %779 = vmatpush1.bf16.msra.mxu0 %v1154_v44  ;;  %737 = vmatprep.subr.bf16.mxu1 %v1155_v45 }
  0x4f   : > { %780 = vmatprep.subr.bf16.mxu0 %v1157_v46 }
  0x51   : > { %738 = vmatpush1.bf16.msra.mxu1 %v1159_v47 }
  0x52   : > { %781 = vmatpush1.bf16.msra.mxu0 %v1160_v48  ;;  %739 = vmatprep.subr.bf16.mxu1 %v1161_v49 }
  0x53   : > { %782 = vmatprep.subr.bf16.mxu0 %v1163_v50 }
  0x55   : > { %740 = vmatpush1.bf16.msra.mxu1 %v1165_v51 }
  0x56   : > { %783 = vmatpush1.bf16.msra.mxu0 %v1166_v53  ;;  %741 = vmatprep.subr.bf16.mxu1 %v1167_v54 }
  0x57   : > { %784 = vmatprep.subr.bf16.mxu0 %v1169_v55 }
  0x59   : > { %742 = vmatpush1.bf16.msra.mxu1 %v1171_v57 }
  0x5a   : > { %785 = vmatpush1.bf16.msra.mxu0 %v1172_v58  ;;  %743 = vmatprep.subr.bf16.mxu1 %v1173_v59 }
  0x5b   : > { %786 = vmatprep.subr.bf16.mxu0 %v1175_v60 }
  0x5d   : > { %744 = vmatpush1.bf16.msra.mxu1 %v1177_v61 }
  0x5e   : > { %787 = vmatpush1.bf16.msra.mxu0 %v1178_v62  ;;  %745 = vmatprep.subr.bf16.mxu1 %v1179_v63 }
  0x5f   : > { %788 = vmatprep.subr.bf16.mxu0 %v1181_v0 }
  0x61   : > { %746 = vmatpush1.bf16.msra.mxu1 %v1183_v1 }
  0x62   : > { %789 = vmatpush1.bf16.msra.mxu0 %v1184_v2  ;;  %747 = vmatprep.subr.bf16.mxu1 %v1185_v3 }
  0x63   : > { %790 = vmatprep.subr.bf16.mxu0 %v1187_v4 }
  0x65   : > { %748 = vmatpush1.bf16.msra.mxu1 %v1189_v5 }
  0x66   : > { %791 = vmatpush1.bf16.msra.mxu0 %v1190_v6 }
  0x68   : > { %750 = vmatmul.mubr.bf16.vlgmr.msra.gmra.mrb[0].mxu1 %v1191_v7 }
  0x69   : > { %793 = vmatmul.mubr.bf16.vlgmr.msra.gmra.mrb[0].mxu0 %v1194_v8 }
 0x13b   : > { %v751_v9 = vpop.f32.mrb[0].mxu1 }
 0x13c   : > { %v794_v11 = vpop.f32.mrb[0].mxu0  ;;  %v753_v13 = vpop.f32.mrb[1].mxu1 }
 0x13d   : > { %v795_v12 = vadd.f32 %v794_v11, %v751_v9  ;;  %v796_v15 = vpop.f32.mrb[1].mxu0  ;;  %v755_v17 = vpop.f32.mrb[2].mxu1 }
 0x13e   : > { %v797_v16 = vadd.f32 %v796_v15, %v753_v13  ;;  %v798_v19 = vpop.f32.mrb[2].mxu0  ;;  %v757_v22 = vpop.f32.mrb[3].mxu1  ;;  %814 = sbr.rel (%p1043_p11) target bundleno = 335 (0x14f), region = 63 }
 0x13f   : > { %v803_v20 = vadd.f32 %v795_v12, %v305_v10  ;;  %v799_v21 = vadd.f32 %v798_v19, %v755_v17  ;;  %v800_v24 = vpop.f32.mrb[3].mxu0 }
 0x140   : > { %v804_v25 = vadd.f32 %v797_v16, %v306_v14  ;;  %v801_v26 = vadd.f32 %v800_v24, %v757_v22 }
 0x141   : > { %807 = vst [vmem:[#allocation2] sm:$0xff] %v803_v20  ;;  %v805_v27 = vadd.f32 %v799_v21, %v307_v18 }
 0x142   : > { %808 = vst [vmem:[#allocation2 + $0x8] sm:$0xff] %v804_v25  ;;  %v806_v28 = vadd.f32 %v801_v26, %v308_v23 }
 0x143   : > { %809 = vst [vmem:[#allocation2 + $0x10] sm:$0xff] %v805_v27 }
 0x144   : > { %810 = vst [vmem:[#allocation2 + $0x18] sm:$0xff] %v806_v28 }
 0x148   : > { %v815_v32 = vld [vmem:[#allocation2] sm:$0xff] }
 0x149   : > { %v816_v35 = vld [vmem:[#allocation2 + $0x8] sm:$0xff]  ;;  %v831_v40 = vadd.f32 %v824_v38, %v815_v32 }
 0x14a   : > { %v817_v36 = vld [vmem:[#allocation2 + $0x10] sm:$0xff]  ;;  %v832_v41 = vadd.f32 %v828_v39, %v816_v35 }
 0x14b   : > { %v818_v37 = vld [vmem:[#allocation2 + $0x18] sm:$0xff]  ;;  %v833_v42 = vadd.f32 %v824_v38, %v817_v36  ;;  %835 = vst [vmem:[%s1415_s3] sm:$0xff] %v831_v40 }
 0x14c   : > { %v834_v43 = vadd.f32 %v828_v39, %v818_v37  ;;  %836 = vst [vmem:[%s1415_s3 + $0x8] sm:$0xff] %v832_v41 }
 0x14d   : > { %837 = vst [vmem:[%s1415_s3 + $0x10] sm:$0xff] %v833_v42 }
 0x14e   : > { %838 = vst [vmem:[%s1415_s3 + $0x18] sm:$0xff] %v834_v43 }
 0x14f PF: > { %s13_s16 = sadd.s32 1, %s1235_s16   ;;  %s1416_s12 = smov %s1223_s13 }
 0x150   : > { %p10_p12 = scmp.ge.s32.totalorder %s13_s16, 5   ;;  %s1417_s13 = smov %s1293_s20 }
 0x151   : > { %s1418_s14 = smov %s1231_s15  ;;  %s1419_s15 = smov %s1421_s17 }
 0x152   :  { %12 = sbr.rel (!%p10_p12) target bundleno = 3 (0x3), region = 104 }

// kernel: net1_forward.46
= control target key start
LH: loop header
LB: loop body
LE: loop exit
PB: predicated region body
PF: predicated region fallthrough
CT: control target
= control target key end

     0   :  { %s741_s12 = smov 0   ;;  %s929_s0 = inlined_call_operand.vmem [shape: f32[64,4,16], index: 0, kind: input, shape index: {}]   ;;  %s930_s1 = inlined_call_operand.vmem [shape: f32[64,4,1], index: 1, kind: input, shape index: {}]   ;;  %s931_s2 = inlined_call_operand.vmem [shape: f32[64,4,1], index: 2, kind: input, shape index: {}]   ;;  %s932_s3 = inlined_call_operand.vmem [shape: f32[64,4,16], index: 3, kind: output, shape index: {}]  }
   0x1 LB: > { %s670_s13 = sadd.s32 4294967295, %s718_s12   ;;  %p674_p0 = scmp.ge.s32.totalorder %s718_s12, 1  ;;  %s718_s12 = sphi %s741_s12, %s13_s12  }
   0x2   : > { %p160_p1 = scmp.lt.s32.totalorder %s718_s12, 9 }
   0x4   : > { %p161_p2 = pnand %p674_p0, %p160_p1 }
   0x5   : > { %s675_s14 = sshll.u32 (!%p161_p2), %s670_s13, 3  ;;  %v720_v0 = vmov (!%p161_p2), 0   ;;  %vm226_vm0 = vcmask (!%p161_p2), 125952   ;;  %vm260_vm1 = vcmask (!%p161_p2), 1043456  }
   0x6   : > { %164 = sbr.rel (%p161_p2) target bundleno = 381 (0x17d), region = 32  ;;  %p195_p3 = scmp.lt.s32.totalorder (!%p161_p2), %s675_s14, 63  ;;  %695 = vset.pattern.permute.xlu1 (!%p161_p2), %v720_v0  ;;  %694 = vset.pattern.permute.xlu0 (!%p161_p2), %v720_v0 }
   0xd   : > { %s934_s14 = smov (!%p195_p3, %s675_s14), 63 }
   0xe   : > { %s749_s15 = sshll.u32 %s934_s14, 2 }
   0xf   : > { %s198_s18 = scalar_lea.vmem %s929_s0, %s749_s15  ;;  %s204_s21 = scalar_lea.vmem %s930_s1, %s749_s15 }
  0x10   : > { %v755_v1 = vld [vmem:[%s198_s18 + $0x8] sm:$0xf]  ;;  %v757_v2 = vld [vmem:[%s198_s18] sm:$0xf]  ;;  %v759_v3 = vld [vmem:[%s198_s18 + $0xc] sm:$0xf]  ;;  %s795_s24 = scalar_lea.vmem %s931_s2, %s749_s15  ;;  %s896_s27 = scalar_lea.vmem %s932_s3, %s749_s15 }
  0x11   : > { %v233_v4 = vsel %vm226_vm0, %v755_v1, 0.0  ;;  %v227_v5 = vsel %vm226_vm0, %v757_v2, 0.0  ;;  %v765_v6 = vld [vmem:[%s198_s18 + $0x4] sm:$0xf]  ;;  %v236_v7 = vsel %vm226_vm0, %v759_v3, 0.0 }
  0x12   : > { %234 = vadd.xlane.f32.xlu1 %v233_v4  ;;  %228 = vadd.xlane.f32.xlu0 %v227_v5  ;;  %v230_v8 = vsel %vm226_vm0, %v765_v6, 0.0  ;;  %v771_v9 = vld [vmem:[%s198_s18 + $0x14] sm:$0xf]  ;;  %v773_v10 = vld [vmem:[%s198_s18 + $0x10] sm:$0xf] }
  0x13   : > { %v242_v11 = vsel %vm226_vm0, %v771_v9, 0.0  ;;  %v239_v12 = vsel %vm226_vm0, %v773_v10, 0.0  ;;  %v779_v13 = vld [vmem:[%s198_s18 + $0x1c] sm:$0xf]  ;;  %v781_v14 = vld [vmem:[%s198_s18 + $0x18] sm:$0xf] }
  0x14   : > { %v248_v15 = vsel %vm226_vm0, %v779_v13, 0.0  ;;  %v245_v16 = vsel %vm226_vm0, %v781_v14, 0.0  ;;  %v463_v17 = vld [vmem:[%s204_s21 + $0x4] sm:$0xf]  ;;  %v464_v18 = vld [vmem:[%s204_s21 + $0x8] sm:$0xf] }
  0x15   : > { %v462_v19 = vld [vmem:[%s204_s21] sm:$0xf]  ;;  %v465_v20 = vld [vmem:[%s204_s21 + $0xc] sm:$0xf]  ;;  %v466_v21 = vld [vmem:[%s204_s21 + $0x10] sm:$0xf] }
  0x16   : > { %237 = vadd.xlane.f32.xlu1 %v236_v7  ;;  %231 = vadd.xlane.f32.xlu0 %v230_v8  ;;  %v467_v22 = vld [vmem:[%s204_s21 + $0x14] sm:$0xf]  ;;  %v468_v23 = vld [vmem:[%s204_s21 + $0x18] sm:$0xf]  ;;  %v469_v24 = vld [vmem:[%s204_s21 + $0x1c] sm:$0xf] }
  0x17   : > { %v518_v25 = vld [vmem:[%s795_s24] sm:$0xf] }
  0x1a   : > { %243 = vadd.xlane.f32.xlu1 %v242_v11  ;;  %240 = vadd.xlane.f32.xlu0 %v239_v12 }
  0x1e   : > { %249 = vadd.xlane.f32.xlu1 %v248_v15  ;;  %246 = vadd.xlane.f32.xlu0 %v245_v16 }
  0x2f   : > { %477 = vperm.xlu1 %695, %v463_v17  }
  0x33   : > { %482 = vperm.xlu1 %695, %v464_v18  }
  0x34   : > { %472 = vperm.xlu0 %694, %v462_v19  }
  0x37   : > { %487 = vperm.xlu1 %695, %v465_v20  }
  0x3b   : > { %492 = vperm.xlu1 %695, %v466_v21  }
  0x3f   : > { %497 = vperm.xlu1 %695, %v467_v22  }
  0x43   : > { %502 = vperm.xlu1 %695, %v468_v23  }
  0x47   : > { %507 = vperm.xlu1 %695, %v469_v24  }
  0x4b   : > { %528 = vperm.xlu1 %695, %v518_v25  }
  0x9f   : > { %v235_v26 = vpop.xlane.xlu1 %234  ;;  %v229_v27 = vpop.xlane.xlu0 %228 }
  0xa0   : > { %v254_v28 = vmul.f32 0.0625, %v235_v26  ;;  %v252_v29 = vmul.f32 0.0625, %v229_v27 }
  0xa2   : > { %v275_v30 = vsel %vm260_vm1, %v254_v28, 0.0  ;;  %v261_v31 = vsel %vm260_vm1, %v252_v29, 0.0 }
  0xa3   : > { %v276_v32 = vrot.slane %v275_v30, 4  ;;  %v262_v33 = vrot.slane %v261_v31, 4  ;;  %v238_v34 = vpop.xlane.xlu1 %237  ;;  %v232_v35 = vpop.xlane.xlu0 %231 }
  0xa4   : > { %v255_v36 = vmul.f32 0.0625, %v238_v34  ;;  %v253_v37 = vmul.f32 0.0625, %v232_v35 }
  0xa5   : > { %v277_v38 = vadd.f32 %v276_v32, %v275_v30  ;;  %v263_v39 = vadd.f32 %v262_v33, %v261_v31 }
  0xa6   : > { %v282_v40 = vsel %vm260_vm1, %v255_v36, 0.0  ;;  %v268_v41 = vsel %vm260_vm1, %v253_v37, 0.0 }
  0xa7   : > { %v278_v42 = vrot.slane %v277_v38, 2  ;;  %v264_v43 = vrot.slane %v263_v39, 2  ;;  %v283_v44 = vrot.slane %v282_v40, 4  ;;  %v269_v45 = vrot.slane %v268_v41, 4  ;;  %v244_v46 = vpop.xlane.xlu1 %243  ;;  %v241_v47 = vpop.xlane.xlu0 %240 }
  0xa8   : > { %v257_v48 = vmul.f32 0.0625, %v244_v46  ;;  %v256_v49 = vmul.f32 0.0625, %v241_v47 }
  0xa9   : > { %v279_v50 = vadd.f32 %v278_v42, %v277_v38  ;;  %v265_v51 = vadd.f32 %v264_v43, %v263_v39  ;;  %v284_v52 = vadd.f32 %v283_v44, %v282_v40  ;;  %v270_v53 = vadd.f32 %v269_v45, %v268_v41 }
  0xaa   : > { %v296_v54 = vsel %vm260_vm1, %v257_v48, 0.0  ;;  %v289_v55 = vsel %vm260_vm1, %v256_v49, 0.0 }
  0xab   : > { %v280_v56 = vrot.slane %v279_v50, 1  ;;  %v266_v57 = vrot.slane %v265_v51, 1  ;;  %v285_v58 = vrot.slane %v284_v52, 2  ;;  %v271_v59 = vrot.slane %v270_v53, 2  ;;  %v250_v60 = vpop.xlane.xlu1 %249  ;;  %v247_v61 = vpop.xlane.xlu0 %246 }
  0xac   : > { %v297_v62 = vrot.slane %v296_v54, 4  ;;  %v290_v63 = vrot.slane %v289_v55, 4  ;;  %v259_v0 = vmul.f32 0.0625, %v250_v60  ;;  %v258_v4 = vmul.f32 0.0625, %v247_v61 }
  0xad   : > { %v286_v5 = vadd.f32 %v285_v58, %v284_v52  ;;  %v272_v7 = vadd.f32 %v271_v59, %v270_v53  ;;  %v267_v8 = vadd.f32 %v266_v57, %v265_v51  ;;  %v281_v11 = vadd.f32 %v280_v56, %v279_v50 }
  0xae   : > { %v298_v12 = vadd.f32 %v297_v62, %v296_v54  ;;  %v291_v15 = vadd.f32 %v290_v63, %v289_v55  ;;  %v310_v16 = vsel %vm260_vm1, %v259_v0, 0.0  ;;  %v303_v17 = vsel %vm260_vm1, %v258_v4, 0.0 }
  0xaf   : > { %v287_v18 = vrot.slane %v286_v5, 1  ;;  %v273_v19 = vrot.slane %v272_v7, 1  ;;  %v311_v20 = vrot.slane %v310_v16, 4  ;;  %v304_v21 = vrot.slane %v303_v17, 4 }
  0xb0   : > { %v299_v22 = vrot.slane %v298_v12, 2  ;;  %v292_v23 = vrot.slane %v291_v15, 2  ;;  %v318_v24 = vmul.f32 0.25, %v267_v8  ;;  %v320_v25 = vmul.f32 0.25, %v281_v11  ;;  %v522_v8 = vld [vmem:[%s795_s24 + $0x10] sm:$0xf] }
  0xb1   : > { %v312_v26 = vadd.f32 %v311_v20, %v310_v16  ;;  %v305_v27 = vadd.f32 %v304_v21, %v303_v17  ;;  %v274_v28 = vadd.f32 %v273_v19, %v272_v7  ;;  %v288_v29 = vadd.f32 %v287_v18, %v286_v5  ;;  %v520_v5 = vld [vmem:[%s795_s24 + $0x8] sm:$0xf]  ;;  %v519_v7 = vld [vmem:[%s795_s24 + $0x4] sm:$0xf]  ;;  %v521_v11 = vld [vmem:[%s795_s24 + $0xc] sm:$0xf]  ;;  %v861_v17 = vpop.permute.xlu1 %477 }
  0xb2   : > { %v300_v30 = vadd.f32 %v299_v22, %v298_v12  ;;  %v293_v31 = vadd.f32 %v292_v23, %v291_v15  ;;  %v807_v32 = vsub.f32 %v757_v2, %v318_v24  ;;  %v810_v33 = vsub.f32 %v755_v1, %v320_v25  ;;  %v524_v12 = vld [vmem:[%s795_s24 + $0x18] sm:$0xf]  ;;  %v523_v15 = vld [vmem:[%s795_s24 + $0x14] sm:$0xf]  ;;  %v525_v16 = vld [vmem:[%s795_s24 + $0x1c] sm:$0xf] }
  0xb3   : > { %v313_v34 = vrot.slane %v312_v26, 2  ;;  %v306_v35 = vrot.slane %v305_v27, 2  ;;  %v319_v36 = vmul.f32 0.25, %v274_v28  ;;  %v321_v37 = vmul.f32 0.25, %v288_v29  ;;  %v875_v24 = vpop.permute.xlu0 %472 }
  0xb4   : > { %v301_v38 = vrot.slane %v300_v30, 1  ;;  %v294_v39 = vrot.slane %v293_v31, 1  ;;  %v334_v40 = vmul.f32 %v807_v32, %v807_v32  ;;  %v336_v44 = vmul.f32 %v810_v33, %v810_v33 }
  0xb5   : > { %v314_v41 = vadd.f32 %v313_v34, %v312_v26  ;;  %v307_v42 = vadd.f32 %v306_v35, %v305_v27  ;;  %v815_v43 = vsub.f32 %v765_v6, %v319_v36  ;;  %v818_v2 = vsub.f32 %v759_v3, %v321_v37  ;;  %v863_v18 = vpop.permute.xlu1 %482 }
  0xb6   : > { %v342_v1 = vsel %vm226_vm0, %v334_v40, 0.0  ;;  %v295_v45 = vadd.f32 %v294_v39, %v293_v31  ;;  %v302_v46 = vadd.f32 %v301_v38, %v300_v30  ;;  %v348_v54 = vsel %vm226_vm0, %v336_v44, 0.0 }
  0xb7   : > { %v315_v47 = vrot.slane %v314_v41, 1  ;;  %v308_v48 = vrot.slane %v307_v42, 1  ;;  %343 = vadd.xlane.f32.xlu0 %v342_v1  ;;  %v335_v49 = vmul.f32 %v815_v43, %v815_v43  ;;  %v337_v3 = vmul.f32 %v818_v2, %v818_v2 }
  0xb8   : > { %v322_v50 = vmul.f32 0.25, %v295_v45  ;;  %v323_v51 = vmul.f32 0.25, %v302_v46 }
  0xb9   : > { %v345_v6 = vsel %vm226_vm0, %v335_v49, 0.0  ;;  %v309_v52 = vadd.f32 %v308_v48, %v307_v42  ;;  %v316_v53 = vadd.f32 %v315_v47, %v314_v41  ;;  %v351_v60 = vsel %vm226_vm0, %v337_v3, 0.0  ;;  %v865_v19 = vpop.permute.xlu1 %487 }
  0xba   : > { %346 = vadd.xlane.f32.xlu1 %v345_v6  ;;  %v830_v55 = vsub.f32 %v773_v10, %v322_v50  ;;  %v833_v56 = vsub.f32 %v771_v9, %v323_v51 }
  0xbb   : > { %349 = vadd.xlane.f32.xlu0 %v348_v54  ;;  %v324_v57 = vmul.f32 0.25, %v309_v52  ;;  %v325_v58 = vmul.f32 0.25, %v316_v53 }
  0xbc   : > { %v338_v59 = vmul.f32 %v830_v55, %v830_v55  ;;  %v339_v61 = vmul.f32 %v833_v56, %v833_v56 }
  0xbd   : > { %v841_v62 = vsub.f32 %v781_v14, %v324_v57  ;;  %v844_v9 = vsub.f32 %v779_v13, %v325_v58  ;;  %v867_v20 = vpop.permute.xlu1 %492 }
  0xbe   : > { %352 = vadd.xlane.f32.xlu1 %v351_v60  ;;  %v354_v10 = vsel %vm226_vm0, %v338_v59, 0.0  ;;  %v357_v0 = vsel %vm226_vm0, %v339_v61, 0.0 }
  0xbf   : > { %355 = vadd.xlane.f32.xlu0 %v354_v10  ;;  %v340_v63 = vmul.f32 %v841_v62, %v841_v62  ;;  %v341_v14 = vmul.f32 %v844_v9, %v844_v9 }
  0xc1   : > { %v360_v4 = vsel %vm226_vm0, %v340_v63, 0.0  ;;  %v363_v13 = vsel %vm226_vm0, %v341_v14, 0.0  ;;  %v869_v21 = vpop.permute.xlu1 %497 }
  0xc2   : > { %358 = vadd.xlane.f32.xlu1 %v357_v0 }
  0xc3   : > { %361 = vadd.xlane.f32.xlu0 %v360_v4 }
  0xc5   : > { %v871_v22 = vpop.permute.xlu1 %502 }
  0xc6   : > { %364 = vadd.xlane.f32.xlu1 %v363_v13 }
  0xc9   : > { %v873_v23 = vpop.permute.xlu1 %507 }
  0xcd   : > { %v877_v25 = vpop.permute.xlu1 %528 }
  0xd7   : > { %538 = vperm.xlu1 %695, %v520_v5  }
  0xd9   : > { %533 = vperm.xlu0 %694, %v519_v7  }
  0xdb   : > { %548 = vperm.xlu1 %695, %v522_v8  }
  0xdd   : > { %543 = vperm.xlu0 %694, %v521_v11  }
  0xdf   : > { %558 = vperm.xlu1 %695, %v524_v12  }
  0xe1   : > { %553 = vperm.xlu0 %694, %v523_v15  }
  0xe5   : > { %563 = vperm.xlu0 %694, %v525_v16  }
 0x144   : > { %v344_v26 = vpop.xlane.xlu0 %343 }
 0x145   : > { %v366_v27 = vmul.f32 0.0625, %v344_v26 }
 0x147   : > { %v374_v28 = vsel %vm260_vm1, %v366_v27, 0.0  ;;  %v347_v29 = vpop.xlane.xlu1 %346 }
 0x148   : > { %v375_v30 = vrot.slane %v374_v28, 4  ;;  %v367_v31 = vmul.f32 0.0625, %v347_v29  ;;  %v350_v34 = vpop.xlane.xlu0 %349 }
 0x149   : > { %v368_v35 = vmul.f32 0.0625, %v350_v34 }
 0x14a   : > { %v376_v36 = vadd.f32 %v375_v30, %v374_v28  ;;  %v381_v37 = vsel %vm260_vm1, %v367_v31, 0.0 }
 0x14b   : > { %v382_v38 = vrot.slane %v381_v37, 4  ;;  %v388_v39 = vsel %vm260_vm1, %v368_v35, 0.0  ;;  %v353_v40 = vpop.xlane.xlu1 %352 }
 0x14c   : > { %v377_v41 = vrot.slane %v376_v36, 2  ;;  %v389_v42 = vrot.slane %v388_v39, 4  ;;  %v369_v1 = vmul.f32 0.0625, %v353_v40  ;;  %v356_v44 = vpop.xlane.xlu0 %355 }
 0x14d   : > { %v383_v45 = vadd.f32 %v382_v38, %v381_v37  ;;  %v370_v46 = vmul.f32 0.0625, %v356_v44 }
 0x14e   : > { %v378_v47 = vadd.f32 %v377_v41, %v376_v36  ;;  %v390_v48 = vadd.f32 %v389_v42, %v388_v39  ;;  %v395_v49 = vsel %vm260_vm1, %v369_v1, 0.0 }
 0x14f   : > { %v384_v50 = vrot.slane %v383_v45, 2  ;;  %v396_v51 = vrot.slane %v395_v49, 4  ;;  %v402_v6 = vsel %vm260_vm1, %v370_v46, 0.0  ;;  %v359_v3 = vpop.xlane.xlu1 %358 }
 0x150   : > { %v379_v52 = vrot.slane %v378_v47, 1  ;;  %v391_v53 = vrot.slane %v390_v48, 2  ;;  %v403_v54 = vrot.slane %v402_v6, 4  ;;  %v371_v57 = vmul.f32 0.0625, %v359_v3  ;;  %v362_v58 = vpop.xlane.xlu0 %361 }
 0x151   : > { %v385_v59 = vadd.f32 %v384_v50, %v383_v45  ;;  %v397_v60 = vadd.f32 %v396_v51, %v395_v49  ;;  %v372_v61 = vmul.f32 0.0625, %v362_v58 }
 0x152   : > { %v380_v10 = vadd.f32 %v379_v52, %v378_v47  ;;  %v392_v63 = vadd.f32 %v391_v53, %v390_v48  ;;  %v404_v0 = vadd.f32 %v403_v54, %v402_v6  ;;  %v409_v4 = vsel %vm260_vm1, %v371_v57, 0.0 }
 0x153   : > { %v386_v14 = vrot.slane %v385_v59, 1  ;;  %v398_v13 = vrot.slane %v397_v60, 2  ;;  %v410_v5 = vrot.slane %v409_v4, 4  ;;  %v416_v7 = vsel %vm260_vm1, %v372_v61, 0.0  ;;  %v365_v8 = vpop.xlane.xlu1 %364 }
 0x154   : > { %v430_v11 = vmul.f32 0.25, %v380_v10  ;;  %v393_v12 = vrot.slane %v392_v63, 1  ;;  %v405_v15 = vrot.slane %v404_v0, 2  ;;  %v417_v16 = vrot.slane %v416_v7, 4 }
 0x155   : > { %v387_v26 = vadd.f32 %v386_v14, %v385_v59  ;;  %v399_v27 = vadd.f32 %v398_v13, %v397_v60  ;;  %v411_v28 = vadd.f32 %v410_v5, %v409_v4  ;;  %v373_v29 = vmul.f32 0.0625, %v365_v8 }
 0x156   : > { %v438_v30 = vadd.f32 1e-05, %v430_v11  ;;  %v394_v31 = vadd.f32 %v393_v12, %v392_v63  ;;  %v406_v34 = vadd.f32 %v405_v15, %v404_v0  ;;  %v418_v35 = vadd.f32 %v417_v16, %v416_v7 }
 0x157   : > { %v431_v36 = vmul.f32 0.25, %v387_v26  ;;  %v400_v37 = vrot.slane %v399_v27, 1  ;;  %v412_v38 = vrot.slane %v411_v28, 2  ;;  %v423_v39 = vsel %vm260_vm1, %v373_v29, 0.0  ;;  %v539_v16 = vpop.permute.xlu1 %538 }
 0x158   : > { %696 = vrsqrt.f32 %v438_v30  ;;  %v432_v40 = vmul.f32 0.25, %v394_v31  ;;  %v407_v41 = vrot.slane %v406_v34, 1  ;;  %v419_v42 = vrot.slane %v418_v35, 2  ;;  %v534_v12 = vpop.permute.xlu0 %533 }
 0x159   : > { %v439_v1 = vadd.f32 1e-05, %v431_v36  ;;  %v401_v44 = vadd.f32 %v400_v37, %v399_v27  ;;  %v413_v45 = vadd.f32 %v412_v38, %v411_v28  ;;  %v424_v46 = vrot.slane %v423_v39, 4 }
 0x15a   : > { %v440_v47 = vadd.f32 1e-05, %v432_v40  ;;  %v408_v48 = vadd.f32 %v407_v41, %v406_v34  ;;  %v420_v49 = vadd.f32 %v419_v42, %v418_v35 }
 0x15b   : > { %698 = vrsqrt.f32 %v439_v1  ;;  %v433_v50 = vmul.f32 0.25, %v401_v44  ;;  %v414_v51 = vrot.slane %v413_v45, 1  ;;  %v425_v6 = vadd.f32 %v424_v46, %v423_v39  ;;  %v549_v38 = vpop.permute.xlu1 %548 }
 0x15c   : > { %700 = vrsqrt.f32 %v440_v47  ;;  %v434_v3 = vmul.f32 0.25, %v408_v48  ;;  %v421_v52 = vrot.slane %v420_v49, 1  ;;  %v544_v36 = vpop.permute.xlu0 %543 }
 0x15d   : > { %v441_v53 = vadd.f32 1e-05, %v433_v50  ;;  %v415_v54 = vadd.f32 %v414_v51, %v413_v45  ;;  %v426_v57 = vrot.slane %v425_v6, 2 }
 0x15e   : > { %v442_v58 = vadd.f32 1e-05, %v434_v3  ;;  %v422_v59 = vadd.f32 %v421_v52, %v420_v49 }
 0x15f   : > { %702 = vrsqrt.f32 %v441_v53  ;;  %v435_v60 = vmul.f32 0.25, %v415_v54  ;;  %v427_v61 = vadd.f32 %v426_v57, %v425_v6  ;;  %v559_v47 = vpop.permute.xlu1 %558 }
 0x160   : > { %704 = vrsqrt.f32 %v442_v58  ;;  %v436_v10 = vmul.f32 0.25, %v422_v59  ;;  %v554_v46 = vpop.permute.xlu0 %553 }
 0x161   : > { %v443_v63 = vadd.f32 1e-05, %v435_v60  ;;  %v428_v0 = vrot.slane %v427_v61, 1 }
 0x162   : > { %v697_v4 = vpop.eup %696  ;;  %v444_v14 = vadd.f32 1e-05, %v436_v10 }
 0x163   : > { %v454_v13 = vmul.f32 %v697_v4, %v807_v32  ;;  %706 = vrsqrt.f32 %v443_v63  ;;  %v429_v5 = vadd.f32 %v428_v0, %v427_v61 }
 0x164   : > { %708 = vrsqrt.f32 %v444_v14 }
 0x165   : > { %v699_v7 = vpop.eup %698  ;;  %v510_v8 = vmul.f32 %v875_v24, %v454_v13  ;;  %v437_v11 = vmul.f32 0.25, %v429_v5 }
 0x166   : > { %v701_v15 = vpop.eup %700  ;;  %v455_v26 = vmul.f32 %v699_v7, %v815_v43 }
 0x167   : > { %v566_v27 = vadd.f32 %v877_v25, %v510_v8  ;;  %v445_v28 = vadd.f32 1e-05, %v437_v11  ;;  %v456_v29 = vmul.f32 %v701_v15, %v810_v33 }
 0x168   : > { %v511_v32 = vmul.f32 %v861_v17, %v455_v26 }
 0x169   : > { %v703_v24 = vpop.eup %702  ;;  %v574_v30 = vmax.f32 %v566_v27, 0.0  ;;  %710 = vrsqrt.f32 %v445_v28  ;;  %v512_v31 = vmul.f32 %v863_v18, %v456_v29 }
 0x16a   : > { %v705_v43 = vpop.eup %704  ;;  %v567_v34 = vadd.f32 %v534_v12, %v511_v32  ;;  %v457_v25 = vmul.f32 %v703_v24, %v818_v2 }
 0x16b   : > { %v568_v33 = vadd.f32 %v539_v16, %v512_v31  ;;  %582 = vst.msk [vmem:[%s896_s27] sm:$0xf] %vm226_vm0, %v574_v30  ;;  %v458_v35 = vmul.f32 %v705_v43, %v830_v55 }
 0x16c   : > { %v575_v37 = vmax.f32 %v567_v34, 0.0  ;;  %v513_v17 = vmul.f32 %v865_v19, %v457_v25 }
 0x16d   : > { %v707_v39 = vpop.eup %706  ;;  %v576_v40 = vmax.f32 %v568_v33, 0.0  ;;  %v514_v18 = vmul.f32 %v867_v20, %v458_v35 }
 0x16e   : > { %v709_v41 = vpop.eup %708  ;;  %583 = vst.msk [vmem:[%s896_s27 + $0x4] sm:$0xf] %vm226_vm0, %v575_v37  ;;  %v569_v2 = vadd.f32 %v544_v36, %v513_v17  ;;  %v459_v42 = vmul.f32 %v707_v39, %v833_v56 }
 0x16f   : > { %584 = vst.msk [vmem:[%s896_s27 + $0x8] sm:$0xf] %vm226_vm0, %v576_v40  ;;  %v570_v55 = vadd.f32 %v549_v38, %v514_v18  ;;  %v460_v1 = vmul.f32 %v709_v41, %v841_v62 }
 0x170   : > { %v577_v44 = vmax.f32 %v569_v2, 0.0  ;;  %v515_v19 = vmul.f32 %v869_v21, %v459_v42 }
 0x171   : > { %v578_v45 = vmax.f32 %v570_v55, 0.0  ;;  %v516_v20 = vmul.f32 %v871_v22, %v460_v1  ;;  %v564_v22 = vpop.permute.xlu0 %563 }
 0x172   : > { %585 = vst.msk [vmem:[%s896_s27 + $0xc] sm:$0xf] %vm226_vm0, %v577_v44  ;;  %v571_v48 = vadd.f32 %v554_v46, %v515_v19 }
 0x173   : > { %v711_v56 = vpop.eup %710  ;;  %586 = vst.msk [vmem:[%s896_s27 + $0x10] sm:$0xf] %vm226_vm0, %v578_v45  ;;  %v572_v49 = vadd.f32 %v559_v47, %v516_v20 }
 0x174   : > { %v579_v50 = vmax.f32 %v571_v48, 0.0  ;;  %v461_v62 = vmul.f32 %v711_v56, %v844_v9 }
 0x175   : > { %v580_v51 = vmax.f32 %v572_v49, 0.0 }
 0x176   : > { %587 = vst.msk [vmem:[%s896_s27 + $0x14] sm:$0xf] %vm226_vm0, %v579_v50  ;;  %v517_v21 = vmul.f32 %v873_v23, %v461_v62 }
 0x177   : > { %588 = vst.msk [vmem:[%s896_s27 + $0x18] sm:$0xf] %vm226_vm0, %v580_v51 }
 0x178   : > { %v573_v6 = vadd.f32 %v564_v22, %v517_v21 }
 0x17a   : > { %v581_v3 = vmax.f32 %v573_v6, 0.0 }
 0x17c   : > { %589 = vst.msk [vmem:[%s896_s27 + $0x1c] sm:$0xf] %vm226_vm0, %v581_v3 }
 0x17d PF: > { %s13_s12 = sadd.s32 1, %s718_s12  }
 0x17e   : > { %p10_p4 = scmp.ge.s32.totalorder %s13_s12, 10  }
 0x180   :  { %12 = sbr.rel (!%p10_p4) target bundleno = 1 (0x1), region = 68 }

// kernel: net1_forward.47
= control target key start
LH: loop header
LB: loop body
LE: loop exit
PB: predicated region body
PF: predicated region fallthrough
CT: control target
= control target key end

     0   :  { %s371_s1 = inlined_call_operand.vmem [shape: bf16[256,128], index: 1, kind: input, shape index: {}]   ;;  %s372_s0 = inlined_call_operand.vmem [shape: bf16[16,256], index: 0, kind: input, shape index: {}]   ;;  %s373_s2 = inlined_call_operand.vmem [shape: f32[1,128], index: 2, kind: input, shape index: {}]   ;;  %s374_s3 = inlined_call_operand.vmem [shape: f32[16,128], index: 3, kind: output, shape index: {}]  }
   0x1   :  { %v269_v0 = vld [vmem:[%s371_s1 + $0x40] sm:$0xff]   ;;  %v271_v2 = vld [vmem:[%s371_s1 + $0x48] sm:$0xff]   ;;  %v273_v4 = vld [vmem:[%s371_s1 + $0x50] sm:$0xff]  }
   0x2   :  { %v270_v1 = vld [vmem:[%s371_s1] sm:$0xff]   ;;  %247 = vmatprep.subr.bf16.mxu0 %v269_v0  ;;  %v272_v3 = vld [vmem:[%s371_s1 + $0x8] sm:$0xff]   ;;  %v274_v5 = vld [vmem:[%s371_s1 + $0x10] sm:$0xff]  }
   0x3   :  { %248 = vmatpush3.bf16.msra.mxu0 %v270_v1  ;;  %v275_v6 = vld [vmem:[%s371_s1 + $0x58] sm:$0xff]   ;;  %v277_v8 = vld [vmem:[%s371_s1 + $0x60] sm:$0xff]   ;;  %v279_v10 = vld [vmem:[%s371_s1 + $0x68] sm:$0xff]  }
   0x4   :  { %249 = vmatprep.subr.bf16.mxu0 %v271_v2  ;;  %v276_v7 = vld [vmem:[%s371_s1 + $0x18] sm:$0xff]   ;;  %v278_v9 = vld [vmem:[%s371_s1 + $0x20] sm:$0xff]   ;;  %v280_v12 = vld [vmem:[%s371_s1 + $0x28] sm:$0xff]  }
   0x5   :  { %v287_v11 = vld [vmem:[%s372_s0 + $0x4] ss:$8 sps:$4 sm:$0xff]   ;;  %v281_v13 = vld [vmem:[%s371_s1 + $0x70] sm:$0xff]   ;;  %v283_v15 = vld [vmem:[%s371_s1 + $0x78] sm:$0xff]  }
   0x6   :  { %195 = vmatprep.mubr.bf16.mxu0 %v287_v11  ;;  %v282_v14 = vld [vmem:[%s371_s1 + $0x30] sm:$0xff]   ;;  %v284_v16 = vld [vmem:[%s371_s1 + $0x38] sm:$0xff]   ;;  %v285_v17 = vld [vmem:[%s372_s0] ss:$8 sps:$4 sm:$0xff]  }
   0x7   :  { %250 = vmatpush3.bf16.msra.mxu0 %v272_v3  ;;  %v246_v20 = vld [vmem:[%s373_s2] ss:$0 sm:$0xff] }
   0x8   :  { %251 = vmatprep.subr.bf16.mxu0 %v273_v4 }
   0xb   :  { %252 = vmatpush3.bf16.msra.mxu0 %v274_v5 }
   0xc   :  { %253 = vmatprep.subr.bf16.mxu0 %v275_v6 }
   0xf   :  { %254 = vmatpush3.bf16.msra.mxu0 %v276_v7 }
  0x10   :  { %255 = vmatprep.subr.bf16.mxu0 %v277_v8 }
  0x13   :  { %256 = vmatpush3.bf16.msra.mxu0 %v278_v9 }
  0x14   :  { %257 = vmatprep.subr.bf16.mxu0 %v279_v10 }
  0x17   :  { %258 = vmatpush3.bf16.msra.mxu0 %v280_v12 }
  0x18   :  { %259 = vmatprep.subr.bf16.mxu0 %v281_v13 }
  0x1b   :  { %260 = vmatpush3.bf16.msra.mxu0 %v282_v14 }
  0x1c   :  { %261 = vmatprep.subr.bf16.mxu0 %v283_v15 }
  0x1f   :  { %262 = vmatpush3.bf16.msra.mxu0 %v284_v16 }
  0x22   :  { %196 = vmatmul.mubr.bf16.vlgmr.msra.gmra.mrb[0].mxu0 %v285_v17 }
  0xf5   :  { %v263_v18 = vpop.f32.mrb[0].mxu0 }
  0xf6   :  { %v264_v19 = vpop.f32.mrb[1].mxu0 }
  0xf7   :  { %v265_v21 = vadd.f32 %v264_v19, %v263_v18  ;;  %v266_v22 = vpop.f32.mrb[2].mxu0 }
  0xf8   :  { %v267_v23 = vpop.f32.mrb[3].mxu0 }
  0xf9   :  { %v220_v24 = vadd.f32 %v265_v21, %v246_v20  ;;  %v268_v25 = vadd.f32 %v267_v23, %v266_v22 }
  0xfb   :  { %222 = vst [vmem:[%s374_s3] sm:$0xff] %v220_v24  ;;  %v221_v26 = vadd.f32 %v268_v25, %v246_v20 }
  0xfd   :  { %223 = vst [vmem:[%s374_s3 + $0x8] sm:$0xff] %v221_v26 }

// kernel: net1_forward.48
= control target key start
LH: loop header
LB: loop body
LE: loop exit
PB: predicated region body
PF: predicated region fallthrough
CT: control target
= control target key end

     0   :  { %s741_s12 = smov 0   ;;  %s929_s0 = inlined_call_operand.vmem [shape: f32[16,4,16], index: 0, kind: input, shape index: {}]   ;;  %s930_s1 = inlined_call_operand.vmem [shape: f32[16,4,1], index: 1, kind: input, shape index: {}]   ;;  %s931_s2 = inlined_call_operand.vmem [shape: f32[16,4,1], index: 2, kind: input, shape index: {}]   ;;  %s932_s3 = inlined_call_operand.vmem [shape: f32[16,4,16], index: 3, kind: output, shape index: {}]  }
   0x1 LB: > { %s670_s13 = sadd.s32 4294967295, %s718_s12   ;;  %p674_p0 = scmp.ge.s32.totalorder %s718_s12, 1  ;;  %s718_s12 = sphi %s741_s12, %s13_s12  }
   0x2   : > { %p160_p1 = scmp.lt.s32.totalorder %s718_s12, 3 }
   0x4   : > { %p161_p2 = pnand %p674_p0, %p160_p1 }
   0x5   : > { %s675_s14 = sshll.u32 (!%p161_p2), %s670_s13, 3  ;;  %v720_v0 = vmov (!%p161_p2), 0   ;;  %vm226_vm0 = vcmask (!%p161_p2), 125952   ;;  %vm260_vm1 = vcmask (!%p161_p2), 1043456  }
   0x6   : > { %164 = sbr.rel (%p161_p2) target bundleno = 381 (0x17d), region = 32  ;;  %p195_p3 = scmp.lt.s32.totalorder (!%p161_p2), %s675_s14, 15  ;;  %695 = vset.pattern.permute.xlu1 (!%p161_p2), %v720_v0  ;;  %694 = vset.pattern.permute.xlu0 (!%p161_p2), %v720_v0 }
   0xd   : > { %s934_s14 = smov (!%p195_p3, %s675_s14), 15 }
   0xe   : > { %s749_s15 = sshll.u32 %s934_s14, 2 }
   0xf   : > { %s198_s18 = scalar_lea.vmem %s929_s0, %s749_s15  ;;  %s204_s21 = scalar_lea.vmem %s930_s1, %s749_s15 }
  0x10   : > { %v755_v1 = vld [vmem:[%s198_s18 + $0x8] sm:$0xf]  ;;  %v757_v2 = vld [vmem:[%s198_s18] sm:$0xf]  ;;  %v759_v3 = vld [vmem:[%s198_s18 + $0xc] sm:$0xf]  ;;  %s795_s24 = scalar_lea.vmem %s931_s2, %s749_s15  ;;  %s896_s27 = scalar_lea.vmem %s932_s3, %s749_s15 }
  0x11   : > { %v233_v4 = vsel %vm226_vm0, %v755_v1, 0.0  ;;  %v227_v5 = vsel %vm226_vm0, %v757_v2, 0.0  ;;  %v765_v6 = vld [vmem:[%s198_s18 + $0x4] sm:$0xf]  ;;  %v236_v7 = vsel %vm226_vm0, %v759_v3, 0.0 }
  0x12   : > { %234 = vadd.xlane.f32.xlu1 %v233_v4  ;;  %228 = vadd.xlane.f32.xlu0 %v227_v5  ;;  %v230_v8 = vsel %vm226_vm0, %v765_v6, 0.0  ;;  %v771_v9 = vld [vmem:[%s198_s18 + $0x14] sm:$0xf]  ;;  %v773_v10 = vld [vmem:[%s198_s18 + $0x10] sm:$0xf] }
  0x13   : > { %v242_v11 = vsel %vm226_vm0, %v771_v9, 0.0  ;;  %v239_v12 = vsel %vm226_vm0, %v773_v10, 0.0  ;;  %v779_v13 = vld [vmem:[%s198_s18 + $0x1c] sm:$0xf]  ;;  %v781_v14 = vld [vmem:[%s198_s18 + $0x18] sm:$0xf] }
  0x14   : > { %v248_v15 = vsel %vm226_vm0, %v779_v13, 0.0  ;;  %v245_v16 = vsel %vm226_vm0, %v781_v14, 0.0  ;;  %v463_v17 = vld [vmem:[%s204_s21 + $0x4] sm:$0xf]  ;;  %v464_v18 = vld [vmem:[%s204_s21 + $0x8] sm:$0xf] }
  0x15   : > { %v462_v19 = vld [vmem:[%s204_s21] sm:$0xf]  ;;  %v465_v20 = vld [vmem:[%s204_s21 + $0xc] sm:$0xf]  ;;  %v466_v21 = vld [vmem:[%s204_s21 + $0x10] sm:$0xf] }
  0x16   : > { %237 = vadd.xlane.f32.xlu1 %v236_v7  ;;  %231 = vadd.xlane.f32.xlu0 %v230_v8  ;;  %v467_v22 = vld [vmem:[%s204_s21 + $0x14] sm:$0xf]  ;;  %v468_v23 = vld [vmem:[%s204_s21 + $0x18] sm:$0xf]  ;;  %v469_v24 = vld [vmem:[%s204_s21 + $0x1c] sm:$0xf] }
  0x17   : > { %v518_v25 = vld [vmem:[%s795_s24] sm:$0xf] }
  0x1a   : > { %243 = vadd.xlane.f32.xlu1 %v242_v11  ;;  %240 = vadd.xlane.f32.xlu0 %v239_v12 }
  0x1e   : > { %249 = vadd.xlane.f32.xlu1 %v248_v15  ;;  %246 = vadd.xlane.f32.xlu0 %v245_v16 }
  0x2f   : > { %477 = vperm.xlu1 %695, %v463_v17  }
  0x33   : > { %482 = vperm.xlu1 %695, %v464_v18  }
  0x34   : > { %472 = vperm.xlu0 %694, %v462_v19  }
  0x37   : > { %487 = vperm.xlu1 %695, %v465_v20  }
  0x3b   : > { %492 = vperm.xlu1 %695, %v466_v21  }
  0x3f   : > { %497 = vperm.xlu1 %695, %v467_v22  }
  0x43   : > { %502 = vperm.xlu1 %695, %v468_v23  }
  0x47   : > { %507 = vperm.xlu1 %695, %v469_v24  }
  0x4b   : > { %528 = vperm.xlu1 %695, %v518_v25  }
  0x9f   : > { %v235_v26 = vpop.xlane.xlu1 %234  ;;  %v229_v27 = vpop.xlane.xlu0 %228 }
  0xa0   : > { %v254_v28 = vmul.f32 0.0625, %v235_v26  ;;  %v252_v29 = vmul.f32 0.0625, %v229_v27 }
  0xa2   : > { %v275_v30 = vsel %vm260_vm1, %v254_v28, 0.0  ;;  %v261_v31 = vsel %vm260_vm1, %v252_v29, 0.0 }
  0xa3   : > { %v276_v32 = vrot.slane %v275_v30, 4  ;;  %v262_v33 = vrot.slane %v261_v31, 4  ;;  %v238_v34 = vpop.xlane.xlu1 %237  ;;  %v232_v35 = vpop.xlane.xlu0 %231 }
  0xa4   : > { %v255_v36 = vmul.f32 0.0625, %v238_v34  ;;  %v253_v37 = vmul.f32 0.0625, %v232_v35 }
  0xa5   : > { %v277_v38 = vadd.f32 %v276_v32, %v275_v30  ;;  %v263_v39 = vadd.f32 %v262_v33, %v261_v31 }
  0xa6   : > { %v282_v40 = vsel %vm260_vm1, %v255_v36, 0.0  ;;  %v268_v41 = vsel %vm260_vm1, %v253_v37, 0.0 }
  0xa7   : > { %v278_v42 = vrot.slane %v277_v38, 2  ;;  %v264_v43 = vrot.slane %v263_v39, 2  ;;  %v283_v44 = vrot.slane %v282_v40, 4  ;;  %v269_v45 = vrot.slane %v268_v41, 4  ;;  %v244_v46 = vpop.xlane.xlu1 %243  ;;  %v241_v47 = vpop.xlane.xlu0 %240 }
  0xa8   : > { %v257_v48 = vmul.f32 0.0625, %v244_v46  ;;  %v256_v49 = vmul.f32 0.0625, %v241_v47 }
  0xa9   : > { %v279_v50 = vadd.f32 %v278_v42, %v277_v38  ;;  %v265_v51 = vadd.f32 %v264_v43, %v263_v39  ;;  %v284_v52 = vadd.f32 %v283_v44, %v282_v40  ;;  %v270_v53 = vadd.f32 %v269_v45, %v268_v41 }
  0xaa   : > { %v296_v54 = vsel %vm260_vm1, %v257_v48, 0.0  ;;  %v289_v55 = vsel %vm260_vm1, %v256_v49, 0.0 }
  0xab   : > { %v280_v56 = vrot.slane %v279_v50, 1  ;;  %v266_v57 = vrot.slane %v265_v51, 1  ;;  %v285_v58 = vrot.slane %v284_v52, 2  ;;  %v271_v59 = vrot.slane %v270_v53, 2  ;;  %v250_v60 = vpop.xlane.xlu1 %249  ;;  %v247_v61 = vpop.xlane.xlu0 %246 }
  0xac   : > { %v297_v62 = vrot.slane %v296_v54, 4  ;;  %v290_v63 = vrot.slane %v289_v55, 4  ;;  %v259_v0 = vmul.f32 0.0625, %v250_v60  ;;  %v258_v4 = vmul.f32 0.0625, %v247_v61 }
  0xad   : > { %v286_v5 = vadd.f32 %v285_v58, %v284_v52  ;;  %v272_v7 = vadd.f32 %v271_v59, %v270_v53  ;;  %v267_v8 = vadd.f32 %v266_v57, %v265_v51  ;;  %v281_v11 = vadd.f32 %v280_v56, %v279_v50 }
  0xae   : > { %v298_v12 = vadd.f32 %v297_v62, %v296_v54  ;;  %v291_v15 = vadd.f32 %v290_v63, %v289_v55  ;;  %v310_v16 = vsel %vm260_vm1, %v259_v0, 0.0  ;;  %v303_v17 = vsel %vm260_vm1, %v258_v4, 0.0 }
  0xaf   : > { %v287_v18 = vrot.slane %v286_v5, 1  ;;  %v273_v19 = vrot.slane %v272_v7, 1  ;;  %v311_v20 = vrot.slane %v310_v16, 4  ;;  %v304_v21 = vrot.slane %v303_v17, 4 }
  0xb0   : > { %v299_v22 = vrot.slane %v298_v12, 2  ;;  %v292_v23 = vrot.slane %v291_v15, 2  ;;  %v318_v24 = vmul.f32 0.25, %v267_v8  ;;  %v320_v25 = vmul.f32 0.25, %v281_v11  ;;  %v522_v8 = vld [vmem:[%s795_s24 + $0x10] sm:$0xf] }
  0xb1   : > { %v312_v26 = vadd.f32 %v311_v20, %v310_v16  ;;  %v305_v27 = vadd.f32 %v304_v21, %v303_v17  ;;  %v274_v28 = vadd.f32 %v273_v19, %v272_v7  ;;  %v288_v29 = vadd.f32 %v287_v18, %v286_v5  ;;  %v520_v5 = vld [vmem:[%s795_s24 + $0x8] sm:$0xf]  ;;  %v519_v7 = vld [vmem:[%s795_s24 + $0x4] sm:$0xf]  ;;  %v521_v11 = vld [vmem:[%s795_s24 + $0xc] sm:$0xf]  ;;  %v861_v17 = vpop.permute.xlu1 %477 }
  0xb2   : > { %v300_v30 = vadd.f32 %v299_v22, %v298_v12  ;;  %v293_v31 = vadd.f32 %v292_v23, %v291_v15  ;;  %v807_v32 = vsub.f32 %v757_v2, %v318_v24  ;;  %v810_v33 = vsub.f32 %v755_v1, %v320_v25  ;;  %v524_v12 = vld [vmem:[%s795_s24 + $0x18] sm:$0xf]  ;;  %v523_v15 = vld [vmem:[%s795_s24 + $0x14] sm:$0xf]  ;;  %v525_v16 = vld [vmem:[%s795_s24 + $0x1c] sm:$0xf] }
  0xb3   : > { %v313_v34 = vrot.slane %v312_v26, 2  ;;  %v306_v35 = vrot.slane %v305_v27, 2  ;;  %v319_v36 = vmul.f32 0.25, %v274_v28  ;;  %v321_v37 = vmul.f32 0.25, %v288_v29  ;;  %v875_v24 = vpop.permute.xlu0 %472 }
  0xb4   : > { %v301_v38 = vrot.slane %v300_v30, 1  ;;  %v294_v39 = vrot.slane %v293_v31, 1  ;;  %v334_v40 = vmul.f32 %v807_v32, %v807_v32  ;;  %v336_v44 = vmul.f32 %v810_v33, %v810_v33 }
  0xb5   : > { %v314_v41 = vadd.f32 %v313_v34, %v312_v26  ;;  %v307_v42 = vadd.f32 %v306_v35, %v305_v27  ;;  %v815_v43 = vsub.f32 %v765_v6, %v319_v36  ;;  %v818_v2 = vsub.f32 %v759_v3, %v321_v37  ;;  %v863_v18 = vpop.permute.xlu1 %482 }
  0xb6   : > { %v342_v1 = vsel %vm226_vm0, %v334_v40, 0.0  ;;  %v295_v45 = vadd.f32 %v294_v39, %v293_v31  ;;  %v302_v46 = vadd.f32 %v301_v38, %v300_v30  ;;  %v348_v54 = vsel %vm226_vm0, %v336_v44, 0.0 }
  0xb7   : > { %v315_v47 = vrot.slane %v314_v41, 1  ;;  %v308_v48 = vrot.slane %v307_v42, 1  ;;  %343 = vadd.xlane.f32.xlu0 %v342_v1  ;;  %v335_v49 = vmul.f32 %v815_v43, %v815_v43  ;;  %v337_v3 = vmul.f32 %v818_v2, %v818_v2 }
  0xb8   : > { %v322_v50 = vmul.f32 0.25, %v295_v45  ;;  %v323_v51 = vmul.f32 0.25, %v302_v46 }
  0xb9   : > { %v345_v6 = vsel %vm226_vm0, %v335_v49, 0.0  ;;  %v309_v52 = vadd.f32 %v308_v48, %v307_v42  ;;  %v316_v53 = vadd.f32 %v315_v47, %v314_v41  ;;  %v351_v60 = vsel %vm226_vm0, %v337_v3, 0.0  ;;  %v865_v19 = vpop.permute.xlu1 %487 }
  0xba   : > { %346 = vadd.xlane.f32.xlu1 %v345_v6  ;;  %v830_v55 = vsub.f32 %v773_v10, %v322_v50  ;;  %v833_v56 = vsub.f32 %v771_v9, %v323_v51 }
  0xbb   : > { %349 = vadd.xlane.f32.xlu0 %v348_v54  ;;  %v324_v57 = vmul.f32 0.25, %v309_v52  ;;  %v325_v58 = vmul.f32 0.25, %v316_v53 }
  0xbc   : > { %v338_v59 = vmul.f32 %v830_v55, %v830_v55  ;;  %v339_v61 = vmul.f32 %v833_v56, %v833_v56 }
  0xbd   : > { %v841_v62 = vsub.f32 %v781_v14, %v324_v57  ;;  %v844_v9 = vsub.f32 %v779_v13, %v325_v58  ;;  %v867_v20 = vpop.permute.xlu1 %492 }
  0xbe   : > { %352 = vadd.xlane.f32.xlu1 %v351_v60  ;;  %v354_v10 = vsel %vm226_vm0, %v338_v59, 0.0  ;;  %v357_v0 = vsel %vm226_vm0, %v339_v61, 0.0 }
  0xbf   : > { %355 = vadd.xlane.f32.xlu0 %v354_v10  ;;  %v340_v63 = vmul.f32 %v841_v62, %v841_v62  ;;  %v341_v14 = vmul.f32 %v844_v9, %v844_v9 }
  0xc1   : > { %v360_v4 = vsel %vm226_vm0, %v340_v63, 0.0  ;;  %v363_v13 = vsel %vm226_vm0, %v341_v14, 0.0  ;;  %v869_v21 = vpop.permute.xlu1 %497 }
  0xc2   : > { %358 = vadd.xlane.f32.xlu1 %v357_v0 }
  0xc3   : > { %361 = vadd.xlane.f32.xlu0 %v360_v4 }
  0xc5   : > { %v871_v22 = vpop.permute.xlu1 %502 }
  0xc6   : > { %364 = vadd.xlane.f32.xlu1 %v363_v13 }
  0xc9   : > { %v873_v23 = vpop.permute.xlu1 %507 }
  0xcd   : > { %v877_v25 = vpop.permute.xlu1 %528 }
  0xd7   : > { %538 = vperm.xlu1 %695, %v520_v5  }
  0xd9   : > { %533 = vperm.xlu0 %694, %v519_v7  }
  0xdb   : > { %548 = vperm.xlu1 %695, %v522_v8  }
  0xdd   : > { %543 = vperm.xlu0 %694, %v521_v11  }
  0xdf   : > { %558 = vperm.xlu1 %695, %v524_v12  }
  0xe1   : > { %553 = vperm.xlu0 %694, %v523_v15  }
  0xe5   : > { %563 = vperm.xlu0 %694, %v525_v16  }
 0x144   : > { %v344_v26 = vpop.xlane.xlu0 %343 }
 0x145   : > { %v366_v27 = vmul.f32 0.0625, %v344_v26 }
 0x147   : > { %v374_v28 = vsel %vm260_vm1, %v366_v27, 0.0  ;;  %v347_v29 = vpop.xlane.xlu1 %346 }
 0x148   : > { %v375_v30 = vrot.slane %v374_v28, 4  ;;  %v367_v31 = vmul.f32 0.0625, %v347_v29  ;;  %v350_v34 = vpop.xlane.xlu0 %349 }
 0x149   : > { %v368_v35 = vmul.f32 0.0625, %v350_v34 }
 0x14a   : > { %v376_v36 = vadd.f32 %v375_v30, %v374_v28  ;;  %v381_v37 = vsel %vm260_vm1, %v367_v31, 0.0 }
 0x14b   : > { %v382_v38 = vrot.slane %v381_v37, 4  ;;  %v388_v39 = vsel %vm260_vm1, %v368_v35, 0.0  ;;  %v353_v40 = vpop.xlane.xlu1 %352 }
 0x14c   : > { %v377_v41 = vrot.slane %v376_v36, 2  ;;  %v389_v42 = vrot.slane %v388_v39, 4  ;;  %v369_v1 = vmul.f32 0.0625, %v353_v40  ;;  %v356_v44 = vpop.xlane.xlu0 %355 }
 0x14d   : > { %v383_v45 = vadd.f32 %v382_v38, %v381_v37  ;;  %v370_v46 = vmul.f32 0.0625, %v356_v44 }
 0x14e   : > { %v378_v47 = vadd.f32 %v377_v41, %v376_v36  ;;  %v390_v48 = vadd.f32 %v389_v42, %v388_v39  ;;  %v395_v49 = vsel %vm260_vm1, %v369_v1, 0.0 }
 0x14f   : > { %v384_v50 = vrot.slane %v383_v45, 2  ;;  %v396_v51 = vrot.slane %v395_v49, 4  ;;  %v402_v6 = vsel %vm260_vm1, %v370_v46, 0.0  ;;  %v359_v3 = vpop.xlane.xlu1 %358 }
 0x150   : > { %v379_v52 = vrot.slane %v378_v47, 1  ;;  %v391_v53 = vrot.slane %v390_v48, 2  ;;  %v403_v54 = vrot.slane %v402_v6, 4  ;;  %v371_v57 = vmul.f32 0.0625, %v359_v3  ;;  %v362_v58 = vpop.xlane.xlu0 %361 }
 0x151   : > { %v385_v59 = vadd.f32 %v384_v50, %v383_v45  ;;  %v397_v60 = vadd.f32 %v396_v51, %v395_v49  ;;  %v372_v61 = vmul.f32 0.0625, %v362_v58 }
 0x152   : > { %v380_v10 = vadd.f32 %v379_v52, %v378_v47  ;;  %v392_v63 = vadd.f32 %v391_v53, %v390_v48  ;;  %v404_v0 = vadd.f32 %v403_v54, %v402_v6  ;;  %v409_v4 = vsel %vm260_vm1, %v371_v57, 0.0 }
 0x153   : > { %v386_v14 = vrot.slane %v385_v59, 1  ;;  %v398_v13 = vrot.slane %v397_v60, 2  ;;  %v410_v5 = vrot.slane %v409_v4, 4  ;;  %v416_v7 = vsel %vm260_vm1, %v372_v61, 0.0  ;;  %v365_v8 = vpop.xlane.xlu1 %364 }
 0x154   : > { %v430_v11 = vmul.f32 0.25, %v380_v10  ;;  %v393_v12 = vrot.slane %v392_v63, 1  ;;  %v405_v15 = vrot.slane %v404_v0, 2  ;;  %v417_v16 = vrot.slane %v416_v7, 4 }
 0x155   : > { %v387_v26 = vadd.f32 %v386_v14, %v385_v59  ;;  %v399_v27 = vadd.f32 %v398_v13, %v397_v60  ;;  %v411_v28 = vadd.f32 %v410_v5, %v409_v4  ;;  %v373_v29 = vmul.f32 0.0625, %v365_v8 }
 0x156   : > { %v438_v30 = vadd.f32 1e-05, %v430_v11  ;;  %v394_v31 = vadd.f32 %v393_v12, %v392_v63  ;;  %v406_v34 = vadd.f32 %v405_v15, %v404_v0  ;;  %v418_v35 = vadd.f32 %v417_v16, %v416_v7 }
 0x157   : > { %v431_v36 = vmul.f32 0.25, %v387_v26  ;;  %v400_v37 = vrot.slane %v399_v27, 1  ;;  %v412_v38 = vrot.slane %v411_v28, 2  ;;  %v423_v39 = vsel %vm260_vm1, %v373_v29, 0.0  ;;  %v539_v16 = vpop.permute.xlu1 %538 }
 0x158   : > { %696 = vrsqrt.f32 %v438_v30  ;;  %v432_v40 = vmul.f32 0.25, %v394_v31  ;;  %v407_v41 = vrot.slane %v406_v34, 1  ;;  %v419_v42 = vrot.slane %v418_v35, 2  ;;  %v534_v12 = vpop.permute.xlu0 %533 }
 0x159   : > { %v439_v1 = vadd.f32 1e-05, %v431_v36  ;;  %v401_v44 = vadd.f32 %v400_v37, %v399_v27  ;;  %v413_v45 = vadd.f32 %v412_v38, %v411_v28  ;;  %v424_v46 = vrot.slane %v423_v39, 4 }
 0x15a   : > { %v440_v47 = vadd.f32 1e-05, %v432_v40  ;;  %v408_v48 = vadd.f32 %v407_v41, %v406_v34  ;;  %v420_v49 = vadd.f32 %v419_v42, %v418_v35 }
 0x15b   : > { %698 = vrsqrt.f32 %v439_v1  ;;  %v433_v50 = vmul.f32 0.25, %v401_v44  ;;  %v414_v51 = vrot.slane %v413_v45, 1  ;;  %v425_v6 = vadd.f32 %v424_v46, %v423_v39  ;;  %v549_v38 = vpop.permute.xlu1 %548 }
 0x15c   : > { %700 = vrsqrt.f32 %v440_v47  ;;  %v434_v3 = vmul.f32 0.25, %v408_v48  ;;  %v421_v52 = vrot.slane %v420_v49, 1  ;;  %v544_v36 = vpop.permute.xlu0 %543 }
 0x15d   : > { %v441_v53 = vadd.f32 1e-05, %v433_v50  ;;  %v415_v54 = vadd.f32 %v414_v51, %v413_v45  ;;  %v426_v57 = vrot.slane %v425_v6, 2 }
 0x15e   : > { %v442_v58 = vadd.f32 1e-05, %v434_v3  ;;  %v422_v59 = vadd.f32 %v421_v52, %v420_v49 }
 0x15f   : > { %702 = vrsqrt.f32 %v441_v53  ;;  %v435_v60 = vmul.f32 0.25, %v415_v54  ;;  %v427_v61 = vadd.f32 %v426_v57, %v425_v6  ;;  %v559_v47 = vpop.permute.xlu1 %558 }
 0x160   : > { %704 = vrsqrt.f32 %v442_v58  ;;  %v436_v10 = vmul.f32 0.25, %v422_v59  ;;  %v554_v46 = vpop.permute.xlu0 %553 }
 0x161   : > { %v443_v63 = vadd.f32 1e-05, %v435_v60  ;;  %v428_v0 = vrot.slane %v427_v61, 1 }
 0x162   : > { %v697_v4 = vpop.eup %696  ;;  %v444_v14 = vadd.f32 1e-05, %v436_v10 }
 0x163   : > { %v454_v13 = vmul.f32 %v697_v4, %v807_v32  ;;  %706 = vrsqrt.f32 %v443_v63  ;;  %v429_v5 = vadd.f32 %v428_v0, %v427_v61 }
 0x164   : > { %708 = vrsqrt.f32 %v444_v14 }
 0x165   : > { %v699_v7 = vpop.eup %698  ;;  %v510_v8 = vmul.f32 %v875_v24, %v454_v13  ;;  %v437_v11 = vmul.f32 0.25, %v429_v5 }
 0x166   : > { %v701_v15 = vpop.eup %700  ;;  %v455_v26 = vmul.f32 %v699_v7, %v815_v43 }
 0x167   : > { %v566_v27 = vadd.f32 %v877_v25, %v510_v8  ;;  %v445_v28 = vadd.f32 1e-05, %v437_v11  ;;  %v456_v29 = vmul.f32 %v701_v15, %v810_v33 }
 0x168   : > { %v511_v32 = vmul.f32 %v861_v17, %v455_v26 }
 0x169   : > { %v703_v24 = vpop.eup %702  ;;  %v574_v30 = vmax.f32 %v566_v27, 0.0  ;;  %710 = vrsqrt.f32 %v445_v28  ;;  %v512_v31 = vmul.f32 %v863_v18, %v456_v29 }
 0x16a   : > { %v705_v43 = vpop.eup %704  ;;  %v567_v34 = vadd.f32 %v534_v12, %v511_v32  ;;  %v457_v25 = vmul.f32 %v703_v24, %v818_v2 }
 0x16b   : > { %v568_v33 = vadd.f32 %v539_v16, %v512_v31  ;;  %582 = vst.msk [vmem:[%s896_s27] sm:$0xf] %vm226_vm0, %v574_v30  ;;  %v458_v35 = vmul.f32 %v705_v43, %v830_v55 }
 0x16c   : > { %v575_v37 = vmax.f32 %v567_v34, 0.0  ;;  %v513_v17 = vmul.f32 %v865_v19, %v457_v25 }
 0x16d   : > { %v707_v39 = vpop.eup %706  ;;  %v576_v40 = vmax.f32 %v568_v33, 0.0  ;;  %v514_v18 = vmul.f32 %v867_v20, %v458_v35 }
 0x16e   : > { %v709_v41 = vpop.eup %708  ;;  %583 = vst.msk [vmem:[%s896_s27 + $0x4] sm:$0xf] %vm226_vm0, %v575_v37  ;;  %v569_v2 = vadd.f32 %v544_v36, %v513_v17  ;;  %v459_v42 = vmul.f32 %v707_v39, %v833_v56 }
 0x16f   : > { %584 = vst.msk [vmem:[%s896_s27 + $0x8] sm:$0xf] %vm226_vm0, %v576_v40  ;;  %v570_v55 = vadd.f32 %v549_v38, %v514_v18  ;;  %v460_v1 = vmul.f32 %v709_v41, %v841_v62 }
 0x170   : > { %v577_v44 = vmax.f32 %v569_v2, 0.0  ;;  %v515_v19 = vmul.f32 %v869_v21, %v459_v42 }
 0x171   : > { %v578_v45 = vmax.f32 %v570_v55, 0.0  ;;  %v516_v20 = vmul.f32 %v871_v22, %v460_v1  ;;  %v564_v22 = vpop.permute.xlu0 %563 }
 0x172   : > { %585 = vst.msk [vmem:[%s896_s27 + $0xc] sm:$0xf] %vm226_vm0, %v577_v44  ;;  %v571_v48 = vadd.f32 %v554_v46, %v515_v19 }
 0x173   : > { %v711_v56 = vpop.eup %710  ;;  %586 = vst.msk [vmem:[%s896_s27 + $0x10] sm:$0xf] %vm226_vm0, %v578_v45  ;;  %v572_v49 = vadd.f32 %v559_v47, %v516_v20 }
 0x174   : > { %v579_v50 = vmax.f32 %v571_v48, 0.0  ;;  %v461_v62 = vmul.f32 %v711_v56, %v844_v9 }
 0x175   : > { %v580_v51 = vmax.f32 %v572_v49, 0.0 }
 0x176   : > { %587 = vst.msk [vmem:[%s896_s27 + $0x14] sm:$0xf] %vm226_vm0, %v579_v50  ;;  %v517_v21 = vmul.f32 %v873_v23, %v461_v62 }
 0x177   : > { %588 = vst.msk [vmem:[%s896_s27 + $0x18] sm:$0xf] %vm226_vm0, %v580_v51 }
 0x178   : > { %v573_v6 = vadd.f32 %v564_v22, %v517_v21 }
 0x17a   : > { %v581_v3 = vmax.f32 %v573_v6, 0.0 }
 0x17c   : > { %589 = vst.msk [vmem:[%s896_s27 + $0x1c] sm:$0xf] %vm226_vm0, %v581_v3 }
 0x17d PF: > { %s13_s12 = sadd.s32 1, %s718_s12  }
 0x17e   : > { %p10_p4 = scmp.ge.s32.totalorder %s13_s12, 4  }
 0x180   :  { %12 = sbr.rel (!%p10_p4) target bundleno = 1 (0x1), region = 68 }

// kernel: net1_forward.49
= control target key start
LH: loop header
LB: loop body
LE: loop exit
PB: predicated region body
PF: predicated region fallthrough
CT: control target
= control target key end

     0   :  { %s1021_s12 = smov 0   ;;  %s1023_s13 = smov 0   ;;  %s1137_s0 = inlined_call_operand.vmem [shape: bf16[16,1024], index: 0, kind: input, shape index: {}]   ;;  %s1138_s1 = inlined_call_operand.vmem [shape: bf16[1024,128], index: 1, kind: input, shape index: {}]   ;;  %s1139_s2 = inlined_call_operand.vmem [shape: f32[1,128], index: 2, kind: input, shape index: {}]   ;;  %s1140_s3 = inlined_call_operand.vmem [shape: f32[16,128], index: 3, kind: output, shape index: {}]  }
   0x1   :  { %s1025_s14 = smov 0   ;;  %s1027_s15 = smov 0  }
   0x2   :  { %s1029_s16 = smov 0  }
   0x3 LB: > { %s25_s17 = sadd.s32 1, %s994_s15  ;;  %p48_p1 = scmp.ne.s32.totalorder %s986_s13, %s982_s12  ;;  %s998_s16 = sphi %s1029_s16, %s13_s16   ;;  %s994_s15 = sphi %s1027_s15, %s1144_s15   ;;  %s990_s14 = sphi %s1025_s14, %s1143_s14   ;;  %s986_s13 = sphi %s1023_s13, %s1142_s13   ;;  %s982_s12 = sphi %s1021_s12, %s1141_s12  }
   0x4   : > { %p26_p0 = scmp.ge.s32.totalorder %s25_s17, 2  ;;  %p49_p2 = scmp.eq.s32.totalorder %s998_s16, 0 }
   0x5   : > { %s41_s19 = sadd.s32 1, %s986_s13  ;;  %p785_p5 = scmp.ge.s32.totalorder %s998_s16, 2 }
   0x6   : > { %s1146_s17 = smov (%p26_p0, %s25_s17), 0  ;;  %p50_p3 = por %p49_p2, %p48_p1 }
   0x7   : > { %s37_s18 = ssub.s32 %s994_s15, %s1146_s17  ;;  %162 = sbr.rel (%p785_p5) target bundleno = 21 (0x15), region = 20 }
   0x8   : > { %p39_p4 = scmp.eq.s32.totalorder %s37_s18, 0 }
   0xa   : > { %s1056_s20 = scalar_select %p39_p4, %s986_s13, %s41_s19  }
   0xe   : > { %165 = sbr.rel (!%p50_p3) target bundleno = 21 (0x15), region = 24  ;;  %s167_s21 = sand.u32 (%p50_p3), 1, %s986_s13  }
   0xf   : > { %s836_s22 = sshll.u32 (%p50_p3), %s994_s15, 4  ;;  %s786_s23 = sshll.u32 (%p50_p3), %s167_s21, 5 }
  0x10   : > { %s175_s26 = scalar_lea.vmem (%p50_p3), %s1137_s0, %s836_s22  ;;  %s169_s27 = scalar_lea.vmem (%p50_p3), [#allocation3], %s786_s23 }
  0x11   : > { %v188_v0 = vld [vmem:[%s175_s26] sm:$0xff] (%p50_p3)  ;;  %v190_v1 = vld [vmem:[%s175_s26 + $0x8] sm:$0xff] (%p50_p3) }
  0x12   : > { %v192_v2 = vld [vmem:[%s175_s26 + $0x20] sm:$0xff] (%p50_p3)  ;;  %189 = vst [vmem:[%s169_s27] sm:$0xff] (%p50_p3), %v188_v0  ;;  %191 = vst [vmem:[%s169_s27 + $0x8] sm:$0xff] (%p50_p3), %v190_v1  ;;  %v194_v3 = vld [vmem:[%s175_s26 + $0x28] sm:$0xff] (%p50_p3) }
  0x13   : > { %193 = vst [vmem:[%s169_s27 + $0x10] sm:$0xff] (%p50_p3), %v192_v2  ;;  %195 = vst [vmem:[%s169_s27 + $0x18] sm:$0xff] (%p50_p3), %v194_v3 }
  0x15 PF: > { %p789_p6 = scmp.ge.s32.totalorder %s998_s16, 1  ;;  %p212_p7 = scmp.lt.s32.totalorder %s998_s16, 3 }
  0x17   : > { %p213_p8 = pnand %p789_p6, %p212_p7 }
  0x18   : > { %s219_s28 = sand.u32 (!%p213_p8), 1, %s982_s12   ;;  %s791_s29 = sshll.u32 (!%p213_p8), %s990_s14, 6 }
  0x19   : > { %216 = sbr.rel (%p213_p8) target bundleno = 306 (0x132), region = 51  ;;  %s790_s30 = sshll.u32 (!%p213_p8), %s219_s28, 5 }
  0x1a   : > { %p259_p9 = scmp.lt.s32.totalorder (!%p213_p8), %s791_s29, 127  ;;  %s1073_s8 = scalar_lea.vmem (!%p213_p8), [#allocation3], %s790_s30 }
  0x1b   : > { %p793_p10 = scmp.ne.s32.totalorder (!%p213_p8), %s990_s14, 0 }
  0x20   : > { %s1148_s29 = smov (!%p259_p9, %s791_s29), 127  ;;  %283 = sbr.rel (%p793_p10) target bundleno = 39 (0x27), region = 59 }
  0x21   : > { %s792_s4 = sshll.u32 %s1148_s29, 2  ;;  %v1000_v4 = vmov (!%p793_p10), 0.0  }
  0x22   : > { %s1071_s7 = scalar_lea.vmem %s1138_s1, %s792_s4  ;;  %284 = vst [vmem:[#allocation2] sm:$0xff] (!%p793_p10), %v1000_v4  ;;  %285 = vst [vmem:[#allocation2 + $0x8] sm:$0xff] (!%p793_p10), %v1000_v4 }
  0x27 PF: > { %v922_v5 = vld [vmem:[%s1071_s7 + $0x40] sm:$0xff]   ;;  %v926_v9 = vld [vmem:[%s1071_s7 + $0x48] sm:$0xff]   ;;  %v930_v13 = vld [vmem:[%s1071_s7 + $0x50] sm:$0xff]   ;;  %p830_p11 = scmp.ne.s32.totalorder %s990_s14, 1 }
  0x28   : > { %v923_v6 = vld [vmem:[%s1071_s7 + $0xc0] sm:$0xff]   ;;  %837 = vmatprep.subr.bf16.mxu0 %v922_v5  ;;  %v927_v10 = vld [vmem:[%s1071_s7 + $0xc8] sm:$0xff]   ;;  %v931_v14 = vld [vmem:[%s1071_s7 + $0xd0] sm:$0xff]  }
  0x29   : > { %v924_v7 = vld [vmem:[%s1071_s7] sm:$0xff]   ;;  %859 = vmatprep.subr.bf16.mxu1 %v923_v6  ;;  %v928_v11 = vld [vmem:[%s1071_s7 + $0x8] sm:$0xff]   ;;  %v932_v15 = vld [vmem:[%s1071_s7 + $0x10] sm:$0xff]  }
  0x2a   : > { %v925_v8 = vld [vmem:[%s1071_s7 + $0x80] sm:$0xff]   ;;  %838 = vmatpush3.bf16.msra.mxu0 %v924_v7  ;;  %v929_v12 = vld [vmem:[%s1071_s7 + $0x88] sm:$0xff]   ;;  %v933_v16 = vld [vmem:[%s1071_s7 + $0x90] sm:$0xff]  }
  0x2b   : > { %860 = vmatpush3.bf16.msra.mxu1 %v925_v8  ;;  %839 = vmatprep.subr.bf16.mxu0 %v926_v9  ;;  %v934_v17 = vld [vmem:[%s1071_s7 + $0x58] sm:$0xff]   ;;  %v938_v21 = vld [vmem:[%s1071_s7 + $0x60] sm:$0xff]   ;;  %v942_v25 = vld [vmem:[%s1071_s7 + $0x68] sm:$0xff]  }
  0x2c   : > { %861 = vmatprep.subr.bf16.mxu1 %v927_v10  ;;  %v935_v18 = vld [vmem:[%s1071_s7 + $0xd8] sm:$0xff]   ;;  %v939_v22 = vld [vmem:[%s1071_s7 + $0xe0] sm:$0xff]   ;;  %v943_v26 = vld [vmem:[%s1071_s7 + $0xe8] sm:$0xff]  }
  0x2d   : > { %v936_v19 = vld [vmem:[%s1071_s7 + $0x18] sm:$0xff]   ;;  %v940_v23 = vld [vmem:[%s1071_s7 + $0x20] sm:$0xff]   ;;  %v944_v27 = vld [vmem:[%s1071_s7 + $0x28] sm:$0xff]  }
  0x2e   : > { %840 = vmatpush3.bf16.msra.mxu0 %v928_v11  ;;  %v937_v20 = vld [vmem:[%s1071_s7 + $0x98] sm:$0xff]   ;;  %v941_v24 = vld [vmem:[%s1071_s7 + $0xa0] sm:$0xff]   ;;  %v945_v28 = vld [vmem:[%s1071_s7 + $0xa8] sm:$0xff]  }
  0x2f   : > { %862 = vmatpush3.bf16.msra.mxu1 %v929_v12  ;;  %841 = vmatprep.subr.bf16.mxu0 %v930_v13  ;;  %v946_v29 = vld [vmem:[%s1071_s7 + $0x70] sm:$0xff]   ;;  %v950_v33 = vld [vmem:[%s1071_s7 + $0x78] sm:$0xff]   ;;  %v286_v50 = vld [vmem:[#allocation2] sm:$0xff] }
  0x30   : > { %863 = vmatprep.subr.bf16.mxu1 %v931_v14  ;;  %v947_v30 = vld [vmem:[%s1071_s7 + $0xf0] sm:$0xff]   ;;  %v951_v34 = vld [vmem:[%s1071_s7 + $0xf8] sm:$0xff]   ;;  %v287_v55 = vld [vmem:[#allocation2 + $0x8] sm:$0xff] }
  0x31   : > { %v948_v31 = vld [vmem:[%s1071_s7 + $0x30] sm:$0xff]   ;;  %v952_v35 = vld [vmem:[%s1071_s7 + $0x38] sm:$0xff]   ;;  %v831_v60 = vld [vmem:[%s1139_s2] ss:$0 sm:$0xff] (!%p830_p11) }
  0x32   : > { %842 = vmatpush3.bf16.msra.mxu0 %v932_v15  ;;  %v949_v32 = vld [vmem:[%s1071_s7 + $0xb0] sm:$0xff]   ;;  %v953_v36 = vld [vmem:[%s1071_s7 + $0xb8] sm:$0xff]  }
  0x33   : > { %864 = vmatpush3.bf16.msra.mxu1 %v933_v16  ;;  %843 = vmatprep.subr.bf16.mxu0 %v934_v17  ;;  %v954_v37 = vld [vmem:[%s1073_s8] ss:$16 sps:$4 sm:$0xff]   ;;  %v956_v38 = vld [vmem:[%s1073_s8 + $0x4] ss:$16 sps:$4 sm:$0xff]   ;;  %v957_v39 = vld [vmem:[%s1073_s8 + $0x8] ss:$16 sps:$4 sm:$0xff]  }
  0x34   : > { %865 = vmatprep.subr.bf16.mxu1 %v935_v18  ;;  %v959_v40 = vld [vmem:[%s1073_s8 + $0xc] ss:$16 sps:$4 sm:$0xff]   ;;  %600 = vmatprep.mubr.bf16.mxu0 %v956_v38 }
  0x35   : > { %641 = vmatprep.mubr.bf16.mxu1 %v959_v40 }
  0x36   : > { %844 = vmatpush3.bf16.msra.mxu0 %v936_v19 }
  0x37   : > { %866 = vmatpush3.bf16.msra.mxu1 %v937_v20  ;;  %845 = vmatprep.subr.bf16.mxu0 %v938_v21 }
  0x38   : > { %867 = vmatprep.subr.bf16.mxu1 %v939_v22 }
  0x3a   : > { %846 = vmatpush3.bf16.msra.mxu0 %v940_v23 }
  0x3b   : > { %868 = vmatpush3.bf16.msra.mxu1 %v941_v24  ;;  %847 = vmatprep.subr.bf16.mxu0 %v942_v25 }
  0x3c   : > { %869 = vmatprep.subr.bf16.mxu1 %v943_v26 }
  0x3e   : > { %848 = vmatpush3.bf16.msra.mxu0 %v944_v27 }
  0x3f   : > { %870 = vmatpush3.bf16.msra.mxu1 %v945_v28  ;;  %849 = vmatprep.subr.bf16.mxu0 %v946_v29 }
  0x40   : > { %871 = vmatprep.subr.bf16.mxu1 %v947_v30 }
  0x42   : > { %850 = vmatpush3.bf16.msra.mxu0 %v948_v31 }
  0x43   : > { %872 = vmatpush3.bf16.msra.mxu1 %v949_v32  ;;  %851 = vmatprep.subr.bf16.mxu0 %v950_v33 }
  0x44   : > { %873 = vmatprep.subr.bf16.mxu1 %v951_v34 }
  0x46   : > { %852 = vmatpush3.bf16.msra.mxu0 %v952_v35 }
  0x47   : > { %874 = vmatpush3.bf16.msra.mxu1 %v953_v36 }
  0x49   : > { %601 = vmatmul.mubr.bf16.vlgmr.msra.gmra.mrb[0].mxu0 %v954_v37 }
  0x4a   : > { %642 = vmatmul.mubr.bf16.vlgmr.msra.gmra.mrb[0].mxu1 %v957_v39 }
 0x11c   : > { %v853_v41 = vpop.f32.mrb[0].mxu0 }
 0x11d   : > { %v875_v42 = vpop.f32.mrb[0].mxu1  ;;  %v854_v43 = vpop.f32.mrb[1].mxu0 }
 0x11e   : > { %v855_v44 = vadd.f32 %v854_v43, %v853_v41  ;;  %v876_v45 = vpop.f32.mrb[1].mxu1  ;;  %v856_v46 = vpop.f32.mrb[2].mxu0 }
 0x11f   : > { %v877_v47 = vadd.f32 %v876_v45, %v875_v42  ;;  %v878_v48 = vpop.f32.mrb[2].mxu1  ;;  %v857_v49 = vpop.f32.mrb[3].mxu0 }
 0x120   : > { %v858_v51 = vadd.f32 %v857_v49, %v856_v46  ;;  %v879_v52 = vpop.f32.mrb[3].mxu1 }
 0x121   : > { %v644_v53 = vadd.f32 %v877_v47, %v855_v44  ;;  %v880_v54 = vadd.f32 %v879_v52, %v878_v48  ;;  %657 = sbr.rel (%p830_p11) target bundleno = 306 (0x132), region = 63 }
 0x123   : > { %v650_v56 = vadd.f32 %v644_v53, %v286_v50  ;;  %v647_v57 = vadd.f32 %v880_v54, %v858_v51 }
 0x125   : > { %652 = vst [vmem:[#allocation2] sm:$0xff] %v650_v56  ;;  %v651_v58 = vadd.f32 %v647_v57, %v287_v55 }
 0x127   : > { %653 = vst [vmem:[#allocation2 + $0x8] sm:$0xff] %v651_v58 }
 0x12c   : > { %v658_v59 = vld [vmem:[#allocation2] sm:$0xff] }
 0x12d   : > { %v667_v62 = vadd.f32 %v831_v60, %v658_v59 }
 0x12e   : > { %v659_v61 = vld [vmem:[#allocation2 + $0x8] sm:$0xff] }
 0x12f   : > { %v668_v63 = vadd.f32 %v831_v60, %v659_v61  ;;  %669 = vst [vmem:[%s1140_s3] sm:$0xff] %v667_v62 }
 0x131   : > { %670 = vst [vmem:[%s1140_s3 + $0x8] sm:$0xff] %v668_v63 }
 0x132 PF: > { %s13_s16 = sadd.s32 1, %s998_s16   ;;  %s1141_s12 = smov %s986_s13 }
 0x133   : > { %p10_p12 = scmp.ge.s32.totalorder %s13_s16, 4   ;;  %s1142_s13 = smov %s1056_s20 }
 0x134   : > { %s1143_s14 = smov %s994_s15  ;;  %s1144_s15 = smov %s1146_s17 }
 0x135   :  { %12 = sbr.rel (!%p10_p12) target bundleno = 3 (0x3), region = 104 }

// kernel: net1_forward.51
= control target key start
LH: loop header
LB: loop body
LE: loop exit
PB: predicated region body
PF: predicated region fallthrough
CT: control target
= control target key end

     0   :  { %v256_v1 = vmov 0   ;;  %v191_v18 = vlaneseq  ;;  %s343_s1 = inlined_call_operand.vmem [shape: bf16[128,256], index: 1, kind: input, shape index: {}]   ;;  %s344_s0 = inlined_call_operand.vmem [shape: bf16[16,128], index: 0, kind: input, shape index: {}]   ;;  %s345_s2 = inlined_call_operand.vmem [shape: f32[1,256], index: 2, kind: input, shape index: {}]   ;;  %s346_s3 = inlined_call_operand.vmem [shape: f32[16,256], index: 3, kind: output, shape index: {}]  }
   0x1   :  { %v231_v0 = vld [vmem:[%s343_s1 + $0x4] ss:$8 sps:$4 sm:$0xff]   ;;  %163 = vmatprep.mubr.bf16.mxu0 %v256_v1  ;;  %v233_v2 = vld [vmem:[%s343_s1] ss:$8 sps:$4 sm:$0xff]   ;;  %v234_v3 = vld [vmem:[%s343_s1 + $0x14] ss:$8 sps:$4 sm:$0xff]  }
   0x2   :  { %131 = vmatprep.subr.bf16.mxu0 %v231_v0  ;;  %v236_v4 = vld [vmem:[%s343_s1 + $0x10] ss:$8 sps:$4 sm:$0xff]   ;;  %v237_v5 = vld [vmem:[%s343_s1 + $0x24] ss:$8 sps:$4 sm:$0xff]   ;;  %v239_v6 = vld [vmem:[%s343_s1 + $0x20] ss:$8 sps:$4 sm:$0xff]  }
   0x3   :  { %132 = vmatpush1.bf16.msra.mxu0 %v233_v2  ;;  %v240_v7 = vld [vmem:[%s343_s1 + $0x34] ss:$8 sps:$4 sm:$0xff]   ;;  %v242_v8 = vld [vmem:[%s343_s1 + $0x30] ss:$8 sps:$4 sm:$0xff]   ;;  %v243_v9 = vld [vmem:[%s343_s1 + $0x44] ss:$8 sps:$4 sm:$0xff]  }
   0x4   :  { %133 = vmatprep.subr.bf16.mxu0 %v234_v3  ;;  %v245_v10 = vld [vmem:[%s343_s1 + $0x40] ss:$8 sps:$4 sm:$0xff]   ;;  %v246_v11 = vld [vmem:[%s343_s1 + $0x54] ss:$8 sps:$4 sm:$0xff]   ;;  %v248_v12 = vld [vmem:[%s343_s1 + $0x50] ss:$8 sps:$4 sm:$0xff]  }
   0x5   :  { %v249_v13 = vld [vmem:[%s343_s1 + $0x64] ss:$8 sps:$4 sm:$0xff]   ;;  %v251_v14 = vld [vmem:[%s343_s1 + $0x60] ss:$8 sps:$4 sm:$0xff]   ;;  %v252_v15 = vld [vmem:[%s343_s1 + $0x74] ss:$8 sps:$4 sm:$0xff]  }
   0x6   :  { %v254_v16 = vld [vmem:[%s343_s1 + $0x70] ss:$8 sps:$4 sm:$0xff]   ;;  %v255_v17 = vld [vmem:[%s344_s0] sm:$0xff]   ;;  %v192_v19 = vshrl.u32 %v191_v18, 7 }
   0x7   :  { %134 = vmatpush1.bf16.msra.mxu0 %v236_v4  ;;  %v189_v21 = vld [vmem:[%s345_s2] sm:$0x3] }
   0x8   :  { %135 = vmatprep.subr.bf16.mxu0 %v237_v5  ;;  %v193_v20 = vsub.s32 0, %v192_v19  ;;  %v197_v22 = vsub.s32 1, %v192_v19 }
   0xa   :  { %v194_v23 = vrot.slane %v189_v21, %v193_v20  ;;  %v198_v24 = vrot.slane %v189_v21, %v197_v22 }
   0xb   :  { %136 = vmatpush1.bf16.msra.mxu0 %v239_v6 }
   0xc   :  { %137 = vmatprep.subr.bf16.mxu0 %v240_v7 }
   0xf   :  { %138 = vmatpush1.bf16.msra.mxu0 %v242_v8 }
  0x10   :  { %139 = vmatprep.subr.bf16.mxu0 %v243_v9 }
  0x13   :  { %140 = vmatpush1.bf16.msra.mxu0 %v245_v10 }
  0x14   :  { %141 = vmatprep.subr.bf16.mxu0 %v246_v11 }
  0x17   :  { %142 = vmatpush1.bf16.msra.mxu0 %v248_v12 }
  0x18   :  { %143 = vmatprep.subr.bf16.mxu0 %v249_v13 }
  0x1b   :  { %144 = vmatpush1.bf16.msra.mxu0 %v251_v14 }
  0x1c   :  { %145 = vmatprep.subr.bf16.mxu0 %v252_v15 }
  0x1f   :  { %146 = vmatpush1.bf16.msra.mxu0 %v254_v16 }
  0x22   :  { %164 = vmatmul.mubr.bf16.vlgmr.msra.gmra.mrb[0].mxu0 %v255_v17 }
  0xf5   :  { %v165_v25 = vpop.f32.mrb[0].mxu0 }
  0xf6   :  { %v201_v26 = vadd.f32 %v194_v23, %v165_v25  ;;  %v167_v27 = vpop.f32.mrb[1].mxu0 }
  0xf7   :  { %v202_v28 = vadd.f32 %v198_v24, %v167_v27  ;;  %v169_v29 = vpop.f32.mrb[2].mxu0 }
  0xf8   :  { %205 = vst [vmem:[%s346_s3] sm:$0xff] %v201_v26  ;;  %v203_v30 = vadd.f32 %v194_v23, %v169_v29  ;;  %v171_v31 = vpop.f32.mrb[3].mxu0 }
  0xf9   :  { %206 = vst [vmem:[%s346_s3 + $0x8] sm:$0xff] %v202_v28  ;;  %v204_v32 = vadd.f32 %v198_v24, %v171_v31 }
  0xfa   :  { %207 = vst [vmem:[%s346_s3 + $0x10] sm:$0xff] %v203_v30 }
  0xfb   :  { %208 = vst [vmem:[%s346_s3 + $0x18] sm:$0xff] %v204_v32 }

// kernel: net1_forward.52
= control target key start
LH: loop header
LB: loop body
LE: loop exit
PB: predicated region body
PF: predicated region fallthrough
CT: control target
= control target key end

     0   :  { %s825_s15 = smov 0   ;;  %s1027_s0 = inlined_call_operand.vmem [shape: f32[64,4,16], index: 0, kind: input, shape index: {}]   ;;  %s1028_s1 = inlined_call_operand.vmem [shape: f32[64,4,1], index: 1, kind: input, shape index: {}]   ;;  %s1029_s2 = inlined_call_operand.vmem [shape: f32[64,4,1], index: 2, kind: input, shape index: {}]   ;;  %s1030_s3 = inlined_call_operand.vmem [shape: f32[64,4,16], index: 3, kind: input, shape index: {}]   ;;  %s1031_s4 = inlined_call_operand.vmem [shape: f32[64,4,16], index: 4, kind: output, shape index: {}]  }
   0x1 LB: > { %s747_s16 = sadd.s32 4294967295, %s797_s15   ;;  %p751_p0 = scmp.ge.s32.totalorder %s797_s15, 1  ;;  %s797_s15 = sphi %s825_s15, %s14_s15  }
   0x2   : > { %p196_p1 = scmp.lt.s32.totalorder %s797_s15, 9 }
   0x4   : > { %p197_p2 = pnand %p751_p0, %p196_p1 }
   0x5   : > { %s752_s17 = sshll.u32 (!%p197_p2), %s747_s16, 3  ;;  %v799_v0 = vmov (!%p197_p2), 0   ;;  %vm275_vm0 = vcmask (!%p197_p2), 125952   ;;  %vm309_vm1 = vcmask (!%p197_p2), 1043456  }
   0x6   : > { %200 = sbr.rel (%p197_p2) target bundleno = 383 (0x17f), region = 36  ;;  %p238_p3 = scmp.lt.s32.totalorder (!%p197_p2), %s752_s17, 63  ;;  %774 = vset.pattern.permute.xlu1 (!%p197_p2), %v799_v0  ;;  %773 = vset.pattern.permute.xlu0 (!%p197_p2), %v799_v0 }
   0xd   : > { %s1033_s17 = smov (!%p238_p3, %s752_s17), 63 }
   0xe   : > { %s833_s18 = sshll.u32 %s1033_s17, 2 }
   0xf   : > { %s241_s21 = scalar_lea.vmem %s1027_s0, %s833_s18  ;;  %s247_s24 = scalar_lea.vmem %s1028_s1, %s833_s18 }
  0x10   : > { %v839_v1 = vld [vmem:[%s241_s21 + $0x8] sm:$0xf]  ;;  %v841_v2 = vld [vmem:[%s241_s21] sm:$0xf]  ;;  %v843_v3 = vld [vmem:[%s241_s21 + $0xc] sm:$0xf]  ;;  %s879_s27 = scalar_lea.vmem %s1029_s2, %s833_s18  ;;  %s977_s30 = scalar_lea.vmem %s1030_s3, %s833_s18 }
  0x11   : > { %v282_v4 = vsel %vm275_vm0, %v839_v1, 0.0  ;;  %v276_v5 = vsel %vm275_vm0, %v841_v2, 0.0  ;;  %v849_v6 = vld [vmem:[%s241_s21 + $0x4] sm:$0xf]  ;;  %v285_v7 = vsel %vm275_vm0, %v843_v3, 0.0  ;;  %s989_s7 = scalar_lea.vmem %s1031_s4, %s833_s18 }
  0x12   : > { %283 = vadd.xlane.f32.xlu1 %v282_v4  ;;  %277 = vadd.xlane.f32.xlu0 %v276_v5  ;;  %v279_v8 = vsel %vm275_vm0, %v849_v6, 0.0  ;;  %v855_v9 = vld [vmem:[%s241_s21 + $0x14] sm:$0xf]  ;;  %v857_v10 = vld [vmem:[%s241_s21 + $0x10] sm:$0xf] }
  0x13   : > { %v291_v11 = vsel %vm275_vm0, %v855_v9, 0.0  ;;  %v288_v12 = vsel %vm275_vm0, %v857_v10, 0.0  ;;  %v863_v13 = vld [vmem:[%s241_s21 + $0x1c] sm:$0xf]  ;;  %v865_v14 = vld [vmem:[%s241_s21 + $0x18] sm:$0xf] }
  0x14   : > { %v297_v15 = vsel %vm275_vm0, %v863_v13, 0.0  ;;  %v294_v16 = vsel %vm275_vm0, %v865_v14, 0.0  ;;  %v512_v17 = vld [vmem:[%s247_s24 + $0x4] sm:$0xf]  ;;  %v513_v18 = vld [vmem:[%s247_s24 + $0x8] sm:$0xf] }
  0x15   : > { %v511_v19 = vld [vmem:[%s247_s24] sm:$0xf]  ;;  %v514_v20 = vld [vmem:[%s247_s24 + $0xc] sm:$0xf]  ;;  %v515_v21 = vld [vmem:[%s247_s24 + $0x10] sm:$0xf] }
  0x16   : > { %286 = vadd.xlane.f32.xlu1 %v285_v7  ;;  %280 = vadd.xlane.f32.xlu0 %v279_v8  ;;  %v516_v22 = vld [vmem:[%s247_s24 + $0x14] sm:$0xf]  ;;  %v517_v23 = vld [vmem:[%s247_s24 + $0x18] sm:$0xf]  ;;  %v518_v24 = vld [vmem:[%s247_s24 + $0x1c] sm:$0xf] }
  0x17   : > { %v567_v25 = vld [vmem:[%s879_s27] sm:$0xf] }
  0x1a   : > { %292 = vadd.xlane.f32.xlu1 %v291_v11  ;;  %289 = vadd.xlane.f32.xlu0 %v288_v12 }
  0x1e   : > { %298 = vadd.xlane.f32.xlu1 %v297_v15  ;;  %295 = vadd.xlane.f32.xlu0 %v294_v16 }
  0x2f   : > { %526 = vperm.xlu1 %774, %v512_v17  }
  0x33   : > { %531 = vperm.xlu1 %774, %v513_v18  }
  0x34   : > { %521 = vperm.xlu0 %773, %v511_v19  }
  0x37   : > { %536 = vperm.xlu1 %774, %v514_v20  }
  0x3b   : > { %541 = vperm.xlu1 %774, %v515_v21  }
  0x3f   : > { %546 = vperm.xlu1 %774, %v516_v22  }
  0x43   : > { %551 = vperm.xlu1 %774, %v517_v23  }
  0x47   : > { %556 = vperm.xlu1 %774, %v518_v24  }
  0x4b   : > { %577 = vperm.xlu1 %774, %v567_v25  }
  0x9f   : > { %v284_v26 = vpop.xlane.xlu1 %283  ;;  %v278_v27 = vpop.xlane.xlu0 %277 }
  0xa0   : > { %v303_v28 = vmul.f32 0.0625, %v284_v26  ;;  %v301_v29 = vmul.f32 0.0625, %v278_v27 }
  0xa2   : > { %v324_v30 = vsel %vm309_vm1, %v303_v28, 0.0  ;;  %v310_v31 = vsel %vm309_vm1, %v301_v29, 0.0 }
  0xa3   : > { %v325_v32 = vrot.slane %v324_v30, 4  ;;  %v311_v33 = vrot.slane %v310_v31, 4  ;;  %v287_v34 = vpop.xlane.xlu1 %286  ;;  %v281_v35 = vpop.xlane.xlu0 %280 }
  0xa4   : > { %v304_v36 = vmul.f32 0.0625, %v287_v34  ;;  %v302_v37 = vmul.f32 0.0625, %v281_v35 }
  0xa5   : > { %v326_v38 = vadd.f32 %v325_v32, %v324_v30  ;;  %v312_v39 = vadd.f32 %v311_v33, %v310_v31 }
  0xa6   : > { %v331_v40 = vsel %vm309_vm1, %v304_v36, 0.0  ;;  %v317_v41 = vsel %vm309_vm1, %v302_v37, 0.0 }
  0xa7   : > { %v327_v42 = vrot.slane %v326_v38, 2  ;;  %v313_v43 = vrot.slane %v312_v39, 2  ;;  %v332_v44 = vrot.slane %v331_v40, 4  ;;  %v318_v45 = vrot.slane %v317_v41, 4  ;;  %v293_v46 = vpop.xlane.xlu1 %292  ;;  %v290_v47 = vpop.xlane.xlu0 %289 }
  0xa8   : > { %v306_v48 = vmul.f32 0.0625, %v293_v46  ;;  %v305_v49 = vmul.f32 0.0625, %v290_v47 }
  0xa9   : > { %v328_v50 = vadd.f32 %v327_v42, %v326_v38  ;;  %v314_v51 = vadd.f32 %v313_v43, %v312_v39  ;;  %v333_v52 = vadd.f32 %v332_v44, %v331_v40  ;;  %v319_v53 = vadd.f32 %v318_v45, %v317_v41 }
  0xaa   : > { %v345_v54 = vsel %vm309_vm1, %v306_v48, 0.0  ;;  %v338_v55 = vsel %vm309_vm1, %v305_v49, 0.0 }
  0xab   : > { %v329_v56 = vrot.slane %v328_v50, 1  ;;  %v315_v57 = vrot.slane %v314_v51, 1  ;;  %v334_v58 = vrot.slane %v333_v52, 2  ;;  %v320_v59 = vrot.slane %v319_v53, 2  ;;  %v299_v60 = vpop.xlane.xlu1 %298  ;;  %v296_v61 = vpop.xlane.xlu0 %295 }
  0xac   : > { %v346_v62 = vrot.slane %v345_v54, 4  ;;  %v339_v63 = vrot.slane %v338_v55, 4  ;;  %v308_v0 = vmul.f32 0.0625, %v299_v60  ;;  %v307_v4 = vmul.f32 0.0625, %v296_v61 }
  0xad   : > { %v335_v5 = vadd.f32 %v334_v58, %v333_v52  ;;  %v321_v7 = vadd.f32 %v320_v59, %v319_v53  ;;  %v316_v8 = vadd.f32 %v315_v57, %v314_v51  ;;  %v330_v11 = vadd.f32 %v329_v56, %v328_v50 }
  0xae   : > { %v347_v12 = vadd.f32 %v346_v62, %v345_v54  ;;  %v340_v15 = vadd.f32 %v339_v63, %v338_v55  ;;  %v359_v16 = vsel %vm309_vm1, %v308_v0, 0.0  ;;  %v352_v17 = vsel %vm309_vm1, %v307_v4, 0.0 }
  0xaf   : > { %v336_v18 = vrot.slane %v335_v5, 1  ;;  %v322_v19 = vrot.slane %v321_v7, 1  ;;  %v360_v20 = vrot.slane %v359_v16, 4  ;;  %v353_v21 = vrot.slane %v352_v17, 4 }
  0xb0   : > { %v348_v22 = vrot.slane %v347_v12, 2  ;;  %v341_v23 = vrot.slane %v340_v15, 2  ;;  %v367_v24 = vmul.f32 0.25, %v316_v8  ;;  %v369_v25 = vmul.f32 0.25, %v330_v11  ;;  %v571_v8 = vld [vmem:[%s879_s27 + $0x10] sm:$0xf] }
  0xb1   : > { %v361_v26 = vadd.f32 %v360_v20, %v359_v16  ;;  %v354_v27 = vadd.f32 %v353_v21, %v352_v17  ;;  %v323_v28 = vadd.f32 %v322_v19, %v321_v7  ;;  %v337_v29 = vadd.f32 %v336_v18, %v335_v5  ;;  %v569_v5 = vld [vmem:[%s879_s27 + $0x8] sm:$0xf]  ;;  %v568_v7 = vld [vmem:[%s879_s27 + $0x4] sm:$0xf]  ;;  %v570_v11 = vld [vmem:[%s879_s27 + $0xc] sm:$0xf]  ;;  %v945_v17 = vpop.permute.xlu1 %526 }
  0xb2   : > { %v349_v30 = vadd.f32 %v348_v22, %v347_v12  ;;  %v342_v31 = vadd.f32 %v341_v23, %v340_v15  ;;  %v891_v32 = vsub.f32 %v841_v2, %v367_v24  ;;  %v894_v33 = vsub.f32 %v839_v1, %v369_v25  ;;  %v573_v12 = vld [vmem:[%s879_s27 + $0x18] sm:$0xf]  ;;  %v572_v15 = vld [vmem:[%s879_s27 + $0x14] sm:$0xf]  ;;  %v574_v16 = vld [vmem:[%s879_s27 + $0x1c] sm:$0xf] }
  0xb3   : > { %v362_v34 = vrot.slane %v361_v26, 2  ;;  %v355_v35 = vrot.slane %v354_v27, 2  ;;  %v368_v36 = vmul.f32 0.25, %v323_v28  ;;  %v370_v37 = vmul.f32 0.25, %v337_v29  ;;  %v959_v24 = vpop.permute.xlu0 %521 }
  0xb4   : > { %v350_v38 = vrot.slane %v349_v30, 1  ;;  %v343_v39 = vrot.slane %v342_v31, 1  ;;  %v383_v40 = vmul.f32 %v891_v32, %v891_v32  ;;  %v385_v44 = vmul.f32 %v894_v33, %v894_v33 }
  0xb5   : > { %v363_v41 = vadd.f32 %v362_v34, %v361_v26  ;;  %v356_v42 = vadd.f32 %v355_v35, %v354_v27  ;;  %v899_v43 = vsub.f32 %v849_v6, %v368_v36  ;;  %v902_v2 = vsub.f32 %v843_v3, %v370_v37  ;;  %v947_v18 = vpop.permute.xlu1 %531 }
  0xb6   : > { %v391_v1 = vsel %vm275_vm0, %v383_v40, 0.0  ;;  %v344_v45 = vadd.f32 %v343_v39, %v342_v31  ;;  %v351_v46 = vadd.f32 %v350_v38, %v349_v30  ;;  %v397_v54 = vsel %vm275_vm0, %v385_v44, 0.0 }
  0xb7   : > { %v364_v47 = vrot.slane %v363_v41, 1  ;;  %v357_v48 = vrot.slane %v356_v42, 1  ;;  %392 = vadd.xlane.f32.xlu0 %v391_v1  ;;  %v384_v49 = vmul.f32 %v899_v43, %v899_v43  ;;  %v386_v3 = vmul.f32 %v902_v2, %v902_v2 }
  0xb8   : > { %v371_v50 = vmul.f32 0.25, %v344_v45  ;;  %v372_v51 = vmul.f32 0.25, %v351_v46 }
  0xb9   : > { %v394_v6 = vsel %vm275_vm0, %v384_v49, 0.0  ;;  %v358_v52 = vadd.f32 %v357_v48, %v356_v42  ;;  %v365_v53 = vadd.f32 %v364_v47, %v363_v41  ;;  %v400_v60 = vsel %vm275_vm0, %v386_v3, 0.0  ;;  %v949_v19 = vpop.permute.xlu1 %536 }
  0xba   : > { %395 = vadd.xlane.f32.xlu1 %v394_v6  ;;  %v914_v55 = vsub.f32 %v857_v10, %v371_v50  ;;  %v917_v56 = vsub.f32 %v855_v9, %v372_v51 }
  0xbb   : > { %398 = vadd.xlane.f32.xlu0 %v397_v54  ;;  %v373_v57 = vmul.f32 0.25, %v358_v52  ;;  %v374_v58 = vmul.f32 0.25, %v365_v53 }
  0xbc   : > { %v387_v59 = vmul.f32 %v914_v55, %v914_v55  ;;  %v388_v61 = vmul.f32 %v917_v56, %v917_v56 }
  0xbd   : > { %v925_v62 = vsub.f32 %v865_v14, %v373_v57  ;;  %v928_v9 = vsub.f32 %v863_v13, %v374_v58  ;;  %v951_v20 = vpop.permute.xlu1 %541 }
  0xbe   : > { %401 = vadd.xlane.f32.xlu1 %v400_v60  ;;  %v403_v10 = vsel %vm275_vm0, %v387_v59, 0.0  ;;  %v406_v0 = vsel %vm275_vm0, %v388_v61, 0.0 }
  0xbf   : > { %404 = vadd.xlane.f32.xlu0 %v403_v10  ;;  %v389_v63 = vmul.f32 %v925_v62, %v925_v62  ;;  %v390_v14 = vmul.f32 %v928_v9, %v928_v9 }
  0xc1   : > { %v409_v4 = vsel %vm275_vm0, %v389_v63, 0.0  ;;  %v412_v13 = vsel %vm275_vm0, %v390_v14, 0.0  ;;  %v953_v21 = vpop.permute.xlu1 %546 }
  0xc2   : > { %407 = vadd.xlane.f32.xlu1 %v406_v0 }
  0xc3   : > { %410 = vadd.xlane.f32.xlu0 %v409_v4 }
  0xc5   : > { %v955_v22 = vpop.permute.xlu1 %551 }
  0xc6   : > { %413 = vadd.xlane.f32.xlu1 %v412_v13 }
  0xc9   : > { %v957_v23 = vpop.permute.xlu1 %556 }
  0xcd   : > { %v961_v25 = vpop.permute.xlu1 %577 }
  0xd7   : > { %587 = vperm.xlu1 %774, %v569_v5  }
  0xd9   : > { %582 = vperm.xlu0 %773, %v568_v7  }
  0xdb   : > { %597 = vperm.xlu1 %774, %v571_v8  }
  0xdd   : > { %592 = vperm.xlu0 %773, %v570_v11  }
  0xdf   : > { %607 = vperm.xlu1 %774, %v573_v12  }
  0xe1   : > { %602 = vperm.xlu0 %773, %v572_v15  }
  0xe5   : > { %612 = vperm.xlu0 %773, %v574_v16  }
 0x144   : > { %v393_v26 = vpop.xlane.xlu0 %392 }
 0x145   : > { %v415_v27 = vmul.f32 0.0625, %v393_v26 }
 0x147   : > { %v423_v28 = vsel %vm309_vm1, %v415_v27, 0.0  ;;  %v396_v29 = vpop.xlane.xlu1 %395 }
 0x148   : > { %v424_v30 = vrot.slane %v423_v28, 4  ;;  %v416_v31 = vmul.f32 0.0625, %v396_v29  ;;  %v399_v34 = vpop.xlane.xlu0 %398 }
 0x149   : > { %v417_v35 = vmul.f32 0.0625, %v399_v34 }
 0x14a   : > { %v425_v36 = vadd.f32 %v424_v30, %v423_v28  ;;  %v430_v37 = vsel %vm309_vm1, %v416_v31, 0.0 }
 0x14b   : > { %v431_v38 = vrot.slane %v430_v37, 4  ;;  %v437_v39 = vsel %vm309_vm1, %v417_v35, 0.0  ;;  %v402_v40 = vpop.xlane.xlu1 %401 }
 0x14c   : > { %v426_v41 = vrot.slane %v425_v36, 2  ;;  %v438_v42 = vrot.slane %v437_v39, 4  ;;  %v418_v1 = vmul.f32 0.0625, %v402_v40  ;;  %v405_v44 = vpop.xlane.xlu0 %404 }
 0x14d   : > { %v432_v45 = vadd.f32 %v431_v38, %v430_v37  ;;  %v419_v46 = vmul.f32 0.0625, %v405_v44 }
 0x14e   : > { %v427_v47 = vadd.f32 %v426_v41, %v425_v36  ;;  %v439_v48 = vadd.f32 %v438_v42, %v437_v39  ;;  %v444_v49 = vsel %vm309_vm1, %v418_v1, 0.0 }
 0x14f   : > { %v433_v50 = vrot.slane %v432_v45, 2  ;;  %v445_v51 = vrot.slane %v444_v49, 4  ;;  %v451_v6 = vsel %vm309_vm1, %v419_v46, 0.0  ;;  %v408_v3 = vpop.xlane.xlu1 %407 }
 0x150   : > { %v428_v52 = vrot.slane %v427_v47, 1  ;;  %v440_v53 = vrot.slane %v439_v48, 2  ;;  %v452_v54 = vrot.slane %v451_v6, 4  ;;  %v420_v57 = vmul.f32 0.0625, %v408_v3  ;;  %v411_v58 = vpop.xlane.xlu0 %410 }
 0x151   : > { %v434_v59 = vadd.f32 %v433_v50, %v432_v45  ;;  %v446_v60 = vadd.f32 %v445_v51, %v444_v49  ;;  %v421_v61 = vmul.f32 0.0625, %v411_v58 }
 0x152   : > { %v429_v10 = vadd.f32 %v428_v52, %v427_v47  ;;  %v441_v63 = vadd.f32 %v440_v53, %v439_v48  ;;  %v453_v0 = vadd.f32 %v452_v54, %v451_v6  ;;  %v458_v4 = vsel %vm309_vm1, %v420_v57, 0.0 }
 0x153   : > { %v435_v14 = vrot.slane %v434_v59, 1  ;;  %v447_v13 = vrot.slane %v446_v60, 2  ;;  %v459_v5 = vrot.slane %v458_v4, 4  ;;  %v465_v7 = vsel %vm309_vm1, %v421_v61, 0.0  ;;  %v414_v8 = vpop.xlane.xlu1 %413 }
 0x154   : > { %v479_v11 = vmul.f32 0.25, %v429_v10  ;;  %v442_v12 = vrot.slane %v441_v63, 1  ;;  %v454_v15 = vrot.slane %v453_v0, 2  ;;  %v466_v16 = vrot.slane %v465_v7, 4 }
 0x155   : > { %v436_v26 = vadd.f32 %v435_v14, %v434_v59  ;;  %v448_v27 = vadd.f32 %v447_v13, %v446_v60  ;;  %v460_v28 = vadd.f32 %v459_v5, %v458_v4  ;;  %v422_v29 = vmul.f32 0.0625, %v414_v8 }
 0x156   : > { %v487_v30 = vadd.f32 1e-05, %v479_v11  ;;  %v443_v31 = vadd.f32 %v442_v12, %v441_v63  ;;  %v455_v34 = vadd.f32 %v454_v15, %v453_v0  ;;  %v467_v35 = vadd.f32 %v466_v16, %v465_v7 }
 0x157   : > { %v480_v36 = vmul.f32 0.25, %v436_v26  ;;  %v449_v37 = vrot.slane %v448_v27, 1  ;;  %v461_v38 = vrot.slane %v460_v28, 2  ;;  %v472_v39 = vsel %vm309_vm1, %v422_v29, 0.0  ;;  %v588_v16 = vpop.permute.xlu1 %587 }
 0x158   : > { %775 = vrsqrt.f32 %v487_v30  ;;  %v481_v40 = vmul.f32 0.25, %v443_v31  ;;  %v456_v41 = vrot.slane %v455_v34, 1  ;;  %v468_v42 = vrot.slane %v467_v35, 2  ;;  %v583_v12 = vpop.permute.xlu0 %582 }
 0x159   : > { %v488_v1 = vadd.f32 1e-05, %v480_v36  ;;  %v450_v44 = vadd.f32 %v449_v37, %v448_v27  ;;  %v462_v45 = vadd.f32 %v461_v38, %v460_v28  ;;  %v473_v46 = vrot.slane %v472_v39, 4  ;;  %v632_v37 = vld [vmem:[%s977_s30 + $0x4] sm:$0xf] }
 0x15a   : > { %v489_v47 = vadd.f32 1e-05, %v481_v40  ;;  %v457_v48 = vadd.f32 %v456_v41, %v455_v34  ;;  %v469_v49 = vadd.f32 %v468_v42, %v467_v35 }
 0x15b   : > { %777 = vrsqrt.f32 %v488_v1  ;;  %v482_v50 = vmul.f32 0.25, %v450_v44  ;;  %v463_v51 = vrot.slane %v462_v45, 1  ;;  %v474_v6 = vadd.f32 %v473_v46, %v472_v39  ;;  %v633_v39 = vld [vmem:[%s977_s30 + $0x8] sm:$0xf]  ;;  %v598_v40 = vpop.permute.xlu1 %597 }
 0x15c   : > { %779 = vrsqrt.f32 %v489_v47  ;;  %v483_v3 = vmul.f32 0.25, %v457_v48  ;;  %v470_v52 = vrot.slane %v469_v49, 1  ;;  %v593_v38 = vpop.permute.xlu0 %592 }
 0x15d   : > { %v490_v53 = vadd.f32 1e-05, %v482_v50  ;;  %v464_v54 = vadd.f32 %v463_v51, %v462_v45  ;;  %v475_v57 = vrot.slane %v474_v6, 2 }
 0x15e   : > { %v491_v58 = vadd.f32 1e-05, %v483_v3  ;;  %v471_v59 = vadd.f32 %v470_v52, %v469_v49  ;;  %v634_v49 = vld [vmem:[%s977_s30 + $0xc] sm:$0xf] }
 0x15f   : > { %781 = vrsqrt.f32 %v490_v53  ;;  %v484_v60 = vmul.f32 0.25, %v464_v54  ;;  %v476_v61 = vadd.f32 %v475_v57, %v474_v6  ;;  %v608_v53 = vpop.permute.xlu1 %607 }
 0x160   : > { %783 = vrsqrt.f32 %v491_v58  ;;  %v485_v10 = vmul.f32 0.25, %v471_v59  ;;  %v603_v3 = vpop.permute.xlu0 %602  ;;  %v636_v59 = vld [vmem:[%s977_s30 + $0x14] sm:$0xf] }
 0x161   : > { %v492_v63 = vadd.f32 1e-05, %v484_v60  ;;  %v477_v0 = vrot.slane %v476_v61, 1 }
 0x162   : > { %v776_v4 = vpop.eup %775  ;;  %v493_v14 = vadd.f32 1e-05, %v485_v10 }
 0x163   : > { %v503_v13 = vmul.f32 %v776_v4, %v891_v32  ;;  %785 = vrsqrt.f32 %v492_v63  ;;  %v478_v5 = vadd.f32 %v477_v0, %v476_v61 }
 0x164   : > { %787 = vrsqrt.f32 %v493_v14  ;;  %v613_v4 = vpop.permute.xlu0 %612 }
 0x165   : > { %v778_v7 = vpop.eup %777  ;;  %v559_v8 = vmul.f32 %v959_v24, %v503_v13  ;;  %v486_v11 = vmul.f32 0.25, %v478_v5  ;;  %v631_v24 = vld [vmem:[%s977_s30] sm:$0xf]  ;;  %v638_v13 = vld [vmem:[%s977_s30 + $0x1c] sm:$0xf] }
 0x166   : > { %v780_v15 = vpop.eup %779  ;;  %v504_v26 = vmul.f32 %v778_v7, %v899_v43 }
 0x167   : > { %v615_v32 = vadd.f32 %v961_v25, %v559_v8  ;;  %v494_v27 = vadd.f32 1e-05, %v486_v11  ;;  %v505_v28 = vmul.f32 %v780_v15, %v894_v33 }
 0x168   : > { %v560_v29 = vmul.f32 %v945_v17, %v504_v26 }
 0x169   : > { %v782_v30 = vpop.eup %781  ;;  %v623_v31 = vmax.f32 %v615_v32, 0.0  ;;  %789 = vrsqrt.f32 %v494_v27  ;;  %v561_v34 = vmul.f32 %v947_v18, %v505_v28 }
 0x16a   : > { %v784_v35 = vpop.eup %783  ;;  %v616_v43 = vadd.f32 %v583_v12, %v560_v29  ;;  %v506_v25 = vmul.f32 %v782_v30, %v902_v2 }
 0x16b   : > { %v617_v33 = vadd.f32 %v588_v16, %v561_v34  ;;  %v639_v36 = vadd.f32 %v631_v24, %v623_v31  ;;  %v507_v17 = vmul.f32 %v784_v35, %v914_v55 }
 0x16c   : > { %v624_v18 = vmax.f32 %v616_v43, 0.0  ;;  %v562_v41 = vmul.f32 %v949_v19, %v506_v25  ;;  %v635_v19 = vld [vmem:[%s977_s30 + $0x10] sm:$0xf] }
 0x16d   : > { %v786_v42 = vpop.eup %785  ;;  %v625_v1 = vmax.f32 %v617_v33, 0.0  ;;  %647 = vst.msk [vmem:[%s989_s7] sm:$0xf] %vm275_vm0, %v639_v36  ;;  %v563_v2 = vmul.f32 %v951_v20, %v507_v17 }
 0x16e   : > { %v788_v44 = vpop.eup %787  ;;  %v640_v45 = vadd.f32 %v632_v37, %v624_v18  ;;  %v618_v46 = vadd.f32 %v593_v38, %v562_v41  ;;  %v508_v55 = vmul.f32 %v786_v42, %v917_v56 }
 0x16f   : > { %v641_v47 = vadd.f32 %v633_v39, %v625_v1  ;;  %v619_v48 = vadd.f32 %v598_v40, %v563_v2  ;;  %v509_v50 = vmul.f32 %v788_v44, %v925_v62 }
 0x170   : > { %648 = vst.msk [vmem:[%s989_s7 + $0x4] sm:$0xf] %vm275_vm0, %v640_v45  ;;  %v626_v51 = vmax.f32 %v618_v46, 0.0  ;;  %v564_v6 = vmul.f32 %v953_v21, %v508_v55  ;;  %v637_v21 = vld [vmem:[%s977_s30 + $0x18] sm:$0xf] }
 0x171   : > { %649 = vst.msk [vmem:[%s989_s7 + $0x8] sm:$0xf] %vm275_vm0, %v641_v47  ;;  %v627_v20 = vmax.f32 %v619_v48, 0.0  ;;  %v565_v56 = vmul.f32 %v955_v22, %v509_v50 }
 0x172   : > { %v642_v52 = vadd.f32 %v634_v49, %v626_v51  ;;  %v620_v54 = vadd.f32 %v603_v3, %v564_v6 }
 0x173   : > { %v790_v62 = vpop.eup %789  ;;  %v643_v57 = vadd.f32 %v635_v19, %v627_v20  ;;  %v621_v58 = vadd.f32 %v608_v53, %v565_v56 }
 0x174   : > { %650 = vst.msk [vmem:[%s989_s7 + $0xc] sm:$0xf] %vm275_vm0, %v642_v52  ;;  %v628_v60 = vmax.f32 %v620_v54, 0.0  ;;  %v510_v61 = vmul.f32 %v790_v62, %v928_v9 }
 0x175   : > { %651 = vst.msk [vmem:[%s989_s7 + $0x10] sm:$0xf] %vm275_vm0, %v643_v57  ;;  %v629_v22 = vmax.f32 %v621_v58, 0.0 }
 0x176   : > { %v644_v10 = vadd.f32 %v636_v59, %v628_v60  ;;  %v566_v63 = vmul.f32 %v957_v23, %v510_v61 }
 0x177   : > { %v645_v0 = vadd.f32 %v637_v21, %v629_v22 }
 0x178   : > { %652 = vst.msk [vmem:[%s989_s7 + $0x14] sm:$0xf] %vm275_vm0, %v644_v10  ;;  %v622_v14 = vadd.f32 %v613_v4, %v566_v63 }
 0x179   : > { %653 = vst.msk [vmem:[%s989_s7 + $0x18] sm:$0xf] %vm275_vm0, %v645_v0 }
 0x17a   : > { %v630_v5 = vmax.f32 %v622_v14, 0.0 }
 0x17c   : > { %v646_v7 = vadd.f32 %v638_v13, %v630_v5 }
 0x17e   : > { %654 = vst.msk [vmem:[%s989_s7 + $0x1c] sm:$0xf] %vm275_vm0, %v646_v7 }
 0x17f PF: > { %s14_s15 = sadd.s32 1, %s797_s15  }
 0x180   : > { %p11_p4 = scmp.ge.s32.totalorder %s14_s15, 10  }
 0x182   :  { %13 = sbr.rel (!%p11_p4) target bundleno = 1 (0x1), region = 75 }

// kernel: net1_forward.71
= control target key start
LH: loop header
LB: loop body
LE: loop exit
PB: predicated region body
PF: predicated region fallthrough
CT: control target
= control target key end

     0   :  { %s665_s1 = inlined_call_operand.vmem [shape: bf16[512,128], index: 1, kind: input, shape index: {}]   ;;  %s666_s0 = inlined_call_operand.vmem [shape: bf16[16,512], index: 0, kind: input, shape index: {}]   ;;  %s667_s2 = inlined_call_operand.vmem [shape: f32[1,128], index: 2, kind: input, shape index: {}]   ;;  %s668_s3 = inlined_call_operand.vmem [shape: f32[16,128], index: 3, kind: output, shape index: {}]  }
   0x1   :  { %v490_v0 = vld [vmem:[%s665_s1 + $0x40] sm:$0xff]   ;;  %v494_v4 = vld [vmem:[%s665_s1 + $0x48] sm:$0xff]   ;;  %v498_v8 = vld [vmem:[%s665_s1 + $0x50] sm:$0xff]  }
   0x2   :  { %v491_v1 = vld [vmem:[%s665_s1 + $0xc0] sm:$0xff]   ;;  %446 = vmatprep.subr.bf16.mxu0 %v490_v0  ;;  %v495_v5 = vld [vmem:[%s665_s1 + $0xc8] sm:$0xff]   ;;  %v499_v9 = vld [vmem:[%s665_s1 + $0xd0] sm:$0xff]  }
   0x3   :  { %v492_v2 = vld [vmem:[%s665_s1] sm:$0xff]   ;;  %468 = vmatprep.subr.bf16.mxu1 %v491_v1  ;;  %v496_v6 = vld [vmem:[%s665_s1 + $0x8] sm:$0xff]   ;;  %v500_v10 = vld [vmem:[%s665_s1 + $0x10] sm:$0xff]  }
   0x4   :  { %v493_v3 = vld [vmem:[%s665_s1 + $0x80] sm:$0xff]   ;;  %447 = vmatpush3.bf16.msra.mxu0 %v492_v2  ;;  %v497_v7 = vld [vmem:[%s665_s1 + $0x88] sm:$0xff]   ;;  %v501_v11 = vld [vmem:[%s665_s1 + $0x90] sm:$0xff]  }
   0x5   :  { %469 = vmatpush3.bf16.msra.mxu1 %v493_v3  ;;  %448 = vmatprep.subr.bf16.mxu0 %v494_v4  ;;  %v502_v12 = vld [vmem:[%s665_s1 + $0x58] sm:$0xff]   ;;  %v506_v16 = vld [vmem:[%s665_s1 + $0x60] sm:$0xff]   ;;  %v510_v20 = vld [vmem:[%s665_s1 + $0x68] sm:$0xff]  }
   0x6   :  { %470 = vmatprep.subr.bf16.mxu1 %v495_v5  ;;  %v503_v13 = vld [vmem:[%s665_s1 + $0xd8] sm:$0xff]   ;;  %v507_v17 = vld [vmem:[%s665_s1 + $0xe0] sm:$0xff]   ;;  %v511_v21 = vld [vmem:[%s665_s1 + $0xe8] sm:$0xff]  }
   0x7   :  { %v504_v14 = vld [vmem:[%s665_s1 + $0x18] sm:$0xff]   ;;  %v508_v18 = vld [vmem:[%s665_s1 + $0x20] sm:$0xff]   ;;  %v512_v22 = vld [vmem:[%s665_s1 + $0x28] sm:$0xff]  }
   0x8   :  { %449 = vmatpush3.bf16.msra.mxu0 %v496_v6  ;;  %v505_v15 = vld [vmem:[%s665_s1 + $0x98] sm:$0xff]   ;;  %v509_v19 = vld [vmem:[%s665_s1 + $0xa0] sm:$0xff]   ;;  %v513_v23 = vld [vmem:[%s665_s1 + $0xa8] sm:$0xff]  }
   0x9   :  { %471 = vmatpush3.bf16.msra.mxu1 %v497_v7  ;;  %450 = vmatprep.subr.bf16.mxu0 %v498_v8  ;;  %v514_v24 = vld [vmem:[%s665_s1 + $0x70] sm:$0xff]   ;;  %v518_v28 = vld [vmem:[%s665_s1 + $0x78] sm:$0xff]   ;;  %v445_v45 = vld [vmem:[%s667_s2] ss:$0 sm:$0xff] }
   0xa   :  { %472 = vmatprep.subr.bf16.mxu1 %v499_v9  ;;  %v515_v25 = vld [vmem:[%s665_s1 + $0xf0] sm:$0xff]   ;;  %v519_v29 = vld [vmem:[%s665_s1 + $0xf8] sm:$0xff]  }
   0xb   :  { %v516_v26 = vld [vmem:[%s665_s1 + $0x30] sm:$0xff]   ;;  %v520_v30 = vld [vmem:[%s665_s1 + $0x38] sm:$0xff]  }
   0xc   :  { %451 = vmatpush3.bf16.msra.mxu0 %v500_v10  ;;  %v517_v27 = vld [vmem:[%s665_s1 + $0xb0] sm:$0xff]   ;;  %v521_v31 = vld [vmem:[%s665_s1 + $0xb8] sm:$0xff]  }
   0xd   :  { %473 = vmatpush3.bf16.msra.mxu1 %v501_v11  ;;  %452 = vmatprep.subr.bf16.mxu0 %v502_v12  ;;  %v522_v32 = vld [vmem:[%s666_s0] ss:$16 sps:$4 sm:$0xff]   ;;  %v524_v33 = vld [vmem:[%s666_s0 + $0x4] ss:$16 sps:$4 sm:$0xff]   ;;  %v525_v34 = vld [vmem:[%s666_s0 + $0x8] ss:$16 sps:$4 sm:$0xff]  }
   0xe   :  { %474 = vmatprep.subr.bf16.mxu1 %v503_v13  ;;  %v527_v35 = vld [vmem:[%s666_s0 + $0xc] ss:$16 sps:$4 sm:$0xff]   ;;  %335 = vmatprep.mubr.bf16.mxu0 %v524_v33 }
   0xf   :  { %376 = vmatprep.mubr.bf16.mxu1 %v527_v35 }
  0x10   :  { %453 = vmatpush3.bf16.msra.mxu0 %v504_v14 }
  0x11   :  { %475 = vmatpush3.bf16.msra.mxu1 %v505_v15  ;;  %454 = vmatprep.subr.bf16.mxu0 %v506_v16 }
  0x12   :  { %476 = vmatprep.subr.bf16.mxu1 %v507_v17 }
  0x14   :  { %455 = vmatpush3.bf16.msra.mxu0 %v508_v18 }
  0x15   :  { %477 = vmatpush3.bf16.msra.mxu1 %v509_v19  ;;  %456 = vmatprep.subr.bf16.mxu0 %v510_v20 }
  0x16   :  { %478 = vmatprep.subr.bf16.mxu1 %v511_v21 }
  0x18   :  { %457 = vmatpush3.bf16.msra.mxu0 %v512_v22 }
  0x19   :  { %479 = vmatpush3.bf16.msra.mxu1 %v513_v23  ;;  %458 = vmatprep.subr.bf16.mxu0 %v514_v24 }
  0x1a   :  { %480 = vmatprep.subr.bf16.mxu1 %v515_v25 }
  0x1c   :  { %459 = vmatpush3.bf16.msra.mxu0 %v516_v26 }
  0x1d   :  { %481 = vmatpush3.bf16.msra.mxu1 %v517_v27  ;;  %460 = vmatprep.subr.bf16.mxu0 %v518_v28 }
  0x1e   :  { %482 = vmatprep.subr.bf16.mxu1 %v519_v29 }
  0x20   :  { %461 = vmatpush3.bf16.msra.mxu0 %v520_v30 }
  0x21   :  { %483 = vmatpush3.bf16.msra.mxu1 %v521_v31 }
  0x23   :  { %336 = vmatmul.mubr.bf16.vlgmr.msra.gmra.mrb[0].mxu0 %v522_v32 }
  0x24   :  { %377 = vmatmul.mubr.bf16.vlgmr.msra.gmra.mrb[0].mxu1 %v525_v34 }
  0xf6   :  { %v462_v36 = vpop.f32.mrb[0].mxu0 }
  0xf7   :  { %v484_v37 = vpop.f32.mrb[0].mxu1  ;;  %v463_v38 = vpop.f32.mrb[1].mxu0 }
  0xf8   :  { %v464_v39 = vadd.f32 %v463_v38, %v462_v36  ;;  %v485_v40 = vpop.f32.mrb[1].mxu1  ;;  %v465_v41 = vpop.f32.mrb[2].mxu0 }
  0xf9   :  { %v486_v42 = vadd.f32 %v485_v40, %v484_v37  ;;  %v487_v43 = vpop.f32.mrb[2].mxu1  ;;  %v466_v44 = vpop.f32.mrb[3].mxu0 }
  0xfa   :  { %v467_v46 = vadd.f32 %v466_v44, %v465_v41  ;;  %v488_v47 = vpop.f32.mrb[3].mxu1 }
  0xfb   :  { %v379_v48 = vadd.f32 %v486_v42, %v464_v39  ;;  %v489_v49 = vadd.f32 %v488_v47, %v487_v43 }
  0xfd   :  { %v401_v50 = vadd.f32 %v445_v45, %v379_v48  ;;  %v382_v51 = vadd.f32 %v489_v49, %v467_v46 }
  0xff   :  { %403 = vst [vmem:[%s668_s3] sm:$0xff] %v401_v50  ;;  %v402_v52 = vadd.f32 %v445_v45, %v382_v51 }
 0x101   :  { %404 = vst [vmem:[%s668_s3 + $0x8] sm:$0xff] %v402_v52 }

// kernel: net1_forward.74
= control target key start
LH: loop header
LB: loop body
LE: loop exit
PB: predicated region body
PF: predicated region fallthrough
CT: control target
= control target key end

     0   :  { %s1021_s12 = smov 0   ;;  %s1023_s13 = smov 0   ;;  %s1137_s0 = inlined_call_operand.vmem [shape: bf16[16,2048], index: 0, kind: input, shape index: {}]   ;;  %s1138_s1 = inlined_call_operand.vmem [shape: bf16[2048,128], index: 1, kind: input, shape index: {}]   ;;  %s1139_s2 = inlined_call_operand.vmem [shape: f32[1,128], index: 2, kind: input, shape index: {}]   ;;  %s1140_s3 = inlined_call_operand.vmem [shape: f32[16,128], index: 3, kind: output, shape index: {}]  }
   0x1   :  { %s1025_s14 = smov 0   ;;  %s1027_s15 = smov 0  }
   0x2   :  { %s1029_s16 = smov 0  }
   0x3 LB: > { %s25_s17 = sadd.s32 1, %s994_s15  ;;  %p48_p1 = scmp.ne.s32.totalorder %s986_s13, %s982_s12  ;;  %s998_s16 = sphi %s1029_s16, %s13_s16   ;;  %s994_s15 = sphi %s1027_s15, %s1144_s15   ;;  %s990_s14 = sphi %s1025_s14, %s1143_s14   ;;  %s986_s13 = sphi %s1023_s13, %s1142_s13   ;;  %s982_s12 = sphi %s1021_s12, %s1141_s12  }
   0x4   : > { %p26_p0 = scmp.ge.s32.totalorder %s25_s17, 4  ;;  %p49_p2 = scmp.eq.s32.totalorder %s998_s16, 0 }
   0x5   : > { %s41_s19 = sadd.s32 1, %s986_s13  ;;  %p785_p5 = scmp.ge.s32.totalorder %s998_s16, 4 }
   0x6   : > { %s1146_s17 = smov (%p26_p0, %s25_s17), 0  ;;  %p50_p3 = por %p49_p2, %p48_p1 }
   0x7   : > { %s37_s18 = ssub.s32 %s994_s15, %s1146_s17  ;;  %162 = sbr.rel (%p785_p5) target bundleno = 21 (0x15), region = 20 }
   0x8   : > { %p39_p4 = scmp.eq.s32.totalorder %s37_s18, 0 }
   0xa   : > { %s1056_s20 = scalar_select %p39_p4, %s986_s13, %s41_s19  }
   0xe   : > { %165 = sbr.rel (!%p50_p3) target bundleno = 21 (0x15), region = 24  ;;  %s167_s21 = sand.u32 (%p50_p3), 1, %s986_s13  }
   0xf   : > { %s836_s22 = sshll.u32 (%p50_p3), %s994_s15, 4  ;;  %s786_s23 = sshll.u32 (%p50_p3), %s167_s21, 5 }
  0x10   : > { %s175_s26 = scalar_lea.vmem (%p50_p3), %s1137_s0, %s836_s22  ;;  %s169_s27 = scalar_lea.vmem (%p50_p3), [#allocation3], %s786_s23 }
  0x11   : > { %v188_v0 = vld [vmem:[%s175_s26] sm:$0xff] (%p50_p3)  ;;  %v190_v1 = vld [vmem:[%s175_s26 + $0x8] sm:$0xff] (%p50_p3) }
  0x12   : > { %v192_v2 = vld [vmem:[%s175_s26 + $0x40] sm:$0xff] (%p50_p3)  ;;  %189 = vst [vmem:[%s169_s27] sm:$0xff] (%p50_p3), %v188_v0  ;;  %191 = vst [vmem:[%s169_s27 + $0x8] sm:$0xff] (%p50_p3), %v190_v1  ;;  %v194_v3 = vld [vmem:[%s175_s26 + $0x48] sm:$0xff] (%p50_p3) }
  0x13   : > { %193 = vst [vmem:[%s169_s27 + $0x10] sm:$0xff] (%p50_p3), %v192_v2  ;;  %195 = vst [vmem:[%s169_s27 + $0x18] sm:$0xff] (%p50_p3), %v194_v3 }
  0x15 PF: > { %p789_p6 = scmp.ge.s32.totalorder %s998_s16, 1  ;;  %p212_p7 = scmp.lt.s32.totalorder %s998_s16, 5 }
  0x17   : > { %p213_p8 = pnand %p789_p6, %p212_p7 }
  0x18   : > { %s219_s28 = sand.u32 (!%p213_p8), 1, %s982_s12   ;;  %s791_s29 = sshll.u32 (!%p213_p8), %s990_s14, 6 }
  0x19   : > { %216 = sbr.rel (%p213_p8) target bundleno = 306 (0x132), region = 51  ;;  %s790_s30 = sshll.u32 (!%p213_p8), %s219_s28, 5 }
  0x1a   : > { %p259_p9 = scmp.lt.s32.totalorder (!%p213_p8), %s791_s29, 255  ;;  %s1073_s8 = scalar_lea.vmem (!%p213_p8), [#allocation3], %s790_s30 }
  0x1b   : > { %p793_p10 = scmp.ne.s32.totalorder (!%p213_p8), %s990_s14, 0 }
  0x20   : > { %s1148_s29 = smov (!%p259_p9, %s791_s29), 255  ;;  %283 = sbr.rel (%p793_p10) target bundleno = 39 (0x27), region = 59 }
  0x21   : > { %s792_s4 = sshll.u32 %s1148_s29, 2  ;;  %v1000_v4 = vmov (!%p793_p10), 0.0  }
  0x22   : > { %s1071_s7 = scalar_lea.vmem %s1138_s1, %s792_s4  ;;  %284 = vst [vmem:[#allocation2] sm:$0xff] (!%p793_p10), %v1000_v4  ;;  %285 = vst [vmem:[#allocation2 + $0x8] sm:$0xff] (!%p793_p10), %v1000_v4 }
  0x27 PF: > { %v922_v5 = vld [vmem:[%s1071_s7 + $0x40] sm:$0xff]   ;;  %v926_v9 = vld [vmem:[%s1071_s7 + $0x48] sm:$0xff]   ;;  %v930_v13 = vld [vmem:[%s1071_s7 + $0x50] sm:$0xff]   ;;  %p830_p11 = scmp.ne.s32.totalorder %s990_s14, 3 }
  0x28   : > { %v923_v6 = vld [vmem:[%s1071_s7 + $0xc0] sm:$0xff]   ;;  %837 = vmatprep.subr.bf16.mxu0 %v922_v5  ;;  %v927_v10 = vld [vmem:[%s1071_s7 + $0xc8] sm:$0xff]   ;;  %v931_v14 = vld [vmem:[%s1071_s7 + $0xd0] sm:$0xff]  }
  0x29   : > { %v924_v7 = vld [vmem:[%s1071_s7] sm:$0xff]   ;;  %859 = vmatprep.subr.bf16.mxu1 %v923_v6  ;;  %v928_v11 = vld [vmem:[%s1071_s7 + $0x8] sm:$0xff]   ;;  %v932_v15 = vld [vmem:[%s1071_s7 + $0x10] sm:$0xff]  }
  0x2a   : > { %v925_v8 = vld [vmem:[%s1071_s7 + $0x80] sm:$0xff]   ;;  %838 = vmatpush3.bf16.msra.mxu0 %v924_v7  ;;  %v929_v12 = vld [vmem:[%s1071_s7 + $0x88] sm:$0xff]   ;;  %v933_v16 = vld [vmem:[%s1071_s7 + $0x90] sm:$0xff]  }
  0x2b   : > { %860 = vmatpush3.bf16.msra.mxu1 %v925_v8  ;;  %839 = vmatprep.subr.bf16.mxu0 %v926_v9  ;;  %v934_v17 = vld [vmem:[%s1071_s7 + $0x58] sm:$0xff]   ;;  %v938_v21 = vld [vmem:[%s1071_s7 + $0x60] sm:$0xff]   ;;  %v942_v25 = vld [vmem:[%s1071_s7 + $0x68] sm:$0xff]  }
  0x2c   : > { %861 = vmatprep.subr.bf16.mxu1 %v927_v10  ;;  %v935_v18 = vld [vmem:[%s1071_s7 + $0xd8] sm:$0xff]   ;;  %v939_v22 = vld [vmem:[%s1071_s7 + $0xe0] sm:$0xff]   ;;  %v943_v26 = vld [vmem:[%s1071_s7 + $0xe8] sm:$0xff]  }
  0x2d   : > { %v936_v19 = vld [vmem:[%s1071_s7 + $0x18] sm:$0xff]   ;;  %v940_v23 = vld [vmem:[%s1071_s7 + $0x20] sm:$0xff]   ;;  %v944_v27 = vld [vmem:[%s1071_s7 + $0x28] sm:$0xff]  }
  0x2e   : > { %840 = vmatpush3.bf16.msra.mxu0 %v928_v11  ;;  %v937_v20 = vld [vmem:[%s1071_s7 + $0x98] sm:$0xff]   ;;  %v941_v24 = vld [vmem:[%s1071_s7 + $0xa0] sm:$0xff]   ;;  %v945_v28 = vld [vmem:[%s1071_s7 + $0xa8] sm:$0xff]  }
  0x2f   : > { %862 = vmatpush3.bf16.msra.mxu1 %v929_v12  ;;  %841 = vmatprep.subr.bf16.mxu0 %v930_v13  ;;  %v946_v29 = vld [vmem:[%s1071_s7 + $0x70] sm:$0xff]   ;;  %v950_v33 = vld [vmem:[%s1071_s7 + $0x78] sm:$0xff]   ;;  %v286_v50 = vld [vmem:[#allocation2] sm:$0xff] }
  0x30   : > { %863 = vmatprep.subr.bf16.mxu1 %v931_v14  ;;  %v947_v30 = vld [vmem:[%s1071_s7 + $0xf0] sm:$0xff]   ;;  %v951_v34 = vld [vmem:[%s1071_s7 + $0xf8] sm:$0xff]   ;;  %v287_v55 = vld [vmem:[#allocation2 + $0x8] sm:$0xff] }
  0x31   : > { %v948_v31 = vld [vmem:[%s1071_s7 + $0x30] sm:$0xff]   ;;  %v952_v35 = vld [vmem:[%s1071_s7 + $0x38] sm:$0xff]   ;;  %v831_v60 = vld [vmem:[%s1139_s2] ss:$0 sm:$0xff] (!%p830_p11) }
  0x32   : > { %842 = vmatpush3.bf16.msra.mxu0 %v932_v15  ;;  %v949_v32 = vld [vmem:[%s1071_s7 + $0xb0] sm:$0xff]   ;;  %v953_v36 = vld [vmem:[%s1071_s7 + $0xb8] sm:$0xff]  }
  0x33   : > { %864 = vmatpush3.bf16.msra.mxu1 %v933_v16  ;;  %843 = vmatprep.subr.bf16.mxu0 %v934_v17  ;;  %v954_v37 = vld [vmem:[%s1073_s8] ss:$16 sps:$4 sm:$0xff]   ;;  %v956_v38 = vld [vmem:[%s1073_s8 + $0x4] ss:$16 sps:$4 sm:$0xff]   ;;  %v957_v39 = vld [vmem:[%s1073_s8 + $0x8] ss:$16 sps:$4 sm:$0xff]  }
  0x34   : > { %865 = vmatprep.subr.bf16.mxu1 %v935_v18  ;;  %v959_v40 = vld [vmem:[%s1073_s8 + $0xc] ss:$16 sps:$4 sm:$0xff]   ;;  %600 = vmatprep.mubr.bf16.mxu0 %v956_v38 }
  0x35   : > { %641 = vmatprep.mubr.bf16.mxu1 %v959_v40 }
  0x36   : > { %844 = vmatpush3.bf16.msra.mxu0 %v936_v19 }
  0x37   : > { %866 = vmatpush3.bf16.msra.mxu1 %v937_v20  ;;  %845 = vmatprep.subr.bf16.mxu0 %v938_v21 }
  0x38   : > { %867 = vmatprep.subr.bf16.mxu1 %v939_v22 }
  0x3a   : > { %846 = vmatpush3.bf16.msra.mxu0 %v940_v23 }
  0x3b   : > { %868 = vmatpush3.bf16.msra.mxu1 %v941_v24  ;;  %847 = vmatprep.subr.bf16.mxu0 %v942_v25 }
  0x3c   : > { %869 = vmatprep.subr.bf16.mxu1 %v943_v26 }
  0x3e   : > { %848 = vmatpush3.bf16.msra.mxu0 %v944_v27 }
  0x3f   : > { %870 = vmatpush3.bf16.msra.mxu1 %v945_v28  ;;  %849 = vmatprep.subr.bf16.mxu0 %v946_v29 }
  0x40   : > { %871 = vmatprep.subr.bf16.mxu1 %v947_v30 }
  0x42   : > { %850 = vmatpush3.bf16.msra.mxu0 %v948_v31 }
  0x43   : > { %872 = vmatpush3.bf16.msra.mxu1 %v949_v32  ;;  %851 = vmatprep.subr.bf16.mxu0 %v950_v33 }
  0x44   : > { %873 = vmatprep.subr.bf16.mxu1 %v951_v34 }
  0x46   : > { %852 = vmatpush3.bf16.msra.mxu0 %v952_v35 }
  0x47   : > { %874 = vmatpush3.bf16.msra.mxu1 %v953_v36 }
  0x49   : > { %601 = vmatmul.mubr.bf16.vlgmr.msra.gmra.mrb[0].mxu0 %v954_v37 }
  0x4a   : > { %642 = vmatmul.mubr.bf16.vlgmr.msra.gmra.mrb[0].mxu1 %v957_v39 }
 0x11c   : > { %v853_v41 = vpop.f32.mrb[0].mxu0 }
 0x11d   : > { %v875_v42 = vpop.f32.mrb[0].mxu1  ;;  %v854_v43 = vpop.f32.mrb[1].mxu0 }
 0x11e   : > { %v855_v44 = vadd.f32 %v854_v43, %v853_v41  ;;  %v876_v45 = vpop.f32.mrb[1].mxu1  ;;  %v856_v46 = vpop.f32.mrb[2].mxu0 }
 0x11f   : > { %v877_v47 = vadd.f32 %v876_v45, %v875_v42  ;;  %v878_v48 = vpop.f32.mrb[2].mxu1  ;;  %v857_v49 = vpop.f32.mrb[3].mxu0 }
 0x120   : > { %v858_v51 = vadd.f32 %v857_v49, %v856_v46  ;;  %v879_v52 = vpop.f32.mrb[3].mxu1 }
 0x121   : > { %v644_v53 = vadd.f32 %v877_v47, %v855_v44  ;;  %v880_v54 = vadd.f32 %v879_v52, %v878_v48  ;;  %657 = sbr.rel (%p830_p11) target bundleno = 306 (0x132), region = 63 }
 0x123   : > { %v650_v56 = vadd.f32 %v644_v53, %v286_v50  ;;  %v647_v57 = vadd.f32 %v880_v54, %v858_v51 }
 0x125   : > { %652 = vst [vmem:[#allocation2] sm:$0xff] %v650_v56  ;;  %v651_v58 = vadd.f32 %v647_v57, %v287_v55 }
 0x127   : > { %653 = vst [vmem:[#allocation2 + $0x8] sm:$0xff] %v651_v58 }
 0x12c   : > { %v658_v59 = vld [vmem:[#allocation2] sm:$0xff] }
 0x12d   : > { %v667_v62 = vadd.f32 %v831_v60, %v658_v59 }
 0x12e   : > { %v659_v61 = vld [vmem:[#allocation2 + $0x8] sm:$0xff] }
 0x12f   : > { %v668_v63 = vadd.f32 %v831_v60, %v659_v61  ;;  %669 = vst [vmem:[%s1140_s3] sm:$0xff] %v667_v62 }
 0x131   : > { %670 = vst [vmem:[%s1140_s3 + $0x8] sm:$0xff] %v668_v63 }
 0x132 PF: > { %s13_s16 = sadd.s32 1, %s998_s16   ;;  %s1141_s12 = smov %s986_s13 }
 0x133   : > { %p10_p12 = scmp.ge.s32.totalorder %s13_s16, 6   ;;  %s1142_s13 = smov %s1056_s20 }
 0x134   : > { %s1143_s14 = smov %s994_s15  ;;  %s1144_s15 = smov %s1146_s17 }
 0x135   :  { %12 = sbr.rel (!%p10_p12) target bundleno = 3 (0x3), region = 104 }

// kernel: net1_forward.76
= control target key start
LH: loop header
LB: loop body
LE: loop exit
PB: predicated region body
PF: predicated region fallthrough
CT: control target
= control target key end

     0   :  { %s558_s1 = inlined_call_operand.vmem [shape: bf16[256,128], index: 1, kind: input, shape index: {}]   ;;  %s559_s0 = inlined_call_operand.vmem [shape: bf16[64,256], index: 0, kind: input, shape index: {}]   ;;  %s560_s2 = inlined_call_operand.vmem [shape: f32[1,128], index: 2, kind: input, shape index: {}]   ;;  %s561_s3 = inlined_call_operand.vmem [shape: f32[64,128], index: 3, kind: output, shape index: {}]  }
   0x1   :  { %v411_v0 = vld [vmem:[%s558_s1 + $0x40] sm:$0xff]   ;;  %v413_v2 = vld [vmem:[%s558_s1 + $0x48] sm:$0xff]   ;;  %v415_v4 = vld [vmem:[%s558_s1 + $0x50] sm:$0xff]  }
   0x2   :  { %v412_v1 = vld [vmem:[%s558_s1] sm:$0xff]   ;;  %355 = vmatprep.subr.bf16.mxu0 %v411_v0  ;;  %395 = vmatprep.subr.bf16.mxu1 %v411_v0  ;;  %v414_v3 = vld [vmem:[%s558_s1 + $0x8] sm:$0xff]   ;;  %v416_v5 = vld [vmem:[%s558_s1 + $0x10] sm:$0xff]  }
   0x3   :  { %356 = vmatpush3.bf16.msra.mxu0 %v412_v1  ;;  %403 = vmatpush3.bf16.msra.mxu1 %v412_v1  ;;  %v417_v6 = vld [vmem:[%s558_s1 + $0x58] sm:$0xff]   ;;  %v419_v8 = vld [vmem:[%s558_s1 + $0x60] sm:$0xff]   ;;  %v421_v10 = vld [vmem:[%s558_s1 + $0x68] sm:$0xff]  }
   0x4   :  { %357 = vmatprep.subr.bf16.mxu0 %v413_v2  ;;  %396 = vmatprep.subr.bf16.mxu1 %v413_v2  ;;  %v418_v7 = vld [vmem:[%s558_s1 + $0x18] sm:$0xff]   ;;  %v420_v9 = vld [vmem:[%s558_s1 + $0x20] sm:$0xff]   ;;  %v422_v13 = vld [vmem:[%s558_s1 + $0x28] sm:$0xff]  }
   0x5   :  { %v429_v11 = vld [vmem:[%s559_s0 + $0x4] ss:$8 sps:$4 sm:$0xff]   ;;  %v423_v14 = vld [vmem:[%s558_s1 + $0x70] sm:$0xff]   ;;  %v425_v16 = vld [vmem:[%s558_s1 + $0x78] sm:$0xff]  }
   0x6   :  { %v432_v12 = vld [vmem:[%s559_s0 + $0x24] ss:$8 sps:$4 sm:$0xff]   ;;  %243 = vmatprep.mubr.bf16.mxu0 %v429_v11  ;;  %v424_v15 = vld [vmem:[%s558_s1 + $0x30] sm:$0xff]   ;;  %v426_v17 = vld [vmem:[%s558_s1 + $0x38] sm:$0xff]  }
   0x7   :  { %358 = vmatpush3.bf16.msra.mxu0 %v414_v3  ;;  %404 = vmatpush3.bf16.msra.mxu1 %v414_v3  ;;  %v427_v18 = vld [vmem:[%s559_s0] ss:$8 sps:$4 sm:$0xff]   ;;  %v433_v20 = vld [vmem:[%s559_s0 + $0x14] ss:$8 sps:$4 sm:$0xff]   ;;  %v437_v22 = vld [vmem:[%s559_s0 + $0x10] ss:$8 sps:$4 sm:$0xff]  }
   0x8   :  { %359 = vmatprep.subr.bf16.mxu0 %v415_v4  ;;  %397 = vmatprep.subr.bf16.mxu1 %v415_v4  ;;  %v430_v19 = vld [vmem:[%s559_s0 + $0x20] ss:$8 sps:$4 sm:$0xff]   ;;  %v435_v21 = vld [vmem:[%s559_s0 + $0x34] ss:$8 sps:$4 sm:$0xff]   ;;  %v438_v23 = vld [vmem:[%s559_s0 + $0x30] ss:$8 sps:$4 sm:$0xff]  }
   0x9   :  { %259 = vmatprep.mubr.bf16.mxu1 %v432_v12  ;;  %v354_v27 = vld [vmem:[%s560_s2] ss:$0 sm:$0xff] }
   0xb   :  { %360 = vmatpush3.bf16.msra.mxu0 %v416_v5  ;;  %405 = vmatpush3.bf16.msra.mxu1 %v416_v5 }
   0xc   :  { %361 = vmatprep.subr.bf16.mxu0 %v417_v6  ;;  %398 = vmatprep.subr.bf16.mxu1 %v417_v6 }
   0xf   :  { %362 = vmatpush3.bf16.msra.mxu0 %v418_v7  ;;  %406 = vmatpush3.bf16.msra.mxu1 %v418_v7 }
  0x10   :  { %363 = vmatprep.subr.bf16.mxu0 %v419_v8  ;;  %399 = vmatprep.subr.bf16.mxu1 %v419_v8 }
  0x13   :  { %364 = vmatpush3.bf16.msra.mxu0 %v420_v9  ;;  %407 = vmatpush3.bf16.msra.mxu1 %v420_v9 }
  0x14   :  { %365 = vmatprep.subr.bf16.mxu0 %v421_v10  ;;  %400 = vmatprep.subr.bf16.mxu1 %v421_v10 }
  0x17   :  { %366 = vmatpush3.bf16.msra.mxu0 %v422_v13  ;;  %408 = vmatpush3.bf16.msra.mxu1 %v422_v13 }
  0x18   :  { %367 = vmatprep.subr.bf16.mxu0 %v423_v14  ;;  %401 = vmatprep.subr.bf16.mxu1 %v423_v14 }
  0x1b   :  { %368 = vmatpush3.bf16.msra.mxu0 %v424_v15  ;;  %409 = vmatpush3.bf16.msra.mxu1 %v424_v15 }
  0x1c   :  { %369 = vmatprep.subr.bf16.mxu0 %v425_v16  ;;  %402 = vmatprep.subr.bf16.mxu1 %v425_v16 }
  0x1f   :  { %370 = vmatpush3.bf16.msra.mxu0 %v426_v17  ;;  %410 = vmatpush3.bf16.msra.mxu1 %v426_v17 }
  0x22   :  { %244 = vmatmul.mubr.bf16.vlgmr.msra.gmra.mrb[0].mxu0 %v427_v18  ;;  %260 = vmatmul.mubr.bf16.vlgmr.msra.gmra.mrb[0].mxu1 %v430_v19 }
  0x23   :  { %251 = vmatprep.mubr.bf16.mxu0 %v433_v20  ;;  %267 = vmatprep.mubr.bf16.mxu1 %v435_v21 }
  0x2a   :  { %252 = vmatmul.mubr.bf16.gmra.mrb[4].mxu0 %v437_v22  ;;  %268 = vmatmul.mubr.bf16.gmra.mrb[4].mxu1 %v438_v23 }
  0xf5   :  { %v371_v24 = vpop.f32.mrb[0].mxu0  ;;  %v383_v25 = vpop.f32.mrb[0].mxu1 }
  0xf6   :  { %v372_v26 = vpop.f32.mrb[1].mxu0  ;;  %v384_v28 = vpop.f32.mrb[1].mxu1 }
  0xf7   :  { %v373_v29 = vadd.f32 %v372_v26, %v371_v24  ;;  %v385_v30 = vadd.f32 %v384_v28, %v383_v25  ;;  %v374_v31 = vpop.f32.mrb[2].mxu0  ;;  %v386_v32 = vpop.f32.mrb[2].mxu1 }
  0xf8   :  { %v375_v33 = vpop.f32.mrb[3].mxu0  ;;  %v387_v34 = vpop.f32.mrb[3].mxu1 }
  0xf9   :  { %v310_v35 = vadd.f32 %v373_v29, %v354_v27  ;;  %v314_v36 = vadd.f32 %v385_v30, %v354_v27  ;;  %v376_v37 = vadd.f32 %v375_v33, %v374_v31  ;;  %v388_v38 = vadd.f32 %v387_v34, %v386_v32 }
  0xfb   :  { %318 = vst [vmem:[%s561_s3] sm:$0xff] %v310_v35  ;;  %322 = vst [vmem:[%s561_s3 + $0x20] sm:$0xff] %v314_v36  ;;  %v311_v39 = vadd.f32 %v376_v37, %v354_v27  ;;  %v315_v40 = vadd.f32 %v388_v38, %v354_v27 }
  0xfd   :  { %319 = vst [vmem:[%s561_s3 + $0x8] sm:$0xff] %v311_v39  ;;  %323 = vst [vmem:[%s561_s3 + $0x28] sm:$0xff] %v315_v40  ;;  %v377_v41 = vpop.f32.mrb[4].mxu0  ;;  %v389_v42 = vpop.f32.mrb[4].mxu1 }
  0xfe   :  { %v378_v43 = vpop.f32.mrb[5].mxu0  ;;  %v390_v44 = vpop.f32.mrb[5].mxu1 }
  0xff   :  { %v379_v45 = vadd.f32 %v378_v43, %v377_v41  ;;  %v391_v46 = vadd.f32 %v390_v44, %v389_v42  ;;  %v380_v47 = vpop.f32.mrb[6].mxu0  ;;  %v392_v48 = vpop.f32.mrb[6].mxu1 }
 0x100   :  { %v381_v49 = vpop.f32.mrb[7].mxu0  ;;  %v393_v50 = vpop.f32.mrb[7].mxu1 }
 0x101   :  { %v312_v51 = vadd.f32 %v379_v45, %v354_v27  ;;  %v316_v52 = vadd.f32 %v391_v46, %v354_v27  ;;  %v382_v53 = vadd.f32 %v381_v49, %v380_v47  ;;  %v394_v54 = vadd.f32 %v393_v50, %v392_v48 }
 0x103   :  { %320 = vst [vmem:[%s561_s3 + $0x10] sm:$0xff] %v312_v51  ;;  %324 = vst [vmem:[%s561_s3 + $0x30] sm:$0xff] %v316_v52  ;;  %v313_v55 = vadd.f32 %v382_v53, %v354_v27  ;;  %v317_v56 = vadd.f32 %v394_v54, %v354_v27 }
 0x105   :  { %321 = vst [vmem:[%s561_s3 + $0x18] sm:$0xff] %v313_v55  ;;  %325 = vst [vmem:[%s561_s3 + $0x38] sm:$0xff] %v317_v56 }

// kernel: net1_forward.77
= control target key start
LH: loop header
LB: loop body
LE: loop exit
PB: predicated region body
PF: predicated region fallthrough
CT: control target
= control target key end

     0   :  { %s957_s1 = inlined_call_operand.vmem [shape: bf16[512,128], index: 1, kind: input, shape index: {}]   ;;  %s958_s0 = inlined_call_operand.vmem [shape: bf16[64,512], index: 0, kind: input, shape index: {}]   ;;  %s959_s2 = inlined_call_operand.vmem [shape: f32[1,128], index: 2, kind: input, shape index: {}]   ;;  %s960_s3 = inlined_call_operand.vmem [shape: f32[64,128], index: 3, kind: output, shape index: {}]  }
   0x1   :  { %v700_v0 = vld [vmem:[%s957_s1 + $0x40] sm:$0xff]   ;;  %v704_v4 = vld [vmem:[%s957_s1 + $0x48] sm:$0xff]   ;;  %v708_v8 = vld [vmem:[%s957_s1 + $0x50] sm:$0xff]  }
   0x2   :  { %v701_v1 = vld [vmem:[%s957_s1 + $0xc0] sm:$0xff]   ;;  %620 = vmatprep.subr.bf16.mxu0 %v700_v0  ;;  %v705_v5 = vld [vmem:[%s957_s1 + $0xc8] sm:$0xff]   ;;  %v709_v9 = vld [vmem:[%s957_s1 + $0xd0] sm:$0xff]  }
   0x3   :  { %v702_v2 = vld [vmem:[%s957_s1] sm:$0xff]   ;;  %660 = vmatprep.subr.bf16.mxu1 %v701_v1  ;;  %v706_v6 = vld [vmem:[%s957_s1 + $0x8] sm:$0xff]   ;;  %v710_v10 = vld [vmem:[%s957_s1 + $0x10] sm:$0xff]  }
   0x4   :  { %v703_v3 = vld [vmem:[%s957_s1 + $0x80] sm:$0xff]   ;;  %621 = vmatpush3.bf16.msra.mxu0 %v702_v2  ;;  %v707_v7 = vld [vmem:[%s957_s1 + $0x88] sm:$0xff]   ;;  %v711_v11 = vld [vmem:[%s957_s1 + $0x90] sm:$0xff]  }
   0x5   :  { %661 = vmatpush3.bf16.msra.mxu1 %v703_v3  ;;  %622 = vmatprep.subr.bf16.mxu0 %v704_v4  ;;  %v712_v12 = vld [vmem:[%s957_s1 + $0x58] sm:$0xff]   ;;  %v716_v16 = vld [vmem:[%s957_s1 + $0x60] sm:$0xff]   ;;  %v720_v20 = vld [vmem:[%s957_s1 + $0x68] sm:$0xff]  }
   0x6   :  { %662 = vmatprep.subr.bf16.mxu1 %v705_v5  ;;  %v713_v13 = vld [vmem:[%s957_s1 + $0xd8] sm:$0xff]   ;;  %v717_v17 = vld [vmem:[%s957_s1 + $0xe0] sm:$0xff]   ;;  %v721_v21 = vld [vmem:[%s957_s1 + $0xe8] sm:$0xff]  }
   0x7   :  { %v714_v14 = vld [vmem:[%s957_s1 + $0x18] sm:$0xff]   ;;  %v718_v18 = vld [vmem:[%s957_s1 + $0x20] sm:$0xff]   ;;  %v722_v22 = vld [vmem:[%s957_s1 + $0x28] sm:$0xff]  }
   0x8   :  { %623 = vmatpush3.bf16.msra.mxu0 %v706_v6  ;;  %v715_v15 = vld [vmem:[%s957_s1 + $0x98] sm:$0xff]   ;;  %v719_v19 = vld [vmem:[%s957_s1 + $0xa0] sm:$0xff]   ;;  %v723_v23 = vld [vmem:[%s957_s1 + $0xa8] sm:$0xff]  }
   0x9   :  { %663 = vmatpush3.bf16.msra.mxu1 %v707_v7  ;;  %624 = vmatprep.subr.bf16.mxu0 %v708_v8  ;;  %v724_v24 = vld [vmem:[%s957_s1 + $0x70] sm:$0xff]   ;;  %v728_v28 = vld [vmem:[%s957_s1 + $0x78] sm:$0xff]   ;;  %v923_v57 = vld [vmem:[%s959_s2] ss:$0 sm:$0xff] }
   0xa   :  { %664 = vmatprep.subr.bf16.mxu1 %v709_v9  ;;  %v725_v25 = vld [vmem:[%s957_s1 + $0xf0] sm:$0xff]   ;;  %v729_v29 = vld [vmem:[%s957_s1 + $0xf8] sm:$0xff]  }
   0xb   :  { %v726_v26 = vld [vmem:[%s957_s1 + $0x30] sm:$0xff]   ;;  %v730_v30 = vld [vmem:[%s957_s1 + $0x38] sm:$0xff]  }
   0xc   :  { %625 = vmatpush3.bf16.msra.mxu0 %v710_v10  ;;  %v727_v27 = vld [vmem:[%s957_s1 + $0xb0] sm:$0xff]   ;;  %v731_v31 = vld [vmem:[%s957_s1 + $0xb8] sm:$0xff]  }
   0xd   :  { %665 = vmatpush3.bf16.msra.mxu1 %v711_v11  ;;  %626 = vmatprep.subr.bf16.mxu0 %v712_v12  ;;  %v732_v32 = vld [vmem:[%s958_s0] ss:$16 sps:$4 sm:$0xff]   ;;  %v734_v33 = vld [vmem:[%s958_s0 + $0x4] ss:$16 sps:$4 sm:$0xff]   ;;  %v735_v34 = vld [vmem:[%s958_s0 + $0x8] ss:$16 sps:$4 sm:$0xff]  }
   0xe   :  { %666 = vmatprep.subr.bf16.mxu1 %v713_v13  ;;  %v737_v35 = vld [vmem:[%s958_s0 + $0xc] ss:$16 sps:$4 sm:$0xff]   ;;  %419 = vmatprep.mubr.bf16.mxu0 %v734_v33  ;;  %v738_v36 = vld [vmem:[%s958_s0 + $0x24] ss:$16 sps:$4 sm:$0xff]   ;;  %v742_v38 = vld [vmem:[%s958_s0 + $0x20] ss:$16 sps:$4 sm:$0xff]  }
   0xf   :  { %484 = vmatprep.mubr.bf16.mxu1 %v737_v35  ;;  %v740_v37 = vld [vmem:[%s958_s0 + $0x2c] ss:$16 sps:$4 sm:$0xff]   ;;  %v743_v39 = vld [vmem:[%s958_s0 + $0x28] ss:$16 sps:$4 sm:$0xff]   ;;  %v744_v40 = vld [vmem:[%s958_s0 + $0x44] ss:$16 sps:$4 sm:$0xff]  }
  0x10   :  { %627 = vmatpush3.bf16.msra.mxu0 %v714_v14  ;;  %v746_v41 = vld [vmem:[%s958_s0 + $0x4c] ss:$16 sps:$4 sm:$0xff]   ;;  %v748_v42 = vld [vmem:[%s958_s0 + $0x40] ss:$16 sps:$4 sm:$0xff]   ;;  %v749_v43 = vld [vmem:[%s958_s0 + $0x48] ss:$16 sps:$4 sm:$0xff]  }
  0x11   :  { %667 = vmatpush3.bf16.msra.mxu1 %v715_v15  ;;  %628 = vmatprep.subr.bf16.mxu0 %v716_v16  ;;  %v750_v44 = vld [vmem:[%s958_s0 + $0x64] ss:$16 sps:$4 sm:$0xff]   ;;  %v752_v45 = vld [vmem:[%s958_s0 + $0x6c] ss:$16 sps:$4 sm:$0xff]   ;;  %v754_v46 = vld [vmem:[%s958_s0 + $0x60] ss:$16 sps:$4 sm:$0xff]  }
  0x12   :  { %668 = vmatprep.subr.bf16.mxu1 %v717_v17  ;;  %v755_v47 = vld [vmem:[%s958_s0 + $0x68] ss:$16 sps:$4 sm:$0xff]  }
  0x14   :  { %629 = vmatpush3.bf16.msra.mxu0 %v718_v18 }
  0x15   :  { %669 = vmatpush3.bf16.msra.mxu1 %v719_v19  ;;  %630 = vmatprep.subr.bf16.mxu0 %v720_v20 }
  0x16   :  { %670 = vmatprep.subr.bf16.mxu1 %v721_v21 }
  0x18   :  { %631 = vmatpush3.bf16.msra.mxu0 %v722_v22 }
  0x19   :  { %671 = vmatpush3.bf16.msra.mxu1 %v723_v23  ;;  %632 = vmatprep.subr.bf16.mxu0 %v724_v24 }
  0x1a   :  { %672 = vmatprep.subr.bf16.mxu1 %v725_v25 }
  0x1c   :  { %633 = vmatpush3.bf16.msra.mxu0 %v726_v26 }
  0x1d   :  { %673 = vmatpush3.bf16.msra.mxu1 %v727_v27  ;;  %634 = vmatprep.subr.bf16.mxu0 %v728_v28 }
  0x1e   :  { %674 = vmatprep.subr.bf16.mxu1 %v729_v29 }
  0x20   :  { %635 = vmatpush3.bf16.msra.mxu0 %v730_v30 }
  0x21   :  { %675 = vmatpush3.bf16.msra.mxu1 %v731_v31 }
  0x23   :  { %420 = vmatmul.mubr.bf16.vlgmr.msra.gmra.mrb[0].mxu0 %v732_v32 }
  0x24   :  { %485 = vmatmul.mubr.bf16.vlgmr.msra.gmra.mrb[0].mxu1 %v735_v34  ;;  %427 = vmatprep.mubr.bf16.mxu0 %v738_v36 }
  0x25   :  { %492 = vmatprep.mubr.bf16.mxu1 %v740_v37 }
  0x2b   :  { %428 = vmatmul.mubr.bf16.gmra.mrb[4].mxu0 %v742_v38 }
  0x2c   :  { %493 = vmatmul.mubr.bf16.gmra.mrb[4].mxu1 %v743_v39  ;;  %435 = vmatprep.mubr.bf16.mxu0 %v744_v40 }
  0x2d   :  { %500 = vmatprep.mubr.bf16.mxu1 %v746_v41 }
  0x33   :  { %436 = vmatmul.mubr.bf16.gmra.mrb[8].mxu0 %v748_v42 }
  0x34   :  { %501 = vmatmul.mubr.bf16.gmra.mrb[8].mxu1 %v749_v43  ;;  %443 = vmatprep.mubr.bf16.mxu0 %v750_v44 }
  0x35   :  { %508 = vmatprep.mubr.bf16.mxu1 %v752_v45 }
  0x3b   :  { %444 = vmatmul.mubr.bf16.gmra.mrb[12].mxu0 %v754_v46 }
  0x3c   :  { %509 = vmatmul.mubr.bf16.gmra.mrb[12].mxu1 %v755_v47 }
  0xf6   :  { %v636_v48 = vpop.f32.mrb[0].mxu0 }
  0xf7   :  { %v676_v49 = vpop.f32.mrb[0].mxu1  ;;  %v637_v50 = vpop.f32.mrb[1].mxu0 }
  0xf8   :  { %v638_v51 = vadd.f32 %v637_v50, %v636_v48  ;;  %v677_v52 = vpop.f32.mrb[1].mxu1  ;;  %v639_v53 = vpop.f32.mrb[2].mxu0 }
  0xf9   :  { %v678_v54 = vadd.f32 %v677_v52, %v676_v49  ;;  %v679_v55 = vpop.f32.mrb[2].mxu1  ;;  %v640_v56 = vpop.f32.mrb[3].mxu0 }
  0xfa   :  { %v641_v58 = vadd.f32 %v640_v56, %v639_v53  ;;  %v680_v59 = vpop.f32.mrb[3].mxu1 }
  0xfb   :  { %v487_v60 = vadd.f32 %v678_v54, %v638_v51  ;;  %v681_v61 = vadd.f32 %v680_v59, %v679_v55 }
  0xfd   :  { %v551_v62 = vadd.f32 %v923_v57, %v487_v60  ;;  %v490_v63 = vadd.f32 %v681_v61, %v641_v58 }
  0xfe   :  { %v642_v0 = vpop.f32.mrb[4].mxu0 }
  0xff   :  { %559 = vst [vmem:[%s960_s3] sm:$0xff] %v551_v62  ;;  %v552_v1 = vadd.f32 %v923_v57, %v490_v63  ;;  %v682_v2 = vpop.f32.mrb[4].mxu1  ;;  %v643_v3 = vpop.f32.mrb[5].mxu0 }
 0x100   :  { %v644_v4 = vadd.f32 %v643_v3, %v642_v0  ;;  %v683_v5 = vpop.f32.mrb[5].mxu1  ;;  %v645_v6 = vpop.f32.mrb[6].mxu0 }
 0x101   :  { %560 = vst [vmem:[%s960_s3 + $0x8] sm:$0xff] %v552_v1  ;;  %v684_v7 = vadd.f32 %v683_v5, %v682_v2  ;;  %v685_v8 = vpop.f32.mrb[6].mxu1  ;;  %v646_v9 = vpop.f32.mrb[7].mxu0 }
 0x102   :  { %v647_v10 = vadd.f32 %v646_v9, %v645_v6  ;;  %v686_v11 = vpop.f32.mrb[7].mxu1 }
 0x103   :  { %v495_v12 = vadd.f32 %v684_v7, %v644_v4  ;;  %v687_v13 = vadd.f32 %v686_v11, %v685_v8 }
 0x105   :  { %v553_v14 = vadd.f32 %v923_v57, %v495_v12  ;;  %v498_v15 = vadd.f32 %v687_v13, %v647_v10 }
 0x106   :  { %v648_v16 = vpop.f32.mrb[8].mxu0 }
 0x107   :  { %561 = vst [vmem:[%s960_s3 + $0x10] sm:$0xff] %v553_v14  ;;  %v554_v17 = vadd.f32 %v923_v57, %v498_v15  ;;  %v688_v18 = vpop.f32.mrb[8].mxu1  ;;  %v649_v19 = vpop.f32.mrb[9].mxu0 }
 0x108   :  { %v650_v20 = vadd.f32 %v649_v19, %v648_v16  ;;  %v689_v21 = vpop.f32.mrb[9].mxu1  ;;  %v651_v22 = vpop.f32.mrb[10].mxu0 }
 0x109   :  { %562 = vst [vmem:[%s960_s3 + $0x18] sm:$0xff] %v554_v17  ;;  %v690_v23 = vadd.f32 %v689_v21, %v688_v18  ;;  %v691_v24 = vpop.f32.mrb[10].mxu1  ;;  %v652_v25 = vpop.f32.mrb[11].mxu0 }
 0x10a   :  { %v653_v26 = vadd.f32 %v652_v25, %v651_v22  ;;  %v692_v27 = vpop.f32.mrb[11].mxu1 }
 0x10b   :  { %v503_v28 = vadd.f32 %v690_v23, %v650_v20  ;;  %v693_v29 = vadd.f32 %v692_v27, %v691_v24 }
 0x10d   :  { %v555_v30 = vadd.f32 %v923_v57, %v503_v28  ;;  %v506_v31 = vadd.f32 %v693_v29, %v653_v26 }
 0x10e   :  { %v654_v32 = vpop.f32.mrb[12].mxu0 }
 0x10f   :  { %563 = vst [vmem:[%s960_s3 + $0x20] sm:$0xff] %v555_v30  ;;  %v556_v33 = vadd.f32 %v923_v57, %v506_v31  ;;  %v694_v34 = vpop.f32.mrb[12].mxu1  ;;  %v655_v35 = vpop.f32.mrb[13].mxu0 }
 0x110   :  { %v656_v36 = vadd.f32 %v655_v35, %v654_v32  ;;  %v695_v37 = vpop.f32.mrb[13].mxu1  ;;  %v657_v38 = vpop.f32.mrb[14].mxu0 }
 0x111   :  { %564 = vst [vmem:[%s960_s3 + $0x28] sm:$0xff] %v556_v33  ;;  %v696_v39 = vadd.f32 %v695_v37, %v694_v34  ;;  %v697_v40 = vpop.f32.mrb[14].mxu1  ;;  %v658_v41 = vpop.f32.mrb[15].mxu0 }
 0x112   :  { %v659_v42 = vadd.f32 %v658_v41, %v657_v38  ;;  %v698_v43 = vpop.f32.mrb[15].mxu1 }
 0x113   :  { %v511_v44 = vadd.f32 %v696_v39, %v656_v36  ;;  %v699_v45 = vadd.f32 %v698_v43, %v697_v40 }
 0x115   :  { %v557_v46 = vadd.f32 %v923_v57, %v511_v44  ;;  %v514_v47 = vadd.f32 %v699_v45, %v659_v42 }
 0x117   :  { %565 = vst [vmem:[%s960_s3 + $0x30] sm:$0xff] %v557_v46  ;;  %v558_v48 = vadd.f32 %v923_v57, %v514_v47 }
 0x119   :  { %566 = vst [vmem:[%s960_s3 + $0x38] sm:$0xff] %v558_v48 }

// kernel: net1_forward.80
= control target key start
LH: loop header
LB: loop body
LE: loop exit
PB: predicated region body
PF: predicated region fallthrough
CT: control target
= control target key end

     0   :  { %s953_s12 = smov 0   ;;  %s1191_s0 = inlined_call_operand.vmem [shape: f32[16,4,256], index: 0, kind: input, shape index: {}]   ;;  %s1192_s1 = inlined_call_operand.vmem [shape: f32[16,4,1], index: 1, kind: input, shape index: {}]   ;;  %s1193_s2 = inlined_call_operand.vmem [shape: f32[16,4,1], index: 2, kind: input, shape index: {}]   ;;  %s1194_s3 = inlined_call_operand.vmem [shape: f32[16,4,256], index: 3, kind: output, shape index: {}]  }
   0x1 LB: > { %s868_s13 = sadd.s32 4294967295, %s929_s12   ;;  %p872_p0 = scmp.ge.s32.totalorder %s929_s12, 1  ;;  %s929_s12 = sphi %s953_s12, %s13_s12  }
   0x2   : > { %p161_p1 = scmp.lt.s32.totalorder %s929_s12, 3 }
   0x4   : > { %p162_p2 = pnand %p872_p0, %p161_p1 }
   0x5   : > { %s873_s14 = sshll.u32 (!%p162_p2), %s868_s13, 3  ;;  %v931_v0 = vmov (!%p162_p2), 0   ;;  %vm255_vm0 = vcmask (!%p162_p2), 1043456  }
   0x6   : > { %165 = sbr.rel (%p162_p2) target bundleno = 390 (0x186), region = 32  ;;  %p198_p3 = scmp.lt.s32.totalorder (!%p162_p2), %s873_s14, 15  ;;  %898 = vset.pattern.permute.xlu1 (!%p162_p2), %v931_v0  ;;  %897 = vset.pattern.permute.xlu0 (!%p162_p2), %v931_v0 }
   0xd   : > { %s1196_s14 = smov (!%p198_p3, %s873_s14), 15 }
   0xe   : > { %s885_s15 = sshll.u32 %s1196_s14, 3  ;;  %s877_s19 = sshll.u32 %s1196_s14, 2 }
   0xf   : > { %s202_s18 = scalar_lea.vmem %s1191_s0, %s885_s15  ;;  %s208_s22 = scalar_lea.vmem %s1192_s1, %s877_s19 }
  0x10   : > { %v969_v1 = vld [vmem:[%s202_s18 + $0x10] sm:$0xff]  ;;  %v971_v2 = vld [vmem:[%s202_s18] sm:$0xff]  ;;  %v973_v3 = vld [vmem:[%s202_s18 + $0x18] sm:$0xff]  ;;  %s1032_s25 = scalar_lea.vmem %s1193_s2, %s877_s19  ;;  %s1154_s28 = scalar_lea.vmem %s1194_s3, %s885_s15 }
  0x11   : > { %v241_v4 = vcombine.high %v969_v1, %v969_v1  ;;  %v266_v5 = vsel %vm255_vm0, %v969_v1, 0.0  ;;  %v239_v6 = vcombine.high %v971_v2, %v971_v2  ;;  %v256_v7 = vsel %vm255_vm0, %v971_v2, 0.0  ;;  %v983_v8 = vld [vmem:[%s202_s18 + $0x8] sm:$0xff]  ;;  %v993_v13 = vld [vmem:[%s202_s18 + $0x20] sm:$0xff]  ;;  %v1003_v22 = vld [vmem:[%s202_s18 + $0x38] sm:$0xff] }
  0x12   : > { %v985_v9 = vld [vmem:[%s202_s18 + $0x28] sm:$0xff]  ;;  %v242_v10 = vcombine.high %v973_v3, %v973_v3  ;;  %v271_v11 = vsel %vm255_vm0, %v973_v3, 0.0  ;;  %v240_v12 = vcombine.high %v983_v8, %v983_v8  ;;  %v261_v16 = vsel %vm255_vm0, %v983_v8, 0.0  ;;  %v1005_v23 = vld [vmem:[%s202_s18 + $0x30] sm:$0xff]  ;;  %v547_v41 = vld [vmem:[%s208_s22 + $0x4] sm:$0xf] }
  0x13   : > { %v267_v14 = vsel %vm255_vm0, %v241_v4, 0.0  ;;  %v257_v15 = vsel %vm255_vm0, %v239_v6, 0.0  ;;  %v244_v17 = vcombine.high %v985_v9, %v985_v9  ;;  %v243_v24 = vcombine.high %v993_v13, %v993_v13  ;;  %v548_v42 = vld [vmem:[%s208_s22 + $0x8] sm:$0xf]  ;;  %v546_v43 = vld [vmem:[%s208_s22] sm:$0xf] }
  0x14   : > { %v268_v18 = vadd.f32 %v267_v14, %v266_v5  ;;  %v258_v19 = vadd.f32 %v257_v15, %v256_v7  ;;  %v272_v20 = vsel %vm255_vm0, %v242_v10, 0.0  ;;  %v262_v21 = vsel %vm255_vm0, %v240_v12, 0.0  ;;  %v549_v44 = vld [vmem:[%s208_s22 + $0xc] sm:$0xf]  ;;  %v659_v45 = vld [vmem:[%s1032_s25 + $0x4] sm:$0xf] }
  0x15   : > { %v273_v25 = vadd.f32 %v272_v20, %v271_v11  ;;  %v263_v26 = vadd.f32 %v262_v21, %v261_v16  ;;  %v281_v27 = vsel %vm255_vm0, %v985_v9, 0.0  ;;  %v282_v28 = vsel %vm255_vm0, %v244_v17, 0.0  ;;  %v550_v46 = vld [vmem:[%s208_s22 + $0x10] sm:$0xf]  ;;  %v551_v47 = vld [vmem:[%s208_s22 + $0x14] sm:$0xf] }
  0x16   : > { %269 = vadd.xlane.f32.xlu1 %v268_v18  ;;  %259 = vadd.xlane.f32.xlu0 %v258_v19  ;;  %v276_v29 = vsel %vm255_vm0, %v993_v13, 0.0  ;;  %v277_v30 = vsel %vm255_vm0, %v243_v24, 0.0  ;;  %v246_v31 = vcombine.high %v1003_v22, %v1003_v22  ;;  %v245_v32 = vcombine.high %v1005_v23, %v1005_v23  ;;  %v552_v48 = vld [vmem:[%s208_s22 + $0x18] sm:$0xf]  ;;  %v553_v49 = vld [vmem:[%s208_s22 + $0x1c] sm:$0xf] }
  0x17   : > { %v283_v33 = vadd.f32 %v282_v28, %v281_v27  ;;  %v278_v34 = vadd.f32 %v277_v30, %v276_v29  ;;  %v291_v35 = vsel %vm255_vm0, %v1003_v22, 0.0  ;;  %v286_v37 = vsel %vm255_vm0, %v1005_v23, 0.0  ;;  %v658_v50 = vld [vmem:[%s1032_s25] sm:$0xf]  ;;  %v660_v51 = vld [vmem:[%s1032_s25 + $0x8] sm:$0xf] }
  0x18   : > { %v292_v36 = vsel %vm255_vm0, %v246_v31, 0.0  ;;  %v287_v38 = vsel %vm255_vm0, %v245_v32, 0.0 }
  0x19   : > { %v293_v39 = vadd.f32 %v292_v36, %v291_v35  ;;  %v288_v40 = vadd.f32 %v287_v38, %v286_v37 }
  0x1a   : > { %274 = vadd.xlane.f32.xlu1 %v273_v25  ;;  %264 = vadd.xlane.f32.xlu0 %v263_v26 }
  0x1e   : > { %284 = vadd.xlane.f32.xlu1 %v283_v33  ;;  %279 = vadd.xlane.f32.xlu0 %v278_v34 }
  0x22   : > { %294 = vadd.xlane.f32.xlu1 %v293_v39  ;;  %289 = vadd.xlane.f32.xlu0 %v288_v40 }
  0x33   : > { %560 = vperm.xlu1 %898, %v547_v41  }
  0x37   : > { %564 = vperm.xlu1 %898, %v548_v42  }
  0x38   : > { %556 = vperm.xlu0 %897, %v546_v43  }
  0x3b   : > { %568 = vperm.xlu1 %898, %v549_v44  }
  0x3c   : > { %672 = vperm.xlu0 %897, %v659_v45  }
  0x3f   : > { %572 = vperm.xlu1 %898, %v550_v46  }
  0x43   : > { %576 = vperm.xlu1 %898, %v551_v47  }
  0x47   : > { %580 = vperm.xlu1 %898, %v552_v48  }
  0x4b   : > { %584 = vperm.xlu1 %898, %v553_v49  }
  0x4f   : > { %668 = vperm.xlu1 %898, %v658_v50  }
  0x53   : > { %676 = vperm.xlu1 %898, %v660_v51  }
  0xa3   : > { %v270_v52 = vpop.xlane.xlu1 %269  ;;  %v260_v53 = vpop.xlane.xlu0 %259 }
  0xa4   : > { %v299_v54 = vmul.f32 0.00390625, %v270_v52  ;;  %v297_v55 = vmul.f32 0.00390625, %v260_v53 }
  0xa6   : > { %v319_v56 = vsel %vm255_vm0, %v299_v54, 0.0  ;;  %v305_v57 = vsel %vm255_vm0, %v297_v55, 0.0 }
  0xa7   : > { %v320_v58 = vrot.slane %v319_v56, 4  ;;  %v306_v59 = vrot.slane %v305_v57, 4  ;;  %v275_v60 = vpop.xlane.xlu1 %274  ;;  %v265_v61 = vpop.xlane.xlu0 %264 }
  0xa8   : > { %v300_v62 = vmul.f32 0.00390625, %v275_v60  ;;  %v298_v63 = vmul.f32 0.00390625, %v265_v61 }
  0xa9   : > { %v321_v0 = vadd.f32 %v320_v58, %v319_v56  ;;  %v307_v4 = vadd.f32 %v306_v59, %v305_v57 }
  0xaa   : > { %v326_v5 = vsel %vm255_vm0, %v300_v62, 0.0  ;;  %v312_v6 = vsel %vm255_vm0, %v298_v63, 0.0 }
  0xab   : > { %v322_v7 = vrot.slane %v321_v0, 2  ;;  %v308_v10 = vrot.slane %v307_v4, 2  ;;  %v327_v11 = vrot.slane %v326_v5, 4  ;;  %v313_v12 = vrot.slane %v312_v6, 4  ;;  %v285_v14 = vpop.xlane.xlu1 %284  ;;  %v280_v15 = vpop.xlane.xlu0 %279 }
  0xac   : > { %v302_v16 = vmul.f32 0.00390625, %v285_v14  ;;  %v301_v17 = vmul.f32 0.00390625, %v280_v15 }
  0xad   : > { %v323_v18 = vadd.f32 %v322_v7, %v321_v0  ;;  %v309_v19 = vadd.f32 %v308_v10, %v307_v4  ;;  %v328_v20 = vadd.f32 %v327_v11, %v326_v5  ;;  %v314_v21 = vadd.f32 %v313_v12, %v312_v6 }
  0xae   : > { %v340_v24 = vsel %vm255_vm0, %v302_v16, 0.0  ;;  %v333_v25 = vsel %vm255_vm0, %v301_v17, 0.0 }
  0xaf   : > { %v324_v26 = vrot.slane %v323_v18, 1  ;;  %v310_v27 = vrot.slane %v309_v19, 1  ;;  %v329_v28 = vrot.slane %v328_v20, 2  ;;  %v315_v29 = vrot.slane %v314_v21, 2  ;;  %v295_v30 = vpop.xlane.xlu1 %294  ;;  %v290_v31 = vpop.xlane.xlu0 %289 }
  0xb0   : > { %v341_v32 = vrot.slane %v340_v24, 4  ;;  %v334_v33 = vrot.slane %v333_v25, 4  ;;  %v304_v34 = vmul.f32 0.00390625, %v295_v30  ;;  %v303_v35 = vmul.f32 0.00390625, %v290_v31 }
  0xb1   : > { %v325_v36 = vadd.f32 %v324_v26, %v323_v18  ;;  %v311_v37 = vadd.f32 %v310_v27, %v309_v19  ;;  %v330_v38 = vadd.f32 %v329_v28, %v328_v20  ;;  %v316_v39 = vadd.f32 %v315_v29, %v314_v21 }
  0xb2   : > { %v342_v40 = vadd.f32 %v341_v32, %v340_v24  ;;  %v335_v41 = vadd.f32 %v334_v33, %v333_v25  ;;  %v354_v42 = vsel %vm255_vm0, %v304_v34, 0.0  ;;  %v347_v43 = vsel %vm255_vm0, %v303_v35, 0.0 }
  0xb3   : > { %v364_v44 = vmul.f32 0.25, %v325_v36  ;;  %v362_v45 = vmul.f32 0.25, %v311_v37  ;;  %v331_v46 = vrot.slane %v330_v38, 1  ;;  %v317_v47 = vrot.slane %v316_v39, 1 }
  0xb4   : > { %v343_v48 = vrot.slane %v342_v40, 2  ;;  %v336_v49 = vrot.slane %v335_v41, 2  ;;  %v355_v50 = vrot.slane %v354_v42, 4  ;;  %v348_v51 = vrot.slane %v347_v43, 4 }
  0xb5   : > { %v332_v52 = vadd.f32 %v331_v46, %v330_v38  ;;  %v318_v53 = vadd.f32 %v317_v47, %v316_v39  ;;  %v1046_v54 = vsub.f32 %v971_v2, %v362_v45  ;;  %v1049_v55 = vsub.f32 %v969_v1, %v364_v44 }
  0xb6   : > { %v344_v56 = vadd.f32 %v343_v48, %v342_v40  ;;  %v337_v57 = vadd.f32 %v336_v49, %v335_v41  ;;  %v356_v58 = vadd.f32 %v355_v50, %v354_v42  ;;  %v349_v59 = vadd.f32 %v348_v51, %v347_v43 }
  0xb7   : > { %v365_v60 = vmul.f32 0.25, %v332_v52  ;;  %v363_v61 = vmul.f32 0.25, %v318_v53  ;;  %v378_v62 = vmul.f32 %v1046_v54, %v1046_v54  ;;  %v380_v63 = vmul.f32 %v1049_v55, %v1049_v55 }
  0xb8   : > { %v345_v0 = vrot.slane %v344_v56, 1  ;;  %v338_v4 = vrot.slane %v337_v57, 1  ;;  %v357_v5 = vrot.slane %v356_v58, 2  ;;  %v350_v2 = vrot.slane %v349_v59, 2 }
  0xb9   : > { %v394_v6 = vcombine.high %v378_v62, %v378_v62  ;;  %v396_v7 = vcombine.high %v380_v63, %v380_v63  ;;  %v410_v14 = vsel %vm255_vm0, %v378_v62, 0.0  ;;  %v1058_v16 = vsub.f32 %v983_v8, %v363_v61  ;;  %v662_v62 = vld [vmem:[%s1032_s25 + $0x10] sm:$0xf] }
  0xba   : > { %v346_v1 = vadd.f32 %v345_v0, %v344_v56  ;;  %v339_v10 = vadd.f32 %v338_v4, %v337_v57  ;;  %v358_v11 = vadd.f32 %v357_v5, %v356_v58  ;;  %v351_v12 = vadd.f32 %v350_v2, %v349_v59  ;;  %v664_v0 = vld [vmem:[%s1032_s25 + $0x18] sm:$0xf]  ;;  %v663_v4 = vld [vmem:[%s1032_s25 + $0x14] sm:$0xf]  ;;  %v665_v5 = vld [vmem:[%s1032_s25 + $0x1c] sm:$0xf]  ;;  %v1106_v2 = vpop.permute.xlu1 %560 }
  0xbb   : > { %v411_v15 = vsel %vm255_vm0, %v394_v6, 0.0  ;;  %v1061_v17 = vsub.f32 %v973_v3, %v365_v60  ;;  %v421_v25 = vsel %vm255_vm0, %v396_v7, 0.0  ;;  %v379_v26 = vmul.f32 %v1058_v16, %v1058_v16 }
  0xbc   : > { %v367_v18 = vmul.f32 0.25, %v346_v1  ;;  %v366_v19 = vmul.f32 0.25, %v339_v10  ;;  %v359_v20 = vrot.slane %v358_v11, 1  ;;  %v352_v21 = vrot.slane %v351_v12, 1 }
  0xbd   : > { %v412_v24 = vadd.f32 %v411_v15, %v410_v14  ;;  %v381_v27 = vmul.f32 %v1061_v17, %v1061_v17  ;;  %v420_v30 = vsel %vm255_vm0, %v380_v63, 0.0  ;;  %v395_v31 = vcombine.high %v379_v26, %v379_v26  ;;  %v661_v63 = vld [vmem:[%s1032_s25 + $0xc] sm:$0xf]  ;;  %v1120_v14 = vpop.permute.xlu0 %556 }
  0xbe   : > { %v360_v28 = vadd.f32 %v359_v20, %v358_v11  ;;  %v353_v29 = vadd.f32 %v352_v21, %v351_v12  ;;  %v1069_v8 = vsub.f32 %v993_v13, %v366_v19  ;;  %v1072_v3 = vsub.f32 %v985_v9, %v367_v18  ;;  %v1108_v6 = vpop.permute.xlu1 %564 }
  0xbf   : > { %413 = vadd.xlane.f32.xlu0 %v412_v24  ;;  %v397_v32 = vcombine.high %v381_v27, %v381_v27  ;;  %v422_v37 = vadd.f32 %v421_v25, %v420_v30  ;;  %v415_v13 = vsel %vm255_vm0, %v379_v26, 0.0  ;;  %v416_v38 = vsel %vm255_vm0, %v395_v31, 0.0 }
  0xc0   : > { %v369_v33 = vmul.f32 0.25, %v360_v28  ;;  %v368_v34 = vmul.f32 0.25, %v353_v29  ;;  %v382_v35 = vmul.f32 %v1069_v8, %v1069_v8  ;;  %v383_v36 = vmul.f32 %v1072_v3, %v1072_v3 }
  0xc1   : > { %v417_v9 = vadd.f32 %v416_v38, %v415_v13  ;;  %v426_v40 = vsel %vm255_vm0, %v397_v32, 0.0  ;;  %v425_v46 = vsel %vm255_vm0, %v381_v27, 0.0  ;;  %v1124_v18 = vpop.permute.xlu0 %672 }
  0xc2   : > { %v398_v39 = vcombine.high %v382_v35, %v382_v35  ;;  %v399_v41 = vcombine.high %v383_v36, %v383_v36  ;;  %v1083_v42 = vsub.f32 %v1005_v23, %v368_v34  ;;  %v1086_v43 = vsub.f32 %v1003_v22, %v369_v33  ;;  %v1110_v7 = vpop.permute.xlu1 %568 }
  0xc3   : > { %423 = vadd.xlane.f32.xlu0 %v422_v37  ;;  %418 = vadd.xlane.f32.xlu1 %v417_v9  ;;  %v430_v44 = vsel %vm255_vm0, %v382_v35, 0.0  ;;  %v427_v50 = vadd.f32 %v426_v40, %v425_v46  ;;  %v435_v52 = vsel %vm255_vm0, %v383_v36, 0.0 }
  0xc4   : > { %v431_v45 = vsel %vm255_vm0, %v398_v39, 0.0  ;;  %v384_v48 = vmul.f32 %v1083_v42, %v1083_v42  ;;  %v385_v49 = vmul.f32 %v1086_v43, %v1086_v43  ;;  %v436_v22 = vsel %vm255_vm0, %v399_v41, 0.0 }
  0xc5   : > { %v432_v47 = vadd.f32 %v431_v45, %v430_v44  ;;  %v437_v57 = vadd.f32 %v436_v22, %v435_v52 }
  0xc6   : > { %v400_v23 = vcombine.high %v384_v48, %v384_v48  ;;  %v401_v51 = vcombine.high %v385_v49, %v385_v49  ;;  %v440_v53 = vsel %vm255_vm0, %v384_v48, 0.0  ;;  %v445_v60 = vsel %vm255_vm0, %v385_v49, 0.0  ;;  %v1112_v1 = vpop.permute.xlu1 %572 }
  0xc7   : > { %433 = vadd.xlane.f32.xlu0 %v432_v47  ;;  %428 = vadd.xlane.f32.xlu1 %v427_v50  ;;  %v589_v48 = vlaneseq }
  0xc8   : > { %v441_v56 = vsel %vm255_vm0, %v400_v23, 0.0  ;;  %v446_v59 = vsel %vm255_vm0, %v401_v51, 0.0 }
  0xc9   : > { %v442_v58 = vadd.f32 %v441_v56, %v440_v53  ;;  %v447_v61 = vadd.f32 %v446_v59, %v445_v60 }
  0xca   : > { %v1114_v10 = vpop.permute.xlu1 %576 }
  0xcb   : > { %438 = vadd.xlane.f32.xlu1 %v437_v57  ;;  %443 = vadd.xlane.f32.xlu0 %v442_v58  ;;  %v932_v57 = vmov 839922192  }
  0xcc   : > { %v587_v58 = vunpack.c.l.s4 %v932_v57 }
  0xce   : > { %v1116_v11 = vpop.permute.xlu1 %580 }
  0xcf   : > { %448 = vadd.xlane.f32.xlu1 %v447_v61 }
  0xd2   : > { %v1118_v12 = vpop.permute.xlu1 %584 }
  0xd6   : > { %v1122_v15 = vpop.permute.xlu1 %668 }
  0xda   : > { %v1126_v20 = vpop.permute.xlu1 %676 }
  0xe0   : > { %684 = vperm.xlu1 %898, %v662_v62  }
  0xe1   : > { %680 = vperm.xlu0 %897, %v661_v63  }
  0xe4   : > { %692 = vperm.xlu1 %898, %v664_v0  }
  0xe5   : > { %688 = vperm.xlu0 %897, %v663_v4  }
  0xe9   : > { %696 = vperm.xlu0 %897, %v665_v5  }
 0x14c   : > { %v414_v19 = vpop.xlane.xlu0 %413 }
 0x14d   : > { %v450_v21 = vmul.f32 0.00390625, %v414_v19 }
 0x14f   : > { %v458_v24 = vsel %vm255_vm0, %v450_v21, 0.0 }
 0x150   : > { %v459_v25 = vrot.slane %v458_v24, 4  ;;  %v424_v26 = vpop.xlane.xlu0 %423  ;;  %v419_v27 = vpop.xlane.xlu1 %418 }
 0x151   : > { %v452_v28 = vmul.f32 0.00390625, %v424_v26  ;;  %v451_v30 = vmul.f32 0.00390625, %v419_v27 }
 0x152   : > { %v460_v29 = vadd.f32 %v459_v25, %v458_v24 }
 0x153   : > { %v472_v31 = vsel %vm255_vm0, %v452_v28, 0.0  ;;  %v465_v33 = vsel %vm255_vm0, %v451_v30, 0.0 }
 0x154   : > { %v461_v32 = vrot.slane %v460_v29, 2  ;;  %v473_v34 = vrot.slane %v472_v31, 4  ;;  %v434_v35 = vpop.xlane.xlu0 %433  ;;  %v466_v36 = vrot.slane %v465_v33, 4  ;;  %v429_v37 = vpop.xlane.xlu1 %428 }
 0x155   : > { %v454_v13 = vmul.f32 0.00390625, %v434_v35  ;;  %v453_v39 = vmul.f32 0.00390625, %v429_v37 }
 0x156   : > { %v462_v38 = vadd.f32 %v461_v32, %v460_v29  ;;  %v474_v9 = vadd.f32 %v473_v34, %v472_v31  ;;  %v467_v40 = vadd.f32 %v466_v36, %v465_v33 }
 0x157   : > { %v486_v41 = vsel %vm255_vm0, %v454_v13, 0.0  ;;  %v479_v46 = vsel %vm255_vm0, %v453_v39, 0.0 }
 0x158   : > { %v463_v44 = vrot.slane %v462_v38, 1  ;;  %v475_v45 = vrot.slane %v474_v9, 2  ;;  %v487_v47 = vrot.slane %v486_v41, 4  ;;  %v468_v49 = vrot.slane %v467_v40, 2  ;;  %v439_v22 = vpop.xlane.xlu1 %438  ;;  %v444_v23 = vpop.xlane.xlu0 %443 }
 0x159   : > { %v480_v50 = vrot.slane %v479_v46, 4  ;;  %v455_v56 = vmul.f32 0.00390625, %v439_v22  ;;  %v456_v61 = vmul.f32 0.00390625, %v444_v23 }
 0x15a   : > { %v464_v51 = vadd.f32 %v463_v44, %v462_v38  ;;  %v476_v52 = vadd.f32 %v475_v45, %v474_v9  ;;  %v488_v53 = vadd.f32 %v487_v47, %v486_v41  ;;  %v469_v59 = vadd.f32 %v468_v49, %v467_v40 }
 0x15b   : > { %v481_v60 = vadd.f32 %v480_v50, %v479_v46  ;;  %v493_v4 = vsel %vm255_vm0, %v455_v56, 0.0  ;;  %v500_v24 = vsel %vm255_vm0, %v456_v61, 0.0  ;;  %v590_v45 = vshrl.u32 %v589_v48, 7 }
 0x15c   : > { %v514_v62 = vmul.f32 0.25, %v464_v51  ;;  %v477_v63 = vrot.slane %v476_v52, 1  ;;  %v489_v0 = vrot.slane %v488_v53, 2  ;;  %v470_v5 = vrot.slane %v469_v59, 1  ;;  %v449_v25 = vpop.xlane.xlu1 %448 }
 0x15d   : > { %v482_v19 = vrot.slane %v481_v60, 2  ;;  %v494_v21 = vrot.slane %v493_v4, 4  ;;  %v501_v29 = vrot.slane %v500_v24, 4  ;;  %v457_v33 = vmul.f32 0.00390625, %v449_v25 }
 0x15e   : > { %v522_v26 = vadd.f32 1e-05, %v514_v62  ;;  %v478_v27 = vadd.f32 %v477_v63, %v476_v52  ;;  %v490_v28 = vadd.f32 %v489_v0, %v488_v53  ;;  %v471_v30 = vadd.f32 %v470_v5, %v469_v59 }
 0x15f   : > { %v483_v31 = vadd.f32 %v482_v19, %v481_v60  ;;  %v495_v32 = vadd.f32 %v494_v21, %v493_v4  ;;  %v502_v36 = vadd.f32 %v501_v29, %v500_v24  ;;  %v507_v9 = vsel %vm255_vm0, %v457_v33, 0.0 }
 0x160   : > { %907 = vrsqrt.f32 %v522_v26  ;;  %v516_v34 = vmul.f32 0.25, %v478_v27  ;;  %v491_v35 = vrot.slane %v490_v28, 1  ;;  %v515_v37 = vmul.f32 0.25, %v471_v30 }
 0x161   : > { %v484_v13 = vrot.slane %v483_v31, 1  ;;  %v496_v38 = vrot.slane %v495_v32, 2  ;;  %v503_v41 = vrot.slane %v502_v36, 2  ;;  %v508_v44 = vrot.slane %v507_v9, 4 }
 0x162   : > { %v524_v39 = vadd.f32 1e-05, %v516_v34  ;;  %v492_v40 = vadd.f32 %v491_v35, %v490_v28  ;;  %v523_v46 = vadd.f32 1e-05, %v515_v37  ;;  %v588_v51 = vunpack.c.0.s8 %v587_v58 }
 0x163   : > { %v485_v47 = vadd.f32 %v484_v13, %v483_v31  ;;  %v497_v49 = vadd.f32 %v496_v38, %v495_v32  ;;  %v504_v22 = vadd.f32 %v503_v41, %v502_v36  ;;  %v509_v23 = vadd.f32 %v508_v44, %v507_v9 }
 0x164   : > { %909 = vrsqrt.f32 %v524_v39  ;;  %v518_v50 = vmul.f32 0.25, %v492_v40  ;;  %v1136_v48 = vsub.s32 %v588_v51, %v590_v45 }
 0x165   : > { %911 = vrsqrt.f32 %v523_v46  ;;  %v517_v52 = vmul.f32 0.25, %v485_v47  ;;  %v498_v53 = vrot.slane %v497_v49, 1  ;;  %v505_v57 = vrot.slane %v504_v22, 1 }
 0x166   : > { %v526_v56 = vadd.f32 1e-05, %v518_v50  ;;  %v510_v59 = vrot.slane %v509_v23, 2  ;;  %v592_v58 = vrot.slane %v1120_v14, %v1136_v48  ;;  %v704_v27 = vrot.slane %v1122_v15, %v1136_v48  ;;  %v681_v15 = vpop.permute.xlu0 %680 }
 0x167   : > { %v525_v60 = vadd.f32 1e-05, %v517_v52  ;;  %v499_v61 = vadd.f32 %v498_v53, %v497_v49  ;;  %v506_v62 = vadd.f32 %v505_v57, %v504_v22  ;;  %v606_v32 = vrot.slane %v1108_v6, %v1136_v48 }
 0x168   : > { %913 = vrsqrt.f32 %v526_v56  ;;  %v511_v63 = vadd.f32 %v510_v59, %v509_v23  ;;  %v718_v6 = vrot.slane %v1126_v20, %v1136_v48  ;;  %v620_v9 = vrot.slane %v1112_v1, %v1136_v48 }
 0x169   : > { %915 = vrsqrt.f32 %v525_v60  ;;  %v519_v0 = vmul.f32 0.25, %v499_v61  ;;  %v520_v5 = vmul.f32 0.25, %v506_v62  ;;  %v613_v20 = vrot.slane %v1110_v7, %v1136_v48 }
 0x16a   : > { %v908_v4 = vpop.eup %907  ;;  %v512_v19 = vrot.slane %v511_v63, 1  ;;  %v725_v1 = vrot.slane %v681_v15, %v1136_v48  ;;  %v689_v50 = vpop.permute.xlu0 %688  ;;  %v627_v7 = vrot.slane %v1114_v10, %v1136_v48  ;;  %v634_v53 = vrot.slane %v1116_v11, %v1136_v48 }
 0x16b   : > { %v538_v21 = vmul.f32 %v908_v4, %v1046_v54  ;;  %v527_v24 = vadd.f32 1e-05, %v519_v0  ;;  %v528_v25 = vadd.f32 1e-05, %v520_v5  ;;  %v599_v54 = vrot.slane %v1106_v2, %v1136_v48 }
 0x16c   : > { %v513_v26 = vadd.f32 %v512_v19, %v511_v63  ;;  %v711_v2 = vrot.slane %v1124_v18, %v1136_v48  ;;  %v739_v61 = vrot.slane %v689_v50, %v1136_v48  ;;  %v641_v11 = vrot.slane %v1118_v12, %v1136_v48 }
 0x16d   : > { %v650_v28 = vmul.f32 %v592_v58, %v538_v21  ;;  %917 = vrsqrt.f32 %v527_v24 }
 0x16e   : > { %v910_v29 = vpop.eup %909  ;;  %919 = vrsqrt.f32 %v528_v25  ;;  %v521_v30 = vmul.f32 0.25, %v513_v26  ;;  %v697_v0 = vpop.permute.xlu0 %696 }
 0x16f   : > { %v912_v31 = vpop.eup %911  ;;  %v762_v33 = vadd.f32 %v704_v27, %v650_v28  ;;  %v540_v14 = vmul.f32 %v910_v29, %v1049_v55  ;;  %v753_v21 = vrot.slane %v697_v0, %v1136_v48 }
 0x170   : > { %v539_v34 = vmul.f32 %v912_v31, %v1058_v16  ;;  %v529_v35 = vadd.f32 1e-05, %v521_v30  ;;  %v685_v16 = vpop.permute.xlu1 %684 }
 0x171   : > { %v770_v36 = vmax.f32 %v762_v33, 0.0  ;;  %v652_v37 = vmul.f32 %v606_v32, %v540_v14  ;;  %v732_v46 = vrot.slane %v685_v16, %v1136_v48 }
 0x172   : > { %v914_v55 = vpop.eup %913  ;;  %v651_v13 = vmul.f32 %v599_v54, %v539_v34  ;;  %921 = vrsqrt.f32 %v529_v35 }
 0x173   : > { %v916_v38 = vpop.eup %915  ;;  %v764_v39 = vadd.f32 %v718_v6, %v652_v37  ;;  %v542_v40 = vmul.f32 %v914_v55, %v1069_v8  ;;  %778 = vst [vmem:[%s1154_s28] sm:$0xff] %v770_v36 }
 0x174   : > { %v763_v41 = vadd.f32 %v711_v2, %v651_v13  ;;  %v541_v44 = vmul.f32 %v916_v38, %v1061_v17  ;;  %v693_v51 = vpop.permute.xlu1 %692 }
 0x175   : > { %v772_v18 = vmax.f32 %v764_v39, 0.0  ;;  %v654_v45 = vmul.f32 %v620_v9, %v542_v40  ;;  %v746_v10 = vrot.slane %v693_v51, %v1136_v48 }
 0x176   : > { %v771_v47 = vmax.f32 %v763_v41, 0.0  ;;  %v653_v49 = vmul.f32 %v613_v20, %v541_v44 }
 0x177   : > { %v918_v22 = vpop.eup %917  ;;  %v766_v8 = vadd.f32 %v732_v46, %v654_v45  ;;  %780 = vst [vmem:[%s1154_s28 + $0x10] sm:$0xff] %v772_v18 }
 0x178   : > { %v920_v23 = vpop.eup %919  ;;  %779 = vst [vmem:[%s1154_s28 + $0x8] sm:$0xff] %v771_v47  ;;  %v765_v17 = vadd.f32 %v725_v1, %v653_v49  ;;  %v543_v52 = vmul.f32 %v918_v22, %v1072_v3 }
 0x179   : > { %v774_v56 = vmax.f32 %v766_v8, 0.0  ;;  %v544_v57 = vmul.f32 %v920_v23, %v1083_v42 }
 0x17a   : > { %v773_v59 = vmax.f32 %v765_v17, 0.0  ;;  %v655_v60 = vmul.f32 %v627_v7, %v543_v52 }
 0x17b   : > { %782 = vst [vmem:[%s1154_s28 + $0x20] sm:$0xff] %v774_v56  ;;  %v656_v62 = vmul.f32 %v634_v53, %v544_v57 }
 0x17c   : > { %v922_v63 = vpop.eup %921  ;;  %781 = vst [vmem:[%s1154_s28 + $0x18] sm:$0xff] %v773_v59  ;;  %v767_v3 = vadd.f32 %v739_v61, %v655_v60 }
 0x17d   : > { %v768_v4 = vadd.f32 %v746_v10, %v656_v62  ;;  %v545_v42 = vmul.f32 %v922_v63, %v1086_v43 }
 0x17e   : > { %v775_v5 = vmax.f32 %v767_v3, 0.0 }
 0x17f   : > { %v776_v19 = vmax.f32 %v768_v4, 0.0  ;;  %v657_v58 = vmul.f32 %v641_v11, %v545_v42 }
 0x180   : > { %783 = vst [vmem:[%s1154_s28 + $0x28] sm:$0xff] %v775_v5 }
 0x181   : > { %784 = vst [vmem:[%s1154_s28 + $0x30] sm:$0xff] %v776_v19  ;;  %v769_v24 = vadd.f32 %v753_v21, %v657_v58 }
 0x183   : > { %v777_v25 = vmax.f32 %v769_v24, 0.0 }
 0x185   : > { %785 = vst [vmem:[%s1154_s28 + $0x38] sm:$0xff] %v777_v25 }
 0x186 PF: > { %s13_s12 = sadd.s32 1, %s929_s12  }
 0x187   : > { %p10_p4 = scmp.ge.s32.totalorder %s13_s12, 4  }
 0x189   :  { %12 = sbr.rel (!%p10_p4) target bundleno = 1 (0x1), region = 68 }

// kernel: net1_forward.81
= control target key start
LH: loop header
LB: loop body
LE: loop exit
PB: predicated region body
PF: predicated region fallthrough
CT: control target
= control target key end

     0   :  { %s2525_s15 = smov 0   ;;  %s2527_s16 = smov 0   ;;  %s3053_s0 = inlined_call_operand.vmem [shape: bf16[256,3584], index: 0, kind: input, shape index: {}]   ;;  %s3054_s1 = inlined_call_operand.vmem [shape: bf16[3584,128], index: 1, kind: input, shape index: {}]   ;;  %s3055_s2 = inlined_call_operand.vmem [shape: f32[1,128], index: 2, kind: input, shape index: {}]   ;;  %s3056_s3 = inlined_call_operand.vmem [shape: f32[256,128], index: 3, kind: input, shape index: {}]   ;;  %s3057_s4 = inlined_call_operand.vmem [shape: f32[256,128], index: 4, kind: output, shape index: {}]  }
   0x1   :  { %s2529_s17 = smov 0   ;;  %s2531_s18 = smov 0  }
   0x2   :  { %s2533_s19 = smov 0  }
   0x3 LB: > { %s26_s20 = sadd.s32 1, %s2493_s18  ;;  %p49_p1 = scmp.ne.s32.totalorder %s2485_s16, %s2481_s15  ;;  %s2497_s19 = sphi %s2533_s19, %s14_s19   ;;  %s2493_s18 = sphi %s2531_s18, %s3061_s18   ;;  %s2489_s17 = sphi %s2529_s17, %s3060_s17   ;;  %s2485_s16 = sphi %s2527_s16, %s3059_s16   ;;  %s2481_s15 = sphi %s2525_s15, %s3058_s15  }
   0x4   : > { %p27_p0 = scmp.ge.s32.totalorder %s26_s20, 7  ;;  %p50_p2 = scmp.eq.s32.totalorder %s2497_s19, 0 }
   0x5   : > { %s42_s22 = sadd.s32 1, %s2485_s16  ;;  %p1890_p5 = scmp.ge.s32.totalorder %s2497_s19, 7 }
   0x6   : > { %s3063_s20 = smov (%p27_p0, %s26_s20), 0  ;;  %p51_p3 = por %p50_p2, %p49_p1 }
   0x7   : > { %s38_s21 = ssub.s32 %s2493_s18, %s3063_s20  ;;  %203 = sbr.rel (%p1890_p5) target bundleno = 50 (0x32), region = 24 }
   0x8   : > { %p40_p4 = scmp.eq.s32.totalorder %s38_s21, 0 }
   0xa   : > { %s2560_s23 = scalar_select %p40_p4, %s2485_s16, %s42_s22  }
   0xe   : > { %206 = sbr.rel (!%p51_p3) target bundleno = 50 (0x32), region = 28  ;;  %s208_s24 = sand.u32 (%p51_p3), 1, %s2485_s16  }
   0xf   : > { %s2001_s25 = sshll.u32 (%p51_p3), %s2493_s18, 4  ;;  %s1891_s26 = sshll.u32 (%p51_p3), %s208_s24, 9 }
  0x10   : > { %s2568_s29 = scalar_lea.vmem (%p51_p3), %s3053_s0, %s2001_s25  ;;  %s2573_s30 = scalar_lea.vmem (%p51_p3), [#allocation3], %s1891_s26 }
  0x11   : > { %v229_v0 = vld [vmem:[%s2568_s29] sm:$0xff] (%p51_p3)  ;;  %v231_v1 = vld [vmem:[%s2568_s29 + $0x8] sm:$0xff] (%p51_p3)  ;;  %v233_v2 = vld [vmem:[%s2568_s29 + $0x70] sm:$0xff] (%p51_p3) }
  0x12   : > { %230 = vst [vmem:[%s2573_s30] sm:$0xff] (%p51_p3), %v229_v0  ;;  %232 = vst [vmem:[%s2573_s30 + $0x8] sm:$0xff] (%p51_p3), %v231_v1  ;;  %v235_v3 = vld [vmem:[%s2568_s29 + $0x78] sm:$0xff] (%p51_p3)  ;;  %v237_v4 = vld [vmem:[%s2568_s29 + $0xe0] sm:$0xff] (%p51_p3) }
  0x13   : > { %234 = vst [vmem:[%s2573_s30 + $0x10] sm:$0xff] (%p51_p3), %v233_v2  ;;  %v239_v5 = vld [vmem:[%s2568_s29 + $0xe8] sm:$0xff] (%p51_p3)  ;;  %236 = vst [vmem:[%s2573_s30 + $0x18] sm:$0xff] (%p51_p3), %v235_v3  ;;  %v241_v6 = vld [vmem:[%s2568_s29 + $0x150] sm:$0xff] (%p51_p3) }
  0x14   : > { %238 = vst [vmem:[%s2573_s30 + $0x20] sm:$0xff] (%p51_p3), %v237_v4  ;;  %240 = vst [vmem:[%s2573_s30 + $0x28] sm:$0xff] (%p51_p3), %v239_v5  ;;  %v243_v7 = vld [vmem:[%s2568_s29 + $0x158] sm:$0xff] (%p51_p3)  ;;  %v245_v8 = vld [vmem:[%s2568_s29 + $0x1c0] sm:$0xff] (%p51_p3) }
  0x15   : > { %242 = vst [vmem:[%s2573_s30 + $0x30] sm:$0xff] %v241_v6  ;;  %244 = vst [vmem:[%s2573_s30 + $0x38] sm:$0xff] %v243_v7  ;;  %v247_v9 = vld [vmem:[%s2568_s29 + $0x1c8] sm:$0xff]  ;;  %v249_v10 = vld [vmem:[%s2568_s29 + $0x230] sm:$0xff] }
  0x16   : > { %246 = vst [vmem:[%s2573_s30 + $0x40] sm:$0xff] %v245_v8  ;;  %v251_v11 = vld [vmem:[%s2568_s29 + $0x238] sm:$0xff]  ;;  %248 = vst [vmem:[%s2573_s30 + $0x48] sm:$0xff] %v247_v9  ;;  %v253_v12 = vld [vmem:[%s2568_s29 + $0x2a0] sm:$0xff] }
  0x17   : > { %250 = vst [vmem:[%s2573_s30 + $0x50] sm:$0xff] %v249_v10  ;;  %252 = vst [vmem:[%s2573_s30 + $0x58] sm:$0xff] %v251_v11  ;;  %v255_v13 = vld [vmem:[%s2568_s29 + $0x2a8] sm:$0xff]  ;;  %v257_v14 = vld [vmem:[%s2568_s29 + $0x310] sm:$0xff] }
  0x18   : > { %254 = vst [vmem:[%s2573_s30 + $0x60] sm:$0xff] %v253_v12  ;;  %256 = vst [vmem:[%s2573_s30 + $0x68] sm:$0xff] %v255_v13  ;;  %v259_v15 = vld [vmem:[%s2568_s29 + $0x318] sm:$0xff]  ;;  %v261_v16 = vld [vmem:[%s2568_s29 + $0x380] sm:$0xff] }
  0x19   : > { %258 = vst [vmem:[%s2573_s30 + $0x70] sm:$0xff] %v257_v14  ;;  %v263_v17 = vld [vmem:[%s2568_s29 + $0x388] sm:$0xff]  ;;  %260 = vst [vmem:[%s2573_s30 + $0x78] sm:$0xff] %v259_v15  ;;  %v265_v18 = vld [vmem:[%s2568_s29 + $0x3f0] sm:$0xff] }
  0x1a   : > { %262 = vst [vmem:[%s2573_s30 + $0x80] sm:$0xff] %v261_v16  ;;  %264 = vst [vmem:[%s2573_s30 + $0x88] sm:$0xff] %v263_v17  ;;  %v267_v19 = vld [vmem:[%s2568_s29 + $0x3f8] sm:$0xff]  ;;  %v269_v20 = vld [vmem:[%s2568_s29 + $0x460] sm:$0xff] }
  0x1b   : > { %266 = vst [vmem:[%s2573_s30 + $0x90] sm:$0xff] %v265_v18  ;;  %268 = vst [vmem:[%s2573_s30 + $0x98] sm:$0xff] %v267_v19  ;;  %v271_v21 = vld [vmem:[%s2568_s29 + $0x468] sm:$0xff]  ;;  %v273_v22 = vld [vmem:[%s2568_s29 + $0x4d0] sm:$0xff] }
  0x1c   : > { %270 = vst [vmem:[%s2573_s30 + $0xa0] sm:$0xff] %v269_v20  ;;  %v275_v23 = vld [vmem:[%s2568_s29 + $0x4d8] sm:$0xff]  ;;  %272 = vst [vmem:[%s2573_s30 + $0xa8] sm:$0xff] %v271_v21  ;;  %v277_v24 = vld [vmem:[%s2568_s29 + $0x540] sm:$0xff] }
  0x1d   : > { %274 = vst [vmem:[%s2573_s30 + $0xb0] sm:$0xff] %v273_v22  ;;  %276 = vst [vmem:[%s2573_s30 + $0xb8] sm:$0xff] %v275_v23  ;;  %v279_v25 = vld [vmem:[%s2568_s29 + $0x548] sm:$0xff]  ;;  %v281_v26 = vld [vmem:[%s2568_s29 + $0x5b0] sm:$0xff] }
  0x1e   : > { %278 = vst [vmem:[%s2573_s30 + $0xc0] sm:$0xff] %v277_v24  ;;  %280 = vst [vmem:[%s2573_s30 + $0xc8] sm:$0xff] %v279_v25  ;;  %v283_v27 = vld [vmem:[%s2568_s29 + $0x5b8] sm:$0xff]  ;;  %v285_v28 = vld [vmem:[%s2568_s29 + $0x620] sm:$0xff] }
  0x1f   : > { %282 = vst [vmem:[%s2573_s30 + $0xd0] sm:$0xff] %v281_v26  ;;  %v287_v29 = vld [vmem:[%s2568_s29 + $0x628] sm:$0xff]  ;;  %284 = vst [vmem:[%s2573_s30 + $0xd8] sm:$0xff] %v283_v27  ;;  %v289_v30 = vld [vmem:[%s2568_s29 + $0x690] sm:$0xff] }
  0x20   : > { %286 = vst [vmem:[%s2573_s30 + $0xe0] sm:$0xff] %v285_v28  ;;  %288 = vst [vmem:[%s2573_s30 + $0xe8] sm:$0xff] %v287_v29  ;;  %v291_v31 = vld [vmem:[%s2568_s29 + $0x698] sm:$0xff]  ;;  %v293_v32 = vld [vmem:[%s2568_s29 + $0x700] sm:$0xff] }
  0x21   : > { %290 = vst [vmem:[%s2573_s30 + $0xf0] sm:$0xff] %v289_v30  ;;  %292 = vst [vmem:[%s2573_s30 + $0xf8] sm:$0xff] %v291_v31  ;;  %v295_v33 = vld [vmem:[%s2568_s29 + $0x708] sm:$0xff]  ;;  %v297_v34 = vld [vmem:[%s2568_s29 + $0x770] sm:$0xff] }
  0x22   : > { %294 = vst [vmem:[%s2573_s30 + $0x100] sm:$0xff] %v293_v32  ;;  %v299_v35 = vld [vmem:[%s2568_s29 + $0x778] sm:$0xff]  ;;  %296 = vst [vmem:[%s2573_s30 + $0x108] sm:$0xff] %v295_v33  ;;  %v301_v36 = vld [vmem:[%s2568_s29 + $0x7e0] sm:$0xff] }
  0x23   : > { %298 = vst [vmem:[%s2573_s30 + $0x110] sm:$0xff] %v297_v34  ;;  %300 = vst [vmem:[%s2573_s30 + $0x118] sm:$0xff] %v299_v35  ;;  %v303_v37 = vld [vmem:[%s2568_s29 + $0x7e8] sm:$0xff]  ;;  %v305_v38 = vld [vmem:[%s2568_s29 + $0x850] sm:$0xff] }
  0x24   : > { %302 = vst [vmem:[%s2573_s30 + $0x120] sm:$0xff] %v301_v36  ;;  %304 = vst [vmem:[%s2573_s30 + $0x128] sm:$0xff] %v303_v37  ;;  %v307_v39 = vld [vmem:[%s2568_s29 + $0x858] sm:$0xff]  ;;  %v309_v40 = vld [vmem:[%s2568_s29 + $0x8c0] sm:$0xff] }
  0x25   : > { %306 = vst [vmem:[%s2573_s30 + $0x130] sm:$0xff] %v305_v38  ;;  %v311_v41 = vld [vmem:[%s2568_s29 + $0x8c8] sm:$0xff]  ;;  %308 = vst [vmem:[%s2573_s30 + $0x138] sm:$0xff] %v307_v39  ;;  %v313_v42 = vld [vmem:[%s2568_s29 + $0x930] sm:$0xff] }
  0x26   : > { %310 = vst [vmem:[%s2573_s30 + $0x140] sm:$0xff] %v309_v40  ;;  %312 = vst [vmem:[%s2573_s30 + $0x148] sm:$0xff] %v311_v41  ;;  %v315_v43 = vld [vmem:[%s2568_s29 + $0x938] sm:$0xff]  ;;  %v317_v44 = vld [vmem:[%s2568_s29 + $0x9a0] sm:$0xff] }
  0x27   : > { %314 = vst [vmem:[%s2573_s30 + $0x150] sm:$0xff] %v313_v42  ;;  %316 = vst [vmem:[%s2573_s30 + $0x158] sm:$0xff] %v315_v43  ;;  %v319_v45 = vld [vmem:[%s2568_s29 + $0x9a8] sm:$0xff]  ;;  %v321_v46 = vld [vmem:[%s2568_s29 + $0xa10] sm:$0xff] }
  0x28   : > { %318 = vst [vmem:[%s2573_s30 + $0x160] sm:$0xff] %v317_v44  ;;  %v323_v47 = vld [vmem:[%s2568_s29 + $0xa18] sm:$0xff]  ;;  %320 = vst [vmem:[%s2573_s30 + $0x168] sm:$0xff] %v319_v45  ;;  %v325_v48 = vld [vmem:[%s2568_s29 + $0xa80] sm:$0xff] }
  0x29   : > { %322 = vst [vmem:[%s2573_s30 + $0x170] sm:$0xff] %v321_v46  ;;  %324 = vst [vmem:[%s2573_s30 + $0x178] sm:$0xff] %v323_v47  ;;  %v327_v49 = vld [vmem:[%s2568_s29 + $0xa88] sm:$0xff]  ;;  %v329_v50 = vld [vmem:[%s2568_s29 + $0xaf0] sm:$0xff] }
  0x2a   : > { %326 = vst [vmem:[%s2573_s30 + $0x180] sm:$0xff] %v325_v48  ;;  %328 = vst [vmem:[%s2573_s30 + $0x188] sm:$0xff] %v327_v49  ;;  %v331_v51 = vld [vmem:[%s2568_s29 + $0xaf8] sm:$0xff]  ;;  %v333_v52 = vld [vmem:[%s2568_s29 + $0xb60] sm:$0xff] }
  0x2b   : > { %330 = vst [vmem:[%s2573_s30 + $0x190] sm:$0xff] %v329_v50  ;;  %v335_v53 = vld [vmem:[%s2568_s29 + $0xb68] sm:$0xff]  ;;  %332 = vst [vmem:[%s2573_s30 + $0x198] sm:$0xff] %v331_v51  ;;  %v337_v54 = vld [vmem:[%s2568_s29 + $0xbd0] sm:$0xff] }
  0x2c   : > { %334 = vst [vmem:[%s2573_s30 + $0x1a0] sm:$0xff] %v333_v52  ;;  %336 = vst [vmem:[%s2573_s30 + $0x1a8] sm:$0xff] %v335_v53  ;;  %v339_v55 = vld [vmem:[%s2568_s29 + $0xbd8] sm:$0xff]  ;;  %v341_v56 = vld [vmem:[%s2568_s29 + $0xc40] sm:$0xff] }
  0x2d   : > { %338 = vst [vmem:[%s2573_s30 + $0x1b0] sm:$0xff] %v337_v54  ;;  %340 = vst [vmem:[%s2573_s30 + $0x1b8] sm:$0xff] %v339_v55  ;;  %v343_v57 = vld [vmem:[%s2568_s29 + $0xc48] sm:$0xff]  ;;  %v345_v58 = vld [vmem:[%s2568_s29 + $0xcb0] sm:$0xff] }
  0x2e   : > { %342 = vst [vmem:[%s2573_s30 + $0x1c0] sm:$0xff] %v341_v56  ;;  %v347_v59 = vld [vmem:[%s2568_s29 + $0xcb8] sm:$0xff]  ;;  %344 = vst [vmem:[%s2573_s30 + $0x1c8] sm:$0xff] %v343_v57  ;;  %v349_v60 = vld [vmem:[%s2568_s29 + $0xd20] sm:$0xff] }
  0x2f   : > { %346 = vst [vmem:[%s2573_s30 + $0x1d0] sm:$0xff] %v345_v58  ;;  %348 = vst [vmem:[%s2573_s30 + $0x1d8] sm:$0xff] %v347_v59  ;;  %v351_v61 = vld [vmem:[%s2568_s29 + $0xd28] sm:$0xff]  ;;  %v353_v62 = vld [vmem:[%s2568_s29 + $0xd90] sm:$0xff] }
  0x30   : > { %350 = vst [vmem:[%s2573_s30 + $0x1e0] sm:$0xff] %v349_v60  ;;  %352 = vst [vmem:[%s2573_s30 + $0x1e8] sm:$0xff] %v351_v61  ;;  %v355_v63 = vld [vmem:[%s2568_s29 + $0xd98] sm:$0xff] }
  0x31   : > { %354 = vst [vmem:[%s2573_s30 + $0x1f0] sm:$0xff] %v353_v62  ;;  %356 = vst [vmem:[%s2573_s30 + $0x1f8] sm:$0xff] %v355_v63 }
  0x32 PF: > { %p1894_p6 = scmp.ge.s32.totalorder %s2497_s19, 1  ;;  %p373_p7 = scmp.lt.s32.totalorder %s2497_s19, 8 }
  0x34   : > { %p374_p8 = pnand %p1894_p6, %p373_p7 }
  0x35   : > { %s380_s5 = sand.u32 (!%p374_p8), 1, %s2481_s15   ;;  %s1896_s6 = sshll.u32 (!%p374_p8), %s2489_s17, 6 }
  0x36   : > { %377 = sbr.rel (%p374_p8) target bundleno = 484 (0x1e4), region = 55  ;;  %s1895_s7 = sshll.u32 (!%p374_p8), %s380_s5, 9 }
  0x37   : > { %p430_p9 = scmp.lt.s32.totalorder (!%p374_p8), %s1896_s6, 447  ;;  %s2709_s12 = scalar_lea.vmem (!%p374_p8), [#allocation3], %s1895_s7 }
  0x38   : > { %p1898_p10 = scmp.ne.s32.totalorder (!%p374_p8), %s2489_s17, 0 }
  0x3d   : > { %s3065_s6 = smov (!%p430_p9, %s1896_s6), 447  ;;  %463 = sbr.rel (%p1898_p10) target bundleno = 79 (0x4f), region = 63 }
  0x3e   : > { %s1897_s8 = sshll.u32 %s3065_s6, 2  ;;  %v2499_v0 = vmov (!%p1898_p10), 0.0  }
  0x3f   : > { %s2707_s11 = scalar_lea.vmem %s3054_s1, %s1897_s8  ;;  %464 = vst [vmem:[#allocation2] sm:$0xff] (!%p1898_p10), %v2499_v0  ;;  %465 = vst [vmem:[#allocation2 + $0x8] sm:$0xff] (!%p1898_p10), %v2499_v0 }
  0x40   : > { %466 = vst [vmem:[#allocation2 + $0x10] sm:$0xff] (!%p1898_p10), %v2499_v0  ;;  %467 = vst [vmem:[#allocation2 + $0x18] sm:$0xff] (!%p1898_p10), %v2499_v0 }
  0x41   : > { %468 = vst [vmem:[#allocation2 + $0x20] sm:$0xff] (!%p1898_p10), %v2499_v0  ;;  %469 = vst [vmem:[#allocation2 + $0x28] sm:$0xff] (!%p1898_p10), %v2499_v0 }
  0x42   : > { %470 = vst [vmem:[#allocation2 + $0x30] sm:$0xff] (!%p1898_p10), %v2499_v0  ;;  %471 = vst [vmem:[#allocation2 + $0x38] sm:$0xff] (!%p1898_p10), %v2499_v0 }
  0x43   : > { %472 = vst [vmem:[#allocation2 + $0x40] sm:$0xff] (!%p1898_p10), %v2499_v0  ;;  %473 = vst [vmem:[#allocation2 + $0x48] sm:$0xff] (!%p1898_p10), %v2499_v0 }
  0x44   : > { %474 = vst [vmem:[#allocation2 + $0x50] sm:$0xff] %v2499_v0  ;;  %475 = vst [vmem:[#allocation2 + $0x58] sm:$0xff] %v2499_v0 }
  0x45   : > { %476 = vst [vmem:[#allocation2 + $0x60] sm:$0xff] %v2499_v0  ;;  %477 = vst [vmem:[#allocation2 + $0x68] sm:$0xff] %v2499_v0 }
  0x46   : > { %478 = vst [vmem:[#allocation2 + $0x70] sm:$0xff] %v2499_v0  ;;  %479 = vst [vmem:[#allocation2 + $0x78] sm:$0xff] %v2499_v0 }
  0x47   : > { %480 = vst [vmem:[#allocation2 + $0x80] sm:$0xff] %v2499_v0  ;;  %481 = vst [vmem:[#allocation2 + $0x88] sm:$0xff] %v2499_v0 }
  0x48   : > { %482 = vst [vmem:[#allocation2 + $0x90] sm:$0xff] %v2499_v0  ;;  %483 = vst [vmem:[#allocation2 + $0x98] sm:$0xff] %v2499_v0 }
  0x49   : > { %484 = vst [vmem:[#allocation2 + $0xa0] sm:$0xff] %v2499_v0  ;;  %485 = vst [vmem:[#allocation2 + $0xa8] sm:$0xff] %v2499_v0 }
  0x4a   : > { %486 = vst [vmem:[#allocation2 + $0xb0] sm:$0xff] %v2499_v0  ;;  %487 = vst [vmem:[#allocation2 + $0xb8] sm:$0xff] %v2499_v0 }
  0x4b   : > { %488 = vst [vmem:[#allocation2 + $0xc0] sm:$0xff] %v2499_v0  ;;  %489 = vst [vmem:[#allocation2 + $0xc8] sm:$0xff] %v2499_v0 }
  0x4c   : > { %490 = vst [vmem:[#allocation2 + $0xd0] sm:$0xff] %v2499_v0  ;;  %491 = vst [vmem:[#allocation2 + $0xd8] sm:$0xff] %v2499_v0 }
  0x4d   : > { %492 = vst [vmem:[#allocation2 + $0xe0] sm:$0xff] %v2499_v0  ;;  %493 = vst [vmem:[#allocation2 + $0xe8] sm:$0xff] %v2499_v0 }
  0x4e   : > { %494 = vst [vmem:[#allocation2 + $0xf0] sm:$0xff] %v2499_v0  ;;  %495 = vst [vmem:[#allocation2 + $0xf8] sm:$0xff] %v2499_v0 }
  0x4f PF: > { %v2267_v1 = vld [vmem:[%s2707_s11 + $0x40] sm:$0xff]   ;;  %v2271_v5 = vld [vmem:[%s2707_s11 + $0x48] sm:$0xff]   ;;  %v2275_v9 = vld [vmem:[%s2707_s11 + $0x50] sm:$0xff]   ;;  %p1995_p11 = scmp.ne.s32.totalorder %s2489_s17, 6 }
  0x50   : > { %v2268_v2 = vld [vmem:[%s2707_s11 + $0xc0] sm:$0xff]   ;;  %2002 = vmatprep.subr.bf16.mxu0 %v2267_v1  ;;  %v2272_v6 = vld [vmem:[%s2707_s11 + $0xc8] sm:$0xff]   ;;  %v2276_v10 = vld [vmem:[%s2707_s11 + $0xd0] sm:$0xff]  }
  0x51   : > { %v2269_v3 = vld [vmem:[%s2707_s11] sm:$0xff]   ;;  %2114 = vmatprep.subr.bf16.mxu1 %v2268_v2  ;;  %v2273_v7 = vld [vmem:[%s2707_s11 + $0x8] sm:$0xff]   ;;  %v2277_v11 = vld [vmem:[%s2707_s11 + $0x10] sm:$0xff]  }
  0x52   : > { %v2270_v4 = vld [vmem:[%s2707_s11 + $0x80] sm:$0xff]   ;;  %2003 = vmatpush3.bf16.msra.mxu0 %v2269_v3  ;;  %v2274_v8 = vld [vmem:[%s2707_s11 + $0x88] sm:$0xff]   ;;  %v2278_v12 = vld [vmem:[%s2707_s11 + $0x90] sm:$0xff]  }
  0x53   : > { %2115 = vmatpush3.bf16.msra.mxu1 %v2270_v4  ;;  %2004 = vmatprep.subr.bf16.mxu0 %v2271_v5  ;;  %v2279_v13 = vld [vmem:[%s2707_s11 + $0x58] sm:$0xff]   ;;  %v2283_v17 = vld [vmem:[%s2707_s11 + $0x60] sm:$0xff]   ;;  %v2287_v21 = vld [vmem:[%s2707_s11 + $0x68] sm:$0xff]  }
  0x54   : > { %2116 = vmatprep.subr.bf16.mxu1 %v2272_v6  ;;  %v2280_v14 = vld [vmem:[%s2707_s11 + $0xd8] sm:$0xff]   ;;  %v2284_v18 = vld [vmem:[%s2707_s11 + $0xe0] sm:$0xff]   ;;  %v2288_v22 = vld [vmem:[%s2707_s11 + $0xe8] sm:$0xff]  }
  0x55   : > { %v2281_v15 = vld [vmem:[%s2707_s11 + $0x18] sm:$0xff]   ;;  %v2285_v19 = vld [vmem:[%s2707_s11 + $0x20] sm:$0xff]   ;;  %v2289_v23 = vld [vmem:[%s2707_s11 + $0x28] sm:$0xff]  }
  0x56   : > { %2005 = vmatpush3.bf16.msra.mxu0 %v2273_v7  ;;  %v2282_v16 = vld [vmem:[%s2707_s11 + $0x98] sm:$0xff]   ;;  %v2286_v20 = vld [vmem:[%s2707_s11 + $0xa0] sm:$0xff]   ;;  %v2290_v24 = vld [vmem:[%s2707_s11 + $0xa8] sm:$0xff]  }
  0x57   : > { %2117 = vmatpush3.bf16.msra.mxu1 %v2274_v8  ;;  %2006 = vmatprep.subr.bf16.mxu0 %v2275_v9  ;;  %v2291_v25 = vld [vmem:[%s2707_s11 + $0x70] sm:$0xff]   ;;  %v2295_v29 = vld [vmem:[%s2707_s11 + $0x78] sm:$0xff]  }
  0x58   : > { %2118 = vmatprep.subr.bf16.mxu1 %v2276_v10  ;;  %v2292_v26 = vld [vmem:[%s2707_s11 + $0xf0] sm:$0xff]   ;;  %v2296_v30 = vld [vmem:[%s2707_s11 + $0xf8] sm:$0xff]  }
  0x59   : > { %v2293_v27 = vld [vmem:[%s2707_s11 + $0x30] sm:$0xff]   ;;  %v2297_v31 = vld [vmem:[%s2707_s11 + $0x38] sm:$0xff]  }
  0x5a   : > { %2007 = vmatpush3.bf16.msra.mxu0 %v2277_v11  ;;  %v2294_v28 = vld [vmem:[%s2707_s11 + $0xb0] sm:$0xff]   ;;  %v2298_v32 = vld [vmem:[%s2707_s11 + $0xb8] sm:$0xff]  }
  0x5b   : > { %2119 = vmatpush3.bf16.msra.mxu1 %v2278_v12  ;;  %2008 = vmatprep.subr.bf16.mxu0 %v2279_v13  ;;  %v2299_v33 = vld [vmem:[%s2709_s12] ss:$16 sps:$4 sm:$0xff]   ;;  %v2301_v34 = vld [vmem:[%s2709_s12 + $0x4] ss:$16 sps:$4 sm:$0xff]   ;;  %v2302_v35 = vld [vmem:[%s2709_s12 + $0x8] ss:$16 sps:$4 sm:$0xff]  }
  0x5c   : > { %2120 = vmatprep.subr.bf16.mxu1 %v2280_v14  ;;  %v2304_v36 = vld [vmem:[%s2709_s12 + $0xc] ss:$16 sps:$4 sm:$0xff]   ;;  %1200 = vmatprep.mubr.bf16.mxu0 %v2301_v34  ;;  %v2305_v37 = vld [vmem:[%s2709_s12 + $0x24] ss:$16 sps:$4 sm:$0xff]   ;;  %v2309_v39 = vld [vmem:[%s2709_s12 + $0x20] ss:$16 sps:$4 sm:$0xff]  }
  0x5d   : > { %1361 = vmatprep.mubr.bf16.mxu1 %v2304_v36  ;;  %v2307_v38 = vld [vmem:[%s2709_s12 + $0x2c] ss:$16 sps:$4 sm:$0xff]   ;;  %v2310_v40 = vld [vmem:[%s2709_s12 + $0x28] ss:$16 sps:$4 sm:$0xff]   ;;  %v2311_v41 = vld [vmem:[%s2709_s12 + $0x44] ss:$16 sps:$4 sm:$0xff]  }
  0x5e   : > { %2009 = vmatpush3.bf16.msra.mxu0 %v2281_v15  ;;  %v2313_v42 = vld [vmem:[%s2709_s12 + $0x4c] ss:$16 sps:$4 sm:$0xff]   ;;  %v2315_v43 = vld [vmem:[%s2709_s12 + $0x40] ss:$16 sps:$4 sm:$0xff]   ;;  %v2316_v44 = vld [vmem:[%s2709_s12 + $0x48] ss:$16 sps:$4 sm:$0xff]  }
  0x5f   : > { %2121 = vmatpush3.bf16.msra.mxu1 %v2282_v16  ;;  %2010 = vmatprep.subr.bf16.mxu0 %v2283_v17  ;;  %v2317_v45 = vld [vmem:[%s2709_s12 + $0x64] ss:$16 sps:$4 sm:$0xff]   ;;  %v2319_v46 = vld [vmem:[%s2709_s12 + $0x6c] ss:$16 sps:$4 sm:$0xff]   ;;  %v2321_v47 = vld [vmem:[%s2709_s12 + $0x60] ss:$16 sps:$4 sm:$0xff]  }
  0x60   : > { %2122 = vmatprep.subr.bf16.mxu1 %v2284_v18  ;;  %v2322_v48 = vld [vmem:[%s2709_s12 + $0x68] ss:$16 sps:$4 sm:$0xff]   ;;  %v2323_v49 = vld [vmem:[%s2709_s12 + $0x84] ss:$16 sps:$4 sm:$0xff]   ;;  %v2325_v50 = vld [vmem:[%s2709_s12 + $0x8c] ss:$16 sps:$4 sm:$0xff]  }
  0x61   : > { %v2327_v51 = vld [vmem:[%s2709_s12 + $0x80] ss:$16 sps:$4 sm:$0xff]   ;;  %v2328_v52 = vld [vmem:[%s2709_s12 + $0x88] ss:$16 sps:$4 sm:$0xff]   ;;  %v2329_v53 = vld [vmem:[%s2709_s12 + $0xa4] ss:$16 sps:$4 sm:$0xff]  }
  0x62   : > { %2011 = vmatpush3.bf16.msra.mxu0 %v2285_v19  ;;  %v2331_v54 = vld [vmem:[%s2709_s12 + $0xac] ss:$16 sps:$4 sm:$0xff]   ;;  %v2333_v55 = vld [vmem:[%s2709_s12 + $0xa0] ss:$16 sps:$4 sm:$0xff]   ;;  %v2334_v56 = vld [vmem:[%s2709_s12 + $0xa8] ss:$16 sps:$4 sm:$0xff]  }
  0x63   : > { %2123 = vmatpush3.bf16.msra.mxu1 %v2286_v20  ;;  %2012 = vmatprep.subr.bf16.mxu0 %v2287_v21  ;;  %v2335_v57 = vld [vmem:[%s2709_s12 + $0xc4] ss:$16 sps:$4 sm:$0xff]   ;;  %v2337_v58 = vld [vmem:[%s2709_s12 + $0xcc] ss:$16 sps:$4 sm:$0xff]   ;;  %v2339_v59 = vld [vmem:[%s2709_s12 + $0xc0] ss:$16 sps:$4 sm:$0xff]  }
  0x64   : > { %2124 = vmatprep.subr.bf16.mxu1 %v2288_v22  ;;  %v2340_v60 = vld [vmem:[%s2709_s12 + $0xc8] ss:$16 sps:$4 sm:$0xff]   ;;  %v2341_v61 = vld [vmem:[%s2709_s12 + $0xe4] ss:$16 sps:$4 sm:$0xff]   ;;  %v2343_v62 = vld [vmem:[%s2709_s12 + $0xec] ss:$16 sps:$4 sm:$0xff]  }
  0x65   : > { %v2345_v63 = vld [vmem:[%s2709_s12 + $0xe0] ss:$16 sps:$4 sm:$0xff]   ;;  %v2346_v0 = vld [vmem:[%s2709_s12 + $0xe8] ss:$16 sps:$4 sm:$0xff]   ;;  %v2347_v1 = vld [vmem:[%s2709_s12 + $0x104] ss:$16 sps:$4 sm:$0xff]  }
  0x66   : > { %2013 = vmatpush3.bf16.msra.mxu0 %v2289_v23  ;;  %v2349_v2 = vld [vmem:[%s2709_s12 + $0x10c] ss:$16 sps:$4 sm:$0xff]   ;;  %v2351_v3 = vld [vmem:[%s2709_s12 + $0x100] ss:$16 sps:$4 sm:$0xff]   ;;  %v2352_v4 = vld [vmem:[%s2709_s12 + $0x108] ss:$16 sps:$4 sm:$0xff]  }
  0x67   : > { %2125 = vmatpush3.bf16.msra.mxu1 %v2290_v24  ;;  %2014 = vmatprep.subr.bf16.mxu0 %v2291_v25  ;;  %v2353_v5 = vld [vmem:[%s2709_s12 + $0x124] ss:$16 sps:$4 sm:$0xff]   ;;  %v2355_v6 = vld [vmem:[%s2709_s12 + $0x12c] ss:$16 sps:$4 sm:$0xff]   ;;  %v2357_v7 = vld [vmem:[%s2709_s12 + $0x120] ss:$16 sps:$4 sm:$0xff]  }
  0x68   : > { %2126 = vmatprep.subr.bf16.mxu1 %v2292_v26  ;;  %v2358_v8 = vld [vmem:[%s2709_s12 + $0x128] ss:$16 sps:$4 sm:$0xff]   ;;  %v2359_v9 = vld [vmem:[%s2709_s12 + $0x144] ss:$16 sps:$4 sm:$0xff]   ;;  %v2361_v10 = vld [vmem:[%s2709_s12 + $0x14c] ss:$16 sps:$4 sm:$0xff]  }
  0x69   : > { %v2363_v11 = vld [vmem:[%s2709_s12 + $0x140] ss:$16 sps:$4 sm:$0xff]   ;;  %v2364_v12 = vld [vmem:[%s2709_s12 + $0x148] ss:$16 sps:$4 sm:$0xff]   ;;  %v2365_v13 = vld [vmem:[%s2709_s12 + $0x164] ss:$16 sps:$4 sm:$0xff]  }
  0x6a   : > { %2015 = vmatpush3.bf16.msra.mxu0 %v2293_v27  ;;  %v2367_v14 = vld [vmem:[%s2709_s12 + $0x16c] ss:$16 sps:$4 sm:$0xff]   ;;  %v2369_v15 = vld [vmem:[%s2709_s12 + $0x160] ss:$16 sps:$4 sm:$0xff]   ;;  %v2370_v16 = vld [vmem:[%s2709_s12 + $0x168] ss:$16 sps:$4 sm:$0xff]  }
  0x6b   : > { %2127 = vmatpush3.bf16.msra.mxu1 %v2294_v28  ;;  %2016 = vmatprep.subr.bf16.mxu0 %v2295_v29  ;;  %v2371_v17 = vld [vmem:[%s2709_s12 + $0x184] ss:$16 sps:$4 sm:$0xff]   ;;  %v2373_v18 = vld [vmem:[%s2709_s12 + $0x18c] ss:$16 sps:$4 sm:$0xff]   ;;  %v2375_v19 = vld [vmem:[%s2709_s12 + $0x180] ss:$16 sps:$4 sm:$0xff]  }
  0x6c   : > { %2128 = vmatprep.subr.bf16.mxu1 %v2296_v30  ;;  %v2376_v20 = vld [vmem:[%s2709_s12 + $0x188] ss:$16 sps:$4 sm:$0xff]   ;;  %v2377_v21 = vld [vmem:[%s2709_s12 + $0x1a4] ss:$16 sps:$4 sm:$0xff]   ;;  %v2379_v22 = vld [vmem:[%s2709_s12 + $0x1ac] ss:$16 sps:$4 sm:$0xff]  }
  0x6d   : > { %v2381_v23 = vld [vmem:[%s2709_s12 + $0x1a0] ss:$16 sps:$4 sm:$0xff]   ;;  %v2382_v24 = vld [vmem:[%s2709_s12 + $0x1a8] ss:$16 sps:$4 sm:$0xff]   ;;  %v2383_v25 = vld [vmem:[%s2709_s12 + $0x1c4] ss:$16 sps:$4 sm:$0xff]  }
  0x6e   : > { %2017 = vmatpush3.bf16.msra.mxu0 %v2297_v31  ;;  %v2385_v26 = vld [vmem:[%s2709_s12 + $0x1cc] ss:$16 sps:$4 sm:$0xff]   ;;  %v2387_v27 = vld [vmem:[%s2709_s12 + $0x1c0] ss:$16 sps:$4 sm:$0xff]   ;;  %v2388_v28 = vld [vmem:[%s2709_s12 + $0x1c8] ss:$16 sps:$4 sm:$0xff]  }
  0x6f   : > { %2129 = vmatpush3.bf16.msra.mxu1 %v2298_v32  ;;  %v2389_v29 = vld [vmem:[%s2709_s12 + $0x1e4] ss:$16 sps:$4 sm:$0xff]   ;;  %v2391_v30 = vld [vmem:[%s2709_s12 + $0x1ec] ss:$16 sps:$4 sm:$0xff]   ;;  %v2393_v31 = vld [vmem:[%s2709_s12 + $0x1e0] ss:$16 sps:$4 sm:$0xff]  }
  0x70   : > { %v2394_v32 = vld [vmem:[%s2709_s12 + $0x1e8] ss:$16 sps:$4 sm:$0xff]  }
  0x71   : > { %1201 = vmatmul.mubr.bf16.vlgmr.msra.gmra.mrb[0].mxu0 %v2299_v33 }
  0x72   : > { %1362 = vmatmul.mubr.bf16.vlgmr.msra.gmra.mrb[0].mxu1 %v2302_v35  ;;  %1208 = vmatprep.mubr.bf16.mxu0 %v2305_v37 }
  0x73   : > { %1369 = vmatprep.mubr.bf16.mxu1 %v2307_v38 }
  0x79   : > { %1209 = vmatmul.mubr.bf16.gmra.mrb[4].mxu0 %v2309_v39 }
  0x7a   : > { %1370 = vmatmul.mubr.bf16.gmra.mrb[4].mxu1 %v2310_v40  ;;  %1216 = vmatprep.mubr.bf16.mxu0 %v2311_v41 }
  0x7b   : > { %1377 = vmatprep.mubr.bf16.mxu1 %v2313_v42  ;;  %v496_v42 = vld [vmem:[#allocation2] sm:$0xff] }
  0x81   : > { %1217 = vmatmul.mubr.bf16.gmra.mrb[8].mxu0 %v2315_v43 }
  0x82   : > { %1378 = vmatmul.mubr.bf16.gmra.mrb[8].mxu1 %v2316_v44  ;;  %1224 = vmatprep.mubr.bf16.mxu0 %v2317_v45 }
  0x83   : > { %1385 = vmatprep.mubr.bf16.mxu1 %v2319_v46 }
  0x89   : > { %1225 = vmatmul.mubr.bf16.gmra.mrb[12].mxu0 %v2321_v47  ;;  %v497_v47 = vld [vmem:[#allocation2 + $0x8] sm:$0xff] }
  0x8a   : > { %1386 = vmatmul.mubr.bf16.gmra.mrb[12].mxu1 %v2322_v48  ;;  %1232 = vmatprep.mubr.bf16.mxu0 %v2323_v49 }
  0x8b   : > { %1393 = vmatprep.mubr.bf16.mxu1 %v2325_v50 }
  0x91   : > { %1233 = vmatmul.mubr.bf16.gmra.mrb[16].mxu0 %v2327_v51 }
  0x92   : > { %1394 = vmatmul.mubr.bf16.gmra.mrb[16].mxu1 %v2328_v52  ;;  %1240 = vmatprep.mubr.bf16.mxu0 %v2329_v53 }
  0x93   : > { %1401 = vmatprep.mubr.bf16.mxu1 %v2331_v54 }
  0x99   : > { %1241 = vmatmul.mubr.bf16.gmra.mrb[20].mxu0 %v2333_v55 }
  0x9a   : > { %1402 = vmatmul.mubr.bf16.gmra.mrb[20].mxu1 %v2334_v56  ;;  %1248 = vmatprep.mubr.bf16.mxu0 %v2335_v57 }
  0x9b   : > { %1409 = vmatprep.mubr.bf16.mxu1 %v2337_v58 }
  0xa1   : > { %1249 = vmatmul.mubr.bf16.gmra.mrb[24].mxu0 %v2339_v59 }
  0xa2   : > { %1410 = vmatmul.mubr.bf16.gmra.mrb[24].mxu1 %v2340_v60  ;;  %1256 = vmatprep.mubr.bf16.mxu0 %v2341_v61  ;;  %v498_v60 = vld [vmem:[#allocation2 + $0x10] sm:$0xff] }
  0xa3   : > { %1417 = vmatprep.mubr.bf16.mxu1 %v2343_v62 }
  0xa9   : > { %1257 = vmatmul.mubr.bf16.gmra.mrb[28].mxu0 %v2345_v63 }
  0xaa   : > { %1418 = vmatmul.mubr.bf16.gmra.mrb[28].mxu1 %v2346_v0  ;;  %1264 = vmatprep.mubr.bf16.mxu0 %v2347_v1  ;;  %v499_v1 = vld [vmem:[#allocation2 + $0x18] sm:$0xff] }
  0xab   : > { %1425 = vmatprep.mubr.bf16.mxu1 %v2349_v2 }
  0xb1   : > { %1265 = vmatmul.mubr.bf16.gmra.mrb[32].mxu0 %v2351_v3 }
  0xb2   : > { %1426 = vmatmul.mubr.bf16.gmra.mrb[32].mxu1 %v2352_v4  ;;  %1272 = vmatprep.mubr.bf16.mxu0 %v2353_v5 }
  0xb3   : > { %1433 = vmatprep.mubr.bf16.mxu1 %v2355_v6 }
  0xb9   : > { %1273 = vmatmul.mubr.bf16.gmra.mrb[36].mxu0 %v2357_v7 }
  0xba   : > { %1434 = vmatmul.mubr.bf16.gmra.mrb[36].mxu1 %v2358_v8  ;;  %1280 = vmatprep.mubr.bf16.mxu0 %v2359_v9 }
  0xbb   : > { %1441 = vmatprep.mubr.bf16.mxu1 %v2361_v10 }
  0xc1   : > { %1281 = vmatmul.mubr.bf16.gmra.mrb[40].mxu0 %v2363_v11 }
  0xc2   : > { %1442 = vmatmul.mubr.bf16.gmra.mrb[40].mxu1 %v2364_v12  ;;  %1288 = vmatprep.mubr.bf16.mxu0 %v2365_v13 }
  0xc3   : > { %1449 = vmatprep.mubr.bf16.mxu1 %v2367_v14  ;;  %v500_v14 = vld [vmem:[#allocation2 + $0x20] sm:$0xff] }
  0xc9   : > { %1289 = vmatmul.mubr.bf16.gmra.mrb[44].mxu0 %v2369_v15 }
  0xca   : > { %1450 = vmatmul.mubr.bf16.gmra.mrb[44].mxu1 %v2370_v16  ;;  %1296 = vmatprep.mubr.bf16.mxu0 %v2371_v17 }
  0xcb   : > { %1457 = vmatprep.mubr.bf16.mxu1 %v2373_v18 }
  0xd1   : > { %1297 = vmatmul.mubr.bf16.gmra.mrb[48].mxu0 %v2375_v19  ;;  %v501_v19 = vld [vmem:[#allocation2 + $0x28] sm:$0xff] }
  0xd2   : > { %1458 = vmatmul.mubr.bf16.gmra.mrb[48].mxu1 %v2376_v20  ;;  %1304 = vmatprep.mubr.bf16.mxu0 %v2377_v21 }
  0xd3   : > { %1465 = vmatprep.mubr.bf16.mxu1 %v2379_v22 }
  0xd9   : > { %1305 = vmatmul.mubr.bf16.gmra.mrb[52].mxu0 %v2381_v23 }
  0xda   : > { %1466 = vmatmul.mubr.bf16.gmra.mrb[52].mxu1 %v2382_v24  ;;  %1312 = vmatprep.mubr.bf16.mxu0 %v2383_v25 }
  0xdb   : > { %1473 = vmatprep.mubr.bf16.mxu1 %v2385_v26 }
  0xe1   : > { %1313 = vmatmul.mubr.bf16.gmra.mrb[56].mxu0 %v2387_v27 }
  0xe2   : > { %1474 = vmatmul.mubr.bf16.gmra.mrb[56].mxu1 %v2388_v28  ;;  %1320 = vmatprep.mubr.bf16.mxu0 %v2389_v29 }
  0xe3   : > { %1481 = vmatprep.mubr.bf16.mxu1 %v2391_v30 }
  0xe9   : > { %1321 = vmatmul.mubr.bf16.gmra.mrb[60].mxu0 %v2393_v31 }
  0xea   : > { %1482 = vmatmul.mubr.bf16.gmra.mrb[60].mxu1 %v2394_v32  ;;  %v502_v32 = vld [vmem:[#allocation2 + $0x30] sm:$0xff] }
 0x144   : > { %v2018_v33 = vpop.f32.mrb[0].mxu0 }
 0x145   : > { %v2130_v34 = vpop.f32.mrb[0].mxu1  ;;  %v2019_v35 = vpop.f32.mrb[1].mxu0 }
 0x146   : > { %v2020_v36 = vadd.f32 %v2019_v35, %v2018_v33  ;;  %v2131_v37 = vpop.f32.mrb[1].mxu1  ;;  %v2021_v38 = vpop.f32.mrb[2].mxu0 }
 0x147   : > { %v2132_v39 = vadd.f32 %v2131_v37, %v2130_v34  ;;  %v2133_v40 = vpop.f32.mrb[2].mxu1  ;;  %v2022_v41 = vpop.f32.mrb[3].mxu0  ;;  %v503_v37 = vld [vmem:[#allocation2 + $0x38] sm:$0xff] }
 0x148   : > { %v2023_v43 = vadd.f32 %v2022_v41, %v2021_v38  ;;  %v2134_v44 = vpop.f32.mrb[3].mxu1 }
 0x149   : > { %v1364_v45 = vadd.f32 %v2132_v39, %v2020_v36  ;;  %v2135_v46 = vadd.f32 %v2134_v44, %v2133_v40 }
 0x14b   : > { %v1490_v48 = vadd.f32 %v1364_v45, %v496_v42  ;;  %v1367_v49 = vadd.f32 %v2135_v46, %v2023_v43 }
 0x14c   : > { %v2024_v50 = vpop.f32.mrb[4].mxu0 }
 0x14d   : > { %1522 = vst [vmem:[#allocation2] sm:$0xff] %v1490_v48  ;;  %v1491_v51 = vadd.f32 %v1367_v49, %v497_v47  ;;  %v2136_v52 = vpop.f32.mrb[4].mxu1  ;;  %v2025_v53 = vpop.f32.mrb[5].mxu0 }
 0x14e   : > { %v2026_v54 = vadd.f32 %v2025_v53, %v2024_v50  ;;  %v2137_v55 = vpop.f32.mrb[5].mxu1  ;;  %v2027_v56 = vpop.f32.mrb[6].mxu0  ;;  %v504_v50 = vld [vmem:[#allocation2 + $0x40] sm:$0xff] }
 0x14f   : > { %1523 = vst [vmem:[#allocation2 + $0x8] sm:$0xff] %v1491_v51  ;;  %v2138_v57 = vadd.f32 %v2137_v55, %v2136_v52  ;;  %v2139_v58 = vpop.f32.mrb[6].mxu1  ;;  %v2028_v59 = vpop.f32.mrb[7].mxu0  ;;  %v505_v55 = vld [vmem:[#allocation2 + $0x48] sm:$0xff] }
 0x150   : > { %v2029_v61 = vadd.f32 %v2028_v59, %v2027_v56  ;;  %v2140_v62 = vpop.f32.mrb[7].mxu1 }
 0x151   : > { %v1372_v63 = vadd.f32 %v2138_v57, %v2026_v54  ;;  %v2141_v0 = vadd.f32 %v2140_v62, %v2139_v58 }
 0x153   : > { %v1492_v2 = vadd.f32 %v1372_v63, %v498_v60  ;;  %v1375_v3 = vadd.f32 %v2141_v0, %v2029_v61 }
 0x154   : > { %v2030_v4 = vpop.f32.mrb[8].mxu0 }
 0x155   : > { %1524 = vst [vmem:[#allocation2 + $0x10] sm:$0xff] %v1492_v2  ;;  %v1493_v5 = vadd.f32 %v1375_v3, %v499_v1  ;;  %v2142_v6 = vpop.f32.mrb[8].mxu1  ;;  %v2031_v7 = vpop.f32.mrb[9].mxu0 }
 0x156   : > { %v2032_v8 = vadd.f32 %v2031_v7, %v2030_v4  ;;  %v2143_v9 = vpop.f32.mrb[9].mxu1  ;;  %v2033_v10 = vpop.f32.mrb[10].mxu0  ;;  %v506_v4 = vld [vmem:[#allocation2 + $0x50] sm:$0xff] }
 0x157   : > { %1525 = vst [vmem:[#allocation2 + $0x18] sm:$0xff] %v1493_v5  ;;  %v2144_v11 = vadd.f32 %v2143_v9, %v2142_v6  ;;  %v2145_v12 = vpop.f32.mrb[10].mxu1  ;;  %v2034_v13 = vpop.f32.mrb[11].mxu0  ;;  %v507_v9 = vld [vmem:[#allocation2 + $0x58] sm:$0xff] }
 0x158   : > { %v2035_v15 = vadd.f32 %v2034_v13, %v2033_v10  ;;  %v2146_v16 = vpop.f32.mrb[11].mxu1 }
 0x159   : > { %v1380_v17 = vadd.f32 %v2144_v11, %v2032_v8  ;;  %v2147_v18 = vadd.f32 %v2146_v16, %v2145_v12 }
 0x15b   : > { %v1494_v20 = vadd.f32 %v1380_v17, %v500_v14  ;;  %v1383_v21 = vadd.f32 %v2147_v18, %v2035_v15 }
 0x15c   : > { %v2036_v22 = vpop.f32.mrb[12].mxu0 }
 0x15d   : > { %1526 = vst [vmem:[#allocation2 + $0x20] sm:$0xff] %v1494_v20  ;;  %v1495_v23 = vadd.f32 %v1383_v21, %v501_v19  ;;  %v2148_v24 = vpop.f32.mrb[12].mxu1  ;;  %v2037_v25 = vpop.f32.mrb[13].mxu0 }
 0x15e   : > { %v2038_v26 = vadd.f32 %v2037_v25, %v2036_v22  ;;  %v2149_v27 = vpop.f32.mrb[13].mxu1  ;;  %v2039_v28 = vpop.f32.mrb[14].mxu0  ;;  %v508_v22 = vld [vmem:[#allocation2 + $0x60] sm:$0xff] }
 0x15f   : > { %1527 = vst [vmem:[#allocation2 + $0x28] sm:$0xff] %v1495_v23  ;;  %v2150_v29 = vadd.f32 %v2149_v27, %v2148_v24  ;;  %v2151_v30 = vpop.f32.mrb[14].mxu1  ;;  %v2040_v31 = vpop.f32.mrb[15].mxu0  ;;  %v509_v27 = vld [vmem:[#allocation2 + $0x68] sm:$0xff] }
 0x160   : > { %v2041_v33 = vadd.f32 %v2040_v31, %v2039_v28  ;;  %v2152_v34 = vpop.f32.mrb[15].mxu1 }
 0x161   : > { %v1388_v35 = vadd.f32 %v2150_v29, %v2038_v26  ;;  %v2153_v36 = vadd.f32 %v2152_v34, %v2151_v30 }
 0x163   : > { %v1496_v38 = vadd.f32 %v1388_v35, %v502_v32  ;;  %v1391_v39 = vadd.f32 %v2153_v36, %v2041_v33 }
 0x164   : > { %v2042_v40 = vpop.f32.mrb[16].mxu0 }
 0x165   : > { %1528 = vst [vmem:[#allocation2 + $0x30] sm:$0xff] %v1496_v38  ;;  %v1497_v41 = vadd.f32 %v1391_v39, %v503_v37  ;;  %v2154_v42 = vpop.f32.mrb[16].mxu1  ;;  %v2043_v43 = vpop.f32.mrb[17].mxu0 }
 0x166   : > { %v2044_v44 = vadd.f32 %v2043_v43, %v2042_v40  ;;  %v2155_v45 = vpop.f32.mrb[17].mxu1  ;;  %v2045_v46 = vpop.f32.mrb[18].mxu0  ;;  %v510_v40 = vld [vmem:[#allocation2 + $0x70] sm:$0xff] }
 0x167   : > { %1529 = vst [vmem:[#allocation2 + $0x38] sm:$0xff] %v1497_v41  ;;  %v2156_v47 = vadd.f32 %v2155_v45, %v2154_v42  ;;  %v2157_v48 = vpop.f32.mrb[18].mxu1  ;;  %v2046_v49 = vpop.f32.mrb[19].mxu0  ;;  %v511_v45 = vld [vmem:[#allocation2 + $0x78] sm:$0xff] }
 0x168   : > { %v2047_v51 = vadd.f32 %v2046_v49, %v2045_v46  ;;  %v2158_v52 = vpop.f32.mrb[19].mxu1 }
 0x169   : > { %v1396_v53 = vadd.f32 %v2156_v47, %v2044_v44  ;;  %v2159_v54 = vadd.f32 %v2158_v52, %v2157_v48 }
 0x16b   : > { %v1498_v56 = vadd.f32 %v1396_v53, %v504_v50  ;;  %v1399_v57 = vadd.f32 %v2159_v54, %v2047_v51 }
 0x16c   : > { %v2048_v58 = vpop.f32.mrb[20].mxu0 }
 0x16d   : > { %1530 = vst [vmem:[#allocation2 + $0x40] sm:$0xff] %v1498_v56  ;;  %v1499_v59 = vadd.f32 %v1399_v57, %v505_v55  ;;  %v2160_v60 = vpop.f32.mrb[20].mxu1  ;;  %v2049_v61 = vpop.f32.mrb[21].mxu0 }
 0x16e   : > { %v2050_v62 = vadd.f32 %v2049_v61, %v2048_v58  ;;  %v2161_v63 = vpop.f32.mrb[21].mxu1  ;;  %v2051_v0 = vpop.f32.mrb[22].mxu0  ;;  %v512_v58 = vld [vmem:[#allocation2 + $0x80] sm:$0xff] }
 0x16f   : > { %1531 = vst [vmem:[#allocation2 + $0x48] sm:$0xff] %v1499_v59  ;;  %v2162_v1 = vadd.f32 %v2161_v63, %v2160_v60  ;;  %v2163_v2 = vpop.f32.mrb[22].mxu1  ;;  %v2052_v3 = vpop.f32.mrb[23].mxu0  ;;  %v513_v63 = vld [vmem:[#allocation2 + $0x88] sm:$0xff] }
 0x170   : > { %v2053_v5 = vadd.f32 %v2052_v3, %v2051_v0  ;;  %v2164_v6 = vpop.f32.mrb[23].mxu1 }
 0x171   : > { %v1404_v7 = vadd.f32 %v2162_v1, %v2050_v62  ;;  %v2165_v8 = vadd.f32 %v2164_v6, %v2163_v2 }
 0x173   : > { %v1500_v10 = vadd.f32 %v1404_v7, %v506_v4  ;;  %v1407_v11 = vadd.f32 %v2165_v8, %v2053_v5 }
 0x174   : > { %v2054_v12 = vpop.f32.mrb[24].mxu0 }
 0x175   : > { %1532 = vst [vmem:[#allocation2 + $0x50] sm:$0xff] %v1500_v10  ;;  %v1501_v13 = vadd.f32 %v1407_v11, %v507_v9  ;;  %v2166_v14 = vpop.f32.mrb[24].mxu1  ;;  %v2055_v15 = vpop.f32.mrb[25].mxu0 }
 0x176   : > { %v2056_v16 = vadd.f32 %v2055_v15, %v2054_v12  ;;  %v2167_v17 = vpop.f32.mrb[25].mxu1  ;;  %v2057_v18 = vpop.f32.mrb[26].mxu0  ;;  %v514_v12 = vld [vmem:[#allocation2 + $0x90] sm:$0xff] }
 0x177   : > { %1533 = vst [vmem:[#allocation2 + $0x58] sm:$0xff] %v1501_v13  ;;  %v2168_v19 = vadd.f32 %v2167_v17, %v2166_v14  ;;  %v2169_v20 = vpop.f32.mrb[26].mxu1  ;;  %v2058_v21 = vpop.f32.mrb[27].mxu0  ;;  %v515_v17 = vld [vmem:[#allocation2 + $0x98] sm:$0xff] }
 0x178   : > { %v2059_v23 = vadd.f32 %v2058_v21, %v2057_v18  ;;  %v2170_v24 = vpop.f32.mrb[27].mxu1 }
 0x179   : > { %v1412_v25 = vadd.f32 %v2168_v19, %v2056_v16  ;;  %v2171_v26 = vadd.f32 %v2170_v24, %v2169_v20 }
 0x17b   : > { %v1502_v28 = vadd.f32 %v1412_v25, %v508_v22  ;;  %v1415_v29 = vadd.f32 %v2171_v26, %v2059_v23 }
 0x17c   : > { %v2060_v30 = vpop.f32.mrb[28].mxu0 }
 0x17d   : > { %1534 = vst [vmem:[#allocation2 + $0x60] sm:$0xff] %v1502_v28  ;;  %v1503_v31 = vadd.f32 %v1415_v29, %v509_v27  ;;  %v2172_v32 = vpop.f32.mrb[28].mxu1  ;;  %v2061_v33 = vpop.f32.mrb[29].mxu0 }
 0x17e   : > { %v2062_v34 = vadd.f32 %v2061_v33, %v2060_v30  ;;  %v2173_v35 = vpop.f32.mrb[29].mxu1  ;;  %v2063_v36 = vpop.f32.mrb[30].mxu0  ;;  %v516_v30 = vld [vmem:[#allocation2 + $0xa0] sm:$0xff] }
 0x17f   : > { %1535 = vst [vmem:[#allocation2 + $0x68] sm:$0xff] %v1503_v31  ;;  %v2174_v37 = vadd.f32 %v2173_v35, %v2172_v32  ;;  %v2175_v38 = vpop.f32.mrb[30].mxu1  ;;  %v2064_v39 = vpop.f32.mrb[31].mxu0  ;;  %v517_v35 = vld [vmem:[#allocation2 + $0xa8] sm:$0xff] }
 0x180   : > { %v2065_v41 = vadd.f32 %v2064_v39, %v2063_v36  ;;  %v2176_v42 = vpop.f32.mrb[31].mxu1 }
 0x181   : > { %v1420_v43 = vadd.f32 %v2174_v37, %v2062_v34  ;;  %v2177_v44 = vadd.f32 %v2176_v42, %v2175_v38 }
 0x183   : > { %v1504_v46 = vadd.f32 %v1420_v43, %v510_v40  ;;  %v1423_v47 = vadd.f32 %v2177_v44, %v2065_v41 }
 0x184   : > { %v2066_v48 = vpop.f32.mrb[32].mxu0 }
 0x185   : > { %1536 = vst [vmem:[#allocation2 + $0x70] sm:$0xff] %v1504_v46  ;;  %v1505_v49 = vadd.f32 %v1423_v47, %v511_v45  ;;  %v2178_v50 = vpop.f32.mrb[32].mxu1  ;;  %v2067_v51 = vpop.f32.mrb[33].mxu0 }
 0x186   : > { %v2068_v52 = vadd.f32 %v2067_v51, %v2066_v48  ;;  %v2179_v53 = vpop.f32.mrb[33].mxu1  ;;  %v2069_v54 = vpop.f32.mrb[34].mxu0  ;;  %v518_v48 = vld [vmem:[#allocation2 + $0xb0] sm:$0xff] }
 0x187   : > { %1537 = vst [vmem:[#allocation2 + $0x78] sm:$0xff] %v1505_v49  ;;  %v2180_v55 = vadd.f32 %v2179_v53, %v2178_v50  ;;  %v2181_v56 = vpop.f32.mrb[34].mxu1  ;;  %v2070_v57 = vpop.f32.mrb[35].mxu0  ;;  %v519_v53 = vld [vmem:[#allocation2 + $0xb8] sm:$0xff] }
 0x188   : > { %v2071_v59 = vadd.f32 %v2070_v57, %v2069_v54  ;;  %v2182_v60 = vpop.f32.mrb[35].mxu1 }
 0x189   : > { %v1428_v61 = vadd.f32 %v2180_v55, %v2068_v52  ;;  %v2183_v62 = vadd.f32 %v2182_v60, %v2181_v56 }
 0x18b   : > { %v1506_v0 = vadd.f32 %v1428_v61, %v512_v58  ;;  %v1431_v1 = vadd.f32 %v2183_v62, %v2071_v59 }
 0x18c   : > { %v2072_v2 = vpop.f32.mrb[36].mxu0 }
 0x18d   : > { %1538 = vst [vmem:[#allocation2 + $0x80] sm:$0xff] %v1506_v0  ;;  %v1507_v3 = vadd.f32 %v1431_v1, %v513_v63  ;;  %v2184_v4 = vpop.f32.mrb[36].mxu1  ;;  %v2073_v5 = vpop.f32.mrb[37].mxu0 }
 0x18e   : > { %v2074_v6 = vadd.f32 %v2073_v5, %v2072_v2  ;;  %v2185_v7 = vpop.f32.mrb[37].mxu1  ;;  %v2075_v8 = vpop.f32.mrb[38].mxu0  ;;  %v520_v2 = vld [vmem:[#allocation2 + $0xc0] sm:$0xff] }
 0x18f   : > { %1539 = vst [vmem:[#allocation2 + $0x88] sm:$0xff] %v1507_v3  ;;  %v2186_v9 = vadd.f32 %v2185_v7, %v2184_v4  ;;  %v2187_v10 = vpop.f32.mrb[38].mxu1  ;;  %v2076_v11 = vpop.f32.mrb[39].mxu0  ;;  %v521_v7 = vld [vmem:[#allocation2 + $0xc8] sm:$0xff] }
 0x190   : > { %v2077_v13 = vadd.f32 %v2076_v11, %v2075_v8  ;;  %v2188_v14 = vpop.f32.mrb[39].mxu1 }
 0x191   : > { %v1436_v15 = vadd.f32 %v2186_v9, %v2074_v6  ;;  %v2189_v16 = vadd.f32 %v2188_v14, %v2187_v10 }
 0x193   : > { %v1508_v18 = vadd.f32 %v1436_v15, %v514_v12  ;;  %v1439_v19 = vadd.f32 %v2189_v16, %v2077_v13 }
 0x194   : > { %v2078_v20 = vpop.f32.mrb[40].mxu0 }
 0x195   : > { %1540 = vst [vmem:[#allocation2 + $0x90] sm:$0xff] %v1508_v18  ;;  %v1509_v21 = vadd.f32 %v1439_v19, %v515_v17  ;;  %v2190_v22 = vpop.f32.mrb[40].mxu1  ;;  %v2079_v23 = vpop.f32.mrb[41].mxu0 }
 0x196   : > { %v2080_v24 = vadd.f32 %v2079_v23, %v2078_v20  ;;  %v2191_v25 = vpop.f32.mrb[41].mxu1  ;;  %v2081_v26 = vpop.f32.mrb[42].mxu0  ;;  %v522_v20 = vld [vmem:[#allocation2 + $0xd0] sm:$0xff] }
 0x197   : > { %1541 = vst [vmem:[#allocation2 + $0x98] sm:$0xff] %v1509_v21  ;;  %v2192_v27 = vadd.f32 %v2191_v25, %v2190_v22  ;;  %v2193_v28 = vpop.f32.mrb[42].mxu1  ;;  %v2082_v29 = vpop.f32.mrb[43].mxu0  ;;  %v523_v25 = vld [vmem:[#allocation2 + $0xd8] sm:$0xff] }
 0x198   : > { %v2083_v31 = vadd.f32 %v2082_v29, %v2081_v26  ;;  %v2194_v32 = vpop.f32.mrb[43].mxu1 }
 0x199   : > { %v1444_v33 = vadd.f32 %v2192_v27, %v2080_v24  ;;  %v2195_v34 = vadd.f32 %v2194_v32, %v2193_v28 }
 0x19b   : > { %v1510_v36 = vadd.f32 %v1444_v33, %v516_v30  ;;  %v1447_v37 = vadd.f32 %v2195_v34, %v2083_v31 }
 0x19c   : > { %v2084_v38 = vpop.f32.mrb[44].mxu0 }
 0x19d   : > { %1542 = vst [vmem:[#allocation2 + $0xa0] sm:$0xff] %v1510_v36  ;;  %v1511_v39 = vadd.f32 %v1447_v37, %v517_v35  ;;  %v2196_v40 = vpop.f32.mrb[44].mxu1  ;;  %v2085_v41 = vpop.f32.mrb[45].mxu0 }
 0x19e   : > { %v2086_v42 = vadd.f32 %v2085_v41, %v2084_v38  ;;  %v2197_v43 = vpop.f32.mrb[45].mxu1  ;;  %v2087_v44 = vpop.f32.mrb[46].mxu0  ;;  %v524_v38 = vld [vmem:[#allocation2 + $0xe0] sm:$0xff] }
 0x19f   : > { %1543 = vst [vmem:[#allocation2 + $0xa8] sm:$0xff] %v1511_v39  ;;  %v2198_v45 = vadd.f32 %v2197_v43, %v2196_v40  ;;  %v2199_v46 = vpop.f32.mrb[46].mxu1  ;;  %v2088_v47 = vpop.f32.mrb[47].mxu0  ;;  %v525_v43 = vld [vmem:[#allocation2 + $0xe8] sm:$0xff] }
 0x1a0   : > { %v2089_v49 = vadd.f32 %v2088_v47, %v2087_v44  ;;  %v2200_v50 = vpop.f32.mrb[47].mxu1 }
 0x1a1   : > { %v1452_v51 = vadd.f32 %v2198_v45, %v2086_v42  ;;  %v2201_v52 = vadd.f32 %v2200_v50, %v2199_v46 }
 0x1a3   : > { %v1512_v54 = vadd.f32 %v1452_v51, %v518_v48  ;;  %v1455_v55 = vadd.f32 %v2201_v52, %v2089_v49 }
 0x1a4   : > { %v2090_v56 = vpop.f32.mrb[48].mxu0 }
 0x1a5   : > { %1544 = vst [vmem:[#allocation2 + $0xb0] sm:$0xff] %v1512_v54  ;;  %v1513_v57 = vadd.f32 %v1455_v55, %v519_v53  ;;  %v2202_v58 = vpop.f32.mrb[48].mxu1  ;;  %v2091_v59 = vpop.f32.mrb[49].mxu0 }
 0x1a6   : > { %v2092_v60 = vadd.f32 %v2091_v59, %v2090_v56  ;;  %v2203_v61 = vpop.f32.mrb[49].mxu1  ;;  %v2093_v62 = vpop.f32.mrb[50].mxu0  ;;  %v526_v56 = vld [vmem:[#allocation2 + $0xf0] sm:$0xff] }
 0x1a7   : > { %1545 = vst [vmem:[#allocation2 + $0xb8] sm:$0xff] %v1513_v57  ;;  %v2204_v63 = vadd.f32 %v2203_v61, %v2202_v58  ;;  %v2205_v0 = vpop.f32.mrb[50].mxu1  ;;  %v2094_v1 = vpop.f32.mrb[51].mxu0  ;;  %v527_v61 = vld [vmem:[#allocation2 + $0xf8] sm:$0xff] }
 0x1a8   : > { %v2095_v3 = vadd.f32 %v2094_v1, %v2093_v62  ;;  %v2206_v4 = vpop.f32.mrb[51].mxu1  ;;  %v1558_v1 = vld [vmem:[#allocation2] sm:$0xff] (!%p1995_p11) }
 0x1a9   : > { %v1460_v5 = vadd.f32 %v2204_v63, %v2092_v60  ;;  %v2207_v6 = vadd.f32 %v2206_v4, %v2205_v0  ;;  %v1559_v4 = vld [vmem:[#allocation2 + $0x8] sm:$0xff] (!%p1995_p11) }
 0x1ab   : > { %v1514_v8 = vadd.f32 %v1460_v5, %v520_v2  ;;  %v1463_v9 = vadd.f32 %v2207_v6, %v2095_v3  ;;  %v2812_v2 = vld [vmem:[%s3055_s2] ss:$0 sm:$0xff] (!%p1995_p11)  ;;  %v1560_v5 = vld [vmem:[#allocation2 + $0x10] sm:$0xff] (!%p1995_p11) }
 0x1ac   : > { %v2096_v10 = vpop.f32.mrb[52].mxu0  ;;  %v1597_v3 = vadd.f32 (!%p1995_p11), %v2812_v2, %v1558_v1  ;;  %v1598_v6 = vadd.f32 (!%p1995_p11), %v2812_v2, %v1559_v4 }
 0x1ad   : > { %1546 = vst [vmem:[#allocation2 + $0xc0] sm:$0xff] %v1514_v8  ;;  %v1515_v11 = vadd.f32 %v1463_v9, %v521_v7  ;;  %v2208_v12 = vpop.f32.mrb[52].mxu1  ;;  %v2097_v13 = vpop.f32.mrb[53].mxu0  ;;  %v1599_v7 = vadd.f32 (!%p1995_p11), %v2812_v2, %v1560_v5  ;;  %v1561_v8 = vld [vmem:[#allocation2 + $0x18] sm:$0xff] (!%p1995_p11) }
 0x1ae   : > { %v2098_v14 = vadd.f32 %v2097_v13, %v2096_v10  ;;  %v2209_v15 = vpop.f32.mrb[53].mxu1  ;;  %v2099_v16 = vpop.f32.mrb[54].mxu0  ;;  %2395 = vtanh.f32 (!%p1995_p11), %v1597_v3  ;;  %v1600_v9 = vadd.f32 (!%p1995_p11), %v2812_v2, %v1561_v8  ;;  %v1562_v10 = vld [vmem:[#allocation2 + $0x20] sm:$0xff] (!%p1995_p11)  ;;  %v1581_v5 = vld [vmem:[#allocation2 + $0xb8] sm:$0xff] (!%p1995_p11)  ;;  %v1670_v8 = vld [vmem:[%s3056_s3 + $0x48] sm:$0xff] (!%p1995_p11) }
 0x1af   : > { %1547 = vst [vmem:[#allocation2 + $0xc8] sm:$0xff] %v1515_v11  ;;  %v2210_v17 = vadd.f32 %v2209_v15, %v2208_v12  ;;  %v2211_v18 = vpop.f32.mrb[54].mxu1  ;;  %v2100_v19 = vpop.f32.mrb[55].mxu0  ;;  %v1563_v11 = vld [vmem:[#allocation2 + $0x28] sm:$0xff] (!%p1995_p11)  ;;  %2397 = vtanh.f32 (!%p1995_p11), %v1598_v6  ;;  %v1601_v12 = vadd.f32 (!%p1995_p11), %v2812_v2, %v1562_v10  ;;  %v1669_v3 = vld [vmem:[%s3056_s3 + $0x40] sm:$0xff] (!%p1995_p11) }
 0x1b0   : > { %v2101_v21 = vadd.f32 %v2100_v19, %v2099_v16  ;;  %v2212_v22 = vpop.f32.mrb[55].mxu1  ;;  %v1602_v13 = vadd.f32 (!%p1995_p11), %v2812_v2, %v1563_v11  ;;  %2399 = vtanh.f32 (!%p1995_p11), %v1599_v7  ;;  %v1565_v16 = vld [vmem:[#allocation2 + $0x38] sm:$0xff] (!%p1995_p11)  ;;  %v1567_v19 = vld [vmem:[#allocation2 + $0x48] sm:$0xff] (!%p1995_p11) }
 0x1b1   : > { %v1468_v23 = vadd.f32 %v2210_v17, %v2098_v14  ;;  %v2213_v24 = vadd.f32 %v2212_v22, %v2211_v18  ;;  %v1564_v14 = vld [vmem:[#allocation2 + $0x30] sm:$0xff] (!%p1995_p11)  ;;  %v1566_v17 = vld [vmem:[#allocation2 + $0x40] sm:$0xff] (!%p1995_p11)  ;;  %2401 = vtanh.f32 (!%p1995_p11), %v1600_v9  ;;  %v1604_v18 = vadd.f32 (!%p1995_p11), %v2812_v2, %v1565_v16  ;;  %v1569_v22 = vld [vmem:[#allocation2 + $0x58] sm:$0xff] (!%p1995_p11) }
 0x1b2   : > { %v1603_v15 = vadd.f32 (!%p1995_p11), %v2812_v2, %v1564_v14  ;;  %2403 = vtanh.f32 (!%p1995_p11), %v1601_v12 }
 0x1b3   : > { %v1516_v26 = vadd.f32 %v1468_v23, %v522_v20  ;;  %v1471_v27 = vadd.f32 %v2213_v24, %v2101_v21  ;;  %v1605_v20 = vadd.f32 (!%p1995_p11), %v2812_v2, %v1566_v17  ;;  %v1568_v21 = vld [vmem:[#allocation2 + $0x50] sm:$0xff] (!%p1995_p11)  ;;  %2405 = vtanh.f32 (!%p1995_p11), %v1602_v13  ;;  %v1570_v24 = vld [vmem:[#allocation2 + $0x60] sm:$0xff] (!%p1995_p11) }
 0x1b4   : > { %v2102_v28 = vpop.f32.mrb[56].mxu0  ;;  %v1606_v23 = vadd.f32 (!%p1995_p11), %v2812_v2, %v1567_v19  ;;  %2407 = vtanh.f32 (!%p1995_p11), %v1603_v15  ;;  %v1582_v10 = vld [vmem:[#allocation2 + $0xc0] sm:$0xff] (!%p1995_p11)  ;;  %v1671_v13 = vld [vmem:[%s3056_s3 + $0x50] sm:$0xff] (!%p1995_p11)  ;;  %v1620_v19 = vadd.f32 (!%p1995_p11), %v2812_v2, %v1581_v5  ;;  %v1684_v5 = vld [vmem:[%s3056_s3 + $0xb8] sm:$0xff] (!%p1995_p11) }
 0x1b5   : > { %1548 = vst [vmem:[#allocation2 + $0xd0] sm:$0xff] %v1516_v26  ;;  %v1517_v29 = vadd.f32 %v1471_v27, %v523_v25  ;;  %v2214_v30 = vpop.f32.mrb[56].mxu1  ;;  %v2103_v31 = vpop.f32.mrb[57].mxu0  ;;  %v1607_v25 = vadd.f32 (!%p1995_p11), %v2812_v2, %v1568_v21  ;;  %v1571_v26 = vld [vmem:[#allocation2 + $0x68] sm:$0xff] (!%p1995_p11)  ;;  %2409 = vtanh.f32 (!%p1995_p11), %v1604_v18  ;;  %v1608_v27 = vadd.f32 (!%p1995_p11), %v2812_v2, %v1569_v22  ;;  %v1672_v18 = vld [vmem:[%s3056_s3 + $0x58] sm:$0xff] (!%p1995_p11) }
 0x1b6   : > { %v2104_v32 = vadd.f32 %v2103_v31, %v2102_v28  ;;  %v2215_v33 = vpop.f32.mrb[57].mxu1  ;;  %v2105_v34 = vpop.f32.mrb[58].mxu0  ;;  %v1572_v28 = vld [vmem:[#allocation2 + $0x70] sm:$0xff] (!%p1995_p11)  ;;  %2411 = vtanh.f32 (!%p1995_p11), %v1605_v20  ;;  %v1573_v31 = vld [vmem:[#allocation2 + $0x78] sm:$0xff] (!%p1995_p11)  ;;  %v1583_v15 = vld [vmem:[#allocation2 + $0xc8] sm:$0xff] (!%p1995_p11) }
 0x1b7   : > { %1549 = vst [vmem:[#allocation2 + $0xd8] sm:$0xff] %v1517_v29  ;;  %v2216_v35 = vadd.f32 %v2215_v33, %v2214_v30  ;;  %v2217_v36 = vpop.f32.mrb[58].mxu1  ;;  %v2106_v37 = vpop.f32.mrb[59].mxu0  ;;  %v1661_v29 = vld [vmem:[%s3056_s3] sm:$0xff] (!%p1995_p11)  ;;  %v1609_v30 = vadd.f32 (!%p1995_p11), %v2812_v2, %v1570_v24  ;;  %2413 = vtanh.f32 (!%p1995_p11), %v1606_v23  ;;  %v1610_v33 = vadd.f32 (!%p1995_p11), %v2812_v2, %v1571_v26 }
 0x1b8   : > { %v2107_v39 = vadd.f32 %v2106_v37, %v2105_v34  ;;  %v2218_v40 = vpop.f32.mrb[59].mxu1  ;;  %v1574_v34 = vld [vmem:[#allocation2 + $0x80] sm:$0xff] (!%p1995_p11)  ;;  %2415 = vtanh.f32 (!%p1995_p11), %v1607_v25  ;;  %v1611_v37 = vadd.f32 (!%p1995_p11), %v2812_v2, %v1572_v28  ;;  %v1621_v24 = vadd.f32 (!%p1995_p11), %v2812_v2, %v1582_v10  ;;  %v1674_v28 = vld [vmem:[%s3056_s3 + $0x68] sm:$0xff] (!%p1995_p11) }
 0x1b9   : > { %v1476_v41 = vadd.f32 %v2216_v35, %v2104_v32  ;;  %v2219_v42 = vadd.f32 %v2218_v40, %v2217_v36  ;;  %v1662_v32 = vld [vmem:[%s3056_s3 + $0x8] sm:$0xff] (!%p1995_p11)  ;;  %v2396_v35 = vpop.eup (!%p1995_p11), %2395  ;;  %v1663_v36 = vld [vmem:[%s3056_s3 + $0x10] sm:$0xff] (!%p1995_p11)  ;;  %2417 = vtanh.f32 (!%p1995_p11), %v1608_v27  ;;  %v1673_v23 = vld [vmem:[%s3056_s3 + $0x60] sm:$0xff] (!%p1995_p11) }
 0x1ba   : > { %v1693_v40 = vadd.f32 (!%p1995_p11), %v2396_v35, %v1661_v29  ;;  %2419 = vtanh.f32 (!%p1995_p11), %v1609_v30  ;;  %v1622_v29 = vadd.f32 (!%p1995_p11), %v2812_v2, %v1583_v15 }
 0x1bb   : > { %v1518_v44 = vadd.f32 %v1476_v41, %v524_v38  ;;  %v1479_v45 = vadd.f32 %v2219_v42, %v2107_v39  ;;  %v1575_v38 = vld [vmem:[#allocation2 + $0x88] sm:$0xff] (!%p1995_p11)  ;;  %v2398_v39 = vpop.eup (!%p1995_p11), %2397  ;;  %v1664_v41 = vld [vmem:[%s3056_s3 + $0x18] sm:$0xff] (!%p1995_p11)  ;;  %v1612_v42 = vadd.f32 (!%p1995_p11), %v2812_v2, %v1573_v31  ;;  %2421 = vtanh.f32 (!%p1995_p11), %v1610_v33  ;;  %v1675_v33 = vld [vmem:[%s3056_s3 + $0x70] sm:$0xff] (!%p1995_p11) }
 0x1bc   : > { %v2108_v46 = vpop.f32.mrb[60].mxu0  ;;  %1725 = vst [vmem:[%s3057_s4] sm:$0xff] (!%p1995_p11), %v1693_v40  ;;  %2423 = vtanh.f32 (!%p1995_p11), %v1611_v37  ;;  %v1584_v20 = vld [vmem:[#allocation2 + $0xd0] sm:$0xff] (!%p1995_p11) }
 0x1bd   : > { %1550 = vst [vmem:[#allocation2 + $0xe0] sm:$0xff] %v1518_v44  ;;  %v1519_v47 = vadd.f32 %v1479_v45, %v525_v43  ;;  %v2220_v48 = vpop.f32.mrb[60].mxu1  ;;  %v2109_v49 = vpop.f32.mrb[61].mxu0  ;;  %v1576_v43 = vld [vmem:[#allocation2 + $0x90] sm:$0xff] (!%p1995_p11)  ;;  %v1694_v45 = vadd.f32 (!%p1995_p11), %v2398_v39, %v1662_v32  ;;  %2425 = vtanh.f32 (!%p1995_p11), %v1612_v42 }
 0x1be   : > { %v2110_v50 = vadd.f32 %v2109_v49, %v2108_v46  ;;  %v2221_v51 = vpop.f32.mrb[61].mxu1  ;;  %v2111_v52 = vpop.f32.mrb[62].mxu0  ;;  %v1665_v46 = vld [vmem:[%s3056_s3 + $0x20] sm:$0xff] (!%p1995_p11)  ;;  %v1585_v25 = vld [vmem:[#allocation2 + $0xd8] sm:$0xff] (!%p1995_p11) }
 0x1bf   : > { %1551 = vst [vmem:[#allocation2 + $0xe8] sm:$0xff] %v1519_v47  ;;  %v2222_v53 = vadd.f32 %v2221_v51, %v2220_v48  ;;  %v2223_v54 = vpop.f32.mrb[62].mxu1  ;;  %v2112_v55 = vpop.f32.mrb[63].mxu0  ;;  %v1613_v47 = vadd.f32 (!%p1995_p11), %v2812_v2, %v1574_v34  ;;  %v1577_v48 = vld [vmem:[#allocation2 + $0x98] sm:$0xff] (!%p1995_p11)  ;;  %v1666_v51 = vld [vmem:[%s3056_s3 + $0x28] sm:$0xff] (!%p1995_p11)  ;;  %1726 = vst [vmem:[%s3057_s4 + $0x8] sm:$0xff] (!%p1995_p11), %v1694_v45  ;;  %v1623_v34 = vadd.f32 (!%p1995_p11), %v2812_v2, %v1584_v20 }
 0x1c0   : > { %v2113_v57 = vadd.f32 %v2112_v55, %v2111_v52  ;;  %v2224_v58 = vpop.f32.mrb[63].mxu1  ;;  %v2400_v44 = vpop.eup (!%p1995_p11), %2399  ;;  %v1614_v52 = vadd.f32 (!%p1995_p11), %v2812_v2, %v1575_v38  ;;  %v1676_v38 = vld [vmem:[%s3056_s3 + $0x78] sm:$0xff] (!%p1995_p11)  ;;  %v1624_v39 = vadd.f32 (!%p1995_p11), %v2812_v2, %v1585_v25  ;;  %v1689_v20 = vld [vmem:[%s3056_s3 + $0xe0] sm:$0xff] (!%p1995_p11) }
 0x1c1   : > { %v1484_v59 = vadd.f32 %v2222_v53, %v2110_v50  ;;  %v2225_v60 = vadd.f32 %v2224_v58, %v2223_v54  ;;  %1557 = sbr.rel (%p1995_p11) target bundleno = 484 (0x1e4), region = 67  ;;  %v2402_v49 = vpop.eup (!%p1995_p11), %2401  ;;  %v1695_v50 = vadd.f32 (!%p1995_p11), %v2400_v44, %v1663_v36  ;;  %v1578_v53 = vld [vmem:[#allocation2 + $0xa0] sm:$0xff] (!%p1995_p11)  ;;  %v1579_v58 = vld [vmem:[#allocation2 + $0xa8] sm:$0xff] (!%p1995_p11)  ;;  %2427 = vtanh.f32 (!%p1995_p11), %v1613_v47 }
 0x1c2   : > { %v2404_v54 = vpop.eup (!%p1995_p11), %2403  ;;  %v1696_v55 = vadd.f32 (!%p1995_p11), %v2402_v49, %v1664_v41  ;;  %v1617_v4 = vadd.f32 (!%p1995_p11), %v2812_v2, %v1578_v53  ;;  %2429 = vtanh.f32 (!%p1995_p11), %v1614_v52  ;;  %v1618_v9 = vadd.f32 (!%p1995_p11), %v2812_v2, %v1579_v58  ;;  %v1679_v52 = vld [vmem:[%s3056_s3 + $0x90] sm:$0xff] (!%p1995_p11) }
 0x1c3   : > { %v1520_v62 = vadd.f32 %v1484_v59, %v526_v56  ;;  %v1487_v63 = vadd.f32 %v2225_v60, %v2113_v57  ;;  %v1667_v56 = vld [vmem:[%s3056_s3 + $0x30] sm:$0xff] (!%p1995_p11)  ;;  %v1615_v57 = vadd.f32 (!%p1995_p11), %v2812_v2, %v1576_v43  ;;  %v2406_v59 = vpop.eup (!%p1995_p11), %2405  ;;  %1727 = vst [vmem:[%s3057_s4 + $0x10] sm:$0xff] (!%p1995_p11), %v1695_v50  ;;  %v1697_v60 = vadd.f32 (!%p1995_p11), %v2404_v54, %v1665_v46  ;;  %v1677_v43 = vld [vmem:[%s3056_s3 + $0x80] sm:$0xff] (!%p1995_p11) }
 0x1c4   : > { %1728 = vst [vmem:[%s3057_s4 + $0x18] sm:$0xff] (!%p1995_p11), %v1696_v55  ;;  %v1698_v1 = vadd.f32 (!%p1995_p11), %v2406_v59, %v1666_v51  ;;  %v1586_v30 = vld [vmem:[#allocation2 + $0xe0] sm:$0xff] (!%p1995_p11) }
 0x1c5   : > { %1552 = vst [vmem:[#allocation2 + $0xf0] sm:$0xff] %v1520_v62  ;;  %v1521_v0 = vadd.f32 %v1487_v63, %v527_v61  ;;  %v1668_v61 = vld [vmem:[%s3056_s3 + $0x38] sm:$0xff] (!%p1995_p11)  ;;  %v1616_v62 = vadd.f32 (!%p1995_p11), %v2812_v2, %v1577_v48  ;;  %v1580_v63 = vld [vmem:[#allocation2 + $0xb0] sm:$0xff] (!%p1995_p11)  ;;  %1729 = vst [vmem:[%s3057_s4 + $0x20] sm:$0xff] (!%p1995_p11), %v1697_v60  ;;  %2431 = vtanh.f32 (!%p1995_p11), %v1615_v57  ;;  %v1625_v44 = vadd.f32 (!%p1995_p11), %v2812_v2, %v1586_v30 }
 0x1c6   : > { %1730 = vst [vmem:[%s3057_s4 + $0x28] sm:$0xff] (!%p1995_p11), %v1698_v1  ;;  %v1619_v14 = vadd.f32 (!%p1995_p11), %v2812_v2, %v1580_v63  ;;  %v1587_v35 = vld [vmem:[#allocation2 + $0xe8] sm:$0xff] (!%p1995_p11)  ;;  %v1681_v60 = vld [vmem:[%s3056_s3 + $0xa0] sm:$0xff] (!%p1995_p11)  ;;  %v1683_v1 = vld [vmem:[%s3056_s3 + $0xb0] sm:$0xff] (!%p1995_p11) }
 0x1c7   : > { %1553 = vst [vmem:[#allocation2 + $0xf8] sm:$0xff] %v1521_v0  ;;  %v2408_v0 = vpop.eup (!%p1995_p11), %2407  ;;  %2433 = vtanh.f32 (!%p1995_p11), %v1616_v62  ;;  %v1678_v48 = vld [vmem:[%s3056_s3 + $0x88] sm:$0xff] (!%p1995_p11)  ;;  %v1626_v49 = vadd.f32 (!%p1995_p11), %v2812_v2, %v1587_v35 }
 0x1c8   : > { %v2410_v6 = vpop.eup %2409  ;;  %v1699_v7 = vadd.f32 %v2408_v0, %v1667_v56  ;;  %2435 = vtanh.f32 %v1617_v4  ;;  %v1680_v56 = vld [vmem:[%s3056_s3 + $0x98] sm:$0xff] }
 0x1c9   : > { %v2412_v11 = vpop.eup %2411  ;;  %v1700_v12 = vadd.f32 %v2410_v6, %v1668_v61  ;;  %2437 = vtanh.f32 %v1618_v9 }
 0x1ca   : > { %v2414_v16 = vpop.eup %2413  ;;  %1731 = vst [vmem:[%s3057_s4 + $0x30] sm:$0xff] %v1699_v7  ;;  %v1701_v17 = vadd.f32 %v2412_v11, %v1669_v3  ;;  %2439 = vtanh.f32 %v1619_v14  ;;  %v1686_v11 = vld [vmem:[%s3056_s3 + $0xc8] sm:$0xff]  ;;  %v1687_v14 = vld [vmem:[%s3056_s3 + $0xd0] sm:$0xff] }
 0x1cb   : > { %v2416_v21 = vpop.eup %2415  ;;  %1732 = vst [vmem:[%s3057_s4 + $0x38] sm:$0xff] %v1700_v12  ;;  %v1702_v22 = vadd.f32 %v2414_v16, %v1670_v8  ;;  %2441 = vtanh.f32 %v1620_v19  ;;  %v1685_v8 = vld [vmem:[%s3056_s3 + $0xc0] sm:$0xff] }
 0x1cc   : > { %v2418_v26 = vpop.eup %2417  ;;  %1733 = vst [vmem:[%s3057_s4 + $0x40] sm:$0xff] %v1701_v17  ;;  %v1703_v27 = vadd.f32 %v2416_v21, %v1671_v13  ;;  %v1588_v40 = vld [vmem:[#allocation2 + $0xf0] sm:$0xff]  ;;  %2443 = vtanh.f32 %v1621_v24  ;;  %v1688_v17 = vld [vmem:[%s3056_s3 + $0xd8] sm:$0xff] }
 0x1cd   : > { %v2420_v31 = vpop.eup %2419  ;;  %1734 = vst [vmem:[%s3057_s4 + $0x48] sm:$0xff] %v1702_v22  ;;  %v1704_v32 = vadd.f32 %v2418_v26, %v1672_v18  ;;  %2445 = vtanh.f32 %v1622_v29  ;;  %v1627_v53 = vadd.f32 %v2812_v2, %v1588_v40  ;;  %v1691_v26 = vld [vmem:[%s3056_s3 + $0xf0] sm:$0xff]  ;;  %v1692_v29 = vld [vmem:[%s3056_s3 + $0xf8] sm:$0xff] }
 0x1ce   : > { %v2422_v36 = vpop.eup %2421  ;;  %1735 = vst [vmem:[%s3057_s4 + $0x50] sm:$0xff] %v1703_v27  ;;  %v1705_v37 = vadd.f32 %v2420_v31, %v1673_v23  ;;  %v1589_v45 = vld [vmem:[#allocation2 + $0xf8] sm:$0xff]  ;;  %2447 = vtanh.f32 %v1623_v34  ;;  %v1690_v23 = vld [vmem:[%s3056_s3 + $0xe8] sm:$0xff] }
 0x1cf   : > { %v2424_v41 = vpop.eup %2423  ;;  %1736 = vst [vmem:[%s3057_s4 + $0x58] sm:$0xff] %v1704_v32  ;;  %v1706_v42 = vadd.f32 %v2422_v36, %v1674_v28  ;;  %2449 = vtanh.f32 %v1624_v39  ;;  %v1628_v57 = vadd.f32 %v2812_v2, %v1589_v45  ;;  %v1682_v2 = vld [vmem:[%s3056_s3 + $0xa8] sm:$0xff] }
 0x1d0   : > { %v2426_v46 = vpop.eup %2425  ;;  %1737 = vst [vmem:[%s3057_s4 + $0x60] sm:$0xff] %v1705_v37  ;;  %v1707_v47 = vadd.f32 %v2424_v41, %v1675_v33  ;;  %2451 = vtanh.f32 %v1625_v44 }
 0x1d1   : > { %v2428_v50 = vpop.eup %2427  ;;  %1738 = vst [vmem:[%s3057_s4 + $0x68] sm:$0xff] %v1706_v42  ;;  %v1708_v51 = vadd.f32 %v2426_v46, %v1676_v38  ;;  %2453 = vtanh.f32 %v1626_v49 }
 0x1d2   : > { %v2430_v54 = vpop.eup %2429  ;;  %1739 = vst [vmem:[%s3057_s4 + $0x70] sm:$0xff] %v1707_v47  ;;  %v1709_v55 = vadd.f32 %v2428_v50, %v1677_v43  ;;  %2455 = vtanh.f32 %v1627_v53 }
 0x1d3   : > { %v2432_v58 = vpop.eup %2431  ;;  %1740 = vst [vmem:[%s3057_s4 + $0x78] sm:$0xff] %v1708_v51  ;;  %v1710_v59 = vadd.f32 %v2430_v54, %v1678_v48  ;;  %2457 = vtanh.f32 %v1628_v57 }
 0x1d4   : > { %v2434_v61 = vpop.eup %2433  ;;  %1741 = vst [vmem:[%s3057_s4 + $0x80] sm:$0xff] %v1709_v55  ;;  %v1711_v62 = vadd.f32 %v2432_v58, %v1679_v52 }
 0x1d5   : > { %v2436_v63 = vpop.eup %2435  ;;  %1742 = vst [vmem:[%s3057_s4 + $0x88] sm:$0xff] %v1710_v59  ;;  %v1712_v0 = vadd.f32 %v2434_v61, %v1680_v56 }
 0x1d6   : > { %v2438_v3 = vpop.eup %2437  ;;  %1743 = vst [vmem:[%s3057_s4 + $0x90] sm:$0xff] %v1711_v62  ;;  %v1713_v4 = vadd.f32 %v2436_v63, %v1681_v60 }
 0x1d7   : > { %v2440_v6 = vpop.eup %2439  ;;  %1744 = vst [vmem:[%s3057_s4 + $0x98] sm:$0xff] %v1712_v0  ;;  %v1714_v7 = vadd.f32 %v2438_v3, %v1682_v2 }
 0x1d8   : > { %v2442_v9 = vpop.eup %2441  ;;  %1745 = vst [vmem:[%s3057_s4 + $0xa0] sm:$0xff] %v1713_v4  ;;  %v1715_v10 = vadd.f32 %v2440_v6, %v1683_v1 }
 0x1d9   : > { %v2444_v12 = vpop.eup %2443  ;;  %1746 = vst [vmem:[%s3057_s4 + $0xa8] sm:$0xff] %v1714_v7  ;;  %v1716_v13 = vadd.f32 %v2442_v9, %v1684_v5 }
 0x1da   : > { %v2446_v15 = vpop.eup %2445  ;;  %1747 = vst [vmem:[%s3057_s4 + $0xb0] sm:$0xff] %v1715_v10  ;;  %v1717_v16 = vadd.f32 %v2444_v12, %v1685_v8 }
 0x1db   : > { %v2448_v18 = vpop.eup %2447  ;;  %1748 = vst [vmem:[%s3057_s4 + $0xb8] sm:$0xff] %v1716_v13  ;;  %v1718_v19 = vadd.f32 %v2446_v15, %v1686_v11 }
 0x1dc   : > { %v2450_v21 = vpop.eup %2449  ;;  %1749 = vst [vmem:[%s3057_s4 + $0xc0] sm:$0xff] %v1717_v16  ;;  %v1719_v22 = vadd.f32 %v2448_v18, %v1687_v14 }
 0x1dd   : > { %v2452_v24 = vpop.eup %2451  ;;  %1750 = vst [vmem:[%s3057_s4 + $0xc8] sm:$0xff] %v1718_v19  ;;  %v1720_v25 = vadd.f32 %v2450_v21, %v1688_v17 }
 0x1de   : > { %v2454_v27 = vpop.eup %2453  ;;  %1751 = vst [vmem:[%s3057_s4 + $0xd0] sm:$0xff] %v1719_v22  ;;  %v1721_v28 = vadd.f32 %v2452_v24, %v1689_v20 }
 0x1df   : > { %v2456_v30 = vpop.eup %2455  ;;  %1752 = vst [vmem:[%s3057_s4 + $0xd8] sm:$0xff] %v1720_v25  ;;  %v1722_v31 = vadd.f32 %v2454_v27, %v1690_v23 }
 0x1e0   : > { %v2458_v32 = vpop.eup %2457  ;;  %1753 = vst [vmem:[%s3057_s4 + $0xe0] sm:$0xff] %v1721_v28  ;;  %v1723_v33 = vadd.f32 %v2456_v30, %v1691_v26 }
 0x1e1   : > { %1754 = vst [vmem:[%s3057_s4 + $0xe8] sm:$0xff] %v1722_v31  ;;  %v1724_v34 = vadd.f32 %v2458_v32, %v1692_v29 }
 0x1e2   : > { %1755 = vst [vmem:[%s3057_s4 + $0xf0] sm:$0xff] %v1723_v33 }
 0x1e3   : > { %1756 = vst [vmem:[%s3057_s4 + $0xf8] sm:$0xff] %v1724_v34 }
 0x1e4 PF: > { %s14_s19 = sadd.s32 1, %s2497_s19   ;;  %s3058_s15 = smov %s2485_s16 }
 0x1e5   : > { %p11_p12 = scmp.ge.s32.totalorder %s14_s19, 9   ;;  %s3059_s16 = smov %s2560_s23 }
 0x1e6   : > { %s3060_s17 = smov %s2493_s18  ;;  %s3061_s18 = smov %s3063_s20 }
 0x1e7   :  { %13 = sbr.rel (!%p11_p12) target bundleno = 3 (0x3), region = 111 }

</bundles_post_ra>
